<compile_context>
chip_gen: v6e
topology: v6e:2x2x1
jax: 0.10.0
libtpu: 0.0.40
codegen_flags: <defaults>
</compile_context>

<pallas_src>
import functools

import jax
import jax.numpy as jnp
from jax import lax
from jax.experimental import pallas as pl
from jax.experimental.pallas import tpu as pltpu

NEG_SLOPE = 0.01                       # nn.LeakyReLU default negative_slope

try:
    _PHYS_VMEM = int(pltpu.get_tpu_info().vmem_capacity_bytes)
except Exception:                      # pragma: no cover - conservative fallback
    _PHYS_VMEM = 64 * 1024 * 1024
_VMEM_LIMIT = int(min(_PHYS_VMEM * 3 // 4, 100 * 1024 * 1024))
_COMPILER_PARAMS = pltpu.CompilerParams(
    dimension_semantics=("parallel",), vmem_limit_bytes=_VMEM_LIMIT)


def _leaky(v):
    return jnp.where(v >= 0, v, NEG_SLOPE * v)


def _round_up(v, m):
    return (v + m - 1) // m * m


# ----------------------------- tap offset tables ---------------------------- #

def _frame_offsets(frame_w):
    """Lane offsets of the 9 taps of a stride-1 3x3 conv in a flattened
    (rows, frame_w) zero-ring frame."""
    return [(kh - 1) * frame_w + (kw - 1) for kh in range(3) for kw in range(3)]


def _phase_taps(wo):
    """(phase index, lane shift) of the 9 taps of a stride-2 3x3 conv expressed
    on 4 phase planes of pitch (wo + 1)."""
    taps = []
    for kh in range(3):
        for kw in range(3):
            r, a = kh % 2, kh // 2
            c, b = kw % 2, kw // 2
            taps.append((2 * r + c, a * (wo + 1) + b))
    return taps


# ------------------------------- Pallas kernels ----------------------------- #

def _make_rb_kernel(H, W):
    """Fused ResidualBlock: leaky(conv1) -> leaky(conv2) -> + x, all stride 1."""
    Wf = W + 2
    Pf = (H + 2) * Wf
    G = W + 3                                  # max |tap offset|
    offs = _frame_offsets(Wf)

    def kernel(x_ref, m_ref, w1_ref, b1_ref, w2_ref, b2_ref, o_ref,
               xg_ref, hg_ref):
        Cout = w1_ref.shape[1]
        x = x_ref[0]                           # (C, Pf) bf16, zero ring
        mask = m_ref[...]                      # (1, Pf) f32

        # guard-padded copy of the input frame for the 9 shifted reads
        xg_ref[...] = jnp.zeros(xg_ref.shape, xg_ref.dtype)
        xg_ref[:, G:G + Pf] = x

        acc = jnp.zeros((Cout, Pf), jnp.float32)
        for t, d in enumerate(offs):
            acc = acc + jnp.dot(w1_ref[t], xg_ref[:, G + d:G + d + Pf],
                                preferred_element_type=jnp.float32)
        h1 = _leaky(acc + b1_ref[...]) * mask  # ring -> 0 (conv2 zero padding)

        hg_ref[...] = jnp.zeros(hg_ref.shape, hg_ref.dtype)
        hg_ref[:, G:G + Pf] = h1.astype(hg_ref.dtype)

        acc2 = jnp.zeros((Cout, Pf), jnp.float32)
        for t, d in enumerate(offs):
            acc2 = acc2 + jnp.dot(w2_ref[t], hg_ref[:, G + d:G + d + Pf],
                                  preferred_element_type=jnp.float32)
        h2 = _leaky(acc2 + b2_ref[...]) * mask
        o_ref[0] = (h2 + x.astype(jnp.float32)).astype(o_ref.dtype)

    return kernel


def _make_rbs_kernel(Ho, Wo):
    """Fused ResidualBlockWithStride (stride 2):
    leaky(conv1_s2) -> conv2 -> GDN  +  (1x1 stride-2 skip)."""
    PhP = (Ho + 1) * (Wo + 1)                  # phase-plane size
    Wf = Wo + 2
    Pf = (Ho + 2) * Wf                         # output frame size
    G = Wo + 3
    ph_taps = _phase_taps(Wo)
    offs = _frame_offsets(Wf)

    def kernel(ph_ref, m_ref, w1_ref, b1_ref, w2_ref, b2_ref,
               g_ref, beta_ref, ws_ref, bs_ref, o_ref,
               h1p_ref, skp_ref, hg_ref, sk_ref):
        Cout = w1_ref.shape[1]
        mask = m_ref[...]                      # (1, Pf) f32

        # --- conv1 (3x3, stride 2) expressed on the 4 phase planes ---
        acc = jnp.zeros((Cout, PhP), jnp.float32)
        for t, (p, s) in enumerate(ph_taps):
            acc = acc + jnp.dot(w1_ref[t], ph_ref[0, p, :, s:s + PhP],
                                preferred_element_type=jnp.float32)
        h1p_ref[...] = _leaky(acc + b1_ref[...]).astype(h1p_ref.dtype)

        # --- 1x1 stride-2 skip: Ws @ phase_(1,1) ---
        skp_ref[...] = jnp.dot(ws_ref[...], ph_ref[0, 3, :, 0:PhP],
                               preferred_element_type=jnp.float32) + bs_ref[...]

        # --- repack phase frame -> zero-ringed (Ho+2, Wo+2) frame ---
        hg_ref[...] = jnp.zeros(hg_ref.shape, hg_ref.dtype)
        sk_ref[...] = jnp.zeros(sk_ref.shape, sk_ref.dtype)
        for y in range(Ho):
            src = y * (Wo + 1)
            dst = (y + 1) * Wf + 1
            hg_ref[:, G + dst:G + dst + Wo] = h1p_ref[:, src:src + Wo]
            sk_ref[:, dst:dst + Wo] = skp_ref[:, src:src + Wo]

        # --- conv2 (3x3, stride 1) on the h1 frame (no activation) ---
        acc2 = jnp.zeros((Cout, Pf), jnp.float32)
        for t, d in enumerate(offs):
            acc2 = acc2 + jnp.dot(w2_ref[t], hg_ref[:, G + d:G + d + Pf],
                                  preferred_element_type=jnp.float32)
        h2 = (acc2 + b2_ref[...]) * mask       # ring -> 0 before GDN

        # --- GDN in f32: h2 * rsqrt(gamma @ h2^2 + beta) ---
        norm = jnp.dot(g_ref[...], h2 * h2,
                       preferred_element_type=jnp.float32) + beta_ref[...]
        gdn = h2 * lax.rsqrt(norm)
        o_ref[0] = (gdn + sk_ref[...]).astype(o_ref.dtype)

    return kernel


def _make_final_kernel(Ho, Wo):
    """Plain 3x3 stride-2 conv on the phase planes (no activation)."""
    PhP = (Ho + 1) * (Wo + 1)
    ph_taps = _phase_taps(Wo)

    def kernel(ph_ref, w_ref, b_ref, o_ref):
        Cout = w_ref.shape[1]
        acc = jnp.zeros((Cout, PhP), jnp.float32)
        for t, (p, s) in enumerate(ph_taps):
            acc = acc + jnp.dot(w_ref[t], ph_ref[0, p, :, s:s + PhP],
                                preferred_element_type=jnp.float32)
        o_ref[0] = (acc + b_ref[...]).astype(o_ref.dtype)

    return kernel


# ------------------------------ XLA-side glue ------------------------------- #

def _to_frame(x):
    """(B, C, H, W) -> flattened zero-padded frame (B, C, (H+2)*(W+2))."""
    B, C, H, W = x.shape
    xp = jnp.pad(x, ((0, 0), (0, 0), (1, 1), (1, 1)))
    return xp.reshape(B, C, (H + 2) * (W + 2))


def _frame_mask(H, W):
    m = jnp.zeros((H + 2, W + 2), jnp.float32).at[1:H + 1, 1:W + 1].set(1.0)
    return m.reshape(1, (H + 2) * (W + 2))


def _make_phases(xf, H, W, c_pad):
    """Split a zero-ring frame into the 4 stride-2 phases, flatten, channel-pad
    to c_pad and guard-pad the lane axis so in-kernel tap shifts stay in bounds."""
    assert H % 2 == 0 and W % 2 == 0, "even spatial sizes required"
    B, C, _ = xf.shape
    Ho, Wo = H // 2, W // 2
    x4 = xf.reshape(B, C, H + 2, W + 2)
    phases = [x4[:, :, r::2, c::2] for r in range(2) for c in range(2)]
    ph = jnp.stack(phases, axis=1)                       # (B, 4, C, Ho+1, Wo+1)
    ph = ph.reshape(B, 4, C, (Ho + 1) * (Wo + 1))
    guard = Wo + 2                                       # max in-kernel shift
    ph = jnp.pad(ph, ((0, 0), (0, 0), (0, c_pad - C), (0, guard)))
    return ph.astype(jnp.bfloat16), Ho, Wo


def _tap_weights(w_flat, b, cin, cin_pad):
    """(Cout, 9*Cin) tap-major flat conv weight -> (9, Cout, cin_pad) bf16."""
    cout = w_flat.shape[0]
    w9 = w_flat.reshape(cout, 9, cin)
    if cin_pad > cin:
        w9 = jnp.pad(w9, ((0, 0), (0, 0), (0, cin_pad - cin)))
    w9 = jnp.transpose(w9, (1, 0, 2)).astype(jnp.bfloat16)
    return w9, b.reshape(cout, 1).astype(jnp.float32)


# ------------------------------ block wrappers ------------------------------ #

def residual_block(xf, H, W, p):
    """xf: (B, C, (H+2)*(W+2)) bf16 frame -> same-shape frame."""
    B, C, Pf = xf.shape
    assert Pf == (H + 2) * (W + 2)
    w1, b1 = _tap_weights(p["w1"], p["b1"], C, C)
    w2, b2 = _tap_weights(p["w2"], p["b2"], C, C)
    mask = _frame_mask(H, W)
    G = W + 3
    return pl.pallas_call(
        _make_rb_kernel(H, W),
        out_shape=jax.ShapeDtypeStruct((B, C, Pf), jnp.bfloat16),
        grid=(B,),
        in_specs=[
            pl.BlockSpec((1, C, Pf), lambda b: (b, 0, 0)),
            pl.BlockSpec((1, Pf), lambda b: (0, 0)),
            pl.BlockSpec((9, C, C), lambda b: (0, 0, 0)),
            pl.BlockSpec((C, 1), lambda b: (0, 0)),
            pl.BlockSpec((9, C, C), lambda b: (0, 0, 0)),
            pl.BlockSpec((C, 1), lambda b: (0, 0)),
        ],
        out_specs=pl.BlockSpec((1, C, Pf), lambda b: (b, 0, 0)),
        scratch_shapes=[pltpu.VMEM((C, Pf + 2 * G), jnp.bfloat16),
                        pltpu.VMEM((C, Pf + 2 * G), jnp.bfloat16)],
        compiler_params=_COMPILER_PARAMS,
    )(xf, mask, w1, b1, w2, b2)


def residual_block_with_stride(xf, H, W, p):
    """xf: (B, Cin, (H+2)*(W+2)) frame -> ((B, Cout, (H/2+2)*(W/2+2)), H/2, W/2)."""
    B, C, _ = xf.shape
    Cout = p["w1"].shape[0]
    cp = _round_up(C, 16)                                # bf16 sublane packing
    ph, Ho, Wo = _make_phases(xf, H, W, cp)
    w1, b1 = _tap_weights(p["w1"], p["b1"], C, cp)
    w2, b2 = _tap_weights(p["w2"], p["b2"], Cout, Cout)
    ws = p["ws"]
    if cp > C:
        ws = jnp.pad(ws, ((0, 0), (0, cp - C)))
    ws = ws.astype(jnp.bfloat16)
    bs = p["bs"].reshape(Cout, 1).astype(jnp.float32)
    gamma = p["gamma"].astype(jnp.float32)
    beta = p["beta"].reshape(Cout, 1).astype(jnp.float32)

    PhP = (Ho + 1) * (Wo + 1)
    PhPg = ph.shape[-1]
    Pf = (Ho + 2) * (Wo + 2)
    G = Wo + 3
    mask = _frame_mask(Ho, Wo)

    out = pl.pallas_call(
        _make_rbs_kernel(Ho, Wo),
        out_shape=jax.ShapeDtypeStruct((B, Cout, Pf), jnp.bfloat16),
        grid=(B,),
        in_specs=[
            pl.BlockSpec((1, 4, cp, PhPg), lambda b: (b, 0, 0, 0)),
            pl.BlockSpec((1, Pf), lambda b: (0, 0)),
            pl.BlockSpec((9, Cout, cp), lambda b: (0, 0, 0)),
            pl.BlockSpec((Cout, 1), lambda b: (0, 0)),
            pl.BlockSpec((9, Cout, Cout), lambda b: (0, 0, 0)),
            pl.BlockSpec((Cout, 1), lambda b: (0, 0)),
            pl.BlockSpec((Cout, Cout), lambda b: (0, 0)),
            pl.BlockSpec((Cout, 1), lambda b: (0, 0)),
            pl.BlockSpec((Cout, cp), lambda b: (0, 0)),
            pl.BlockSpec((Cout, 1), lambda b: (0, 0)),
        ],
        out_specs=pl.BlockSpec((1, Cout, Pf), lambda b: (b, 0, 0)),
        scratch_shapes=[pltpu.VMEM((Cout, PhP), jnp.bfloat16),
                        pltpu.VMEM((Cout, PhP), jnp.float32),
                        pltpu.VMEM((Cout, Pf + 2 * G), jnp.bfloat16),
                        pltpu.VMEM((Cout, Pf), jnp.float32)],
        compiler_params=_COMPILER_PARAMS,
    )(ph, mask, w1, b1, w2, b2, gamma, beta, ws, bs)
    return out, Ho, Wo


def final_conv(xf, H, W, w_flat, b):
    """Final conv3x3 stride 2: frame input -> dense (B, M, H/2, W/2)."""
    B, C, _ = xf.shape
    M = w_flat.shape[0]
    cp = _round_up(C, 16)
    ph, Ho, Wo = _make_phases(xf, H, W, cp)
    w9, bc = _tap_weights(w_flat, b, C, cp)
    PhP = (Ho + 1) * (Wo + 1)
    PhPg = ph.shape[-1]
    out = pl.pallas_call(
        _make_final_kernel(Ho, Wo),
        out_shape=jax.ShapeDtypeStruct((B, M, PhP), jnp.float32),
        grid=(B,),
        in_specs=[
            pl.BlockSpec((1, 4, cp, PhPg), lambda b: (b, 0, 0, 0)),
            pl.BlockSpec((9, M, cp), lambda b: (0, 0, 0)),
            pl.BlockSpec((M, 1), lambda b: (0, 0)),
        ],
        out_specs=pl.BlockSpec((1, M, PhP), lambda b: (b, 0, 0)),
        compiler_params=_COMPILER_PARAMS,
    )(ph, w9, bc)
    return out.reshape(B, M, Ho + 1, Wo + 1)[:, :, :Ho, :Wo]


def analysis_transform(x_nchw, params, impl="pallas"):
    if impl == "ref":
        return _mirror_forward(x_nchw, params)
    B, C, H, W = x_nchw.shape
    assert H % 2 == 0 and W % 2 == 0
    xf = _to_frame(x_nchw.astype(jnp.bfloat16))
    xf, H, W = residual_block_with_stride(xf, H, W, params["rbs1"])
    xf = residual_block(xf, H, W, params["rb1"])
    xf, H, W = residual_block_with_stride(xf, H, W, params["rbs2"])
    xf = residual_block(xf, H, W, params["rb2"])
    xf, H, W = residual_block_with_stride(xf, H, W, params["rbs3"])
    xf = residual_block(xf, H, W, params["rb3"])
    y = final_conv(xf, H, W, params["wf"], params["bf"])
    return y.astype(jnp.float32)


# ------------- pure-JAX mirror of the same mixed-precision math ------------- #

def _mirror_conv3x3(x, w_flat, b, stride):
    cout, cin = w_flat.shape[0], x.shape[1]
    w = w_flat.reshape(cout, 3, 3, cin).transpose(1, 2, 3, 0).astype(jnp.bfloat16)
    y = lax.conv_general_dilated(
        x.astype(jnp.bfloat16), w, (stride, stride), [(1, 1), (1, 1)],
        dimension_numbers=("NCHW", "HWIO", "NCHW"),
        preferred_element_type=jnp.float32)
    return y + b.reshape(1, cout, 1, 1).astype(jnp.float32)


def _mirror_rbs(x, p):
    h1 = _leaky(_mirror_conv3x3(x, p["w1"], p["b1"], 2)).astype(jnp.bfloat16)
    h2 = _mirror_conv3x3(h1, p["w2"], p["b2"], 1)
    norm = jnp.einsum("oc,bchw->bohw", p["gamma"], h2 * h2) \
        + p["beta"].reshape(1, -1, 1, 1)
    gdn = h2 * lax.rsqrt(norm)
    skip = jnp.einsum("oc,bchw->bohw", p["ws"].astype(jnp.bfloat16),
                      x[:, :, ::2, ::2].astype(jnp.bfloat16),
                      preferred_element_type=jnp.float32) \
        + p["bs"].reshape(1, -1, 1, 1)
    return (gdn + skip).astype(jnp.bfloat16)


def _mirror_rb(x, p):
    h1 = _leaky(_mirror_conv3x3(x, p["w1"], p["b1"], 1)).astype(jnp.bfloat16)
    h2 = _leaky(_mirror_conv3x3(h1, p["w2"], p["b2"], 1))
    return (h2 + x.astype(jnp.float32)).astype(jnp.bfloat16)


def _mirror_forward(x, params):
    x = x.astype(jnp.bfloat16)
    x = _mirror_rbs(x, params["rbs1"]); x = _mirror_rb(x, params["rb1"])
    x = _mirror_rbs(x, params["rbs2"]); x = _mirror_rb(x, params["rb2"])
    x = _mirror_rbs(x, params["rbs3"]); x = _mirror_rb(x, params["rb3"])
    return _mirror_conv3x3(x, params["wf"], params["bf"], 2).astype(jnp.float32)


# --------------------------- parameter construction ------------------------- #

def init_conv3x3(key, cin, cout):
    kw, kb = jax.random.split(key)
    w = jax.random.normal(kw, (cout, 9 * cin), jnp.float32) / jnp.sqrt(9.0 * cin)
    b = jax.random.normal(kb, (cout,), jnp.float32) * 0.01
    return w, b


def init_conv1x1(key, cin, cout):
    kw, kb = jax.random.split(key)
    w = jax.random.normal(kw, (cout, cin), jnp.float32) / jnp.sqrt(1.0 * cin)
    b = jax.random.normal(kb, (cout,), jnp.float32) * 0.01
    return w, b


def init_rbs(key, cin, cout):
    k1, k2, k3 = jax.random.split(key, 3)
    w1, b1 = init_conv3x3(k1, cin, cout)
    w2, b2 = init_conv3x3(k2, cout, cout)
    ws, bs = init_conv1x1(k3, cin, cout)
    gamma = 0.1 * jnp.eye(cout, dtype=jnp.float32)   # CompressAI GDN init
    beta = jnp.ones((cout,), jnp.float32)
    return dict(w1=w1, b1=b1, w2=w2, b2=b2, ws=ws, bs=bs, gamma=gamma, beta=beta)


def init_rb(key, c):
    k1, k2 = jax.random.split(key)
    w1, b1 = init_conv3x3(k1, c, c)
    w2, b2 = init_conv3x3(k2, c, c)
    return dict(w1=w1, b1=b1, w2=w2, b2=b2)


def init_params(key, N, M):
    ks = jax.random.split(key, 7)
    wf, bf = init_conv3x3(ks[6], N, M)
    return dict(
        rbs1=init_rbs(ks[0], 3, N), rb1=init_rb(ks[1], N),
        rbs2=init_rbs(ks[2], N, N), rb2=init_rb(ks[3], N),
        rbs3=init_rbs(ks[4], N, N), rb3=init_rb(ks[5], N),
        wf=wf, bf=bf)


# ------------------------- pure-f32 semantic reference ---------------------- #

def _ref_conv3x3_f32(x, w_flat, b, stride):
    cout, cin = w_flat.shape[0], x.shape[1]
    w_hwio = w_flat.reshape(cout, 3, 3, cin).transpose(1, 2, 3, 0)
    y = lax.conv_general_dilated(
        x, w_hwio, window_strides=(stride, stride), padding=[(1, 1), (1, 1)],
        dimension_numbers=("NCHW", "HWIO", "NCHW"))
    return y + b.reshape(1, cout, 1, 1)


def _ref_rbs_f32(x, p):
    h = _leaky(_ref_conv3x3_f32(x, p["w1"], p["b1"], 2))
    h = _ref_conv3x3_f32(h, p["w2"], p["b2"], 1)
    norm = jnp.einsum("oc,bchw->bohw", p["gamma"], h * h) + p["beta"].reshape(1, -1, 1, 1)
    gdn = h * lax.rsqrt(norm)
    skip = jnp.einsum("oc,bchw->bohw", p["ws"], x[:, :, ::2, ::2]) \
        + p["bs"].reshape(1, -1, 1, 1)
    return gdn + skip


def _ref_rb_f32(x, p):
    h = _leaky(_ref_conv3x3_f32(x, p["w1"], p["b1"], 1))
    h = _leaky(_ref_conv3x3_f32(h, p["w2"], p["b2"], 1))
    return h + x


def reference_forward_f32(x, params):
    x = _ref_rbs_f32(x, params["rbs1"])
    x = _ref_rb_f32(x, params["rb1"])
    x = _ref_rbs_f32(x, params["rbs2"])
    x = _ref_rb_f32(x, params["rb2"])
    x = _ref_rbs_f32(x, params["rbs3"])
    x = _ref_rb_f32(x, params["rb3"])
    return _ref_conv3x3_f32(x, params["wf"], params["bf"], 2)


# ----------------------------------- main ----------------------------------- #

if __name__ == "__main__":
    N, M = 32, 48
    B, H, W = 2, 16, 16

    key = jax.random.PRNGKey(0)
    kx, kp = jax.random.split(key)
    x = jax.random.normal(kx, (B, 3, H, W), jnp.float32)     # NCHW like PyTorch
    params = init_params(kp, N, M)

    fwd = jax.jit(functools.partial(analysis_transform, impl="pallas"))
    y = jax.block_until_ready(fwd(x, params))
    assert y.shape == (B, M, 1, 1), y.shape                  # 16 -> 8 -> 4 -> 2 -> 1

    # Strict check: pure-JAX mirror of the exact same bf16/f32 mixed-precision math.
    fwd_ref = jax.jit(functools.partial(analysis_transform, impl="ref"))
    y_mirror = jax.block_until_ready(fwd_ref(x, params))
    assert jnp.allclose(y, y_mirror, rtol=2e-2, atol=2e-2), \
        float(jnp.max(jnp.abs(y - y_mirror)))

    # Loose semantic check vs the full-f32 reference (bf16 storage/matmul roundoff).
    y_f32 = jax.block_until_ready(jax.jit(reference_forward_f32)(x, params))
    rel_l2 = float(jnp.linalg.norm(y - y_f32) / jnp.linalg.norm(y_f32))
    assert rel_l2 < 5e-2, rel_l2

    print("KERNEL_OK")
</pallas_src>

<mosaic_0001>
module attributes {stable_mosaic.version = 11 : i64} {
  func.func @kernel(%arg0: i32, %arg1: memref<1x32x100xbf16, #tpu.memory_space<vmem>>, %arg2: memref<1x100xf32, #tpu.memory_space<vmem>>, %arg3: memref<9x32x32xbf16, #tpu.memory_space<vmem>>, %arg4: memref<32x1xf32, #tpu.memory_space<vmem>>, %arg5: memref<9x32x32xbf16, #tpu.memory_space<vmem>>, %arg6: memref<32x1xf32, #tpu.memory_space<vmem>>, %arg7: memref<1x32x100xbf16, #tpu.memory_space<vmem>>, %arg8: memref<32x122xbf16, #tpu.memory_space<vmem>>, %arg9: memref<32x122xbf16, #tpu.memory_space<vmem>>) attributes {dimension_semantics = [#tpu.dimension_semantics<parallel>], iteration_bounds = array<i64: 2>, scalar_prefetch = 0 : i64, scratch_operands = 2 : i64, tpu.core_type = #tpu.core_type<tc>, window_params = [{transform_indices = @transform_0, window_bounds = array<i64: 1, 32, 100>}, {pipeline_mode = #tpu.pipeline_mode<synchronous>, transform_indices = @transform_1, window_bounds = array<i64: 1, 100>}, {pipeline_mode = #tpu.pipeline_mode<synchronous>, transform_indices = @transform_2, window_bounds = array<i64: 9, 32, 32>}, {pipeline_mode = #tpu.pipeline_mode<synchronous>, transform_indices = @transform_3, window_bounds = array<i64: 32, 1>}, {pipeline_mode = #tpu.pipeline_mode<synchronous>, transform_indices = @transform_4, window_bounds = array<i64: 9, 32, 32>}, {pipeline_mode = #tpu.pipeline_mode<synchronous>, transform_indices = @transform_5, window_bounds = array<i64: 32, 1>}, {transform_indices = @transform_6, window_bounds = array<i64: 1, 32, 100>}]} {
    %c0 = arith.constant 0 : index
    %c0_0 = arith.constant 0 : index
    %c0_1 = arith.constant 0 : index
    %0 = vector.load %arg1[%c0, %c0_0, %c0_1] : memref<1x32x100xbf16, #tpu.memory_space<vmem>>, vector<1x32x100xbf16>
    %1 = vector.shape_cast %0 : vector<1x32x100xbf16> to vector<32x100xbf16>
    %c0_2 = arith.constant 0 : index
    %c0_3 = arith.constant 0 : index
    %2 = vector.load %arg2[%c0_2, %c0_3] : memref<1x100xf32, #tpu.memory_space<vmem>>, vector<1x100xf32>
    %cst = arith.constant 0.000000e+00 : bf16
    %3 = vector.broadcast %cst : bf16 to vector<32x122xbf16>
    %c0_4 = arith.constant 0 : index
    %c0_5 = arith.constant 0 : index
    %4 = vector.load %arg8[%c0_4, %c0_5] : memref<32x122xbf16, #tpu.memory_space<vmem>>, vector<32x122xbf16>
    tpu.vector_store %arg8[%c0_4, %c0_5], %3 {strides = array<i32>} : memref<32x122xbf16, #tpu.memory_space<vmem>>, vector<32x122xbf16>,
    %c0_6 = arith.constant 0 : index
    %c11 = arith.constant 11 : index
    %5 = vector.load %arg8[%c0_6, %c11] : memref<32x122xbf16, #tpu.memory_space<vmem>>, vector<32x100xbf16>
    tpu.vector_store %arg8[%c0_6, %c11], %1 {strides = array<i32>} : memref<32x122xbf16, #tpu.memory_space<vmem>>, vector<32x100xbf16>,
    %cst_7 = arith.constant 0.000000e+00 : f32
    %6 = vector.broadcast %cst_7 : f32 to vector<32x100xf32>
    %c0_8 = arith.constant 0 : index
    %c0_9 = arith.constant 0 : index
    %c0_10 = arith.constant 0 : index
    %7 = vector.load %arg3[%c0_8, %c0_9, %c0_10] : memref<9x32x32xbf16, #tpu.memory_space<vmem>>, vector<1x32x32xbf16>
    %8 = vector.shape_cast %7 : vector<1x32x32xbf16> to vector<32x32xbf16>
    %c0_11 = arith.constant 0 : index
    %c0_12 = arith.constant 0 : index
    %9 = vector.load %arg8[%c0_11, %c0_12] : memref<32x122xbf16, #tpu.memory_space<vmem>>, vector<32x100xbf16>
    %cst_13 = arith.constant dense<0.000000e+00> : vector<32x100xf32>
    %10 = tpu.matmul %8, %9, %cst_13 {dimension_numbers = #tpu.dot_dimension_numbers<[1], [0], [0], [1], [0, 0, 1, 1], [], []>} : vector<32x32xbf16>, vector<32x100xbf16>, vector<32x100xf32> -> vector<32x100xf32>
    %11 = arith.addf %6, %10 : vector<32x100xf32>
    %c1 = arith.constant 1 : index
    %c0_14 = arith.constant 0 : index
    %c0_15 = arith.constant 0 : index
    %12 = vector.load %arg3[%c1, %c0_14, %c0_15] : memref<9x32x32xbf16, #tpu.memory_space<vmem>>, vector<1x32x32xbf16>
    %13 = vector.shape_cast %12 : vector<1x32x32xbf16> to vector<32x32xbf16>
    %c0_16 = arith.constant 0 : index
    %c1_17 = arith.constant 1 : index
    %14 = vector.load %arg8[%c0_16, %c1_17] : memref<32x122xbf16, #tpu.memory_space<vmem>>, vector<32x100xbf16>
    %cst_18 = arith.constant dense<0.000000e+00> : vector<32x100xf32>
    %15 = tpu.matmul %13, %14, %cst_18 {dimension_numbers = #tpu.dot_dimension_numbers<[1], [0], [0], [1], [0, 0, 1, 1], [], []>} : vector<32x32xbf16>, vector<32x100xbf16>, vector<32x100xf32> -> vector<32x100xf32>
    %16 = arith.addf %11, %15 : vector<32x100xf32>
    %c2 = arith.constant 2 : index
    %c0_19 = arith.constant 0 : index
    %c0_20 = arith.constant 0 : index
    %17 = vector.load %arg3[%c2, %c0_19, %c0_20] : memref<9x32x32xbf16, #tpu.memory_space<vmem>>, vector<1x32x32xbf16>
    %18 = vector.shape_cast %17 : vector<1x32x32xbf16> to vector<32x32xbf16>
    %c0_21 = arith.constant 0 : index
    %c2_22 = arith.constant 2 : index
    %19 = vector.load %arg8[%c0_21, %c2_22] : memref<32x122xbf16, #tpu.memory_space<vmem>>, vector<32x100xbf16>
    %cst_23 = arith.constant dense<0.000000e+00> : vector<32x100xf32>
    %20 = tpu.matmul %18, %19, %cst_23 {dimension_numbers = #tpu.dot_dimension_numbers<[1], [0], [0], [1], [0, 0, 1, 1], [], []>} : vector<32x32xbf16>, vector<32x100xbf16>, vector<32x100xf32> -> vector<32x100xf32>
    %21 = arith.addf %16, %20 : vector<32x100xf32>
    %c3 = arith.constant 3 : index
    %c0_24 = arith.constant 0 : index
    %c0_25 = arith.constant 0 : index
    %22 = vector.load %arg3[%c3, %c0_24, %c0_25] : memref<9x32x32xbf16, #tpu.memory_space<vmem>>, vector<1x32x32xbf16>
    %23 = vector.shape_cast %22 : vector<1x32x32xbf16> to vector<32x32xbf16>
    %c0_26 = arith.constant 0 : index
    %c10 = arith.constant 10 : index
    %24 = vector.load %arg8[%c0_26, %c10] : memref<32x122xbf16, #tpu.memory_space<vmem>>, vector<32x100xbf16>
    %cst_27 = arith.constant dense<0.000000e+00> : vector<32x100xf32>
    %25 = tpu.matmul %23, %24, %cst_27 {dimension_numbers = #tpu.dot_dimension_numbers<[1], [0], [0], [1], [0, 0, 1, 1], [], []>} : vector<32x32xbf16>, vector<32x100xbf16>, vector<32x100xf32> -> vector<32x100xf32>
    %26 = arith.addf %21, %25 : vector<32x100xf32>
    %c4 = arith.constant 4 : index
    %c0_28 = arith.constant 0 : index
    %c0_29 = arith.constant 0 : index
    %27 = vector.load %arg3[%c4, %c0_28, %c0_29] : memref<9x32x32xbf16, #tpu.memory_space<vmem>>, vector<1x32x32xbf16>
    %28 = vector.shape_cast %27 : vector<1x32x32xbf16> to vector<32x32xbf16>
    %c0_30 = arith.constant 0 : index
    %c11_31 = arith.constant 11 : index
    %29 = vector.load %arg8[%c0_30, %c11_31] : memref<32x122xbf16, #tpu.memory_space<vmem>>, vector<32x100xbf16>
    %cst_32 = arith.constant dense<0.000000e+00> : vector<32x100xf32>
    %30 = tpu.matmul %28, %29, %cst_32 {dimension_numbers = #tpu.dot_dimension_numbers<[1], [0], [0], [1], [0, 0, 1, 1], [], []>} : vector<32x32xbf16>, vector<32x100xbf16>, vector<32x100xf32> -> vector<32x100xf32>
    %31 = arith.addf %26, %30 : vector<32x100xf32>
    %c5 = arith.constant 5 : index
    %c0_33 = arith.constant 0 : index
    %c0_34 = arith.constant 0 : index
    %32 = vector.load %arg3[%c5, %c0_33, %c0_34] : memref<9x32x32xbf16, #tpu.memory_space<vmem>>, vector<1x32x32xbf16>
    %33 = vector.shape_cast %32 : vector<1x32x32xbf16> to vector<32x32xbf16>
    %c0_35 = arith.constant 0 : index
    %c12 = arith.constant 12 : index
    %34 = vector.load %arg8[%c0_35, %c12] : memref<32x122xbf16, #tpu.memory_space<vmem>>, vector<32x100xbf16>
    %cst_36 = arith.constant dense<0.000000e+00> : vector<32x100xf32>
    %35 = tpu.matmul %33, %34, %cst_36 {dimension_numbers = #tpu.dot_dimension_numbers<[1], [0], [0], [1], [0, 0, 1, 1], [], []>} : vector<32x32xbf16>, vector<32x100xbf16>, vector<32x100xf32> -> vector<32x100xf32>
    %36 = arith.addf %31, %35 : vector<32x100xf32>
    %c6 = arith.constant 6 : index
    %c0_37 = arith.constant 0 : index
    %c0_38 = arith.constant 0 : index
    %37 = vector.load %arg3[%c6, %c0_37, %c0_38] : memref<9x32x32xbf16, #tpu.memory_space<vmem>>, vector<1x32x32xbf16>
    %38 = vector.shape_cast %37 : vector<1x32x32xbf16> to vector<32x32xbf16>
    %c0_39 = arith.constant 0 : index
    %c20 = arith.constant 20 : index
    %39 = vector.load %arg8[%c0_39, %c20] : memref<32x122xbf16, #tpu.memory_space<vmem>>, vector<32x100xbf16>
    %cst_40 = arith.constant dense<0.000000e+00> : vector<32x100xf32>
    %40 = tpu.matmul %38, %39, %cst_40 {dimension_numbers = #tpu.dot_dimension_numbers<[1], [0], [0], [1], [0, 0, 1, 1], [], []>} : vector<32x32xbf16>, vector<32x100xbf16>, vector<32x100xf32> -> vector<32x100xf32>
    %41 = arith.addf %36, %40 : vector<32x100xf32>
    %c7 = arith.constant 7 : index
    %c0_41 = arith.constant 0 : index
    %c0_42 = arith.constant 0 : index
    %42 = vector.load %arg3[%c7, %c0_41, %c0_42] : memref<9x32x32xbf16, #tpu.memory_space<vmem>>, vector<1x32x32xbf16>
    %43 = vector.shape_cast %42 : vector<1x32x32xbf16> to vector<32x32xbf16>
    %c0_43 = arith.constant 0 : index
    %c21 = arith.constant 21 : index
    %44 = vector.load %arg8[%c0_43, %c21] : memref<32x122xbf16, #tpu.memory_space<vmem>>, vector<32x100xbf16>
    %cst_44 = arith.constant dense<0.000000e+00> : vector<32x100xf32>
    %45 = tpu.matmul %43, %44, %cst_44 {dimension_numbers = #tpu.dot_dimension_numbers<[1], [0], [0], [1], [0, 0, 1, 1], [], []>} : vector<32x32xbf16>, vector<32x100xbf16>, vector<32x100xf32> -> vector<32x100xf32>
    %46 = arith.addf %41, %45 : vector<32x100xf32>
    %c8 = arith.constant 8 : index
    %c0_45 = arith.constant 0 : index
    %c0_46 = arith.constant 0 : index
    %47 = vector.load %arg3[%c8, %c0_45, %c0_46] : memref<9x32x32xbf16, #tpu.memory_space<vmem>>, vector<1x32x32xbf16>
    %48 = vector.shape_cast %47 : vector<1x32x32xbf16> to vector<32x32xbf16>
    %c0_47 = arith.constant 0 : index
    %c22 = arith.constant 22 : index
    %49 = vector.load %arg8[%c0_47, %c22] : memref<32x122xbf16, #tpu.memory_space<vmem>>, vector<32x100xbf16>
    %cst_48 = arith.constant dense<0.000000e+00> : vector<32x100xf32>
    %50 = tpu.matmul %48, %49, %cst_48 {dimension_numbers = #tpu.dot_dimension_numbers<[1], [0], [0], [1], [0, 0, 1, 1], [], []>} : vector<32x32xbf16>, vector<32x100xbf16>, vector<32x100xf32> -> vector<32x100xf32>
    %51 = arith.addf %46, %50 : vector<32x100xf32>
    %c0_49 = arith.constant 0 : index
    %c0_50 = arith.constant 0 : index
    %52 = vector.load %arg4[%c0_49, %c0_50] : memref<32x1xf32, #tpu.memory_space<vmem>>, vector<32x1xf32>
    %53 = vector.broadcast %52 : vector<32x1xf32> to vector<32x100xf32>
    %54 = arith.addf %51, %53 : vector<32x100xf32>
    %cst_51 = arith.constant 0.000000e+00 : f32
    %55 = vector.broadcast %cst_51 : f32 to vector<32x100xf32>
    %56 = arith.cmpf oge, %54, %55 : vector<32x100xf32>
    %cst_52 = arith.constant 0.00999999977 : f32
    %57 = vector.broadcast %cst_52 : f32 to vector<32x100xf32>
    %58 = arith.mulf %57, %54 : vector<32x100xf32>
    %59 = arith.select %56, %54, %58 : vector<32x100xi1>, vector<32x100xf32>
    %60 = vector.broadcast %2 : vector<1x100xf32> to vector<32x100xf32>
    %61 = arith.mulf %59, %60 : vector<32x100xf32>
    %cst_53 = arith.constant 0.000000e+00 : bf16
    %62 = vector.broadcast %cst_53 : bf16 to vector<32x122xbf16>
    %c0_54 = arith.constant 0 : index
    %c0_55 = arith.constant 0 : index
    %63 = vector.load %arg9[%c0_54, %c0_55] : memref<32x122xbf16, #tpu.memory_space<vmem>>, vector<32x122xbf16>
    tpu.vector_store %arg9[%c0_54, %c0_55], %62 {strides = array<i32>} : memref<32x122xbf16, #tpu.memory_space<vmem>>, vector<32x122xbf16>,
    %64 = arith.truncf %61 : vector<32x100xf32> to vector<32x100xbf16>
    %c0_56 = arith.constant 0 : index
    %c11_57 = arith.constant 11 : index
    %65 = vector.load %arg9[%c0_56, %c11_57] : memref<32x122xbf16, #tpu.memory_space<vmem>>, vector<32x100xbf16>
    tpu.vector_store %arg9[%c0_56, %c11_57], %64 {strides = array<i32>} : memref<32x122xbf16, #tpu.memory_space<vmem>>, vector<32x100xbf16>,
    %cst_58 = arith.constant 0.000000e+00 : f32
    %66 = vector.broadcast %cst_58 : f32 to vector<32x100xf32>
    %c0_59 = arith.constant 0 : index
    %c0_60 = arith.constant 0 : index
    %c0_61 = arith.constant 0 : index
    %67 = vector.load %arg5[%c0_59, %c0_60, %c0_61] : memref<9x32x32xbf16, #tpu.memory_space<vmem>>, vector<1x32x32xbf16>
    %68 = vector.shape_cast %67 : vector<1x32x32xbf16> to vector<32x32xbf16>
    %c0_62 = arith.constant 0 : index
    %c0_63 = arith.constant 0 : index
    %69 = vector.load %arg9[%c0_62, %c0_63] : memref<32x122xbf16, #tpu.memory_space<vmem>>, vector<32x100xbf16>
    %cst_64 = arith.constant dense<0.000000e+00> : vector<32x100xf32>
    %70 = tpu.matmul %68, %69, %cst_64 {dimension_numbers = #tpu.dot_dimension_numbers<[1], [0], [0], [1], [0, 0, 1, 1], [], []>} : vector<32x32xbf16>, vector<32x100xbf16>, vector<32x100xf32> -> vector<32x100xf32>
    %71 = arith.addf %66, %70 : vector<32x100xf32>
    %c1_65 = arith.constant 1 : index
    %c0_66 = arith.constant 0 : index
    %c0_67 = arith.constant 0 : index
    %72 = vector.load %arg5[%c1_65, %c0_66, %c0_67] : memref<9x32x32xbf16, #tpu.memory_space<vmem>>, vector<1x32x32xbf16>
    %73 = vector.shape_cast %72 : vector<1x32x32xbf16> to vector<32x32xbf16>
    %c0_68 = arith.constant 0 : index
    %c1_69 = arith.constant 1 : index
    %74 = vector.load %arg9[%c0_68, %c1_69] : memref<32x122xbf16, #tpu.memory_space<vmem>>, vector<32x100xbf16>
    %cst_70 = arith.constant dense<0.000000e+00> : vector<32x100xf32>
    %75 = tpu.matmul %73, %74, %cst_70 {dimension_numbers = #tpu.dot_dimension_numbers<[1], [0], [0], [1], [0, 0, 1, 1], [], []>} : vector<32x32xbf16>, vector<32x100xbf16>, vector<32x100xf32> -> vector<32x100xf32>
    %76 = arith.addf %71, %75 : vector<32x100xf32>
    %c2_71 = arith.constant 2 : index
    %c0_72 = arith.constant 0 : index
    %c0_73 = arith.constant 0 : index
    %77 = vector.load %arg5[%c2_71, %c0_72, %c0_73] : memref<9x32x32xbf16, #tpu.memory_space<vmem>>, vector<1x32x32xbf16>
    %78 = vector.shape_cast %77 : vector<1x32x32xbf16> to vector<32x32xbf16>
    %c0_74 = arith.constant 0 : index
    %c2_75 = arith.constant 2 : index
    %79 = vector.load %arg9[%c0_74, %c2_75] : memref<32x122xbf16, #tpu.memory_space<vmem>>, vector<32x100xbf16>
    %cst_76 = arith.constant dense<0.000000e+00> : vector<32x100xf32>
    %80 = tpu.matmul %78, %79, %cst_76 {dimension_numbers = #tpu.dot_dimension_numbers<[1], [0], [0], [1], [0, 0, 1, 1], [], []>} : vector<32x32xbf16>, vector<32x100xbf16>, vector<32x100xf32> -> vector<32x100xf32>
    %81 = arith.addf %76, %80 : vector<32x100xf32>
    %c3_77 = arith.constant 3 : index
    %c0_78 = arith.constant 0 : index
    %c0_79 = arith.constant 0 : index
    %82 = vector.load %arg5[%c3_77, %c0_78, %c0_79] : memref<9x32x32xbf16, #tpu.memory_space<vmem>>, vector<1x32x32xbf16>
    %83 = vector.shape_cast %82 : vector<1x32x32xbf16> to vector<32x32xbf16>
    %c0_80 = arith.constant 0 : index
    %c10_81 = arith.constant 10 : index
    %84 = vector.load %arg9[%c0_80, %c10_81] : memref<32x122xbf16, #tpu.memory_space<vmem>>, vector<32x100xbf16>
    %cst_82 = arith.constant dense<0.000000e+00> : vector<32x100xf32>
    %85 = tpu.matmul %83, %84, %cst_82 {dimension_numbers = #tpu.dot_dimension_numbers<[1], [0], [0], [1], [0, 0, 1, 1], [], []>} : vector<32x32xbf16>, vector<32x100xbf16>, vector<32x100xf32> -> vector<32x100xf32>
    %86 = arith.addf %81, %85 : vector<32x100xf32>
    %c4_83 = arith.constant 4 : index
    %c0_84 = arith.constant 0 : index
    %c0_85 = arith.constant 0 : index
    %87 = vector.load %arg5[%c4_83, %c0_84, %c0_85] : memref<9x32x32xbf16, #tpu.memory_space<vmem>>, vector<1x32x32xbf16>
    %88 = vector.shape_cast %87 : vector<1x32x32xbf16> to vector<32x32xbf16>
    %c0_86 = arith.constant 0 : index
    %c11_87 = arith.constant 11 : index
    %89 = vector.load %arg9[%c0_86, %c11_87] : memref<32x122xbf16, #tpu.memory_space<vmem>>, vector<32x100xbf16>
    %cst_88 = arith.constant dense<0.000000e+00> : vector<32x100xf32>
    %90 = tpu.matmul %88, %89, %cst_88 {dimension_numbers = #tpu.dot_dimension_numbers<[1], [0], [0], [1], [0, 0, 1, 1], [], []>} : vector<32x32xbf16>, vector<32x100xbf16>, vector<32x100xf32> -> vector<32x100xf32>
    %91 = arith.addf %86, %90 : vector<32x100xf32>
    %c5_89 = arith.constant 5 : index
    %c0_90 = arith.constant 0 : index
    %c0_91 = arith.constant 0 : index
    %92 = vector.load %arg5[%c5_89, %c0_90, %c0_91] : memref<9x32x32xbf16, #tpu.memory_space<vmem>>, vector<1x32x32xbf16>
    %93 = vector.shape_cast %92 : vector<1x32x32xbf16> to vector<32x32xbf16>
    %c0_92 = arith.constant 0 : index
    %c12_93 = arith.constant 12 : index
    %94 = vector.load %arg9[%c0_92, %c12_93] : memref<32x122xbf16, #tpu.memory_space<vmem>>, vector<32x100xbf16>
    %cst_94 = arith.constant dense<0.000000e+00> : vector<32x100xf32>
    %95 = tpu.matmul %93, %94, %cst_94 {dimension_numbers = #tpu.dot_dimension_numbers<[1], [0], [0], [1], [0, 0, 1, 1], [], []>} : vector<32x32xbf16>, vector<32x100xbf16>, vector<32x100xf32> -> vector<32x100xf32>
    %96 = arith.addf %91, %95 : vector<32x100xf32>
    %c6_95 = arith.constant 6 : index
    %c0_96 = arith.constant 0 : index
    %c0_97 = arith.constant 0 : index
    %97 = vector.load %arg5[%c6_95, %c0_96, %c0_97] : memref<9x32x32xbf16, #tpu.memory_space<vmem>>, vector<1x32x32xbf16>
    %98 = vector.shape_cast %97 : vector<1x32x32xbf16> to vector<32x32xbf16>
    %c0_98 = arith.constant 0 : index
    %c20_99 = arith.constant 20 : index
    %99 = vector.load %arg9[%c0_98, %c20_99] : memref<32x122xbf16, #tpu.memory_space<vmem>>, vector<32x100xbf16>
    %cst_100 = arith.constant dense<0.000000e+00> : vector<32x100xf32>
    %100 = tpu.matmul %98, %99, %cst_100 {dimension_numbers = #tpu.dot_dimension_numbers<[1], [0], [0], [1], [0, 0, 1, 1], [], []>} : vector<32x32xbf16>, vector<32x100xbf16>, vector<32x100xf32> -> vector<32x100xf32>
    %101 = arith.addf %96, %100 : vector<32x100xf32>
    %c7_101 = arith.constant 7 : index
    %c0_102 = arith.constant 0 : index
    %c0_103 = arith.constant 0 : index
    %102 = vector.load %arg5[%c7_101, %c0_102, %c0_103] : memref<9x32x32xbf16, #tpu.memory_space<vmem>>, vector<1x32x32xbf16>
    %103 = vector.shape_cast %102 : vector<1x32x32xbf16> to vector<32x32xbf16>
    %c0_104 = arith.constant 0 : index
    %c21_105 = arith.constant 21 : index
    %104 = vector.load %arg9[%c0_104, %c21_105] : memref<32x122xbf16, #tpu.memory_space<vmem>>, vector<32x100xbf16>
    %cst_106 = arith.constant dense<0.000000e+00> : vector<32x100xf32>
    %105 = tpu.matmul %103, %104, %cst_106 {dimension_numbers = #tpu.dot_dimension_numbers<[1], [0], [0], [1], [0, 0, 1, 1], [], []>} : vector<32x32xbf16>, vector<32x100xbf16>, vector<32x100xf32> -> vector<32x100xf32>
    %106 = arith.addf %101, %105 : vector<32x100xf32>
    %c8_107 = arith.constant 8 : index
    %c0_108 = arith.constant 0 : index
    %c0_109 = arith.constant 0 : index
    %107 = vector.load %arg5[%c8_107, %c0_108, %c0_109] : memref<9x32x32xbf16, #tpu.memory_space<vmem>>, vector<1x32x32xbf16>
    %108 = vector.shape_cast %107 : vector<1x32x32xbf16> to vector<32x32xbf16>
    %c0_110 = arith.constant 0 : index
    %c22_111 = arith.constant 22 : index
    %109 = vector.load %arg9[%c0_110, %c22_111] : memref<32x122xbf16, #tpu.memory_space<vmem>>, vector<32x100xbf16>
    %cst_112 = arith.constant dense<0.000000e+00> : vector<32x100xf32>
    %110 = tpu.matmul %108, %109, %cst_112 {dimension_numbers = #tpu.dot_dimension_numbers<[1], [0], [0], [1], [0, 0, 1, 1], [], []>} : vector<32x32xbf16>, vector<32x100xbf16>, vector<32x100xf32> -> vector<32x100xf32>
    %111 = arith.addf %106, %110 : vector<32x100xf32>
    %c0_113 = arith.constant 0 : index
    %c0_114 = arith.constant 0 : index
    %112 = vector.load %arg6[%c0_113, %c0_114] : memref<32x1xf32, #tpu.memory_space<vmem>>, vector<32x1xf32>
    %113 = vector.broadcast %112 : vector<32x1xf32> to vector<32x100xf32>
    %114 = arith.addf %111, %113 : vector<32x100xf32>
    %cst_115 = arith.constant 0.000000e+00 : f32
    %115 = vector.broadcast %cst_115 : f32 to vector<32x100xf32>
    %116 = arith.cmpf oge, %114, %115 : vector<32x100xf32>
    %cst_116 = arith.constant 0.00999999977 : f32
    %117 = vector.broadcast %cst_116 : f32 to vector<32x100xf32>
    %118 = arith.mulf %117, %114 : vector<32x100xf32>
    %119 = arith.select %116, %114, %118 : vector<32x100xi1>, vector<32x100xf32>
    %120 = vector.broadcast %2 : vector<1x100xf32> to vector<32x100xf32>
    %121 = arith.mulf %119, %120 : vector<32x100xf32>
    %122 = arith.extf %1 : vector<32x100xbf16> to vector<32x100xf32>
    %123 = arith.addf %121, %122 : vector<32x100xf32>
    %124 = arith.truncf %123 : vector<32x100xf32> to vector<32x100xbf16>
    %c0_117 = arith.constant 0 : index
    %c0_118 = arith.constant 0 : index
    %c0_119 = arith.constant 0 : index
    %125 = vector.load %arg7[%c0_117, %c0_118, %c0_119] : memref<1x32x100xbf16, #tpu.memory_space<vmem>>, vector<1x32x100xbf16>
    %126 = vector.shape_cast %125 : vector<1x32x100xbf16> to vector<32x100xbf16>
    %127 = vector.shape_cast %124 : vector<32x100xbf16> to vector<1x32x100xbf16>
    tpu.vector_store %arg7[%c0_117, %c0_118, %c0_119], %127 {strides = array<i32>} : memref<1x32x100xbf16, #tpu.memory_space<vmem>>, vector<1x32x100xbf16>,
    return
  }
  func.func @transform_0(%arg0: i32) -> (i32, i32, i32) {
    %c0_i32 = arith.constant 0 : i32
    %c0_i32_0 = arith.constant 0 : i32
    %c0_i32_1 = arith.constant 0 : i32
    return %arg0, %c0_i32, %c0_i32_0 : i32, i32, i32
  }
  func.func @transform_1(%arg0: i32) -> (i32, i32) {
    %c0_i32 = arith.constant 0 : i32
    %c0_i32_0 = arith.constant 0 : i32
    %c0_i32_1 = arith.constant 0 : i32
    return %c0_i32, %c0_i32_0 : i32, i32
  }
  func.func @transform_2(%arg0: i32) -> (i32, i32, i32) {
    %c0_i32 = arith.constant 0 : i32
    %c0_i32_0 = arith.constant 0 : i32
    %c0_i32_1 = arith.constant 0 : i32
    %c0_i32_2 = arith.constant 0 : i32
    return %c0_i32, %c0_i32_0, %c0_i32_1 : i32, i32, i32
  }
  func.func @transform_3(%arg0: i32) -> (i32, i32) {
    %c0_i32 = arith.constant 0 : i32
    %c0_i32_0 = arith.constant 0 : i32
    %c0_i32_1 = arith.constant 0 : i32
    return %c0_i32, %c0_i32_0 : i32, i32
  }
  func.func @transform_4(%arg0: i32) -> (i32, i32, i32) {
    %c0_i32 = arith.constant 0 : i32
    %c0_i32_0 = arith.constant 0 : i32
    %c0_i32_1 = arith.constant 0 : i32
    %c0_i32_2 = arith.constant 0 : i32
    return %c0_i32, %c0_i32_0, %c0_i32_1 : i32, i32, i32
  }
  func.func @transform_5(%arg0: i32) -> (i32, i32) {
    %c0_i32 = arith.constant 0 : i32
    %c0_i32_0 = arith.constant 0 : i32
    %c0_i32_1 = arith.constant 0 : i32
    return %c0_i32, %c0_i32_0 : i32, i32
  }
  func.func @transform_6(%arg0: i32) -> (i32, i32, i32) {
    %c0_i32 = arith.constant 0 : i32
    %c0_i32_0 = arith.constant 0 : i32
    %c0_i32_1 = arith.constant 0 : i32
    return %arg0, %c0_i32, %c0_i32_0 : i32, i32, i32
  }
}

module attributes {stable_mosaic.version = 11 : i64} {
  func.func @kernel(%arg0: i32, %arg1: memref<1x4x16x91xbf16, #tpu.memory_space<vmem>>, %arg2: memref<1x100xf32, #tpu.memory_space<vmem>>, %arg3: memref<9x32x16xbf16, #tpu.memory_space<vmem>>, %arg4: memref<32x1xf32, #tpu.memory_space<vmem>>, %arg5: memref<9x32x32xbf16, #tpu.memory_space<vmem>>, %arg6: memref<32x1xf32, #tpu.memory_space<vmem>>, %arg7: memref<32x32xf32, #tpu.memory_space<vmem>>, %arg8: memref<32x1xf32, #tpu.memory_space<vmem>>, %arg9: memref<32x16xbf16, #tpu.memory_space<vmem>>, %arg10: memref<32x1xf32, #tpu.memory_space<vmem>>, %arg11: memref<1x32x100xbf16, #tpu.memory_space<vmem>>, %arg12: memref<32x81xbf16, #tpu.memory_space<vmem>>, %arg13: memref<32x81xf32, #tpu.memory_space<vmem>>, %arg14: memref<32x122xbf16, #tpu.memory_space<vmem>>, %arg15: memref<32x100xf32, #tpu.memory_space<vmem>>) attributes {dimension_semantics = [#tpu.dimension_semantics<parallel>], iteration_bounds = array<i64: 2>, scalar_prefetch = 0 : i64, scratch_operands = 4 : i64, tpu.core_type = #tpu.core_type<tc>, window_params = [{transform_indices = @transform_0, window_bounds = array<i64: 1, 4, 16, 91>}, {pipeline_mode = #tpu.pipeline_mode<synchronous>, transform_indices = @transform_1, window_bounds = array<i64: 1, 100>}, {pipeline_mode = #tpu.pipeline_mode<synchronous>, transform_indices = @transform_2, window_bounds = array<i64: 9, 32, 16>}, {pipeline_mode = #tpu.pipeline_mode<synchronous>, transform_indices = @transform_3, window_bounds = array<i64: 32, 1>}, {pipeline_mode = #tpu.pipeline_mode<synchronous>, transform_indices = @transform_4, window_bounds = array<i64: 9, 32, 32>}, {pipeline_mode = #tpu.pipeline_mode<synchronous>, transform_indices = @transform_5, window_bounds = array<i64: 32, 1>}, {pipeline_mode = #tpu.pipeline_mode<synchronous>, transform_indices = @transform_6, window_bounds = array<i64: 32, 32>}, {pipeline_mode = #tpu.pipeline_mode<synchronous>, transform_indices = @transform_7, window_bounds = array<i64: 32, 1>}, {pipeline_mode = #tpu.pipeline_mode<synchronous>, transform_indices = @transform_8, window_bounds = array<i64: 32, 16>}, {pipeline_mode = #tpu.pipeline_mode<synchronous>, transform_indices = @transform_9, window_bounds = array<i64: 32, 1>}, {transform_indices = @transform_10, window_bounds = array<i64: 1, 32, 100>}]} {
    %c0 = arith.constant 0 : index
    %c0_0 = arith.constant 0 : index
    %0 = vector.load %arg2[%c0, %c0_0] : memref<1x100xf32, #tpu.memory_space<vmem>>, vector<1x100xf32>
    %cst = arith.constant 0.000000e+00 : f32
    %1 = vector.broadcast %cst : f32 to vector<32x81xf32>
    %c0_1 = arith.constant 0 : index
    %c0_2 = arith.constant 0 : index
    %c0_3 = arith.constant 0 : index
    %2 = vector.load %arg3[%c0_1, %c0_2, %c0_3] : memref<9x32x16xbf16, #tpu.memory_space<vmem>>, vector<1x32x16xbf16>
    %3 = vector.shape_cast %2 : vector<1x32x16xbf16> to vector<32x16xbf16>
    %c0_4 = arith.constant 0 : index
    %c0_5 = arith.constant 0 : index
    %c0_6 = arith.constant 0 : index
    %c0_7 = arith.constant 0 : index
    %4 = vector.load %arg1[%c0_4, %c0_5, %c0_6, %c0_7] : memref<1x4x16x91xbf16, #tpu.memory_space<vmem>>, vector<1x1x16x81xbf16>
    %5 = vector.shape_cast %4 : vector<1x1x16x81xbf16> to vector<16x81xbf16>
    %cst_8 = arith.constant dense<0.000000e+00> : vector<32x81xf32>
    %6 = tpu.matmul %3, %5, %cst_8 {dimension_numbers = #tpu.dot_dimension_numbers<[1], [0], [0], [1], [0, 0, 1, 1], [], []>} : vector<32x16xbf16>, vector<16x81xbf16>, vector<32x81xf32> -> vector<32x81xf32>
    %7 = arith.addf %1, %6 : vector<32x81xf32>
    %c1 = arith.constant 1 : index
    %c0_9 = arith.constant 0 : index
    %c0_10 = arith.constant 0 : index
    %8 = vector.load %arg3[%c1, %c0_9, %c0_10] : memref<9x32x16xbf16, #tpu.memory_space<vmem>>, vector<1x32x16xbf16>
    %9 = vector.shape_cast %8 : vector<1x32x16xbf16> to vector<32x16xbf16>
    %c0_11 = arith.constant 0 : index
    %c1_12 = arith.constant 1 : index
    %c0_13 = arith.constant 0 : index
    %c0_14 = arith.constant 0 : index
    %10 = vector.load %arg1[%c0_11, %c1_12, %c0_13, %c0_14] : memref<1x4x16x91xbf16, #tpu.memory_space<vmem>>, vector<1x1x16x81xbf16>
    %11 = vector.shape_cast %10 : vector<1x1x16x81xbf16> to vector<16x81xbf16>
    %cst_15 = arith.constant dense<0.000000e+00> : vector<32x81xf32>
    %12 = tpu.matmul %9, %11, %cst_15 {dimension_numbers = #tpu.dot_dimension_numbers<[1], [0], [0], [1], [0, 0, 1, 1], [], []>} : vector<32x16xbf16>, vector<16x81xbf16>, vector<32x81xf32> -> vector<32x81xf32>
    %13 = arith.addf %7, %12 : vector<32x81xf32>
    %c2 = arith.constant 2 : index
    %c0_16 = arith.constant 0 : index
    %c0_17 = arith.constant 0 : index
    %14 = vector.load %arg3[%c2, %c0_16, %c0_17] : memref<9x32x16xbf16, #tpu.memory_space<vmem>>, vector<1x32x16xbf16>
    %15 = vector.shape_cast %14 : vector<1x32x16xbf16> to vector<32x16xbf16>
    %c0_18 = arith.constant 0 : index
    %c0_19 = arith.constant 0 : index
    %c0_20 = arith.constant 0 : index
    %c1_21 = arith.constant 1 : index
    %16 = vector.load %arg1[%c0_18, %c0_19, %c0_20, %c1_21] : memref<1x4x16x91xbf16, #tpu.memory_space<vmem>>, vector<1x1x16x81xbf16>
    %17 = vector.shape_cast %16 : vector<1x1x16x81xbf16> to vector<16x81xbf16>
    %cst_22 = arith.constant dense<0.000000e+00> : vector<32x81xf32>
    %18 = tpu.matmul %15, %17, %cst_22 {dimension_numbers = #tpu.dot_dimension_numbers<[1], [0], [0], [1], [0, 0, 1, 1], [], []>} : vector<32x16xbf16>, vector<16x81xbf16>, vector<32x81xf32> -> vector<32x81xf32>
    %19 = arith.addf %13, %18 : vector<32x81xf32>
    %c3 = arith.constant 3 : index
    %c0_23 = arith.constant 0 : index
    %c0_24 = arith.constant 0 : index
    %20 = vector.load %arg3[%c3, %c0_23, %c0_24] : memref<9x32x16xbf16, #tpu.memory_space<vmem>>, vector<1x32x16xbf16>
    %21 = vector.shape_cast %20 : vector<1x32x16xbf16> to vector<32x16xbf16>
    %c0_25 = arith.constant 0 : index
    %c2_26 = arith.constant 2 : index
    %c0_27 = arith.constant 0 : index
    %c0_28 = arith.constant 0 : index
    %22 = vector.load %arg1[%c0_25, %c2_26, %c0_27, %c0_28] : memref<1x4x16x91xbf16, #tpu.memory_space<vmem>>, vector<1x1x16x81xbf16>
    %23 = vector.shape_cast %22 : vector<1x1x16x81xbf16> to vector<16x81xbf16>
    %cst_29 = arith.constant dense<0.000000e+00> : vector<32x81xf32>
    %24 = tpu.matmul %21, %23, %cst_29 {dimension_numbers = #tpu.dot_dimension_numbers<[1], [0], [0], [1], [0, 0, 1, 1], [], []>} : vector<32x16xbf16>, vector<16x81xbf16>, vector<32x81xf32> -> vector<32x81xf32>
    %25 = arith.addf %19, %24 : vector<32x81xf32>
    %c4 = arith.constant 4 : index
    %c0_30 = arith.constant 0 : index
    %c0_31 = arith.constant 0 : index
    %26 = vector.load %arg3[%c4, %c0_30, %c0_31] : memref<9x32x16xbf16, #tpu.memory_space<vmem>>, vector<1x32x16xbf16>
    %27 = vector.shape_cast %26 : vector<1x32x16xbf16> to vector<32x16xbf16>
    %c0_32 = arith.constant 0 : index
    %c3_33 = arith.constant 3 : index
    %c0_34 = arith.constant 0 : index
    %c0_35 = arith.constant 0 : index
    %28 = vector.load %arg1[%c0_32, %c3_33, %c0_34, %c0_35] : memref<1x4x16x91xbf16, #tpu.memory_space<vmem>>, vector<1x1x16x81xbf16>
    %29 = vector.shape_cast %28 : vector<1x1x16x81xbf16> to vector<16x81xbf16>
    %cst_36 = arith.constant dense<0.000000e+00> : vector<32x81xf32>
    %30 = tpu.matmul %27, %29, %cst_36 {dimension_numbers = #tpu.dot_dimension_numbers<[1], [0], [0], [1], [0, 0, 1, 1], [], []>} : vector<32x16xbf16>, vector<16x81xbf16>, vector<32x81xf32> -> vector<32x81xf32>
    %31 = arith.addf %25, %30 : vector<32x81xf32>
    %c5 = arith.constant 5 : index
    %c0_37 = arith.constant 0 : index
    %c0_38 = arith.constant 0 : index
    %32 = vector.load %arg3[%c5, %c0_37, %c0_38] : memref<9x32x16xbf16, #tpu.memory_space<vmem>>, vector<1x32x16xbf16>
    %33 = vector.shape_cast %32 : vector<1x32x16xbf16> to vector<32x16xbf16>
    %c0_39 = arith.constant 0 : index
    %c2_40 = arith.constant 2 : index
    %c0_41 = arith.constant 0 : index
    %c1_42 = arith.constant 1 : index
    %34 = vector.load %arg1[%c0_39, %c2_40, %c0_41, %c1_42] : memref<1x4x16x91xbf16, #tpu.memory_space<vmem>>, vector<1x1x16x81xbf16>
    %35 = vector.shape_cast %34 : vector<1x1x16x81xbf16> to vector<16x81xbf16>
    %cst_43 = arith.constant dense<0.000000e+00> : vector<32x81xf32>
    %36 = tpu.matmul %33, %35, %cst_43 {dimension_numbers = #tpu.dot_dimension_numbers<[1], [0], [0], [1], [0, 0, 1, 1], [], []>} : vector<32x16xbf16>, vector<16x81xbf16>, vector<32x81xf32> -> vector<32x81xf32>
    %37 = arith.addf %31, %36 : vector<32x81xf32>
    %c6 = arith.constant 6 : index
    %c0_44 = arith.constant 0 : index
    %c0_45 = arith.constant 0 : index
    %38 = vector.load %arg3[%c6, %c0_44, %c0_45] : memref<9x32x16xbf16, #tpu.memory_space<vmem>>, vector<1x32x16xbf16>
    %39 = vector.shape_cast %38 : vector<1x32x16xbf16> to vector<32x16xbf16>
    %c0_46 = arith.constant 0 : index
    %c0_47 = arith.constant 0 : index
    %c0_48 = arith.constant 0 : index
    %c9 = arith.constant 9 : index
    %40 = vector.load %arg1[%c0_46, %c0_47, %c0_48, %c9] : memref<1x4x16x91xbf16, #tpu.memory_space<vmem>>, vector<1x1x16x81xbf16>
    %41 = vector.shape_cast %40 : vector<1x1x16x81xbf16> to vector<16x81xbf16>
    %cst_49 = arith.constant dense<0.000000e+00> : vector<32x81xf32>
    %42 = tpu.matmul %39, %41, %cst_49 {dimension_numbers = #tpu.dot_dimension_numbers<[1], [0], [0], [1], [0, 0, 1, 1], [], []>} : vector<32x16xbf16>, vector<16x81xbf16>, vector<32x81xf32> -> vector<32x81xf32>
    %43 = arith.addf %37, %42 : vector<32x81xf32>
    %c7 = arith.constant 7 : index
    %c0_50 = arith.constant 0 : index
    %c0_51 = arith.constant 0 : index
    %44 = vector.load %arg3[%c7, %c0_50, %c0_51] : memref<9x32x16xbf16, #tpu.memory_space<vmem>>, vector<1x32x16xbf16>
    %45 = vector.shape_cast %44 : vector<1x32x16xbf16> to vector<32x16xbf16>
    %c0_52 = arith.constant 0 : index
    %c1_53 = arith.constant 1 : index
    %c0_54 = arith.constant 0 : index
    %c9_55 = arith.constant 9 : index
    %46 = vector.load %arg1[%c0_52, %c1_53, %c0_54, %c9_55] : memref<1x4x16x91xbf16, #tpu.memory_space<vmem>>, vector<1x1x16x81xbf16>
    %47 = vector.shape_cast %46 : vector<1x1x16x81xbf16> to vector<16x81xbf16>
    %cst_56 = arith.constant dense<0.000000e+00> : vector<32x81xf32>
    %48 = tpu.matmul %45, %47, %cst_56 {dimension_numbers = #tpu.dot_dimension_numbers<[1], [0], [0], [1], [0, 0, 1, 1], [], []>} : vector<32x16xbf16>, vector<16x81xbf16>, vector<32x81xf32> -> vector<32x81xf32>
    %49 = arith.addf %43, %48 : vector<32x81xf32>
    %c8 = arith.constant 8 : index
    %c0_57 = arith.constant 0 : index
    %c0_58 = arith.constant 0 : index
    %50 = vector.load %arg3[%c8, %c0_57, %c0_58] : memref<9x32x16xbf16, #tpu.memory_space<vmem>>, vector<1x32x16xbf16>
    %51 = vector.shape_cast %50 : vector<1x32x16xbf16> to vector<32x16xbf16>
    %c0_59 = arith.constant 0 : index
    %c0_60 = arith.constant 0 : index
    %c0_61 = arith.constant 0 : index
    %c10 = arith.constant 10 : index
    %52 = vector.load %arg1[%c0_59, %c0_60, %c0_61, %c10] : memref<1x4x16x91xbf16, #tpu.memory_space<vmem>>, vector<1x1x16x81xbf16>
    %53 = vector.shape_cast %52 : vector<1x1x16x81xbf16> to vector<16x81xbf16>
    %cst_62 = arith.constant dense<0.000000e+00> : vector<32x81xf32>
    %54 = tpu.matmul %51, %53, %cst_62 {dimension_numbers = #tpu.dot_dimension_numbers<[1], [0], [0], [1], [0, 0, 1, 1], [], []>} : vector<32x16xbf16>, vector<16x81xbf16>, vector<32x81xf32> -> vector<32x81xf32>
    %55 = arith.addf %49, %54 : vector<32x81xf32>
    %c0_63 = arith.constant 0 : index
    %c0_64 = arith.constant 0 : index
    %56 = vector.load %arg4[%c0_63, %c0_64] : memref<32x1xf32, #tpu.memory_space<vmem>>, vector<32x1xf32>
    %57 = vector.broadcast %56 : vector<32x1xf32> to vector<32x81xf32>
    %58 = arith.addf %55, %57 : vector<32x81xf32>
    %cst_65 = arith.constant 0.000000e+00 : f32
    %59 = vector.broadcast %cst_65 : f32 to vector<32x81xf32>
    %60 = arith.cmpf oge, %58, %59 : vector<32x81xf32>
    %cst_66 = arith.constant 0.00999999977 : f32
    %61 = vector.broadcast %cst_66 : f32 to vector<32x81xf32>
    %62 = arith.mulf %61, %58 : vector<32x81xf32>
    %63 = arith.select %60, %58, %62 : vector<32x81xi1>, vector<32x81xf32>
    %64 = arith.truncf %63 : vector<32x81xf32> to vector<32x81xbf16>
    %c0_67 = arith.constant 0 : index
    %c0_68 = arith.constant 0 : index
    %65 = vector.load %arg12[%c0_67, %c0_68] : memref<32x81xbf16, #tpu.memory_space<vmem>>, vector<32x81xbf16>
    tpu.vector_store %arg12[%c0_67, %c0_68], %64 {strides = array<i32>} : memref<32x81xbf16, #tpu.memory_space<vmem>>, vector<32x81xbf16>,
    %c0_69 = arith.constant 0 : index
    %c0_70 = arith.constant 0 : index
    %66 = vector.load %arg9[%c0_69, %c0_70] : memref<32x16xbf16, #tpu.memory_space<vmem>>, vector<32x16xbf16>
    %c0_71 = arith.constant 0 : index
    %c3_72 = arith.constant 3 : index
    %c0_73 = arith.constant 0 : index
    %c0_74 = arith.constant 0 : index
    %67 = vector.load %arg1[%c0_71, %c3_72, %c0_73, %c0_74] : memref<1x4x16x91xbf16, #tpu.memory_space<vmem>>, vector<1x1x16x81xbf16>
    %68 = vector.shape_cast %67 : vector<1x1x16x81xbf16> to vector<16x81xbf16>
    %cst_75 = arith.constant dense<0.000000e+00> : vector<32x81xf32>
    %69 = tpu.matmul %66, %68, %cst_75 {dimension_numbers = #tpu.dot_dimension_numbers<[1], [0], [0], [1], [0, 0, 1, 1], [], []>} : vector<32x16xbf16>, vector<16x81xbf16>, vector<32x81xf32> -> vector<32x81xf32>
    %c0_76 = arith.constant 0 : index
    %c0_77 = arith.constant 0 : index
    %70 = vector.load %arg10[%c0_76, %c0_77] : memref<32x1xf32, #tpu.memory_space<vmem>>, vector<32x1xf32>
    %71 = vector.broadcast %70 : vector<32x1xf32> to vector<32x81xf32>
    %72 = arith.addf %69, %71 : vector<32x81xf32>
    %c0_78 = arith.constant 0 : index
    %c0_79 = arith.constant 0 : index
    %73 = vector.load %arg13[%c0_78, %c0_79] : memref<32x81xf32, #tpu.memory_space<vmem>>, vector<32x81xf32>
    tpu.vector_store %arg13[%c0_78, %c0_79], %72 {strides = array<i32>} : memref<32x81xf32, #tpu.memory_space<vmem>>, vector<32x81xf32>,
    %cst_80 = arith.constant 0.000000e+00 : bf16
    %74 = vector.broadcast %cst_80 : bf16 to vector<32x122xbf16>
    %c0_81 = arith.constant 0 : index
    %c0_82 = arith.constant 0 : index
    %75 = vector.load %arg14[%c0_81, %c0_82] : memref<32x122xbf16, #tpu.memory_space<vmem>>, vector<32x122xbf16>
    tpu.vector_store %arg14[%c0_81, %c0_82], %74 {strides = array<i32>} : memref<32x122xbf16, #tpu.memory_space<vmem>>, vector<32x122xbf16>,
    %cst_83 = arith.constant 0.000000e+00 : f32
    %76 = vector.broadcast %cst_83 : f32 to vector<32x100xf32>
    %c0_84 = arith.constant 0 : index
    %c0_85 = arith.constant 0 : index
    %77 = vector.load %arg15[%c0_84, %c0_85] : memref<32x100xf32, #tpu.memory_space<vmem>>, vector<32x100xf32>
    tpu.vector_store %arg15[%c0_84, %c0_85], %76 {strides = array<i32>} : memref<32x100xf32, #tpu.memory_space<vmem>>, vector<32x100xf32>,
    %c0_86 = arith.constant 0 : index
    %c0_87 = arith.constant 0 : index
    %78 = vector.load %arg12[%c0_86, %c0_87] : memref<32x81xbf16, #tpu.memory_space<vmem>>, vector<32x8xbf16>
    %c0_88 = arith.constant 0 : index
    %c22 = arith.constant 22 : index
    %79 = vector.load %arg14[%c0_88, %c22] : memref<32x122xbf16, #tpu.memory_space<vmem>>, vector<32x8xbf16>
    tpu.vector_store %arg14[%c0_88, %c22], %78 {strides = array<i32>} : memref<32x122xbf16, #tpu.memory_space<vmem>>, vector<32x8xbf16>,
    %c0_89 = arith.constant 0 : index
    %c0_90 = arith.constant 0 : index
    %80 = vector.load %arg13[%c0_89, %c0_90] : memref<32x81xf32, #tpu.memory_space<vmem>>, vector<32x8xf32>
    %c0_91 = arith.constant 0 : index
    %c11 = arith.constant 11 : index
    %81 = vector.load %arg15[%c0_91, %c11] : memref<32x100xf32, #tpu.memory_space<vmem>>, vector<32x8xf32>
    tpu.vector_store %arg15[%c0_91, %c11], %80 {strides = array<i32>} : memref<32x100xf32, #tpu.memory_space<vmem>>, vector<32x8xf32>,
    %c0_92 = arith.constant 0 : index
    %c9_93 = arith.constant 9 : index
    %82 = vector.load %arg12[%c0_92, %c9_93] : memref<32x81xbf16, #tpu.memory_space<vmem>>, vector<32x8xbf16>
    %c0_94 = arith.constant 0 : index
    %c32 = arith.constant 32 : index
    %83 = vector.load %arg14[%c0_94, %c32] : memref<32x122xbf16, #tpu.memory_space<vmem>>, vector<32x8xbf16>
    tpu.vector_store %arg14[%c0_94, %c32], %82 {strides = array<i32>} : memref<32x122xbf16, #tpu.memory_space<vmem>>, vector<32x8xbf16>,
    %c0_95 = arith.constant 0 : index
    %c9_96 = arith.constant 9 : index
    %84 = vector.load %arg13[%c0_95, %c9_96] : memref<32x81xf32, #tpu.memory_space<vmem>>, vector<32x8xf32>
    %c0_97 = arith.constant 0 : index
    %c21 = arith.constant 21 : index
    %85 = vector.load %arg15[%c0_97, %c21] : memref<32x100xf32, #tpu.memory_space<vmem>>, vector<32x8xf32>
    tpu.vector_store %arg15[%c0_97, %c21], %84 {strides = array<i32>} : memref<32x100xf32, #tpu.memory_space<vmem>>, vector<32x8xf32>,
    %c0_98 = arith.constant 0 : index
    %c18 = arith.constant 18 : index
    %86 = vector.load %arg12[%c0_98, %c18] : memref<32x81xbf16, #tpu.memory_space<vmem>>, vector<32x8xbf16>
    %c0_99 = arith.constant 0 : index
    %c42 = arith.constant 42 : index
    %87 = vector.load %arg14[%c0_99, %c42] : memref<32x122xbf16, #tpu.memory_space<vmem>>, vector<32x8xbf16>
    tpu.vector_store %arg14[%c0_99, %c42], %86 {strides = array<i32>} : memref<32x122xbf16, #tpu.memory_space<vmem>>, vector<32x8xbf16>,
    %c0_100 = arith.constant 0 : index
    %c18_101 = arith.constant 18 : index
    %88 = vector.load %arg13[%c0_100, %c18_101] : memref<32x81xf32, #tpu.memory_space<vmem>>, vector<32x8xf32>
    %c0_102 = arith.constant 0 : index
    %c31 = arith.constant 31 : index
    %89 = vector.load %arg15[%c0_102, %c31] : memref<32x100xf32, #tpu.memory_space<vmem>>, vector<32x8xf32>
    tpu.vector_store %arg15[%c0_102, %c31], %88 {strides = array<i32>} : memref<32x100xf32, #tpu.memory_space<vmem>>, vector<32x8xf32>,
    %c0_103 = arith.constant 0 : index
    %c27 = arith.constant 27 : index
    %90 = vector.load %arg12[%c0_103, %c27] : memref<32x81xbf16, #tpu.memory_space<vmem>>, vector<32x8xbf16>
    %c0_104 = arith.constant 0 : index
    %c52 = arith.constant 52 : index
    %91 = vector.load %arg14[%c0_104, %c52] : memref<32x122xbf16, #tpu.memory_space<vmem>>, vector<32x8xbf16>
    tpu.vector_store %arg14[%c0_104, %c52], %90 {strides = array<i32>} : memref<32x122xbf16, #tpu.memory_space<vmem>>, vector<32x8xbf16>,
    %c0_105 = arith.constant 0 : index
    %c27_106 = arith.constant 27 : index
    %92 = vector.load %arg13[%c0_105, %c27_106] : memref<32x81xf32, #tpu.memory_space<vmem>>, vector<32x8xf32>
    %c0_107 = arith.constant 0 : index
    %c41 = arith.constant 41 : index
    %93 = vector.load %arg15[%c0_107, %c41] : memref<32x100xf32, #tpu.memory_space<vmem>>, vector<32x8xf32>
    tpu.vector_store %arg15[%c0_107, %c41], %92 {strides = array<i32>} : memref<32x100xf32, #tpu.memory_space<vmem>>, vector<32x8xf32>,
    %c0_108 = arith.constant 0 : index
    %c36 = arith.constant 36 : index
    %94 = vector.load %arg12[%c0_108, %c36] : memref<32x81xbf16, #tpu.memory_space<vmem>>, vector<32x8xbf16>
    %c0_109 = arith.constant 0 : index
    %c62 = arith.constant 62 : index
    %95 = vector.load %arg14[%c0_109, %c62] : memref<32x122xbf16, #tpu.memory_space<vmem>>, vector<32x8xbf16>
    tpu.vector_store %arg14[%c0_109, %c62], %94 {strides = array<i32>} : memref<32x122xbf16, #tpu.memory_space<vmem>>, vector<32x8xbf16>,
    %c0_110 = arith.constant 0 : index
    %c36_111 = arith.constant 36 : index
    %96 = vector.load %arg13[%c0_110, %c36_111] : memref<32x81xf32, #tpu.memory_space<vmem>>, vector<32x8xf32>
    %c0_112 = arith.constant 0 : index
    %c51 = arith.constant 51 : index
    %97 = vector.load %arg15[%c0_112, %c51] : memref<32x100xf32, #tpu.memory_space<vmem>>, vector<32x8xf32>
    tpu.vector_store %arg15[%c0_112, %c51], %96 {strides = array<i32>} : memref<32x100xf32, #tpu.memory_space<vmem>>, vector<32x8xf32>,
    %c0_113 = arith.constant 0 : index
    %c45 = arith.constant 45 : index
    %98 = vector.load %arg12[%c0_113, %c45] : memref<32x81xbf16, #tpu.memory_space<vmem>>, vector<32x8xbf16>
    %c0_114 = arith.constant 0 : index
    %c72 = arith.constant 72 : index
    %99 = vector.load %arg14[%c0_114, %c72] : memref<32x122xbf16, #tpu.memory_space<vmem>>, vector<32x8xbf16>
    tpu.vector_store %arg14[%c0_114, %c72], %98 {strides = array<i32>} : memref<32x122xbf16, #tpu.memory_space<vmem>>, vector<32x8xbf16>,
    %c0_115 = arith.constant 0 : index
    %c45_116 = arith.constant 45 : index
    %100 = vector.load %arg13[%c0_115, %c45_116] : memref<32x81xf32, #tpu.memory_space<vmem>>, vector<32x8xf32>
    %c0_117 = arith.constant 0 : index
    %c61 = arith.constant 61 : index
    %101 = vector.load %arg15[%c0_117, %c61] : memref<32x100xf32, #tpu.memory_space<vmem>>, vector<32x8xf32>
    tpu.vector_store %arg15[%c0_117, %c61], %100 {strides = array<i32>} : memref<32x100xf32, #tpu.memory_space<vmem>>, vector<32x8xf32>,
    %c0_118 = arith.constant 0 : index
    %c54 = arith.constant 54 : index
    %102 = vector.load %arg12[%c0_118, %c54] : memref<32x81xbf16, #tpu.memory_space<vmem>>, vector<32x8xbf16>
    %c0_119 = arith.constant 0 : index
    %c82 = arith.constant 82 : index
    %103 = vector.load %arg14[%c0_119, %c82] : memref<32x122xbf16, #tpu.memory_space<vmem>>, vector<32x8xbf16>
    tpu.vector_store %arg14[%c0_119, %c82], %102 {strides = array<i32>} : memref<32x122xbf16, #tpu.memory_space<vmem>>, vector<32x8xbf16>,
    %c0_120 = arith.constant 0 : index
    %c54_121 = arith.constant 54 : index
    %104 = vector.load %arg13[%c0_120, %c54_121] : memref<32x81xf32, #tpu.memory_space<vmem>>, vector<32x8xf32>
    %c0_122 = arith.constant 0 : index
    %c71 = arith.constant 71 : index
    %105 = vector.load %arg15[%c0_122, %c71] : memref<32x100xf32, #tpu.memory_space<vmem>>, vector<32x8xf32>
    tpu.vector_store %arg15[%c0_122, %c71], %104 {strides = array<i32>} : memref<32x100xf32, #tpu.memory_space<vmem>>, vector<32x8xf32>,
    %c0_123 = arith.constant 0 : index
    %c63 = arith.constant 63 : index
    %106 = vector.load %arg12[%c0_123, %c63] : memref<32x81xbf16, #tpu.memory_space<vmem>>, vector<32x8xbf16>
    %c0_124 = arith.constant 0 : index
    %c92 = arith.constant 92 : index
    %107 = vector.load %arg14[%c0_124, %c92] : memref<32x122xbf16, #tpu.memory_space<vmem>>, vector<32x8xbf16>
    tpu.vector_store %arg14[%c0_124, %c92], %106 {strides = array<i32>} : memref<32x122xbf16, #tpu.memory_space<vmem>>, vector<32x8xbf16>,
    %c0_125 = arith.constant 0 : index
    %c63_126 = arith.constant 63 : index
    %108 = vector.load %arg13[%c0_125, %c63_126] : memref<32x81xf32, #tpu.memory_space<vmem>>, vector<32x8xf32>
    %c0_127 = arith.constant 0 : index
    %c81 = arith.constant 81 : index
    %109 = vector.load %arg15[%c0_127, %c81] : memref<32x100xf32, #tpu.memory_space<vmem>>, vector<32x8xf32>
    tpu.vector_store %arg15[%c0_127, %c81], %108 {strides = array<i32>} : memref<32x100xf32, #tpu.memory_space<vmem>>, vector<32x8xf32>,
    %cst_128 = arith.constant 0.000000e+00 : f32
    %110 = vector.broadcast %cst_128 : f32 to vector<32x100xf32>
    %c0_129 = arith.constant 0 : index
    %c0_130 = arith.constant 0 : index
    %c0_131 = arith.constant 0 : index
    %111 = vector.load %arg5[%c0_129, %c0_130, %c0_131] : memref<9x32x32xbf16, #tpu.memory_space<vmem>>, vector<1x32x32xbf16>
    %112 = vector.shape_cast %111 : vector<1x32x32xbf16> to vector<32x32xbf16>
    %c0_132 = arith.constant 0 : index
    %c0_133 = arith.constant 0 : index
    %113 = vector.load %arg14[%c0_132, %c0_133] : memref<32x122xbf16, #tpu.memory_space<vmem>>, vector<32x100xbf16>
    %cst_134 = arith.constant dense<0.000000e+00> : vector<32x100xf32>
    %114 = tpu.matmul %112, %113, %cst_134 {dimension_numbers = #tpu.dot_dimension_numbers<[1], [0], [0], [1], [0, 0, 1, 1], [], []>} : vector<32x32xbf16>, vector<32x100xbf16>, vector<32x100xf32> -> vector<32x100xf32>
    %115 = arith.addf %110, %114 : vector<32x100xf32>
    %c1_135 = arith.constant 1 : index
    %c0_136 = arith.constant 0 : index
    %c0_137 = arith.constant 0 : index
    %116 = vector.load %arg5[%c1_135, %c0_136, %c0_137] : memref<9x32x32xbf16, #tpu.memory_space<vmem>>, vector<1x32x32xbf16>
    %117 = vector.shape_cast %116 : vector<1x32x32xbf16> to vector<32x32xbf16>
    %c0_138 = arith.constant 0 : index
    %c1_139 = arith.constant 1 : index
    %118 = vector.load %arg14[%c0_138, %c1_139] : memref<32x122xbf16, #tpu.memory_space<vmem>>, vector<32x100xbf16>
    %cst_140 = arith.constant dense<0.000000e+00> : vector<32x100xf32>
    %119 = tpu.matmul %117, %118, %cst_140 {dimension_numbers = #tpu.dot_dimension_numbers<[1], [0], [0], [1], [0, 0, 1, 1], [], []>} : vector<32x32xbf16>, vector<32x100xbf16>, vector<32x100xf32> -> vector<32x100xf32>
    %120 = arith.addf %115, %119 : vector<32x100xf32>
    %c2_141 = arith.constant 2 : index
    %c0_142 = arith.constant 0 : index
    %c0_143 = arith.constant 0 : index
    %121 = vector.load %arg5[%c2_141, %c0_142, %c0_143] : memref<9x32x32xbf16, #tpu.memory_space<vmem>>, vector<1x32x32xbf16>
    %122 = vector.shape_cast %121 : vector<1x32x32xbf16> to vector<32x32xbf16>
    %c0_144 = arith.constant 0 : index
    %c2_145 = arith.constant 2 : index
    %123 = vector.load %arg14[%c0_144, %c2_145] : memref<32x122xbf16, #tpu.memory_space<vmem>>, vector<32x100xbf16>
    %cst_146 = arith.constant dense<0.000000e+00> : vector<32x100xf32>
    %124 = tpu.matmul %122, %123, %cst_146 {dimension_numbers = #tpu.dot_dimension_numbers<[1], [0], [0], [1], [0, 0, 1, 1], [], []>} : vector<32x32xbf16>, vector<32x100xbf16>, vector<32x100xf32> -> vector<32x100xf32>
    %125 = arith.addf %120, %124 : vector<32x100xf32>
    %c3_147 = arith.constant 3 : index
    %c0_148 = arith.constant 0 : index
    %c0_149 = arith.constant 0 : index
    %126 = vector.load %arg5[%c3_147, %c0_148, %c0_149] : memref<9x32x32xbf16, #tpu.memory_space<vmem>>, vector<1x32x32xbf16>
    %127 = vector.shape_cast %126 : vector<1x32x32xbf16> to vector<32x32xbf16>
    %c0_150 = arith.constant 0 : index
    %c10_151 = arith.constant 10 : index
    %128 = vector.load %arg14[%c0_150, %c10_151] : memref<32x122xbf16, #tpu.memory_space<vmem>>, vector<32x100xbf16>
    %cst_152 = arith.constant dense<0.000000e+00> : vector<32x100xf32>
    %129 = tpu.matmul %127, %128, %cst_152 {dimension_numbers = #tpu.dot_dimension_numbers<[1], [0], [0], [1], [0, 0, 1, 1], [], []>} : vector<32x32xbf16>, vector<32x100xbf16>, vector<32x100xf32> -> vector<32x100xf32>
    %130 = arith.addf %125, %129 : vector<32x100xf32>
    %c4_153 = arith.constant 4 : index
    %c0_154 = arith.constant 0 : index
    %c0_155 = arith.constant 0 : index
    %131 = vector.load %arg5[%c4_153, %c0_154, %c0_155] : memref<9x32x32xbf16, #tpu.memory_space<vmem>>, vector<1x32x32xbf16>
    %132 = vector.shape_cast %131 : vector<1x32x32xbf16> to vector<32x32xbf16>
    %c0_156 = arith.constant 0 : index
    %c11_157 = arith.constant 11 : index
    %133 = vector.load %arg14[%c0_156, %c11_157] : memref<32x122xbf16, #tpu.memory_space<vmem>>, vector<32x100xbf16>
    %cst_158 = arith.constant dense<0.000000e+00> : vector<32x100xf32>
    %134 = tpu.matmul %132, %133, %cst_158 {dimension_numbers = #tpu.dot_dimension_numbers<[1], [0], [0], [1], [0, 0, 1, 1], [], []>} : vector<32x32xbf16>, vector<32x100xbf16>, vector<32x100xf32> -> vector<32x100xf32>
    %135 = arith.addf %130, %134 : vector<32x100xf32>
    %c5_159 = arith.constant 5 : index
    %c0_160 = arith.constant 0 : index
    %c0_161 = arith.constant 0 : index
    %136 = vector.load %arg5[%c5_159, %c0_160, %c0_161] : memref<9x32x32xbf16, #tpu.memory_space<vmem>>, vector<1x32x32xbf16>
    %137 = vector.shape_cast %136 : vector<1x32x32xbf16> to vector<32x32xbf16>
    %c0_162 = arith.constant 0 : index
    %c12 = arith.constant 12 : index
    %138 = vector.load %arg14[%c0_162, %c12] : memref<32x122xbf16, #tpu.memory_space<vmem>>, vector<32x100xbf16>
    %cst_163 = arith.constant dense<0.000000e+00> : vector<32x100xf32>
    %139 = tpu.matmul %137, %138, %cst_163 {dimension_numbers = #tpu.dot_dimension_numbers<[1], [0], [0], [1], [0, 0, 1, 1], [], []>} : vector<32x32xbf16>, vector<32x100xbf16>, vector<32x100xf32> -> vector<32x100xf32>
    %140 = arith.addf %135, %139 : vector<32x100xf32>
    %c6_164 = arith.constant 6 : index
    %c0_165 = arith.constant 0 : index
    %c0_166 = arith.constant 0 : index
    %141 = vector.load %arg5[%c6_164, %c0_165, %c0_166] : memref<9x32x32xbf16, #tpu.memory_space<vmem>>, vector<1x32x32xbf16>
    %142 = vector.shape_cast %141 : vector<1x32x32xbf16> to vector<32x32xbf16>
    %c0_167 = arith.constant 0 : index
    %c20 = arith.constant 20 : index
    %143 = vector.load %arg14[%c0_167, %c20] : memref<32x122xbf16, #tpu.memory_space<vmem>>, vector<32x100xbf16>
    %cst_168 = arith.constant dense<0.000000e+00> : vector<32x100xf32>
    %144 = tpu.matmul %142, %143, %cst_168 {dimension_numbers = #tpu.dot_dimension_numbers<[1], [0], [0], [1], [0, 0, 1, 1], [], []>} : vector<32x32xbf16>, vector<32x100xbf16>, vector<32x100xf32> -> vector<32x100xf32>
    %145 = arith.addf %140, %144 : vector<32x100xf32>
    %c7_169 = arith.constant 7 : index
    %c0_170 = arith.constant 0 : index
    %c0_171 = arith.constant 0 : index
    %146 = vector.load %arg5[%c7_169, %c0_170, %c0_171] : memref<9x32x32xbf16, #tpu.memory_space<vmem>>, vector<1x32x32xbf16>
    %147 = vector.shape_cast %146 : vector<1x32x32xbf16> to vector<32x32xbf16>
    %c0_172 = arith.constant 0 : index
    %c21_173 = arith.constant 21 : index
    %148 = vector.load %arg14[%c0_172, %c21_173] : memref<32x122xbf16, #tpu.memory_space<vmem>>, vector<32x100xbf16>
    %cst_174 = arith.constant dense<0.000000e+00> : vector<32x100xf32>
    %149 = tpu.matmul %147, %148, %cst_174 {dimension_numbers = #tpu.dot_dimension_numbers<[1], [0], [0], [1], [0, 0, 1, 1], [], []>} : vector<32x32xbf16>, vector<32x100xbf16>, vector<32x100xf32> -> vector<32x100xf32>
    %150 = arith.addf %145, %149 : vector<32x100xf32>
    %c8_175 = arith.constant 8 : index
    %c0_176 = arith.constant 0 : index
    %c0_177 = arith.constant 0 : index
    %151 = vector.load %arg5[%c8_175, %c0_176, %c0_177] : memref<9x32x32xbf16, #tpu.memory_space<vmem>>, vector<1x32x32xbf16>
    %152 = vector.shape_cast %151 : vector<1x32x32xbf16> to vector<32x32xbf16>
    %c0_178 = arith.constant 0 : index
    %c22_179 = arith.constant 22 : index
    %153 = vector.load %arg14[%c0_178, %c22_179] : memref<32x122xbf16, #tpu.memory_space<vmem>>, vector<32x100xbf16>
    %cst_180 = arith.constant dense<0.000000e+00> : vector<32x100xf32>
    %154 = tpu.matmul %152, %153, %cst_180 {dimension_numbers = #tpu.dot_dimension_numbers<[1], [0], [0], [1], [0, 0, 1, 1], [], []>} : vector<32x32xbf16>, vector<32x100xbf16>, vector<32x100xf32> -> vector<32x100xf32>
    %155 = arith.addf %150, %154 : vector<32x100xf32>
    %c0_181 = arith.constant 0 : index
    %c0_182 = arith.constant 0 : index
    %156 = vector.load %arg6[%c0_181, %c0_182] : memref<32x1xf32, #tpu.memory_space<vmem>>, vector<32x1xf32>
    %157 = vector.broadcast %156 : vector<32x1xf32> to vector<32x100xf32>
    %158 = arith.addf %155, %157 : vector<32x100xf32>
    %159 = vector.broadcast %0 : vector<1x100xf32> to vector<32x100xf32>
    %160 = arith.mulf %158, %159 : vector<32x100xf32>
    %c0_183 = arith.constant 0 : index
    %c0_184 = arith.constant 0 : index
    %161 = vector.load %arg7[%c0_183, %c0_184] : memref<32x32xf32, #tpu.memory_space<vmem>>, vector<32x32xf32>
    %162 = arith.mulf %160, %160 : vector<32x100xf32>
    %cst_185 = arith.constant dense<0.000000e+00> : vector<32x100xf32>
    %163 = tpu.matmul %161, %162, %cst_185 {dimension_numbers = #tpu.dot_dimension_numbers<[1], [0], [0], [1], [0, 0, 1, 1], [], []>} : vector<32x32xf32>, vector<32x100xf32>, vector<32x100xf32> -> vector<32x100xf32>
    %c0_186 = arith.constant 0 : index
    %c0_187 = arith.constant 0 : index
    %164 = vector.load %arg8[%c0_186, %c0_187] : memref<32x1xf32, #tpu.memory_space<vmem>>, vector<32x1xf32>
    %165 = vector.broadcast %164 : vector<32x1xf32> to vector<32x100xf32>
    %166 = arith.addf %163, %165 : vector<32x100xf32>
    %167 = math.rsqrt %166 : vector<32x100xf32>
    %168 = arith.mulf %160, %167 : vector<32x100xf32>
    %c0_188 = arith.constant 0 : index
    %c0_189 = arith.constant 0 : index
    %169 = vector.load %arg15[%c0_188, %c0_189] : memref<32x100xf32, #tpu.memory_space<vmem>>, vector<32x100xf32>
    %170 = arith.addf %168, %169 : vector<32x100xf32>
    %171 = arith.truncf %170 : vector<32x100xf32> to vector<32x100xbf16>
    %c0_190 = arith.constant 0 : index
    %c0_191 = arith.constant 0 : index
    %c0_192 = arith.constant 0 : index
    %172 = vector.load %arg11[%c0_190, %c0_191, %c0_192] : memref<1x32x100xbf16, #tpu.memory_space<vmem>>, vector<1x32x100xbf16>
    %173 = vector.shape_cast %172 : vector<1x32x100xbf16> to vector<32x100xbf16>
    %174 = vector.shape_cast %171 : vector<32x100xbf16> to vector<1x32x100xbf16>
    tpu.vector_store %arg11[%c0_190, %c0_191, %c0_192], %174 {strides = array<i32>} : memref<1x32x100xbf16, #tpu.memory_space<vmem>>, vector<1x32x100xbf16>,
    return
  }
  func.func @transform_0(%arg0: i32) -> (i32, i32, i32, i32) {
    %c0_i32 = arith.constant 0 : i32
    %c0_i32_0 = arith.constant 0 : i32
    %c0_i32_1 = arith.constant 0 : i32
    %c0_i32_2 = arith.constant 0 : i32
    return %arg0, %c0_i32, %c0_i32_0, %c0_i32_1 : i32, i32, i32, i32
  }
  func.func @transform_1(%arg0: i32) -> (i32, i32) {
    %c0_i32 = arith.constant 0 : i32
    %c0_i32_0 = arith.constant 0 : i32
    %c0_i32_1 = arith.constant 0 : i32
    return %c0_i32, %c0_i32_0 : i32, i32
  }
  func.func @transform_2(%arg0: i32) -> (i32, i32, i32) {
    %c0_i32 = arith.constant 0 : i32
    %c0_i32_0 = arith.constant 0 : i32
    %c0_i32_1 = arith.constant 0 : i32
    %c0_i32_2 = arith.constant 0 : i32
    return %c0_i32, %c0_i32_0, %c0_i32_1 : i32, i32, i32
  }
  func.func @transform_3(%arg0: i32) -> (i32, i32) {
    %c0_i32 = arith.constant 0 : i32
    %c0_i32_0 = arith.constant 0 : i32
    %c0_i32_1 = arith.constant 0 : i32
    return %c0_i32, %c0_i32_0 : i32, i32
  }
  func.func @transform_4(%arg0: i32) -> (i32, i32, i32) {
    %c0_i32 = arith.constant 0 : i32
    %c0_i32_0 = arith.constant 0 : i32
    %c0_i32_1 = arith.constant 0 : i32
    %c0_i32_2 = arith.constant 0 : i32
    return %c0_i32, %c0_i32_0, %c0_i32_1 : i32, i32, i32
  }
  func.func @transform_5(%arg0: i32) -> (i32, i32) {
    %c0_i32 = arith.constant 0 : i32
    %c0_i32_0 = arith.constant 0 : i32
    %c0_i32_1 = arith.constant 0 : i32
    return %c0_i32, %c0_i32_0 : i32, i32
  }
  func.func @transform_6(%arg0: i32) -> (i32, i32) {
    %c0_i32 = arith.constant 0 : i32
    %c0_i32_0 = arith.constant 0 : i32
    %c0_i32_1 = arith.constant 0 : i32
    return %c0_i32, %c0_i32_0 : i32, i32
  }
  func.func @transform_7(%arg0: i32) -> (i32, i32) {
    %c0_i32 = arith.constant 0 : i32
    %c0_i32_0 = arith.constant 0 : i32
    %c0_i32_1 = arith.constant 0 : i32
    return %c0_i32, %c0_i32_0 : i32, i32
  }
  func.func @transform_8(%arg0: i32) -> (i32, i32) {
    %c0_i32 = arith.constant 0 : i32
    %c0_i32_0 = arith.constant 0 : i32
    %c0_i32_1 = arith.constant 0 : i32
    return %c0_i32, %c0_i32_0 : i32, i32
  }
  func.func @transform_9(%arg0: i32) -> (i32, i32) {
    %c0_i32 = arith.constant 0 : i32
    %c0_i32_0 = arith.constant 0 : i32
    %c0_i32_1 = arith.constant 0 : i32
    return %c0_i32, %c0_i32_0 : i32, i32
  }
  func.func @transform_10(%arg0: i32) -> (i32, i32, i32) {
    %c0_i32 = arith.constant 0 : i32
    %c0_i32_0 = arith.constant 0 : i32
    %c0_i32_1 = arith.constant 0 : i32
    return %arg0, %c0_i32, %c0_i32_0 : i32, i32, i32
  }
}

module attributes {stable_mosaic.version = 11 : i64} {
  func.func @kernel(%arg0: i32, %arg1: memref<1x4x32x31xbf16, #tpu.memory_space<vmem>>, %arg2: memref<1x36xf32, #tpu.memory_space<vmem>>, %arg3: memref<9x32x32xbf16, #tpu.memory_space<vmem>>, %arg4: memref<32x1xf32, #tpu.memory_space<vmem>>, %arg5: memref<9x32x32xbf16, #tpu.memory_space<vmem>>, %arg6: memref<32x1xf32, #tpu.memory_space<vmem>>, %arg7: memref<32x32xf32, #tpu.memory_space<vmem>>, %arg8: memref<32x1xf32, #tpu.memory_space<vmem>>, %arg9: memref<32x32xbf16, #tpu.memory_space<vmem>>, %arg10: memref<32x1xf32, #tpu.memory_space<vmem>>, %arg11: memref<1x32x36xbf16, #tpu.memory_space<vmem>>, %arg12: memref<32x25xbf16, #tpu.memory_space<vmem>>, %arg13: memref<32x25xf32, #tpu.memory_space<vmem>>, %arg14: memref<32x50xbf16, #tpu.memory_space<vmem>>, %arg15: memref<32x36xf32, #tpu.memory_space<vmem>>) attributes {dimension_semantics = [#tpu.dimension_semantics<parallel>], iteration_bounds = array<i64: 2>, scalar_prefetch = 0 : i64, scratch_operands = 4 : i64, tpu.core_type = #tpu.core_type<tc>, window_params = [{transform_indices = @transform_0, window_bounds = array<i64: 1, 4, 32, 31>}, {pipeline_mode = #tpu.pipeline_mode<synchronous>, transform_indices = @transform_1, window_bounds = array<i64: 1, 36>}, {pipeline_mode = #tpu.pipeline_mode<synchronous>, transform_indices = @transform_2, window_bounds = array<i64: 9, 32, 32>}, {pipeline_mode = #tpu.pipeline_mode<synchronous>, transform_indices = @transform_3, window_bounds = array<i64: 32, 1>}, {pipeline_mode = #tpu.pipeline_mode<synchronous>, transform_indices = @transform_4, window_bounds = array<i64: 9, 32, 32>}, {pipeline_mode = #tpu.pipeline_mode<synchronous>, transform_indices = @transform_5, window_bounds = array<i64: 32, 1>}, {pipeline_mode = #tpu.pipeline_mode<synchronous>, transform_indices = @transform_6, window_bounds = array<i64: 32, 32>}, {pipeline_mode = #tpu.pipeline_mode<synchronous>, transform_indices = @transform_7, window_bounds = array<i64: 32, 1>}, {pipeline_mode = #tpu.pipeline_mode<synchronous>, transform_indices = @transform_8, window_bounds = array<i64: 32, 32>}, {pipeline_mode = #tpu.pipeline_mode<synchronous>, transform_indices = @transform_9, window_bounds = array<i64: 32, 1>}, {transform_indices = @transform_10, window_bounds = array<i64: 1, 32, 36>}]} {
    %c0 = arith.constant 0 : index
    %c0_0 = arith.constant 0 : index
    %0 = vector.load %arg2[%c0, %c0_0] : memref<1x36xf32, #tpu.memory_space<vmem>>, vector<1x36xf32>
    %cst = arith.constant 0.000000e+00 : f32
    %1 = vector.broadcast %cst : f32 to vector<32x25xf32>
    %c0_1 = arith.constant 0 : index
    %c0_2 = arith.constant 0 : index
    %c0_3 = arith.constant 0 : index
    %2 = vector.load %arg3[%c0_1, %c0_2, %c0_3] : memref<9x32x32xbf16, #tpu.memory_space<vmem>>, vector<1x32x32xbf16>
    %3 = vector.shape_cast %2 : vector<1x32x32xbf16> to vector<32x32xbf16>
    %c0_4 = arith.constant 0 : index
    %c0_5 = arith.constant 0 : index
    %c0_6 = arith.constant 0 : index
    %c0_7 = arith.constant 0 : index
    %4 = vector.load %arg1[%c0_4, %c0_5, %c0_6, %c0_7] : memref<1x4x32x31xbf16, #tpu.memory_space<vmem>>, vector<1x1x32x25xbf16>
    %5 = vector.shape_cast %4 : vector<1x1x32x25xbf16> to vector<32x25xbf16>
    %cst_8 = arith.constant dense<0.000000e+00> : vector<32x25xf32>
    %6 = tpu.matmul %3, %5, %cst_8 {dimension_numbers = #tpu.dot_dimension_numbers<[1], [0], [0], [1], [0, 0, 1, 1], [], []>} : vector<32x32xbf16>, vector<32x25xbf16>, vector<32x25xf32> -> vector<32x25xf32>
    %7 = arith.addf %1, %6 : vector<32x25xf32>
    %c1 = arith.constant 1 : index
    %c0_9 = arith.constant 0 : index
    %c0_10 = arith.constant 0 : index
    %8 = vector.load %arg3[%c1, %c0_9, %c0_10] : memref<9x32x32xbf16, #tpu.memory_space<vmem>>, vector<1x32x32xbf16>
    %9 = vector.shape_cast %8 : vector<1x32x32xbf16> to vector<32x32xbf16>
    %c0_11 = arith.constant 0 : index
    %c1_12 = arith.constant 1 : index
    %c0_13 = arith.constant 0 : index
    %c0_14 = arith.constant 0 : index
    %10 = vector.load %arg1[%c0_11, %c1_12, %c0_13, %c0_14] : memref<1x4x32x31xbf16, #tpu.memory_space<vmem>>, vector<1x1x32x25xbf16>
    %11 = vector.shape_cast %10 : vector<1x1x32x25xbf16> to vector<32x25xbf16>
    %cst_15 = arith.constant dense<0.000000e+00> : vector<32x25xf32>
    %12 = tpu.matmul %9, %11, %cst_15 {dimension_numbers = #tpu.dot_dimension_numbers<[1], [0], [0], [1], [0, 0, 1, 1], [], []>} : vector<32x32xbf16>, vector<32x25xbf16>, vector<32x25xf32> -> vector<32x25xf32>
    %13 = arith.addf %7, %12 : vector<32x25xf32>
    %c2 = arith.constant 2 : index
    %c0_16 = arith.constant 0 : index
    %c0_17 = arith.constant 0 : index
    %14 = vector.load %arg3[%c2, %c0_16, %c0_17] : memref<9x32x32xbf16, #tpu.memory_space<vmem>>, vector<1x32x32xbf16>
    %15 = vector.shape_cast %14 : vector<1x32x32xbf16> to vector<32x32xbf16>
    %c0_18 = arith.constant 0 : index
    %c0_19 = arith.constant 0 : index
    %c0_20 = arith.constant 0 : index
    %c1_21 = arith.constant 1 : index
    %16 = vector.load %arg1[%c0_18, %c0_19, %c0_20, %c1_21] : memref<1x4x32x31xbf16, #tpu.memory_space<vmem>>, vector<1x1x32x25xbf16>
    %17 = vector.shape_cast %16 : vector<1x1x32x25xbf16> to vector<32x25xbf16>
    %cst_22 = arith.constant dense<0.000000e+00> : vector<32x25xf32>
    %18 = tpu.matmul %15, %17, %cst_22 {dimension_numbers = #tpu.dot_dimension_numbers<[1], [0], [0], [1], [0, 0, 1, 1], [], []>} : vector<32x32xbf16>, vector<32x25xbf16>, vector<32x25xf32> -> vector<32x25xf32>
    %19 = arith.addf %13, %18 : vector<32x25xf32>
    %c3 = arith.constant 3 : index
    %c0_23 = arith.constant 0 : index
    %c0_24 = arith.constant 0 : index
    %20 = vector.load %arg3[%c3, %c0_23, %c0_24] : memref<9x32x32xbf16, #tpu.memory_space<vmem>>, vector<1x32x32xbf16>
    %21 = vector.shape_cast %20 : vector<1x32x32xbf16> to vector<32x32xbf16>
    %c0_25 = arith.constant 0 : index
    %c2_26 = arith.constant 2 : index
    %c0_27 = arith.constant 0 : index
    %c0_28 = arith.constant 0 : index
    %22 = vector.load %arg1[%c0_25, %c2_26, %c0_27, %c0_28] : memref<1x4x32x31xbf16, #tpu.memory_space<vmem>>, vector<1x1x32x25xbf16>
    %23 = vector.shape_cast %22 : vector<1x1x32x25xbf16> to vector<32x25xbf16>
    %cst_29 = arith.constant dense<0.000000e+00> : vector<32x25xf32>
    %24 = tpu.matmul %21, %23, %cst_29 {dimension_numbers = #tpu.dot_dimension_numbers<[1], [0], [0], [1], [0, 0, 1, 1], [], []>} : vector<32x32xbf16>, vector<32x25xbf16>, vector<32x25xf32> -> vector<32x25xf32>
    %25 = arith.addf %19, %24 : vector<32x25xf32>
    %c4 = arith.constant 4 : index
    %c0_30 = arith.constant 0 : index
    %c0_31 = arith.constant 0 : index
    %26 = vector.load %arg3[%c4, %c0_30, %c0_31] : memref<9x32x32xbf16, #tpu.memory_space<vmem>>, vector<1x32x32xbf16>
    %27 = vector.shape_cast %26 : vector<1x32x32xbf16> to vector<32x32xbf16>
    %c0_32 = arith.constant 0 : index
    %c3_33 = arith.constant 3 : index
    %c0_34 = arith.constant 0 : index
    %c0_35 = arith.constant 0 : index
    %28 = vector.load %arg1[%c0_32, %c3_33, %c0_34, %c0_35] : memref<1x4x32x31xbf16, #tpu.memory_space<vmem>>, vector<1x1x32x25xbf16>
    %29 = vector.shape_cast %28 : vector<1x1x32x25xbf16> to vector<32x25xbf16>
    %cst_36 = arith.constant dense<0.000000e+00> : vector<32x25xf32>
    %30 = tpu.matmul %27, %29, %cst_36 {dimension_numbers = #tpu.dot_dimension_numbers<[1], [0], [0], [1], [0, 0, 1, 1], [], []>} : vector<32x32xbf16>, vector<32x25xbf16>, vector<32x25xf32> -> vector<32x25xf32>
    %31 = arith.addf %25, %30 : vector<32x25xf32>
    %c5 = arith.constant 5 : index
    %c0_37 = arith.constant 0 : index
    %c0_38 = arith.constant 0 : index
    %32 = vector.load %arg3[%c5, %c0_37, %c0_38] : memref<9x32x32xbf16, #tpu.memory_space<vmem>>, vector<1x32x32xbf16>
    %33 = vector.shape_cast %32 : vector<1x32x32xbf16> to vector<32x32xbf16>
    %c0_39 = arith.constant 0 : index
    %c2_40 = arith.constant 2 : index
    %c0_41 = arith.constant 0 : index
    %c1_42 = arith.constant 1 : index
    %34 = vector.load %arg1[%c0_39, %c2_40, %c0_41, %c1_42] : memref<1x4x32x31xbf16, #tpu.memory_space<vmem>>, vector<1x1x32x25xbf16>
    %35 = vector.shape_cast %34 : vector<1x1x32x25xbf16> to vector<32x25xbf16>
    %cst_43 = arith.constant dense<0.000000e+00> : vector<32x25xf32>
    %36 = tpu.matmul %33, %35, %cst_43 {dimension_numbers = #tpu.dot_dimension_numbers<[1], [0], [0], [1], [0, 0, 1, 1], [], []>} : vector<32x32xbf16>, vector<32x25xbf16>, vector<32x25xf32> -> vector<32x25xf32>
    %37 = arith.addf %31, %36 : vector<32x25xf32>
    %c6 = arith.constant 6 : index
    %c0_44 = arith.constant 0 : index
    %c0_45 = arith.constant 0 : index
    %38 = vector.load %arg3[%c6, %c0_44, %c0_45] : memref<9x32x32xbf16, #tpu.memory_space<vmem>>, vector<1x32x32xbf16>
    %39 = vector.shape_cast %38 : vector<1x32x32xbf16> to vector<32x32xbf16>
    %c0_46 = arith.constant 0 : index
    %c0_47 = arith.constant 0 : index
    %c0_48 = arith.constant 0 : index
    %c5_49 = arith.constant 5 : index
    %40 = vector.load %arg1[%c0_46, %c0_47, %c0_48, %c5_49] : memref<1x4x32x31xbf16, #tpu.memory_space<vmem>>, vector<1x1x32x25xbf16>
    %41 = vector.shape_cast %40 : vector<1x1x32x25xbf16> to vector<32x25xbf16>
    %cst_50 = arith.constant dense<0.000000e+00> : vector<32x25xf32>
    %42 = tpu.matmul %39, %41, %cst_50 {dimension_numbers = #tpu.dot_dimension_numbers<[1], [0], [0], [1], [0, 0, 1, 1], [], []>} : vector<32x32xbf16>, vector<32x25xbf16>, vector<32x25xf32> -> vector<32x25xf32>
    %43 = arith.addf %37, %42 : vector<32x25xf32>
    %c7 = arith.constant 7 : index
    %c0_51 = arith.constant 0 : index
    %c0_52 = arith.constant 0 : index
    %44 = vector.load %arg3[%c7, %c0_51, %c0_52] : memref<9x32x32xbf16, #tpu.memory_space<vmem>>, vector<1x32x32xbf16>
    %45 = vector.shape_cast %44 : vector<1x32x32xbf16> to vector<32x32xbf16>
    %c0_53 = arith.constant 0 : index
    %c1_54 = arith.constant 1 : index
    %c0_55 = arith.constant 0 : index
    %c5_56 = arith.constant 5 : index
    %46 = vector.load %arg1[%c0_53, %c1_54, %c0_55, %c5_56] : memref<1x4x32x31xbf16, #tpu.memory_space<vmem>>, vector<1x1x32x25xbf16>
    %47 = vector.shape_cast %46 : vector<1x1x32x25xbf16> to vector<32x25xbf16>
    %cst_57 = arith.constant dense<0.000000e+00> : vector<32x25xf32>
    %48 = tpu.matmul %45, %47, %cst_57 {dimension_numbers = #tpu.dot_dimension_numbers<[1], [0], [0], [1], [0, 0, 1, 1], [], []>} : vector<32x32xbf16>, vector<32x25xbf16>, vector<32x25xf32> -> vector<32x25xf32>
    %49 = arith.addf %43, %48 : vector<32x25xf32>
    %c8 = arith.constant 8 : index
    %c0_58 = arith.constant 0 : index
    %c0_59 = arith.constant 0 : index
    %50 = vector.load %arg3[%c8, %c0_58, %c0_59] : memref<9x32x32xbf16, #tpu.memory_space<vmem>>, vector<1x32x32xbf16>
    %51 = vector.shape_cast %50 : vector<1x32x32xbf16> to vector<32x32xbf16>
    %c0_60 = arith.constant 0 : index
    %c0_61 = arith.constant 0 : index
    %c0_62 = arith.constant 0 : index
    %c6_63 = arith.constant 6 : index
    %52 = vector.load %arg1[%c0_60, %c0_61, %c0_62, %c6_63] : memref<1x4x32x31xbf16, #tpu.memory_space<vmem>>, vector<1x1x32x25xbf16>
    %53 = vector.shape_cast %52 : vector<1x1x32x25xbf16> to vector<32x25xbf16>
    %cst_64 = arith.constant dense<0.000000e+00> : vector<32x25xf32>
    %54 = tpu.matmul %51, %53, %cst_64 {dimension_numbers = #tpu.dot_dimension_numbers<[1], [0], [0], [1], [0, 0, 1, 1], [], []>} : vector<32x32xbf16>, vector<32x25xbf16>, vector<32x25xf32> -> vector<32x25xf32>
    %55 = arith.addf %49, %54 : vector<32x25xf32>
    %c0_65 = arith.constant 0 : index
    %c0_66 = arith.constant 0 : index
    %56 = vector.load %arg4[%c0_65, %c0_66] : memref<32x1xf32, #tpu.memory_space<vmem>>, vector<32x1xf32>
    %57 = vector.broadcast %56 : vector<32x1xf32> to vector<32x25xf32>
    %58 = arith.addf %55, %57 : vector<32x25xf32>
    %cst_67 = arith.constant 0.000000e+00 : f32
    %59 = vector.broadcast %cst_67 : f32 to vector<32x25xf32>
    %60 = arith.cmpf oge, %58, %59 : vector<32x25xf32>
    %cst_68 = arith.constant 0.00999999977 : f32
    %61 = vector.broadcast %cst_68 : f32 to vector<32x25xf32>
    %62 = arith.mulf %61, %58 : vector<32x25xf32>
    %63 = arith.select %60, %58, %62 : vector<32x25xi1>, vector<32x25xf32>
    %64 = arith.truncf %63 : vector<32x25xf32> to vector<32x25xbf16>
    %c0_69 = arith.constant 0 : index
    %c0_70 = arith.constant 0 : index
    %65 = vector.load %arg12[%c0_69, %c0_70] : memref<32x25xbf16, #tpu.memory_space<vmem>>, vector<32x25xbf16>
    tpu.vector_store %arg12[%c0_69, %c0_70], %64 {strides = array<i32>} : memref<32x25xbf16, #tpu.memory_space<vmem>>, vector<32x25xbf16>,
    %c0_71 = arith.constant 0 : index
    %c0_72 = arith.constant 0 : index
    %66 = vector.load %arg9[%c0_71, %c0_72] : memref<32x32xbf16, #tpu.memory_space<vmem>>, vector<32x32xbf16>
    %c0_73 = arith.constant 0 : index
    %c3_74 = arith.constant 3 : index
    %c0_75 = arith.constant 0 : index
    %c0_76 = arith.constant 0 : index
    %67 = vector.load %arg1[%c0_73, %c3_74, %c0_75, %c0_76] : memref<1x4x32x31xbf16, #tpu.memory_space<vmem>>, vector<1x1x32x25xbf16>
    %68 = vector.shape_cast %67 : vector<1x1x32x25xbf16> to vector<32x25xbf16>
    %cst_77 = arith.constant dense<0.000000e+00> : vector<32x25xf32>
    %69 = tpu.matmul %66, %68, %cst_77 {dimension_numbers = #tpu.dot_dimension_numbers<[1], [0], [0], [1], [0, 0, 1, 1], [], []>} : vector<32x32xbf16>, vector<32x25xbf16>, vector<32x25xf32> -> vector<32x25xf32>
    %c0_78 = arith.constant 0 : index
    %c0_79 = arith.constant 0 : index
    %70 = vector.load %arg10[%c0_78, %c0_79] : memref<32x1xf32, #tpu.memory_space<vmem>>, vector<32x1xf32>
    %71 = vector.broadcast %70 : vector<32x1xf32> to vector<32x25xf32>
    %72 = arith.addf %69, %71 : vector<32x25xf32>
    %c0_80 = arith.constant 0 : index
    %c0_81 = arith.constant 0 : index
    %73 = vector.load %arg13[%c0_80, %c0_81] : memref<32x25xf32, #tpu.memory_space<vmem>>, vector<32x25xf32>
    tpu.vector_store %arg13[%c0_80, %c0_81], %72 {strides = array<i32>} : memref<32x25xf32, #tpu.memory_space<vmem>>, vector<32x25xf32>,
    %cst_82 = arith.constant 0.000000e+00 : bf16
    %74 = vector.broadcast %cst_82 : bf16 to vector<32x50xbf16>
    %c0_83 = arith.constant 0 : index
    %c0_84 = arith.constant 0 : index
    %75 = vector.load %arg14[%c0_83, %c0_84] : memref<32x50xbf16, #tpu.memory_space<vmem>>, vector<32x50xbf16>
    tpu.vector_store %arg14[%c0_83, %c0_84], %74 {strides = array<i32>} : memref<32x50xbf16, #tpu.memory_space<vmem>>, vector<32x50xbf16>,
    %cst_85 = arith.constant 0.000000e+00 : f32
    %76 = vector.broadcast %cst_85 : f32 to vector<32x36xf32>
    %c0_86 = arith.constant 0 : index
    %c0_87 = arith.constant 0 : index
    %77 = vector.load %arg15[%c0_86, %c0_87] : memref<32x36xf32, #tpu.memory_space<vmem>>, vector<32x36xf32>
    tpu.vector_store %arg15[%c0_86, %c0_87], %76 {strides = array<i32>} : memref<32x36xf32, #tpu.memory_space<vmem>>, vector<32x36xf32>,
    %c0_88 = arith.constant 0 : index
    %c0_89 = arith.constant 0 : index
    %78 = vector.load %arg12[%c0_88, %c0_89] : memref<32x25xbf16, #tpu.memory_space<vmem>>, vector<32x4xbf16>
    %c0_90 = arith.constant 0 : index
    %c14 = arith.constant 14 : index
    %79 = vector.load %arg14[%c0_90, %c14] : memref<32x50xbf16, #tpu.memory_space<vmem>>, vector<32x4xbf16>
    tpu.vector_store %arg14[%c0_90, %c14], %78 {strides = array<i32>} : memref<32x50xbf16, #tpu.memory_space<vmem>>, vector<32x4xbf16>,
    %c0_91 = arith.constant 0 : index
    %c0_92 = arith.constant 0 : index
    %80 = vector.load %arg13[%c0_91, %c0_92] : memref<32x25xf32, #tpu.memory_space<vmem>>, vector<32x4xf32>
    %c0_93 = arith.constant 0 : index
    %c7_94 = arith.constant 7 : index
    %81 = vector.load %arg15[%c0_93, %c7_94] : memref<32x36xf32, #tpu.memory_space<vmem>>, vector<32x4xf32>
    tpu.vector_store %arg15[%c0_93, %c7_94], %80 {strides = array<i32>} : memref<32x36xf32, #tpu.memory_space<vmem>>, vector<32x4xf32>,
    %c0_95 = arith.constant 0 : index
    %c5_96 = arith.constant 5 : index
    %82 = vector.load %arg12[%c0_95, %c5_96] : memref<32x25xbf16, #tpu.memory_space<vmem>>, vector<32x4xbf16>
    %c0_97 = arith.constant 0 : index
    %c20 = arith.constant 20 : index
    %83 = vector.load %arg14[%c0_97, %c20] : memref<32x50xbf16, #tpu.memory_space<vmem>>, vector<32x4xbf16>
    tpu.vector_store %arg14[%c0_97, %c20], %82 {strides = array<i32>} : memref<32x50xbf16, #tpu.memory_space<vmem>>, vector<32x4xbf16>,
    %c0_98 = arith.constant 0 : index
    %c5_99 = arith.constant 5 : index
    %84 = vector.load %arg13[%c0_98, %c5_99] : memref<32x25xf32, #tpu.memory_space<vmem>>, vector<32x4xf32>
    %c0_100 = arith.constant 0 : index
    %c13 = arith.constant 13 : index
    %85 = vector.load %arg15[%c0_100, %c13] : memref<32x36xf32, #tpu.memory_space<vmem>>, vector<32x4xf32>
    tpu.vector_store %arg15[%c0_100, %c13], %84 {strides = array<i32>} : memref<32x36xf32, #tpu.memory_space<vmem>>, vector<32x4xf32>,
    %c0_101 = arith.constant 0 : index
    %c10 = arith.constant 10 : index
    %86 = vector.load %arg12[%c0_101, %c10] : memref<32x25xbf16, #tpu.memory_space<vmem>>, vector<32x4xbf16>
    %c0_102 = arith.constant 0 : index
    %c26 = arith.constant 26 : index
    %87 = vector.load %arg14[%c0_102, %c26] : memref<32x50xbf16, #tpu.memory_space<vmem>>, vector<32x4xbf16>
    tpu.vector_store %arg14[%c0_102, %c26], %86 {strides = array<i32>} : memref<32x50xbf16, #tpu.memory_space<vmem>>, vector<32x4xbf16>,
    %c0_103 = arith.constant 0 : index
    %c10_104 = arith.constant 10 : index
    %88 = vector.load %arg13[%c0_103, %c10_104] : memref<32x25xf32, #tpu.memory_space<vmem>>, vector<32x4xf32>
    %c0_105 = arith.constant 0 : index
    %c19 = arith.constant 19 : index
    %89 = vector.load %arg15[%c0_105, %c19] : memref<32x36xf32, #tpu.memory_space<vmem>>, vector<32x4xf32>
    tpu.vector_store %arg15[%c0_105, %c19], %88 {strides = array<i32>} : memref<32x36xf32, #tpu.memory_space<vmem>>, vector<32x4xf32>,
    %c0_106 = arith.constant 0 : index
    %c15 = arith.constant 15 : index
    %90 = vector.load %arg12[%c0_106, %c15] : memref<32x25xbf16, #tpu.memory_space<vmem>>, vector<32x4xbf16>
    %c0_107 = arith.constant 0 : index
    %c32 = arith.constant 32 : index
    %91 = vector.load %arg14[%c0_107, %c32] : memref<32x50xbf16, #tpu.memory_space<vmem>>, vector<32x4xbf16>
    tpu.vector_store %arg14[%c0_107, %c32], %90 {strides = array<i32>} : memref<32x50xbf16, #tpu.memory_space<vmem>>, vector<32x4xbf16>,
    %c0_108 = arith.constant 0 : index
    %c15_109 = arith.constant 15 : index
    %92 = vector.load %arg13[%c0_108, %c15_109] : memref<32x25xf32, #tpu.memory_space<vmem>>, vector<32x4xf32>
    %c0_110 = arith.constant 0 : index
    %c25 = arith.constant 25 : index
    %93 = vector.load %arg15[%c0_110, %c25] : memref<32x36xf32, #tpu.memory_space<vmem>>, vector<32x4xf32>
    tpu.vector_store %arg15[%c0_110, %c25], %92 {strides = array<i32>} : memref<32x36xf32, #tpu.memory_space<vmem>>, vector<32x4xf32>,
    %cst_111 = arith.constant 0.000000e+00 : f32
    %94 = vector.broadcast %cst_111 : f32 to vector<32x36xf32>
    %c0_112 = arith.constant 0 : index
    %c0_113 = arith.constant 0 : index
    %c0_114 = arith.constant 0 : index
    %95 = vector.load %arg5[%c0_112, %c0_113, %c0_114] : memref<9x32x32xbf16, #tpu.memory_space<vmem>>, vector<1x32x32xbf16>
    %96 = vector.shape_cast %95 : vector<1x32x32xbf16> to vector<32x32xbf16>
    %c0_115 = arith.constant 0 : index
    %c0_116 = arith.constant 0 : index
    %97 = vector.load %arg14[%c0_115, %c0_116] : memref<32x50xbf16, #tpu.memory_space<vmem>>, vector<32x36xbf16>
    %cst_117 = arith.constant dense<0.000000e+00> : vector<32x36xf32>
    %98 = tpu.matmul %96, %97, %cst_117 {dimension_numbers = #tpu.dot_dimension_numbers<[1], [0], [0], [1], [0, 0, 1, 1], [], []>} : vector<32x32xbf16>, vector<32x36xbf16>, vector<32x36xf32> -> vector<32x36xf32>
    %99 = arith.addf %94, %98 : vector<32x36xf32>
    %c1_118 = arith.constant 1 : index
    %c0_119 = arith.constant 0 : index
    %c0_120 = arith.constant 0 : index
    %100 = vector.load %arg5[%c1_118, %c0_119, %c0_120] : memref<9x32x32xbf16, #tpu.memory_space<vmem>>, vector<1x32x32xbf16>
    %101 = vector.shape_cast %100 : vector<1x32x32xbf16> to vector<32x32xbf16>
    %c0_121 = arith.constant 0 : index
    %c1_122 = arith.constant 1 : index
    %102 = vector.load %arg14[%c0_121, %c1_122] : memref<32x50xbf16, #tpu.memory_space<vmem>>, vector<32x36xbf16>
    %cst_123 = arith.constant dense<0.000000e+00> : vector<32x36xf32>
    %103 = tpu.matmul %101, %102, %cst_123 {dimension_numbers = #tpu.dot_dimension_numbers<[1], [0], [0], [1], [0, 0, 1, 1], [], []>} : vector<32x32xbf16>, vector<32x36xbf16>, vector<32x36xf32> -> vector<32x36xf32>
    %104 = arith.addf %99, %103 : vector<32x36xf32>
    %c2_124 = arith.constant 2 : index
    %c0_125 = arith.constant 0 : index
    %c0_126 = arith.constant 0 : index
    %105 = vector.load %arg5[%c2_124, %c0_125, %c0_126] : memref<9x32x32xbf16, #tpu.memory_space<vmem>>, vector<1x32x32xbf16>
    %106 = vector.shape_cast %105 : vector<1x32x32xbf16> to vector<32x32xbf16>
    %c0_127 = arith.constant 0 : index
    %c2_128 = arith.constant 2 : index
    %107 = vector.load %arg14[%c0_127, %c2_128] : memref<32x50xbf16, #tpu.memory_space<vmem>>, vector<32x36xbf16>
    %cst_129 = arith.constant dense<0.000000e+00> : vector<32x36xf32>
    %108 = tpu.matmul %106, %107, %cst_129 {dimension_numbers = #tpu.dot_dimension_numbers<[1], [0], [0], [1], [0, 0, 1, 1], [], []>} : vector<32x32xbf16>, vector<32x36xbf16>, vector<32x36xf32> -> vector<32x36xf32>
    %109 = arith.addf %104, %108 : vector<32x36xf32>
    %c3_130 = arith.constant 3 : index
    %c0_131 = arith.constant 0 : index
    %c0_132 = arith.constant 0 : index
    %110 = vector.load %arg5[%c3_130, %c0_131, %c0_132] : memref<9x32x32xbf16, #tpu.memory_space<vmem>>, vector<1x32x32xbf16>
    %111 = vector.shape_cast %110 : vector<1x32x32xbf16> to vector<32x32xbf16>
    %c0_133 = arith.constant 0 : index
    %c6_134 = arith.constant 6 : index
    %112 = vector.load %arg14[%c0_133, %c6_134] : memref<32x50xbf16, #tpu.memory_space<vmem>>, vector<32x36xbf16>
    %cst_135 = arith.constant dense<0.000000e+00> : vector<32x36xf32>
    %113 = tpu.matmul %111, %112, %cst_135 {dimension_numbers = #tpu.dot_dimension_numbers<[1], [0], [0], [1], [0, 0, 1, 1], [], []>} : vector<32x32xbf16>, vector<32x36xbf16>, vector<32x36xf32> -> vector<32x36xf32>
    %114 = arith.addf %109, %113 : vector<32x36xf32>
    %c4_136 = arith.constant 4 : index
    %c0_137 = arith.constant 0 : index
    %c0_138 = arith.constant 0 : index
    %115 = vector.load %arg5[%c4_136, %c0_137, %c0_138] : memref<9x32x32xbf16, #tpu.memory_space<vmem>>, vector<1x32x32xbf16>
    %116 = vector.shape_cast %115 : vector<1x32x32xbf16> to vector<32x32xbf16>
    %c0_139 = arith.constant 0 : index
    %c7_140 = arith.constant 7 : index
    %117 = vector.load %arg14[%c0_139, %c7_140] : memref<32x50xbf16, #tpu.memory_space<vmem>>, vector<32x36xbf16>
    %cst_141 = arith.constant dense<0.000000e+00> : vector<32x36xf32>
    %118 = tpu.matmul %116, %117, %cst_141 {dimension_numbers = #tpu.dot_dimension_numbers<[1], [0], [0], [1], [0, 0, 1, 1], [], []>} : vector<32x32xbf16>, vector<32x36xbf16>, vector<32x36xf32> -> vector<32x36xf32>
    %119 = arith.addf %114, %118 : vector<32x36xf32>
    %c5_142 = arith.constant 5 : index
    %c0_143 = arith.constant 0 : index
    %c0_144 = arith.constant 0 : index
    %120 = vector.load %arg5[%c5_142, %c0_143, %c0_144] : memref<9x32x32xbf16, #tpu.memory_space<vmem>>, vector<1x32x32xbf16>
    %121 = vector.shape_cast %120 : vector<1x32x32xbf16> to vector<32x32xbf16>
    %c0_145 = arith.constant 0 : index
    %c8_146 = arith.constant 8 : index
    %122 = vector.load %arg14[%c0_145, %c8_146] : memref<32x50xbf16, #tpu.memory_space<vmem>>, vector<32x36xbf16>
    %cst_147 = arith.constant dense<0.000000e+00> : vector<32x36xf32>
    %123 = tpu.matmul %121, %122, %cst_147 {dimension_numbers = #tpu.dot_dimension_numbers<[1], [0], [0], [1], [0, 0, 1, 1], [], []>} : vector<32x32xbf16>, vector<32x36xbf16>, vector<32x36xf32> -> vector<32x36xf32>
    %124 = arith.addf %119, %123 : vector<32x36xf32>
    %c6_148 = arith.constant 6 : index
    %c0_149 = arith.constant 0 : index
    %c0_150 = arith.constant 0 : index
    %125 = vector.load %arg5[%c6_148, %c0_149, %c0_150] : memref<9x32x32xbf16, #tpu.memory_space<vmem>>, vector<1x32x32xbf16>
    %126 = vector.shape_cast %125 : vector<1x32x32xbf16> to vector<32x32xbf16>
    %c0_151 = arith.constant 0 : index
    %c12 = arith.constant 12 : index
    %127 = vector.load %arg14[%c0_151, %c12] : memref<32x50xbf16, #tpu.memory_space<vmem>>, vector<32x36xbf16>
    %cst_152 = arith.constant dense<0.000000e+00> : vector<32x36xf32>
    %128 = tpu.matmul %126, %127, %cst_152 {dimension_numbers = #tpu.dot_dimension_numbers<[1], [0], [0], [1], [0, 0, 1, 1], [], []>} : vector<32x32xbf16>, vector<32x36xbf16>, vector<32x36xf32> -> vector<32x36xf32>
    %129 = arith.addf %124, %128 : vector<32x36xf32>
    %c7_153 = arith.constant 7 : index
    %c0_154 = arith.constant 0 : index
    %c0_155 = arith.constant 0 : index
    %130 = vector.load %arg5[%c7_153, %c0_154, %c0_155] : memref<9x32x32xbf16, #tpu.memory_space<vmem>>, vector<1x32x32xbf16>
    %131 = vector.shape_cast %130 : vector<1x32x32xbf16> to vector<32x32xbf16>
    %c0_156 = arith.constant 0 : index
    %c13_157 = arith.constant 13 : index
    %132 = vector.load %arg14[%c0_156, %c13_157] : memref<32x50xbf16, #tpu.memory_space<vmem>>, vector<32x36xbf16>
    %cst_158 = arith.constant dense<0.000000e+00> : vector<32x36xf32>
    %133 = tpu.matmul %131, %132, %cst_158 {dimension_numbers = #tpu.dot_dimension_numbers<[1], [0], [0], [1], [0, 0, 1, 1], [], []>} : vector<32x32xbf16>, vector<32x36xbf16>, vector<32x36xf32> -> vector<32x36xf32>
    %134 = arith.addf %129, %133 : vector<32x36xf32>
    %c8_159 = arith.constant 8 : index
    %c0_160 = arith.constant 0 : index
    %c0_161 = arith.constant 0 : index
    %135 = vector.load %arg5[%c8_159, %c0_160, %c0_161] : memref<9x32x32xbf16, #tpu.memory_space<vmem>>, vector<1x32x32xbf16>
    %136 = vector.shape_cast %135 : vector<1x32x32xbf16> to vector<32x32xbf16>
    %c0_162 = arith.constant 0 : index
    %c14_163 = arith.constant 14 : index
    %137 = vector.load %arg14[%c0_162, %c14_163] : memref<32x50xbf16, #tpu.memory_space<vmem>>, vector<32x36xbf16>
    %cst_164 = arith.constant dense<0.000000e+00> : vector<32x36xf32>
    %138 = tpu.matmul %136, %137, %cst_164 {dimension_numbers = #tpu.dot_dimension_numbers<[1], [0], [0], [1], [0, 0, 1, 1], [], []>} : vector<32x32xbf16>, vector<32x36xbf16>, vector<32x36xf32> -> vector<32x36xf32>
    %139 = arith.addf %134, %138 : vector<32x36xf32>
    %c0_165 = arith.constant 0 : index
    %c0_166 = arith.constant 0 : index
    %140 = vector.load %arg6[%c0_165, %c0_166] : memref<32x1xf32, #tpu.memory_space<vmem>>, vector<32x1xf32>
    %141 = vector.broadcast %140 : vector<32x1xf32> to vector<32x36xf32>
    %142 = arith.addf %139, %141 : vector<32x36xf32>
    %143 = vector.broadcast %0 : vector<1x36xf32> to vector<32x36xf32>
    %144 = arith.mulf %142, %143 : vector<32x36xf32>
    %c0_167 = arith.constant 0 : index
    %c0_168 = arith.constant 0 : index
    %145 = vector.load %arg7[%c0_167, %c0_168] : memref<32x32xf32, #tpu.memory_space<vmem>>, vector<32x32xf32>
    %146 = arith.mulf %144, %144 : vector<32x36xf32>
    %cst_169 = arith.constant dense<0.000000e+00> : vector<32x36xf32>
    %147 = tpu.matmul %145, %146, %cst_169 {dimension_numbers = #tpu.dot_dimension_numbers<[1], [0], [0], [1], [0, 0, 1, 1], [], []>} : vector<32x32xf32>, vector<32x36xf32>, vector<32x36xf32> -> vector<32x36xf32>
    %c0_170 = arith.constant 0 : index
    %c0_171 = arith.constant 0 : index
    %148 = vector.load %arg8[%c0_170, %c0_171] : memref<32x1xf32, #tpu.memory_space<vmem>>, vector<32x1xf32>
    %149 = vector.broadcast %148 : vector<32x1xf32> to vector<32x36xf32>
    %150 = arith.addf %147, %149 : vector<32x36xf32>
    %151 = math.rsqrt %150 : vector<32x36xf32>
    %152 = arith.mulf %144, %151 : vector<32x36xf32>
    %c0_172 = arith.constant 0 : index
    %c0_173 = arith.constant 0 : index
    %153 = vector.load %arg15[%c0_172, %c0_173] : memref<32x36xf32, #tpu.memory_space<vmem>>, vector<32x36xf32>
    %154 = arith.addf %152, %153 : vector<32x36xf32>
    %155 = arith.truncf %154 : vector<32x36xf32> to vector<32x36xbf16>
    %c0_174 = arith.constant 0 : index
    %c0_175 = arith.constant 0 : index
    %c0_176 = arith.constant 0 : index
    %156 = vector.load %arg11[%c0_174, %c0_175, %c0_176] : memref<1x32x36xbf16, #tpu.memory_space<vmem>>, vector<1x32x36xbf16>
    %157 = vector.shape_cast %156 : vector<1x32x36xbf16> to vector<32x36xbf16>
    %158 = vector.shape_cast %155 : vector<32x36xbf16> to vector<1x32x36xbf16>
    tpu.vector_store %arg11[%c0_174, %c0_175, %c0_176], %158 {strides = array<i32>} : memref<1x32x36xbf16, #tpu.memory_space<vmem>>, vector<1x32x36xbf16>,
    return
  }
  func.func @transform_0(%arg0: i32) -> (i32, i32, i32, i32) {
    %c0_i32 = arith.constant 0 : i32
    %c0_i32_0 = arith.constant 0 : i32
    %c0_i32_1 = arith.constant 0 : i32
    %c0_i32_2 = arith.constant 0 : i32
    return %arg0, %c0_i32, %c0_i32_0, %c0_i32_1 : i32, i32, i32, i32
  }
  func.func @transform_1(%arg0: i32) -> (i32, i32) {
    %c0_i32 = arith.constant 0 : i32
    %c0_i32_0 = arith.constant 0 : i32
    %c0_i32_1 = arith.constant 0 : i32
    return %c0_i32, %c0_i32_0 : i32, i32
  }
  func.func @transform_2(%arg0: i32) -> (i32, i32, i32) {
    %c0_i32 = arith.constant 0 : i32
    %c0_i32_0 = arith.constant 0 : i32
    %c0_i32_1 = arith.constant 0 : i32
    %c0_i32_2 = arith.constant 0 : i32
    return %c0_i32, %c0_i32_0, %c0_i32_1 : i32, i32, i32
  }
  func.func @transform_3(%arg0: i32) -> (i32, i32) {
    %c0_i32 = arith.constant 0 : i32
    %c0_i32_0 = arith.constant 0 : i32
    %c0_i32_1 = arith.constant 0 : i32
    return %c0_i32, %c0_i32_0 : i32, i32
  }
  func.func @transform_4(%arg0: i32) -> (i32, i32, i32) {
    %c0_i32 = arith.constant 0 : i32
    %c0_i32_0 = arith.constant 0 : i32
    %c0_i32_1 = arith.constant 0 : i32
    %c0_i32_2 = arith.constant 0 : i32
    return %c0_i32, %c0_i32_0, %c0_i32_1 : i32, i32, i32
  }
  func.func @transform_5(%arg0: i32) -> (i32, i32) {
    %c0_i32 = arith.constant 0 : i32
    %c0_i32_0 = arith.constant 0 : i32
    %c0_i32_1 = arith.constant 0 : i32
    return %c0_i32, %c0_i32_0 : i32, i32
  }
  func.func @transform_6(%arg0: i32) -> (i32, i32) {
    %c0_i32 = arith.constant 0 : i32
    %c0_i32_0 = arith.constant 0 : i32
    %c0_i32_1 = arith.constant 0 : i32
    return %c0_i32, %c0_i32_0 : i32, i32
  }
  func.func @transform_7(%arg0: i32) -> (i32, i32) {
    %c0_i32 = arith.constant 0 : i32
    %c0_i32_0 = arith.constant 0 : i32
    %c0_i32_1 = arith.constant 0 : i32
    return %c0_i32, %c0_i32_0 : i32, i32
  }
  func.func @transform_8(%arg0: i32) -> (i32, i32) {
    %c0_i32 = arith.constant 0 : i32
    %c0_i32_0 = arith.constant 0 : i32
    %c0_i32_1 = arith.constant 0 : i32
    return %c0_i32, %c0_i32_0 : i32, i32
  }
  func.func @transform_9(%arg0: i32) -> (i32, i32) {
    %c0_i32 = arith.constant 0 : i32
    %c0_i32_0 = arith.constant 0 : i32
    %c0_i32_1 = arith.constant 0 : i32
    return %c0_i32, %c0_i32_0 : i32, i32
  }
  func.func @transform_10(%arg0: i32) -> (i32, i32, i32) {
    %c0_i32 = arith.constant 0 : i32
    %c0_i32_0 = arith.constant 0 : i32
    %c0_i32_1 = arith.constant 0 : i32
    return %arg0, %c0_i32, %c0_i32_0 : i32, i32, i32
  }
}

module attributes {stable_mosaic.version = 11 : i64} {
  func.func @kernel(%arg0: i32, %arg1: memref<1x32x36xbf16, #tpu.memory_space<vmem>>, %arg2: memref<1x36xf32, #tpu.memory_space<vmem>>, %arg3: memref<9x32x32xbf16, #tpu.memory_space<vmem>>, %arg4: memref<32x1xf32, #tpu.memory_space<vmem>>, %arg5: memref<9x32x32xbf16, #tpu.memory_space<vmem>>, %arg6: memref<32x1xf32, #tpu.memory_space<vmem>>, %arg7: memref<1x32x36xbf16, #tpu.memory_space<vmem>>, %arg8: memref<32x50xbf16, #tpu.memory_space<vmem>>, %arg9: memref<32x50xbf16, #tpu.memory_space<vmem>>) attributes {dimension_semantics = [#tpu.dimension_semantics<parallel>], iteration_bounds = array<i64: 2>, scalar_prefetch = 0 : i64, scratch_operands = 2 : i64, tpu.core_type = #tpu.core_type<tc>, window_params = [{transform_indices = @transform_0, window_bounds = array<i64: 1, 32, 36>}, {pipeline_mode = #tpu.pipeline_mode<synchronous>, transform_indices = @transform_1, window_bounds = array<i64: 1, 36>}, {pipeline_mode = #tpu.pipeline_mode<synchronous>, transform_indices = @transform_2, window_bounds = array<i64: 9, 32, 32>}, {pipeline_mode = #tpu.pipeline_mode<synchronous>, transform_indices = @transform_3, window_bounds = array<i64: 32, 1>}, {pipeline_mode = #tpu.pipeline_mode<synchronous>, transform_indices = @transform_4, window_bounds = array<i64: 9, 32, 32>}, {pipeline_mode = #tpu.pipeline_mode<synchronous>, transform_indices = @transform_5, window_bounds = array<i64: 32, 1>}, {transform_indices = @transform_6, window_bounds = array<i64: 1, 32, 36>}]} {
    %c0 = arith.constant 0 : index
    %c0_0 = arith.constant 0 : index
    %c0_1 = arith.constant 0 : index
    %0 = vector.load %arg1[%c0, %c0_0, %c0_1] : memref<1x32x36xbf16, #tpu.memory_space<vmem>>, vector<1x32x36xbf16>
    %1 = vector.shape_cast %0 : vector<1x32x36xbf16> to vector<32x36xbf16>
    %c0_2 = arith.constant 0 : index
    %c0_3 = arith.constant 0 : index
    %2 = vector.load %arg2[%c0_2, %c0_3] : memref<1x36xf32, #tpu.memory_space<vmem>>, vector<1x36xf32>
    %cst = arith.constant 0.000000e+00 : bf16
    %3 = vector.broadcast %cst : bf16 to vector<32x50xbf16>
    %c0_4 = arith.constant 0 : index
    %c0_5 = arith.constant 0 : index
    %4 = vector.load %arg8[%c0_4, %c0_5] : memref<32x50xbf16, #tpu.memory_space<vmem>>, vector<32x50xbf16>
    tpu.vector_store %arg8[%c0_4, %c0_5], %3 {strides = array<i32>} : memref<32x50xbf16, #tpu.memory_space<vmem>>, vector<32x50xbf16>,
    %c0_6 = arith.constant 0 : index
    %c7 = arith.constant 7 : index
    %5 = vector.load %arg8[%c0_6, %c7] : memref<32x50xbf16, #tpu.memory_space<vmem>>, vector<32x36xbf16>
    tpu.vector_store %arg8[%c0_6, %c7], %1 {strides = array<i32>} : memref<32x50xbf16, #tpu.memory_space<vmem>>, vector<32x36xbf16>,
    %cst_7 = arith.constant 0.000000e+00 : f32
    %6 = vector.broadcast %cst_7 : f32 to vector<32x36xf32>
    %c0_8 = arith.constant 0 : index
    %c0_9 = arith.constant 0 : index
    %c0_10 = arith.constant 0 : index
    %7 = vector.load %arg3[%c0_8, %c0_9, %c0_10] : memref<9x32x32xbf16, #tpu.memory_space<vmem>>, vector<1x32x32xbf16>
    %8 = vector.shape_cast %7 : vector<1x32x32xbf16> to vector<32x32xbf16>
    %c0_11 = arith.constant 0 : index
    %c0_12 = arith.constant 0 : index
    %9 = vector.load %arg8[%c0_11, %c0_12] : memref<32x50xbf16, #tpu.memory_space<vmem>>, vector<32x36xbf16>
    %cst_13 = arith.constant dense<0.000000e+00> : vector<32x36xf32>
    %10 = tpu.matmul %8, %9, %cst_13 {dimension_numbers = #tpu.dot_dimension_numbers<[1], [0], [0], [1], [0, 0, 1, 1], [], []>} : vector<32x32xbf16>, vector<32x36xbf16>, vector<32x36xf32> -> vector<32x36xf32>
    %11 = arith.addf %6, %10 : vector<32x36xf32>
    %c1 = arith.constant 1 : index
    %c0_14 = arith.constant 0 : index
    %c0_15 = arith.constant 0 : index
    %12 = vector.load %arg3[%c1, %c0_14, %c0_15] : memref<9x32x32xbf16, #tpu.memory_space<vmem>>, vector<1x32x32xbf16>
    %13 = vector.shape_cast %12 : vector<1x32x32xbf16> to vector<32x32xbf16>
    %c0_16 = arith.constant 0 : index
    %c1_17 = arith.constant 1 : index
    %14 = vector.load %arg8[%c0_16, %c1_17] : memref<32x50xbf16, #tpu.memory_space<vmem>>, vector<32x36xbf16>
    %cst_18 = arith.constant dense<0.000000e+00> : vector<32x36xf32>
    %15 = tpu.matmul %13, %14, %cst_18 {dimension_numbers = #tpu.dot_dimension_numbers<[1], [0], [0], [1], [0, 0, 1, 1], [], []>} : vector<32x32xbf16>, vector<32x36xbf16>, vector<32x36xf32> -> vector<32x36xf32>
    %16 = arith.addf %11, %15 : vector<32x36xf32>
    %c2 = arith.constant 2 : index
    %c0_19 = arith.constant 0 : index
    %c0_20 = arith.constant 0 : index
    %17 = vector.load %arg3[%c2, %c0_19, %c0_20] : memref<9x32x32xbf16, #tpu.memory_space<vmem>>, vector<1x32x32xbf16>
    %18 = vector.shape_cast %17 : vector<1x32x32xbf16> to vector<32x32xbf16>
    %c0_21 = arith.constant 0 : index
    %c2_22 = arith.constant 2 : index
    %19 = vector.load %arg8[%c0_21, %c2_22] : memref<32x50xbf16, #tpu.memory_space<vmem>>, vector<32x36xbf16>
    %cst_23 = arith.constant dense<0.000000e+00> : vector<32x36xf32>
    %20 = tpu.matmul %18, %19, %cst_23 {dimension_numbers = #tpu.dot_dimension_numbers<[1], [0], [0], [1], [0, 0, 1, 1], [], []>} : vector<32x32xbf16>, vector<32x36xbf16>, vector<32x36xf32> -> vector<32x36xf32>
    %21 = arith.addf %16, %20 : vector<32x36xf32>
    %c3 = arith.constant 3 : index
    %c0_24 = arith.constant 0 : index
    %c0_25 = arith.constant 0 : index
    %22 = vector.load %arg3[%c3, %c0_24, %c0_25] : memref<9x32x32xbf16, #tpu.memory_space<vmem>>, vector<1x32x32xbf16>
    %23 = vector.shape_cast %22 : vector<1x32x32xbf16> to vector<32x32xbf16>
    %c0_26 = arith.constant 0 : index
    %c6 = arith.constant 6 : index
    %24 = vector.load %arg8[%c0_26, %c6] : memref<32x50xbf16, #tpu.memory_space<vmem>>, vector<32x36xbf16>
    %cst_27 = arith.constant dense<0.000000e+00> : vector<32x36xf32>
    %25 = tpu.matmul %23, %24, %cst_27 {dimension_numbers = #tpu.dot_dimension_numbers<[1], [0], [0], [1], [0, 0, 1, 1], [], []>} : vector<32x32xbf16>, vector<32x36xbf16>, vector<32x36xf32> -> vector<32x36xf32>
    %26 = arith.addf %21, %25 : vector<32x36xf32>
    %c4 = arith.constant 4 : index
    %c0_28 = arith.constant 0 : index
    %c0_29 = arith.constant 0 : index
    %27 = vector.load %arg3[%c4, %c0_28, %c0_29] : memref<9x32x32xbf16, #tpu.memory_space<vmem>>, vector<1x32x32xbf16>
    %28 = vector.shape_cast %27 : vector<1x32x32xbf16> to vector<32x32xbf16>
    %c0_30 = arith.constant 0 : index
    %c7_31 = arith.constant 7 : index
    %29 = vector.load %arg8[%c0_30, %c7_31] : memref<32x50xbf16, #tpu.memory_space<vmem>>, vector<32x36xbf16>
    %cst_32 = arith.constant dense<0.000000e+00> : vector<32x36xf32>
    %30 = tpu.matmul %28, %29, %cst_32 {dimension_numbers = #tpu.dot_dimension_numbers<[1], [0], [0], [1], [0, 0, 1, 1], [], []>} : vector<32x32xbf16>, vector<32x36xbf16>, vector<32x36xf32> -> vector<32x36xf32>
    %31 = arith.addf %26, %30 : vector<32x36xf32>
    %c5 = arith.constant 5 : index
    %c0_33 = arith.constant 0 : index
    %c0_34 = arith.constant 0 : index
    %32 = vector.load %arg3[%c5, %c0_33, %c0_34] : memref<9x32x32xbf16, #tpu.memory_space<vmem>>, vector<1x32x32xbf16>
    %33 = vector.shape_cast %32 : vector<1x32x32xbf16> to vector<32x32xbf16>
    %c0_35 = arith.constant 0 : index
    %c8 = arith.constant 8 : index
    %34 = vector.load %arg8[%c0_35, %c8] : memref<32x50xbf16, #tpu.memory_space<vmem>>, vector<32x36xbf16>
    %cst_36 = arith.constant dense<0.000000e+00> : vector<32x36xf32>
    %35 = tpu.matmul %33, %34, %cst_36 {dimension_numbers = #tpu.dot_dimension_numbers<[1], [0], [0], [1], [0, 0, 1, 1], [], []>} : vector<32x32xbf16>, vector<32x36xbf16>, vector<32x36xf32> -> vector<32x36xf32>
    %36 = arith.addf %31, %35 : vector<32x36xf32>
    %c6_37 = arith.constant 6 : index
    %c0_38 = arith.constant 0 : index
    %c0_39 = arith.constant 0 : index
    %37 = vector.load %arg3[%c6_37, %c0_38, %c0_39] : memref<9x32x32xbf16, #tpu.memory_space<vmem>>, vector<1x32x32xbf16>
    %38 = vector.shape_cast %37 : vector<1x32x32xbf16> to vector<32x32xbf16>
    %c0_40 = arith.constant 0 : index
    %c12 = arith.constant 12 : index
    %39 = vector.load %arg8[%c0_40, %c12] : memref<32x50xbf16, #tpu.memory_space<vmem>>, vector<32x36xbf16>
    %cst_41 = arith.constant dense<0.000000e+00> : vector<32x36xf32>
    %40 = tpu.matmul %38, %39, %cst_41 {dimension_numbers = #tpu.dot_dimension_numbers<[1], [0], [0], [1], [0, 0, 1, 1], [], []>} : vector<32x32xbf16>, vector<32x36xbf16>, vector<32x36xf32> -> vector<32x36xf32>
    %41 = arith.addf %36, %40 : vector<32x36xf32>
    %c7_42 = arith.constant 7 : index
    %c0_43 = arith.constant 0 : index
    %c0_44 = arith.constant 0 : index
    %42 = vector.load %arg3[%c7_42, %c0_43, %c0_44] : memref<9x32x32xbf16, #tpu.memory_space<vmem>>, vector<1x32x32xbf16>
    %43 = vector.shape_cast %42 : vector<1x32x32xbf16> to vector<32x32xbf16>
    %c0_45 = arith.constant 0 : index
    %c13 = arith.constant 13 : index
    %44 = vector.load %arg8[%c0_45, %c13] : memref<32x50xbf16, #tpu.memory_space<vmem>>, vector<32x36xbf16>
    %cst_46 = arith.constant dense<0.000000e+00> : vector<32x36xf32>
    %45 = tpu.matmul %43, %44, %cst_46 {dimension_numbers = #tpu.dot_dimension_numbers<[1], [0], [0], [1], [0, 0, 1, 1], [], []>} : vector<32x32xbf16>, vector<32x36xbf16>, vector<32x36xf32> -> vector<32x36xf32>
    %46 = arith.addf %41, %45 : vector<32x36xf32>
    %c8_47 = arith.constant 8 : index
    %c0_48 = arith.constant 0 : index
    %c0_49 = arith.constant 0 : index
    %47 = vector.load %arg3[%c8_47, %c0_48, %c0_49] : memref<9x32x32xbf16, #tpu.memory_space<vmem>>, vector<1x32x32xbf16>
    %48 = vector.shape_cast %47 : vector<1x32x32xbf16> to vector<32x32xbf16>
    %c0_50 = arith.constant 0 : index
    %c14 = arith.constant 14 : index
    %49 = vector.load %arg8[%c0_50, %c14] : memref<32x50xbf16, #tpu.memory_space<vmem>>, vector<32x36xbf16>
    %cst_51 = arith.constant dense<0.000000e+00> : vector<32x36xf32>
    %50 = tpu.matmul %48, %49, %cst_51 {dimension_numbers = #tpu.dot_dimension_numbers<[1], [0], [0], [1], [0, 0, 1, 1], [], []>} : vector<32x32xbf16>, vector<32x36xbf16>, vector<32x36xf32> -> vector<32x36xf32>
    %51 = arith.addf %46, %50 : vector<32x36xf32>
    %c0_52 = arith.constant 0 : index
    %c0_53 = arith.constant 0 : index
    %52 = vector.load %arg4[%c0_52, %c0_53] : memref<32x1xf32, #tpu.memory_space<vmem>>, vector<32x1xf32>
    %53 = vector.broadcast %52 : vector<32x1xf32> to vector<32x36xf32>
    %54 = arith.addf %51, %53 : vector<32x36xf32>
    %cst_54 = arith.constant 0.000000e+00 : f32
    %55 = vector.broadcast %cst_54 : f32 to vector<32x36xf32>
    %56 = arith.cmpf oge, %54, %55 : vector<32x36xf32>
    %cst_55 = arith.constant 0.00999999977 : f32
    %57 = vector.broadcast %cst_55 : f32 to vector<32x36xf32>
    %58 = arith.mulf %57, %54 : vector<32x36xf32>
    %59 = arith.select %56, %54, %58 : vector<32x36xi1>, vector<32x36xf32>
    %60 = vector.broadcast %2 : vector<1x36xf32> to vector<32x36xf32>
    %61 = arith.mulf %59, %60 : vector<32x36xf32>
    %cst_56 = arith.constant 0.000000e+00 : bf16
    %62 = vector.broadcast %cst_56 : bf16 to vector<32x50xbf16>
    %c0_57 = arith.constant 0 : index
    %c0_58 = arith.constant 0 : index
    %63 = vector.load %arg9[%c0_57, %c0_58] : memref<32x50xbf16, #tpu.memory_space<vmem>>, vector<32x50xbf16>
    tpu.vector_store %arg9[%c0_57, %c0_58], %62 {strides = array<i32>} : memref<32x50xbf16, #tpu.memory_space<vmem>>, vector<32x50xbf16>,
    %64 = arith.truncf %61 : vector<32x36xf32> to vector<32x36xbf16>
    %c0_59 = arith.constant 0 : index
    %c7_60 = arith.constant 7 : index
    %65 = vector.load %arg9[%c0_59, %c7_60] : memref<32x50xbf16, #tpu.memory_space<vmem>>, vector<32x36xbf16>
    tpu.vector_store %arg9[%c0_59, %c7_60], %64 {strides = array<i32>} : memref<32x50xbf16, #tpu.memory_space<vmem>>, vector<32x36xbf16>,
    %cst_61 = arith.constant 0.000000e+00 : f32
    %66 = vector.broadcast %cst_61 : f32 to vector<32x36xf32>
    %c0_62 = arith.constant 0 : index
    %c0_63 = arith.constant 0 : index
    %c0_64 = arith.constant 0 : index
    %67 = vector.load %arg5[%c0_62, %c0_63, %c0_64] : memref<9x32x32xbf16, #tpu.memory_space<vmem>>, vector<1x32x32xbf16>
    %68 = vector.shape_cast %67 : vector<1x32x32xbf16> to vector<32x32xbf16>
    %c0_65 = arith.constant 0 : index
    %c0_66 = arith.constant 0 : index
    %69 = vector.load %arg9[%c0_65, %c0_66] : memref<32x50xbf16, #tpu.memory_space<vmem>>, vector<32x36xbf16>
    %cst_67 = arith.constant dense<0.000000e+00> : vector<32x36xf32>
    %70 = tpu.matmul %68, %69, %cst_67 {dimension_numbers = #tpu.dot_dimension_numbers<[1], [0], [0], [1], [0, 0, 1, 1], [], []>} : vector<32x32xbf16>, vector<32x36xbf16>, vector<32x36xf32> -> vector<32x36xf32>
    %71 = arith.addf %66, %70 : vector<32x36xf32>
    %c1_68 = arith.constant 1 : index
    %c0_69 = arith.constant 0 : index
    %c0_70 = arith.constant 0 : index
    %72 = vector.load %arg5[%c1_68, %c0_69, %c0_70] : memref<9x32x32xbf16, #tpu.memory_space<vmem>>, vector<1x32x32xbf16>
    %73 = vector.shape_cast %72 : vector<1x32x32xbf16> to vector<32x32xbf16>
    %c0_71 = arith.constant 0 : index
    %c1_72 = arith.constant 1 : index
    %74 = vector.load %arg9[%c0_71, %c1_72] : memref<32x50xbf16, #tpu.memory_space<vmem>>, vector<32x36xbf16>
    %cst_73 = arith.constant dense<0.000000e+00> : vector<32x36xf32>
    %75 = tpu.matmul %73, %74, %cst_73 {dimension_numbers = #tpu.dot_dimension_numbers<[1], [0], [0], [1], [0, 0, 1, 1], [], []>} : vector<32x32xbf16>, vector<32x36xbf16>, vector<32x36xf32> -> vector<32x36xf32>
    %76 = arith.addf %71, %75 : vector<32x36xf32>
    %c2_74 = arith.constant 2 : index
    %c0_75 = arith.constant 0 : index
    %c0_76 = arith.constant 0 : index
    %77 = vector.load %arg5[%c2_74, %c0_75, %c0_76] : memref<9x32x32xbf16, #tpu.memory_space<vmem>>, vector<1x32x32xbf16>
    %78 = vector.shape_cast %77 : vector<1x32x32xbf16> to vector<32x32xbf16>
    %c0_77 = arith.constant 0 : index
    %c2_78 = arith.constant 2 : index
    %79 = vector.load %arg9[%c0_77, %c2_78] : memref<32x50xbf16, #tpu.memory_space<vmem>>, vector<32x36xbf16>
    %cst_79 = arith.constant dense<0.000000e+00> : vector<32x36xf32>
    %80 = tpu.matmul %78, %79, %cst_79 {dimension_numbers = #tpu.dot_dimension_numbers<[1], [0], [0], [1], [0, 0, 1, 1], [], []>} : vector<32x32xbf16>, vector<32x36xbf16>, vector<32x36xf32> -> vector<32x36xf32>
    %81 = arith.addf %76, %80 : vector<32x36xf32>
    %c3_80 = arith.constant 3 : index
    %c0_81 = arith.constant 0 : index
    %c0_82 = arith.constant 0 : index
    %82 = vector.load %arg5[%c3_80, %c0_81, %c0_82] : memref<9x32x32xbf16, #tpu.memory_space<vmem>>, vector<1x32x32xbf16>
    %83 = vector.shape_cast %82 : vector<1x32x32xbf16> to vector<32x32xbf16>
    %c0_83 = arith.constant 0 : index
    %c6_84 = arith.constant 6 : index
    %84 = vector.load %arg9[%c0_83, %c6_84] : memref<32x50xbf16, #tpu.memory_space<vmem>>, vector<32x36xbf16>
    %cst_85 = arith.constant dense<0.000000e+00> : vector<32x36xf32>
    %85 = tpu.matmul %83, %84, %cst_85 {dimension_numbers = #tpu.dot_dimension_numbers<[1], [0], [0], [1], [0, 0, 1, 1], [], []>} : vector<32x32xbf16>, vector<32x36xbf16>, vector<32x36xf32> -> vector<32x36xf32>
    %86 = arith.addf %81, %85 : vector<32x36xf32>
    %c4_86 = arith.constant 4 : index
    %c0_87 = arith.constant 0 : index
    %c0_88 = arith.constant 0 : index
    %87 = vector.load %arg5[%c4_86, %c0_87, %c0_88] : memref<9x32x32xbf16, #tpu.memory_space<vmem>>, vector<1x32x32xbf16>
    %88 = vector.shape_cast %87 : vector<1x32x32xbf16> to vector<32x32xbf16>
    %c0_89 = arith.constant 0 : index
    %c7_90 = arith.constant 7 : index
    %89 = vector.load %arg9[%c0_89, %c7_90] : memref<32x50xbf16, #tpu.memory_space<vmem>>, vector<32x36xbf16>
    %cst_91 = arith.constant dense<0.000000e+00> : vector<32x36xf32>
    %90 = tpu.matmul %88, %89, %cst_91 {dimension_numbers = #tpu.dot_dimension_numbers<[1], [0], [0], [1], [0, 0, 1, 1], [], []>} : vector<32x32xbf16>, vector<32x36xbf16>, vector<32x36xf32> -> vector<32x36xf32>
    %91 = arith.addf %86, %90 : vector<32x36xf32>
    %c5_92 = arith.constant 5 : index
    %c0_93 = arith.constant 0 : index
    %c0_94 = arith.constant 0 : index
    %92 = vector.load %arg5[%c5_92, %c0_93, %c0_94] : memref<9x32x32xbf16, #tpu.memory_space<vmem>>, vector<1x32x32xbf16>
    %93 = vector.shape_cast %92 : vector<1x32x32xbf16> to vector<32x32xbf16>
    %c0_95 = arith.constant 0 : index
    %c8_96 = arith.constant 8 : index
    %94 = vector.load %arg9[%c0_95, %c8_96] : memref<32x50xbf16, #tpu.memory_space<vmem>>, vector<32x36xbf16>
    %cst_97 = arith.constant dense<0.000000e+00> : vector<32x36xf32>
    %95 = tpu.matmul %93, %94, %cst_97 {dimension_numbers = #tpu.dot_dimension_numbers<[1], [0], [0], [1], [0, 0, 1, 1], [], []>} : vector<32x32xbf16>, vector<32x36xbf16>, vector<32x36xf32> -> vector<32x36xf32>
    %96 = arith.addf %91, %95 : vector<32x36xf32>
    %c6_98 = arith.constant 6 : index
    %c0_99 = arith.constant 0 : index
    %c0_100 = arith.constant 0 : index
    %97 = vector.load %arg5[%c6_98, %c0_99, %c0_100] : memref<9x32x32xbf16, #tpu.memory_space<vmem>>, vector<1x32x32xbf16>
    %98 = vector.shape_cast %97 : vector<1x32x32xbf16> to vector<32x32xbf16>
    %c0_101 = arith.constant 0 : index
    %c12_102 = arith.constant 12 : index
    %99 = vector.load %arg9[%c0_101, %c12_102] : memref<32x50xbf16, #tpu.memory_space<vmem>>, vector<32x36xbf16>
    %cst_103 = arith.constant dense<0.000000e+00> : vector<32x36xf32>
    %100 = tpu.matmul %98, %99, %cst_103 {dimension_numbers = #tpu.dot_dimension_numbers<[1], [0], [0], [1], [0, 0, 1, 1], [], []>} : vector<32x32xbf16>, vector<32x36xbf16>, vector<32x36xf32> -> vector<32x36xf32>
    %101 = arith.addf %96, %100 : vector<32x36xf32>
    %c7_104 = arith.constant 7 : index
    %c0_105 = arith.constant 0 : index
    %c0_106 = arith.constant 0 : index
    %102 = vector.load %arg5[%c7_104, %c0_105, %c0_106] : memref<9x32x32xbf16, #tpu.memory_space<vmem>>, vector<1x32x32xbf16>
    %103 = vector.shape_cast %102 : vector<1x32x32xbf16> to vector<32x32xbf16>
    %c0_107 = arith.constant 0 : index
    %c13_108 = arith.constant 13 : index
    %104 = vector.load %arg9[%c0_107, %c13_108] : memref<32x50xbf16, #tpu.memory_space<vmem>>, vector<32x36xbf16>
    %cst_109 = arith.constant dense<0.000000e+00> : vector<32x36xf32>
    %105 = tpu.matmul %103, %104, %cst_109 {dimension_numbers = #tpu.dot_dimension_numbers<[1], [0], [0], [1], [0, 0, 1, 1], [], []>} : vector<32x32xbf16>, vector<32x36xbf16>, vector<32x36xf32> -> vector<32x36xf32>
    %106 = arith.addf %101, %105 : vector<32x36xf32>
    %c8_110 = arith.constant 8 : index
    %c0_111 = arith.constant 0 : index
    %c0_112 = arith.constant 0 : index
    %107 = vector.load %arg5[%c8_110, %c0_111, %c0_112] : memref<9x32x32xbf16, #tpu.memory_space<vmem>>, vector<1x32x32xbf16>
    %108 = vector.shape_cast %107 : vector<1x32x32xbf16> to vector<32x32xbf16>
    %c0_113 = arith.constant 0 : index
    %c14_114 = arith.constant 14 : index
    %109 = vector.load %arg9[%c0_113, %c14_114] : memref<32x50xbf16, #tpu.memory_space<vmem>>, vector<32x36xbf16>
    %cst_115 = arith.constant dense<0.000000e+00> : vector<32x36xf32>
    %110 = tpu.matmul %108, %109, %cst_115 {dimension_numbers = #tpu.dot_dimension_numbers<[1], [0], [0], [1], [0, 0, 1, 1], [], []>} : vector<32x32xbf16>, vector<32x36xbf16>, vector<32x36xf32> -> vector<32x36xf32>
    %111 = arith.addf %106, %110 : vector<32x36xf32>
    %c0_116 = arith.constant 0 : index
    %c0_117 = arith.constant 0 : index
    %112 = vector.load %arg6[%c0_116, %c0_117] : memref<32x1xf32, #tpu.memory_space<vmem>>, vector<32x1xf32>
    %113 = vector.broadcast %112 : vector<32x1xf32> to vector<32x36xf32>
    %114 = arith.addf %111, %113 : vector<32x36xf32>
    %cst_118 = arith.constant 0.000000e+00 : f32
    %115 = vector.broadcast %cst_118 : f32 to vector<32x36xf32>
    %116 = arith.cmpf oge, %114, %115 : vector<32x36xf32>
    %cst_119 = arith.constant 0.00999999977 : f32
    %117 = vector.broadcast %cst_119 : f32 to vector<32x36xf32>
    %118 = arith.mulf %117, %114 : vector<32x36xf32>
    %119 = arith.select %116, %114, %118 : vector<32x36xi1>, vector<32x36xf32>
    %120 = vector.broadcast %2 : vector<1x36xf32> to vector<32x36xf32>
    %121 = arith.mulf %119, %120 : vector<32x36xf32>
    %122 = arith.extf %1 : vector<32x36xbf16> to vector<32x36xf32>
    %123 = arith.addf %121, %122 : vector<32x36xf32>
    %124 = arith.truncf %123 : vector<32x36xf32> to vector<32x36xbf16>
    %c0_120 = arith.constant 0 : index
    %c0_121 = arith.constant 0 : index
    %c0_122 = arith.constant 0 : index
    %125 = vector.load %arg7[%c0_120, %c0_121, %c0_122] : memref<1x32x36xbf16, #tpu.memory_space<vmem>>, vector<1x32x36xbf16>
    %126 = vector.shape_cast %125 : vector<1x32x36xbf16> to vector<32x36xbf16>
    %127 = vector.shape_cast %124 : vector<32x36xbf16> to vector<1x32x36xbf16>
    tpu.vector_store %arg7[%c0_120, %c0_121, %c0_122], %127 {strides = array<i32>} : memref<1x32x36xbf16, #tpu.memory_space<vmem>>, vector<1x32x36xbf16>,
    return
  }
  func.func @transform_0(%arg0: i32) -> (i32, i32, i32) {
    %c0_i32 = arith.constant 0 : i32
    %c0_i32_0 = arith.constant 0 : i32
    %c0_i32_1 = arith.constant 0 : i32
    return %arg0, %c0_i32, %c0_i32_0 : i32, i32, i32
  }
  func.func @transform_1(%arg0: i32) -> (i32, i32) {
    %c0_i32 = arith.constant 0 : i32
    %c0_i32_0 = arith.constant 0 : i32
    %c0_i32_1 = arith.constant 0 : i32
    return %c0_i32, %c0_i32_0 : i32, i32
  }
  func.func @transform_2(%arg0: i32) -> (i32, i32, i32) {
    %c0_i32 = arith.constant 0 : i32
    %c0_i32_0 = arith.constant 0 : i32
    %c0_i32_1 = arith.constant 0 : i32
    %c0_i32_2 = arith.constant 0 : i32
    return %c0_i32, %c0_i32_0, %c0_i32_1 : i32, i32, i32
  }
  func.func @transform_3(%arg0: i32) -> (i32, i32) {
    %c0_i32 = arith.constant 0 : i32
    %c0_i32_0 = arith.constant 0 : i32
    %c0_i32_1 = arith.constant 0 : i32
    return %c0_i32, %c0_i32_0 : i32, i32
  }
  func.func @transform_4(%arg0: i32) -> (i32, i32, i32) {
    %c0_i32 = arith.constant 0 : i32
    %c0_i32_0 = arith.constant 0 : i32
    %c0_i32_1 = arith.constant 0 : i32
    %c0_i32_2 = arith.constant 0 : i32
    return %c0_i32, %c0_i32_0, %c0_i32_1 : i32, i32, i32
  }
  func.func @transform_5(%arg0: i32) -> (i32, i32) {
    %c0_i32 = arith.constant 0 : i32
    %c0_i32_0 = arith.constant 0 : i32
    %c0_i32_1 = arith.constant 0 : i32
    return %c0_i32, %c0_i32_0 : i32, i32
  }
  func.func @transform_6(%arg0: i32) -> (i32, i32, i32) {
    %c0_i32 = arith.constant 0 : i32
    %c0_i32_0 = arith.constant 0 : i32
    %c0_i32_1 = arith.constant 0 : i32
    return %arg0, %c0_i32, %c0_i32_0 : i32, i32, i32
  }
}

module attributes {stable_mosaic.version = 11 : i64} {
  func.func @kernel(%arg0: i32, %arg1: memref<1x32x16xbf16, #tpu.memory_space<vmem>>, %arg2: memref<1x16xf32, #tpu.memory_space<vmem>>, %arg3: memref<9x32x32xbf16, #tpu.memory_space<vmem>>, %arg4: memref<32x1xf32, #tpu.memory_space<vmem>>, %arg5: memref<9x32x32xbf16, #tpu.memory_space<vmem>>, %arg6: memref<32x1xf32, #tpu.memory_space<vmem>>, %arg7: memref<1x32x16xbf16, #tpu.memory_space<vmem>>, %arg8: memref<32x26xbf16, #tpu.memory_space<vmem>>, %arg9: memref<32x26xbf16, #tpu.memory_space<vmem>>) attributes {dimension_semantics = [#tpu.dimension_semantics<parallel>], iteration_bounds = array<i64: 2>, scalar_prefetch = 0 : i64, scratch_operands = 2 : i64, tpu.core_type = #tpu.core_type<tc>, window_params = [{transform_indices = @transform_0, window_bounds = array<i64: 1, 32, 16>}, {pipeline_mode = #tpu.pipeline_mode<synchronous>, transform_indices = @transform_1, window_bounds = array<i64: 1, 16>}, {pipeline_mode = #tpu.pipeline_mode<synchronous>, transform_indices = @transform_2, window_bounds = array<i64: 9, 32, 32>}, {pipeline_mode = #tpu.pipeline_mode<synchronous>, transform_indices = @transform_3, window_bounds = array<i64: 32, 1>}, {pipeline_mode = #tpu.pipeline_mode<synchronous>, transform_indices = @transform_4, window_bounds = array<i64: 9, 32, 32>}, {pipeline_mode = #tpu.pipeline_mode<synchronous>, transform_indices = @transform_5, window_bounds = array<i64: 32, 1>}, {transform_indices = @transform_6, window_bounds = array<i64: 1, 32, 16>}]} {
    %c0 = arith.constant 0 : index
    %c0_0 = arith.constant 0 : index
    %c0_1 = arith.constant 0 : index
    %0 = vector.load %arg1[%c0, %c0_0, %c0_1] : memref<1x32x16xbf16, #tpu.memory_space<vmem>>, vector<1x32x16xbf16>
    %1 = vector.shape_cast %0 : vector<1x32x16xbf16> to vector<32x16xbf16>
    %c0_2 = arith.constant 0 : index
    %c0_3 = arith.constant 0 : index
    %2 = vector.load %arg2[%c0_2, %c0_3] : memref<1x16xf32, #tpu.memory_space<vmem>>, vector<1x16xf32>
    %cst = arith.constant 0.000000e+00 : bf16
    %3 = vector.broadcast %cst : bf16 to vector<32x26xbf16>
    %c0_4 = arith.constant 0 : index
    %c0_5 = arith.constant 0 : index
    %4 = vector.load %arg8[%c0_4, %c0_5] : memref<32x26xbf16, #tpu.memory_space<vmem>>, vector<32x26xbf16>
    tpu.vector_store %arg8[%c0_4, %c0_5], %3 {strides = array<i32>} : memref<32x26xbf16, #tpu.memory_space<vmem>>, vector<32x26xbf16>,
    %c0_6 = arith.constant 0 : index
    %c5 = arith.constant 5 : index
    %5 = vector.load %arg8[%c0_6, %c5] : memref<32x26xbf16, #tpu.memory_space<vmem>>, vector<32x16xbf16>
    tpu.vector_store %arg8[%c0_6, %c5], %1 {strides = array<i32>} : memref<32x26xbf16, #tpu.memory_space<vmem>>, vector<32x16xbf16>,
    %cst_7 = arith.constant 0.000000e+00 : f32
    %6 = vector.broadcast %cst_7 : f32 to vector<32x16xf32>
    %c0_8 = arith.constant 0 : index
    %c0_9 = arith.constant 0 : index
    %c0_10 = arith.constant 0 : index
    %7 = vector.load %arg3[%c0_8, %c0_9, %c0_10] : memref<9x32x32xbf16, #tpu.memory_space<vmem>>, vector<1x32x32xbf16>
    %8 = vector.shape_cast %7 : vector<1x32x32xbf16> to vector<32x32xbf16>
    %c0_11 = arith.constant 0 : index
    %c0_12 = arith.constant 0 : index
    %9 = vector.load %arg8[%c0_11, %c0_12] : memref<32x26xbf16, #tpu.memory_space<vmem>>, vector<32x16xbf16>
    %cst_13 = arith.constant dense<0.000000e+00> : vector<32x16xf32>
    %10 = tpu.matmul %8, %9, %cst_13 {dimension_numbers = #tpu.dot_dimension_numbers<[1], [0], [0], [1], [0, 0, 1, 1], [], []>} : vector<32x32xbf16>, vector<32x16xbf16>, vector<32x16xf32> -> vector<32x16xf32>
    %11 = arith.addf %6, %10 : vector<32x16xf32>
    %c1 = arith.constant 1 : index
    %c0_14 = arith.constant 0 : index
    %c0_15 = arith.constant 0 : index
    %12 = vector.load %arg3[%c1, %c0_14, %c0_15] : memref<9x32x32xbf16, #tpu.memory_space<vmem>>, vector<1x32x32xbf16>
    %13 = vector.shape_cast %12 : vector<1x32x32xbf16> to vector<32x32xbf16>
    %c0_16 = arith.constant 0 : index
    %c1_17 = arith.constant 1 : index
    %14 = vector.load %arg8[%c0_16, %c1_17] : memref<32x26xbf16, #tpu.memory_space<vmem>>, vector<32x16xbf16>
    %cst_18 = arith.constant dense<0.000000e+00> : vector<32x16xf32>
    %15 = tpu.matmul %13, %14, %cst_18 {dimension_numbers = #tpu.dot_dimension_numbers<[1], [0], [0], [1], [0, 0, 1, 1], [], []>} : vector<32x32xbf16>, vector<32x16xbf16>, vector<32x16xf32> -> vector<32x16xf32>
    %16 = arith.addf %11, %15 : vector<32x16xf32>
    %c2 = arith.constant 2 : index
    %c0_19 = arith.constant 0 : index
    %c0_20 = arith.constant 0 : index
    %17 = vector.load %arg3[%c2, %c0_19, %c0_20] : memref<9x32x32xbf16, #tpu.memory_space<vmem>>, vector<1x32x32xbf16>
    %18 = vector.shape_cast %17 : vector<1x32x32xbf16> to vector<32x32xbf16>
    %c0_21 = arith.constant 0 : index
    %c2_22 = arith.constant 2 : index
    %19 = vector.load %arg8[%c0_21, %c2_22] : memref<32x26xbf16, #tpu.memory_space<vmem>>, vector<32x16xbf16>
    %cst_23 = arith.constant dense<0.000000e+00> : vector<32x16xf32>
    %20 = tpu.matmul %18, %19, %cst_23 {dimension_numbers = #tpu.dot_dimension_numbers<[1], [0], [0], [1], [0, 0, 1, 1], [], []>} : vector<32x32xbf16>, vector<32x16xbf16>, vector<32x16xf32> -> vector<32x16xf32>
    %21 = arith.addf %16, %20 : vector<32x16xf32>
    %c3 = arith.constant 3 : index
    %c0_24 = arith.constant 0 : index
    %c0_25 = arith.constant 0 : index
    %22 = vector.load %arg3[%c3, %c0_24, %c0_25] : memref<9x32x32xbf16, #tpu.memory_space<vmem>>, vector<1x32x32xbf16>
    %23 = vector.shape_cast %22 : vector<1x32x32xbf16> to vector<32x32xbf16>
    %c0_26 = arith.constant 0 : index
    %c4 = arith.constant 4 : index
    %24 = vector.load %arg8[%c0_26, %c4] : memref<32x26xbf16, #tpu.memory_space<vmem>>, vector<32x16xbf16>
    %cst_27 = arith.constant dense<0.000000e+00> : vector<32x16xf32>
    %25 = tpu.matmul %23, %24, %cst_27 {dimension_numbers = #tpu.dot_dimension_numbers<[1], [0], [0], [1], [0, 0, 1, 1], [], []>} : vector<32x32xbf16>, vector<32x16xbf16>, vector<32x16xf32> -> vector<32x16xf32>
    %26 = arith.addf %21, %25 : vector<32x16xf32>
    %c4_28 = arith.constant 4 : index
    %c0_29 = arith.constant 0 : index
    %c0_30 = arith.constant 0 : index
    %27 = vector.load %arg3[%c4_28, %c0_29, %c0_30] : memref<9x32x32xbf16, #tpu.memory_space<vmem>>, vector<1x32x32xbf16>
    %28 = vector.shape_cast %27 : vector<1x32x32xbf16> to vector<32x32xbf16>
    %c0_31 = arith.constant 0 : index
    %c5_32 = arith.constant 5 : index
    %29 = vector.load %arg8[%c0_31, %c5_32] : memref<32x26xbf16, #tpu.memory_space<vmem>>, vector<32x16xbf16>
    %cst_33 = arith.constant dense<0.000000e+00> : vector<32x16xf32>
    %30 = tpu.matmul %28, %29, %cst_33 {dimension_numbers = #tpu.dot_dimension_numbers<[1], [0], [0], [1], [0, 0, 1, 1], [], []>} : vector<32x32xbf16>, vector<32x16xbf16>, vector<32x16xf32> -> vector<32x16xf32>
    %31 = arith.addf %26, %30 : vector<32x16xf32>
    %c5_34 = arith.constant 5 : index
    %c0_35 = arith.constant 0 : index
    %c0_36 = arith.constant 0 : index
    %32 = vector.load %arg3[%c5_34, %c0_35, %c0_36] : memref<9x32x32xbf16, #tpu.memory_space<vmem>>, vector<1x32x32xbf16>
    %33 = vector.shape_cast %32 : vector<1x32x32xbf16> to vector<32x32xbf16>
    %c0_37 = arith.constant 0 : index
    %c6 = arith.constant 6 : index
    %34 = vector.load %arg8[%c0_37, %c6] : memref<32x26xbf16, #tpu.memory_space<vmem>>, vector<32x16xbf16>
    %cst_38 = arith.constant dense<0.000000e+00> : vector<32x16xf32>
    %35 = tpu.matmul %33, %34, %cst_38 {dimension_numbers = #tpu.dot_dimension_numbers<[1], [0], [0], [1], [0, 0, 1, 1], [], []>} : vector<32x32xbf16>, vector<32x16xbf16>, vector<32x16xf32> -> vector<32x16xf32>
    %36 = arith.addf %31, %35 : vector<32x16xf32>
    %c6_39 = arith.constant 6 : index
    %c0_40 = arith.constant 0 : index
    %c0_41 = arith.constant 0 : index
    %37 = vector.load %arg3[%c6_39, %c0_40, %c0_41] : memref<9x32x32xbf16, #tpu.memory_space<vmem>>, vector<1x32x32xbf16>
    %38 = vector.shape_cast %37 : vector<1x32x32xbf16> to vector<32x32xbf16>
    %c0_42 = arith.constant 0 : index
    %c8 = arith.constant 8 : index
    %39 = vector.load %arg8[%c0_42, %c8] : memref<32x26xbf16, #tpu.memory_space<vmem>>, vector<32x16xbf16>
    %cst_43 = arith.constant dense<0.000000e+00> : vector<32x16xf32>
    %40 = tpu.matmul %38, %39, %cst_43 {dimension_numbers = #tpu.dot_dimension_numbers<[1], [0], [0], [1], [0, 0, 1, 1], [], []>} : vector<32x32xbf16>, vector<32x16xbf16>, vector<32x16xf32> -> vector<32x16xf32>
    %41 = arith.addf %36, %40 : vector<32x16xf32>
    %c7 = arith.constant 7 : index
    %c0_44 = arith.constant 0 : index
    %c0_45 = arith.constant 0 : index
    %42 = vector.load %arg3[%c7, %c0_44, %c0_45] : memref<9x32x32xbf16, #tpu.memory_space<vmem>>, vector<1x32x32xbf16>
    %43 = vector.shape_cast %42 : vector<1x32x32xbf16> to vector<32x32xbf16>
    %c0_46 = arith.constant 0 : index
    %c9 = arith.constant 9 : index
    %44 = vector.load %arg8[%c0_46, %c9] : memref<32x26xbf16, #tpu.memory_space<vmem>>, vector<32x16xbf16>
    %cst_47 = arith.constant dense<0.000000e+00> : vector<32x16xf32>
    %45 = tpu.matmul %43, %44, %cst_47 {dimension_numbers = #tpu.dot_dimension_numbers<[1], [0], [0], [1], [0, 0, 1, 1], [], []>} : vector<32x32xbf16>, vector<32x16xbf16>, vector<32x16xf32> -> vector<32x16xf32>
    %46 = arith.addf %41, %45 : vector<32x16xf32>
    %c8_48 = arith.constant 8 : index
    %c0_49 = arith.constant 0 : index
    %c0_50 = arith.constant 0 : index
    %47 = vector.load %arg3[%c8_48, %c0_49, %c0_50] : memref<9x32x32xbf16, #tpu.memory_space<vmem>>, vector<1x32x32xbf16>
    %48 = vector.shape_cast %47 : vector<1x32x32xbf16> to vector<32x32xbf16>
    %c0_51 = arith.constant 0 : index
    %c10 = arith.constant 10 : index
    %49 = vector.load %arg8[%c0_51, %c10] : memref<32x26xbf16, #tpu.memory_space<vmem>>, vector<32x16xbf16>
    %cst_52 = arith.constant dense<0.000000e+00> : vector<32x16xf32>
    %50 = tpu.matmul %48, %49, %cst_52 {dimension_numbers = #tpu.dot_dimension_numbers<[1], [0], [0], [1], [0, 0, 1, 1], [], []>} : vector<32x32xbf16>, vector<32x16xbf16>, vector<32x16xf32> -> vector<32x16xf32>
    %51 = arith.addf %46, %50 : vector<32x16xf32>
    %c0_53 = arith.constant 0 : index
    %c0_54 = arith.constant 0 : index
    %52 = vector.load %arg4[%c0_53, %c0_54] : memref<32x1xf32, #tpu.memory_space<vmem>>, vector<32x1xf32>
    %53 = vector.broadcast %52 : vector<32x1xf32> to vector<32x16xf32>
    %54 = arith.addf %51, %53 : vector<32x16xf32>
    %cst_55 = arith.constant 0.000000e+00 : f32
    %55 = vector.broadcast %cst_55 : f32 to vector<32x16xf32>
    %56 = arith.cmpf oge, %54, %55 : vector<32x16xf32>
    %cst_56 = arith.constant 0.00999999977 : f32
    %57 = vector.broadcast %cst_56 : f32 to vector<32x16xf32>
    %58 = arith.mulf %57, %54 : vector<32x16xf32>
    %59 = arith.select %56, %54, %58 : vector<32x16xi1>, vector<32x16xf32>
    %60 = vector.broadcast %2 : vector<1x16xf32> to vector<32x16xf32>
    %61 = arith.mulf %59, %60 : vector<32x16xf32>
    %cst_57 = arith.constant 0.000000e+00 : bf16
    %62 = vector.broadcast %cst_57 : bf16 to vector<32x26xbf16>
    %c0_58 = arith.constant 0 : index
    %c0_59 = arith.constant 0 : index
    %63 = vector.load %arg9[%c0_58, %c0_59] : memref<32x26xbf16, #tpu.memory_space<vmem>>, vector<32x26xbf16>
    tpu.vector_store %arg9[%c0_58, %c0_59], %62 {strides = array<i32>} : memref<32x26xbf16, #tpu.memory_space<vmem>>, vector<32x26xbf16>,
    %64 = arith.truncf %61 : vector<32x16xf32> to vector<32x16xbf16>
    %c0_60 = arith.constant 0 : index
    %c5_61 = arith.constant 5 : index
    %65 = vector.load %arg9[%c0_60, %c5_61] : memref<32x26xbf16, #tpu.memory_space<vmem>>, vector<32x16xbf16>
    tpu.vector_store %arg9[%c0_60, %c5_61], %64 {strides = array<i32>} : memref<32x26xbf16, #tpu.memory_space<vmem>>, vector<32x16xbf16>,
    %cst_62 = arith.constant 0.000000e+00 : f32
    %66 = vector.broadcast %cst_62 : f32 to vector<32x16xf32>
    %c0_63 = arith.constant 0 : index
    %c0_64 = arith.constant 0 : index
    %c0_65 = arith.constant 0 : index
    %67 = vector.load %arg5[%c0_63, %c0_64, %c0_65] : memref<9x32x32xbf16, #tpu.memory_space<vmem>>, vector<1x32x32xbf16>
    %68 = vector.shape_cast %67 : vector<1x32x32xbf16> to vector<32x32xbf16>
    %c0_66 = arith.constant 0 : index
    %c0_67 = arith.constant 0 : index
    %69 = vector.load %arg9[%c0_66, %c0_67] : memref<32x26xbf16, #tpu.memory_space<vmem>>, vector<32x16xbf16>
    %cst_68 = arith.constant dense<0.000000e+00> : vector<32x16xf32>
    %70 = tpu.matmul %68, %69, %cst_68 {dimension_numbers = #tpu.dot_dimension_numbers<[1], [0], [0], [1], [0, 0, 1, 1], [], []>} : vector<32x32xbf16>, vector<32x16xbf16>, vector<32x16xf32> -> vector<32x16xf32>
    %71 = arith.addf %66, %70 : vector<32x16xf32>
    %c1_69 = arith.constant 1 : index
    %c0_70 = arith.constant 0 : index
    %c0_71 = arith.constant 0 : index
    %72 = vector.load %arg5[%c1_69, %c0_70, %c0_71] : memref<9x32x32xbf16, #tpu.memory_space<vmem>>, vector<1x32x32xbf16>
    %73 = vector.shape_cast %72 : vector<1x32x32xbf16> to vector<32x32xbf16>
    %c0_72 = arith.constant 0 : index
    %c1_73 = arith.constant 1 : index
    %74 = vector.load %arg9[%c0_72, %c1_73] : memref<32x26xbf16, #tpu.memory_space<vmem>>, vector<32x16xbf16>
    %cst_74 = arith.constant dense<0.000000e+00> : vector<32x16xf32>
    %75 = tpu.matmul %73, %74, %cst_74 {dimension_numbers = #tpu.dot_dimension_numbers<[1], [0], [0], [1], [0, 0, 1, 1], [], []>} : vector<32x32xbf16>, vector<32x16xbf16>, vector<32x16xf32> -> vector<32x16xf32>
    %76 = arith.addf %71, %75 : vector<32x16xf32>
    %c2_75 = arith.constant 2 : index
    %c0_76 = arith.constant 0 : index
    %c0_77 = arith.constant 0 : index
    %77 = vector.load %arg5[%c2_75, %c0_76, %c0_77] : memref<9x32x32xbf16, #tpu.memory_space<vmem>>, vector<1x32x32xbf16>
    %78 = vector.shape_cast %77 : vector<1x32x32xbf16> to vector<32x32xbf16>
    %c0_78 = arith.constant 0 : index
    %c2_79 = arith.constant 2 : index
    %79 = vector.load %arg9[%c0_78, %c2_79] : memref<32x26xbf16, #tpu.memory_space<vmem>>, vector<32x16xbf16>
    %cst_80 = arith.constant dense<0.000000e+00> : vector<32x16xf32>
    %80 = tpu.matmul %78, %79, %cst_80 {dimension_numbers = #tpu.dot_dimension_numbers<[1], [0], [0], [1], [0, 0, 1, 1], [], []>} : vector<32x32xbf16>, vector<32x16xbf16>, vector<32x16xf32> -> vector<32x16xf32>
    %81 = arith.addf %76, %80 : vector<32x16xf32>
    %c3_81 = arith.constant 3 : index
    %c0_82 = arith.constant 0 : index
    %c0_83 = arith.constant 0 : index
    %82 = vector.load %arg5[%c3_81, %c0_82, %c0_83] : memref<9x32x32xbf16, #tpu.memory_space<vmem>>, vector<1x32x32xbf16>
    %83 = vector.shape_cast %82 : vector<1x32x32xbf16> to vector<32x32xbf16>
    %c0_84 = arith.constant 0 : index
    %c4_85 = arith.constant 4 : index
    %84 = vector.load %arg9[%c0_84, %c4_85] : memref<32x26xbf16, #tpu.memory_space<vmem>>, vector<32x16xbf16>
    %cst_86 = arith.constant dense<0.000000e+00> : vector<32x16xf32>
    %85 = tpu.matmul %83, %84, %cst_86 {dimension_numbers = #tpu.dot_dimension_numbers<[1], [0], [0], [1], [0, 0, 1, 1], [], []>} : vector<32x32xbf16>, vector<32x16xbf16>, vector<32x16xf32> -> vector<32x16xf32>
    %86 = arith.addf %81, %85 : vector<32x16xf32>
    %c4_87 = arith.constant 4 : index
    %c0_88 = arith.constant 0 : index
    %c0_89 = arith.constant 0 : index
    %87 = vector.load %arg5[%c4_87, %c0_88, %c0_89] : memref<9x32x32xbf16, #tpu.memory_space<vmem>>, vector<1x32x32xbf16>
    %88 = vector.shape_cast %87 : vector<1x32x32xbf16> to vector<32x32xbf16>
    %c0_90 = arith.constant 0 : index
    %c5_91 = arith.constant 5 : index
    %89 = vector.load %arg9[%c0_90, %c5_91] : memref<32x26xbf16, #tpu.memory_space<vmem>>, vector<32x16xbf16>
    %cst_92 = arith.constant dense<0.000000e+00> : vector<32x16xf32>
    %90 = tpu.matmul %88, %89, %cst_92 {dimension_numbers = #tpu.dot_dimension_numbers<[1], [0], [0], [1], [0, 0, 1, 1], [], []>} : vector<32x32xbf16>, vector<32x16xbf16>, vector<32x16xf32> -> vector<32x16xf32>
    %91 = arith.addf %86, %90 : vector<32x16xf32>
    %c5_93 = arith.constant 5 : index
    %c0_94 = arith.constant 0 : index
    %c0_95 = arith.constant 0 : index
    %92 = vector.load %arg5[%c5_93, %c0_94, %c0_95] : memref<9x32x32xbf16, #tpu.memory_space<vmem>>, vector<1x32x32xbf16>
    %93 = vector.shape_cast %92 : vector<1x32x32xbf16> to vector<32x32xbf16>
    %c0_96 = arith.constant 0 : index
    %c6_97 = arith.constant 6 : index
    %94 = vector.load %arg9[%c0_96, %c6_97] : memref<32x26xbf16, #tpu.memory_space<vmem>>, vector<32x16xbf16>
    %cst_98 = arith.constant dense<0.000000e+00> : vector<32x16xf32>
    %95 = tpu.matmul %93, %94, %cst_98 {dimension_numbers = #tpu.dot_dimension_numbers<[1], [0], [0], [1], [0, 0, 1, 1], [], []>} : vector<32x32xbf16>, vector<32x16xbf16>, vector<32x16xf32> -> vector<32x16xf32>
    %96 = arith.addf %91, %95 : vector<32x16xf32>
    %c6_99 = arith.constant 6 : index
    %c0_100 = arith.constant 0 : index
    %c0_101 = arith.constant 0 : index
    %97 = vector.load %arg5[%c6_99, %c0_100, %c0_101] : memref<9x32x32xbf16, #tpu.memory_space<vmem>>, vector<1x32x32xbf16>
    %98 = vector.shape_cast %97 : vector<1x32x32xbf16> to vector<32x32xbf16>
    %c0_102 = arith.constant 0 : index
    %c8_103 = arith.constant 8 : index
    %99 = vector.load %arg9[%c0_102, %c8_103] : memref<32x26xbf16, #tpu.memory_space<vmem>>, vector<32x16xbf16>
    %cst_104 = arith.constant dense<0.000000e+00> : vector<32x16xf32>
    %100 = tpu.matmul %98, %99, %cst_104 {dimension_numbers = #tpu.dot_dimension_numbers<[1], [0], [0], [1], [0, 0, 1, 1], [], []>} : vector<32x32xbf16>, vector<32x16xbf16>, vector<32x16xf32> -> vector<32x16xf32>
    %101 = arith.addf %96, %100 : vector<32x16xf32>
    %c7_105 = arith.constant 7 : index
    %c0_106 = arith.constant 0 : index
    %c0_107 = arith.constant 0 : index
    %102 = vector.load %arg5[%c7_105, %c0_106, %c0_107] : memref<9x32x32xbf16, #tpu.memory_space<vmem>>, vector<1x32x32xbf16>
    %103 = vector.shape_cast %102 : vector<1x32x32xbf16> to vector<32x32xbf16>
    %c0_108 = arith.constant 0 : index
    %c9_109 = arith.constant 9 : index
    %104 = vector.load %arg9[%c0_108, %c9_109] : memref<32x26xbf16, #tpu.memory_space<vmem>>, vector<32x16xbf16>
    %cst_110 = arith.constant dense<0.000000e+00> : vector<32x16xf32>
    %105 = tpu.matmul %103, %104, %cst_110 {dimension_numbers = #tpu.dot_dimension_numbers<[1], [0], [0], [1], [0, 0, 1, 1], [], []>} : vector<32x32xbf16>, vector<32x16xbf16>, vector<32x16xf32> -> vector<32x16xf32>
    %106 = arith.addf %101, %105 : vector<32x16xf32>
    %c8_111 = arith.constant 8 : index
    %c0_112 = arith.constant 0 : index
    %c0_113 = arith.constant 0 : index
    %107 = vector.load %arg5[%c8_111, %c0_112, %c0_113] : memref<9x32x32xbf16, #tpu.memory_space<vmem>>, vector<1x32x32xbf16>
    %108 = vector.shape_cast %107 : vector<1x32x32xbf16> to vector<32x32xbf16>
    %c0_114 = arith.constant 0 : index
    %c10_115 = arith.constant 10 : index
    %109 = vector.load %arg9[%c0_114, %c10_115] : memref<32x26xbf16, #tpu.memory_space<vmem>>, vector<32x16xbf16>
    %cst_116 = arith.constant dense<0.000000e+00> : vector<32x16xf32>
    %110 = tpu.matmul %108, %109, %cst_116 {dimension_numbers = #tpu.dot_dimension_numbers<[1], [0], [0], [1], [0, 0, 1, 1], [], []>} : vector<32x32xbf16>, vector<32x16xbf16>, vector<32x16xf32> -> vector<32x16xf32>
    %111 = arith.addf %106, %110 : vector<32x16xf32>
    %c0_117 = arith.constant 0 : index
    %c0_118 = arith.constant 0 : index
    %112 = vector.load %arg6[%c0_117, %c0_118] : memref<32x1xf32, #tpu.memory_space<vmem>>, vector<32x1xf32>
    %113 = vector.broadcast %112 : vector<32x1xf32> to vector<32x16xf32>
    %114 = arith.addf %111, %113 : vector<32x16xf32>
    %cst_119 = arith.constant 0.000000e+00 : f32
    %115 = vector.broadcast %cst_119 : f32 to vector<32x16xf32>
    %116 = arith.cmpf oge, %114, %115 : vector<32x16xf32>
    %cst_120 = arith.constant 0.00999999977 : f32
    %117 = vector.broadcast %cst_120 : f32 to vector<32x16xf32>
    %118 = arith.mulf %117, %114 : vector<32x16xf32>
    %119 = arith.select %116, %114, %118 : vector<32x16xi1>, vector<32x16xf32>
    %120 = vector.broadcast %2 : vector<1x16xf32> to vector<32x16xf32>
    %121 = arith.mulf %119, %120 : vector<32x16xf32>
    %122 = arith.extf %1 : vector<32x16xbf16> to vector<32x16xf32>
    %123 = arith.addf %121, %122 : vector<32x16xf32>
    %124 = arith.truncf %123 : vector<32x16xf32> to vector<32x16xbf16>
    %c0_121 = arith.constant 0 : index
    %c0_122 = arith.constant 0 : index
    %c0_123 = arith.constant 0 : index
    %125 = vector.load %arg7[%c0_121, %c0_122, %c0_123] : memref<1x32x16xbf16, #tpu.memory_space<vmem>>, vector<1x32x16xbf16>
    %126 = vector.shape_cast %125 : vector<1x32x16xbf16> to vector<32x16xbf16>
    %127 = vector.shape_cast %124 : vector<32x16xbf16> to vector<1x32x16xbf16>
    tpu.vector_store %arg7[%c0_121, %c0_122, %c0_123], %127 {strides = array<i32>} : memref<1x32x16xbf16, #tpu.memory_space<vmem>>, vector<1x32x16xbf16>,
    return
  }
  func.func @transform_0(%arg0: i32) -> (i32, i32, i32) {
    %c0_i32 = arith.constant 0 : i32
    %c0_i32_0 = arith.constant 0 : i32
    %c0_i32_1 = arith.constant 0 : i32
    return %arg0, %c0_i32, %c0_i32_0 : i32, i32, i32
  }
  func.func @transform_1(%arg0: i32) -> (i32, i32) {
    %c0_i32 = arith.constant 0 : i32
    %c0_i32_0 = arith.constant 0 : i32
    %c0_i32_1 = arith.constant 0 : i32
    return %c0_i32, %c0_i32_0 : i32, i32
  }
  func.func @transform_2(%arg0: i32) -> (i32, i32, i32) {
    %c0_i32 = arith.constant 0 : i32
    %c0_i32_0 = arith.constant 0 : i32
    %c0_i32_1 = arith.constant 0 : i32
    %c0_i32_2 = arith.constant 0 : i32
    return %c0_i32, %c0_i32_0, %c0_i32_1 : i32, i32, i32
  }
  func.func @transform_3(%arg0: i32) -> (i32, i32) {
    %c0_i32 = arith.constant 0 : i32
    %c0_i32_0 = arith.constant 0 : i32
    %c0_i32_1 = arith.constant 0 : i32
    return %c0_i32, %c0_i32_0 : i32, i32
  }
  func.func @transform_4(%arg0: i32) -> (i32, i32, i32) {
    %c0_i32 = arith.constant 0 : i32
    %c0_i32_0 = arith.constant 0 : i32
    %c0_i32_1 = arith.constant 0 : i32
    %c0_i32_2 = arith.constant 0 : i32
    return %c0_i32, %c0_i32_0, %c0_i32_1 : i32, i32, i32
  }
  func.func @transform_5(%arg0: i32) -> (i32, i32) {
    %c0_i32 = arith.constant 0 : i32
    %c0_i32_0 = arith.constant 0 : i32
    %c0_i32_1 = arith.constant 0 : i32
    return %c0_i32, %c0_i32_0 : i32, i32
  }
  func.func @transform_6(%arg0: i32) -> (i32, i32, i32) {
    %c0_i32 = arith.constant 0 : i32
    %c0_i32_0 = arith.constant 0 : i32
    %c0_i32_1 = arith.constant 0 : i32
    return %arg0, %c0_i32, %c0_i32_0 : i32, i32, i32
  }
}

module attributes {stable_mosaic.version = 11 : i64} {
  func.func @kernel(%arg0: i32, %arg1: memref<1x4x32x13xbf16, #tpu.memory_space<vmem>>, %arg2: memref<1x16xf32, #tpu.memory_space<vmem>>, %arg3: memref<9x32x32xbf16, #tpu.memory_space<vmem>>, %arg4: memref<32x1xf32, #tpu.memory_space<vmem>>, %arg5: memref<9x32x32xbf16, #tpu.memory_space<vmem>>, %arg6: memref<32x1xf32, #tpu.memory_space<vmem>>, %arg7: memref<32x32xf32, #tpu.memory_space<vmem>>, %arg8: memref<32x1xf32, #tpu.memory_space<vmem>>, %arg9: memref<32x32xbf16, #tpu.memory_space<vmem>>, %arg10: memref<32x1xf32, #tpu.memory_space<vmem>>, %arg11: memref<1x32x16xbf16, #tpu.memory_space<vmem>>, %arg12: memref<32x9xbf16, #tpu.memory_space<vmem>>, %arg13: memref<32x9xf32, #tpu.memory_space<vmem>>, %arg14: memref<32x26xbf16, #tpu.memory_space<vmem>>, %arg15: memref<32x16xf32, #tpu.memory_space<vmem>>) attributes {dimension_semantics = [#tpu.dimension_semantics<parallel>], iteration_bounds = array<i64: 2>, scalar_prefetch = 0 : i64, scratch_operands = 4 : i64, tpu.core_type = #tpu.core_type<tc>, window_params = [{transform_indices = @transform_0, window_bounds = array<i64: 1, 4, 32, 13>}, {pipeline_mode = #tpu.pipeline_mode<synchronous>, transform_indices = @transform_1, window_bounds = array<i64: 1, 16>}, {pipeline_mode = #tpu.pipeline_mode<synchronous>, transform_indices = @transform_2, window_bounds = array<i64: 9, 32, 32>}, {pipeline_mode = #tpu.pipeline_mode<synchronous>, transform_indices = @transform_3, window_bounds = array<i64: 32, 1>}, {pipeline_mode = #tpu.pipeline_mode<synchronous>, transform_indices = @transform_4, window_bounds = array<i64: 9, 32, 32>}, {pipeline_mode = #tpu.pipeline_mode<synchronous>, transform_indices = @transform_5, window_bounds = array<i64: 32, 1>}, {pipeline_mode = #tpu.pipeline_mode<synchronous>, transform_indices = @transform_6, window_bounds = array<i64: 32, 32>}, {pipeline_mode = #tpu.pipeline_mode<synchronous>, transform_indices = @transform_7, window_bounds = array<i64: 32, 1>}, {pipeline_mode = #tpu.pipeline_mode<synchronous>, transform_indices = @transform_8, window_bounds = array<i64: 32, 32>}, {pipeline_mode = #tpu.pipeline_mode<synchronous>, transform_indices = @transform_9, window_bounds = array<i64: 32, 1>}, {transform_indices = @transform_10, window_bounds = array<i64: 1, 32, 16>}]} {
    %c0 = arith.constant 0 : index
    %c0_0 = arith.constant 0 : index
    %0 = vector.load %arg2[%c0, %c0_0] : memref<1x16xf32, #tpu.memory_space<vmem>>, vector<1x16xf32>
    %cst = arith.constant 0.000000e+00 : f32
    %1 = vector.broadcast %cst : f32 to vector<32x9xf32>
    %c0_1 = arith.constant 0 : index
    %c0_2 = arith.constant 0 : index
    %c0_3 = arith.constant 0 : index
    %2 = vector.load %arg3[%c0_1, %c0_2, %c0_3] : memref<9x32x32xbf16, #tpu.memory_space<vmem>>, vector<1x32x32xbf16>
    %3 = vector.shape_cast %2 : vector<1x32x32xbf16> to vector<32x32xbf16>
    %c0_4 = arith.constant 0 : index
    %c0_5 = arith.constant 0 : index
    %c0_6 = arith.constant 0 : index
    %c0_7 = arith.constant 0 : index
    %4 = vector.load %arg1[%c0_4, %c0_5, %c0_6, %c0_7] : memref<1x4x32x13xbf16, #tpu.memory_space<vmem>>, vector<1x1x32x9xbf16>
    %5 = vector.shape_cast %4 : vector<1x1x32x9xbf16> to vector<32x9xbf16>
    %cst_8 = arith.constant dense<0.000000e+00> : vector<32x9xf32>
    %6 = tpu.matmul %3, %5, %cst_8 {dimension_numbers = #tpu.dot_dimension_numbers<[1], [0], [0], [1], [0, 0, 1, 1], [], []>} : vector<32x32xbf16>, vector<32x9xbf16>, vector<32x9xf32> -> vector<32x9xf32>
    %7 = arith.addf %1, %6 : vector<32x9xf32>
    %c1 = arith.constant 1 : index
    %c0_9 = arith.constant 0 : index
    %c0_10 = arith.constant 0 : index
    %8 = vector.load %arg3[%c1, %c0_9, %c0_10] : memref<9x32x32xbf16, #tpu.memory_space<vmem>>, vector<1x32x32xbf16>
    %9 = vector.shape_cast %8 : vector<1x32x32xbf16> to vector<32x32xbf16>
    %c0_11 = arith.constant 0 : index
    %c1_12 = arith.constant 1 : index
    %c0_13 = arith.constant 0 : index
    %c0_14 = arith.constant 0 : index
    %10 = vector.load %arg1[%c0_11, %c1_12, %c0_13, %c0_14] : memref<1x4x32x13xbf16, #tpu.memory_space<vmem>>, vector<1x1x32x9xbf16>
    %11 = vector.shape_cast %10 : vector<1x1x32x9xbf16> to vector<32x9xbf16>
    %cst_15 = arith.constant dense<0.000000e+00> : vector<32x9xf32>
    %12 = tpu.matmul %9, %11, %cst_15 {dimension_numbers = #tpu.dot_dimension_numbers<[1], [0], [0], [1], [0, 0, 1, 1], [], []>} : vector<32x32xbf16>, vector<32x9xbf16>, vector<32x9xf32> -> vector<32x9xf32>
    %13 = arith.addf %7, %12 : vector<32x9xf32>
    %c2 = arith.constant 2 : index
    %c0_16 = arith.constant 0 : index
    %c0_17 = arith.constant 0 : index
    %14 = vector.load %arg3[%c2, %c0_16, %c0_17] : memref<9x32x32xbf16, #tpu.memory_space<vmem>>, vector<1x32x32xbf16>
    %15 = vector.shape_cast %14 : vector<1x32x32xbf16> to vector<32x32xbf16>
    %c0_18 = arith.constant 0 : index
    %c0_19 = arith.constant 0 : index
    %c0_20 = arith.constant 0 : index
    %c1_21 = arith.constant 1 : index
    %16 = vector.load %arg1[%c0_18, %c0_19, %c0_20, %c1_21] : memref<1x4x32x13xbf16, #tpu.memory_space<vmem>>, vector<1x1x32x9xbf16>
    %17 = vector.shape_cast %16 : vector<1x1x32x9xbf16> to vector<32x9xbf16>
    %cst_22 = arith.constant dense<0.000000e+00> : vector<32x9xf32>
    %18 = tpu.matmul %15, %17, %cst_22 {dimension_numbers = #tpu.dot_dimension_numbers<[1], [0], [0], [1], [0, 0, 1, 1], [], []>} : vector<32x32xbf16>, vector<32x9xbf16>, vector<32x9xf32> -> vector<32x9xf32>
    %19 = arith.addf %13, %18 : vector<32x9xf32>
    %c3 = arith.constant 3 : index
    %c0_23 = arith.constant 0 : index
    %c0_24 = arith.constant 0 : index
    %20 = vector.load %arg3[%c3, %c0_23, %c0_24] : memref<9x32x32xbf16, #tpu.memory_space<vmem>>, vector<1x32x32xbf16>
    %21 = vector.shape_cast %20 : vector<1x32x32xbf16> to vector<32x32xbf16>
    %c0_25 = arith.constant 0 : index
    %c2_26 = arith.constant 2 : index
    %c0_27 = arith.constant 0 : index
    %c0_28 = arith.constant 0 : index
    %22 = vector.load %arg1[%c0_25, %c2_26, %c0_27, %c0_28] : memref<1x4x32x13xbf16, #tpu.memory_space<vmem>>, vector<1x1x32x9xbf16>
    %23 = vector.shape_cast %22 : vector<1x1x32x9xbf16> to vector<32x9xbf16>
    %cst_29 = arith.constant dense<0.000000e+00> : vector<32x9xf32>
    %24 = tpu.matmul %21, %23, %cst_29 {dimension_numbers = #tpu.dot_dimension_numbers<[1], [0], [0], [1], [0, 0, 1, 1], [], []>} : vector<32x32xbf16>, vector<32x9xbf16>, vector<32x9xf32> -> vector<32x9xf32>
    %25 = arith.addf %19, %24 : vector<32x9xf32>
    %c4 = arith.constant 4 : index
    %c0_30 = arith.constant 0 : index
    %c0_31 = arith.constant 0 : index
    %26 = vector.load %arg3[%c4, %c0_30, %c0_31] : memref<9x32x32xbf16, #tpu.memory_space<vmem>>, vector<1x32x32xbf16>
    %27 = vector.shape_cast %26 : vector<1x32x32xbf16> to vector<32x32xbf16>
    %c0_32 = arith.constant 0 : index
    %c3_33 = arith.constant 3 : index
    %c0_34 = arith.constant 0 : index
    %c0_35 = arith.constant 0 : index
    %28 = vector.load %arg1[%c0_32, %c3_33, %c0_34, %c0_35] : memref<1x4x32x13xbf16, #tpu.memory_space<vmem>>, vector<1x1x32x9xbf16>
    %29 = vector.shape_cast %28 : vector<1x1x32x9xbf16> to vector<32x9xbf16>
    %cst_36 = arith.constant dense<0.000000e+00> : vector<32x9xf32>
    %30 = tpu.matmul %27, %29, %cst_36 {dimension_numbers = #tpu.dot_dimension_numbers<[1], [0], [0], [1], [0, 0, 1, 1], [], []>} : vector<32x32xbf16>, vector<32x9xbf16>, vector<32x9xf32> -> vector<32x9xf32>
    %31 = arith.addf %25, %30 : vector<32x9xf32>
    %c5 = arith.constant 5 : index
    %c0_37 = arith.constant 0 : index
    %c0_38 = arith.constant 0 : index
    %32 = vector.load %arg3[%c5, %c0_37, %c0_38] : memref<9x32x32xbf16, #tpu.memory_space<vmem>>, vector<1x32x32xbf16>
    %33 = vector.shape_cast %32 : vector<1x32x32xbf16> to vector<32x32xbf16>
    %c0_39 = arith.constant 0 : index
    %c2_40 = arith.constant 2 : index
    %c0_41 = arith.constant 0 : index
    %c1_42 = arith.constant 1 : index
    %34 = vector.load %arg1[%c0_39, %c2_40, %c0_41, %c1_42] : memref<1x4x32x13xbf16, #tpu.memory_space<vmem>>, vector<1x1x32x9xbf16>
    %35 = vector.shape_cast %34 : vector<1x1x32x9xbf16> to vector<32x9xbf16>
    %cst_43 = arith.constant dense<0.000000e+00> : vector<32x9xf32>
    %36 = tpu.matmul %33, %35, %cst_43 {dimension_numbers = #tpu.dot_dimension_numbers<[1], [0], [0], [1], [0, 0, 1, 1], [], []>} : vector<32x32xbf16>, vector<32x9xbf16>, vector<32x9xf32> -> vector<32x9xf32>
    %37 = arith.addf %31, %36 : vector<32x9xf32>
    %c6 = arith.constant 6 : index
    %c0_44 = arith.constant 0 : index
    %c0_45 = arith.constant 0 : index
    %38 = vector.load %arg3[%c6, %c0_44, %c0_45] : memref<9x32x32xbf16, #tpu.memory_space<vmem>>, vector<1x32x32xbf16>
    %39 = vector.shape_cast %38 : vector<1x32x32xbf16> to vector<32x32xbf16>
    %c0_46 = arith.constant 0 : index
    %c0_47 = arith.constant 0 : index
    %c0_48 = arith.constant 0 : index
    %c3_49 = arith.constant 3 : index
    %40 = vector.load %arg1[%c0_46, %c0_47, %c0_48, %c3_49] : memref<1x4x32x13xbf16, #tpu.memory_space<vmem>>, vector<1x1x32x9xbf16>
    %41 = vector.shape_cast %40 : vector<1x1x32x9xbf16> to vector<32x9xbf16>
    %cst_50 = arith.constant dense<0.000000e+00> : vector<32x9xf32>
    %42 = tpu.matmul %39, %41, %cst_50 {dimension_numbers = #tpu.dot_dimension_numbers<[1], [0], [0], [1], [0, 0, 1, 1], [], []>} : vector<32x32xbf16>, vector<32x9xbf16>, vector<32x9xf32> -> vector<32x9xf32>
    %43 = arith.addf %37, %42 : vector<32x9xf32>
    %c7 = arith.constant 7 : index
    %c0_51 = arith.constant 0 : index
    %c0_52 = arith.constant 0 : index
    %44 = vector.load %arg3[%c7, %c0_51, %c0_52] : memref<9x32x32xbf16, #tpu.memory_space<vmem>>, vector<1x32x32xbf16>
    %45 = vector.shape_cast %44 : vector<1x32x32xbf16> to vector<32x32xbf16>
    %c0_53 = arith.constant 0 : index
    %c1_54 = arith.constant 1 : index
    %c0_55 = arith.constant 0 : index
    %c3_56 = arith.constant 3 : index
    %46 = vector.load %arg1[%c0_53, %c1_54, %c0_55, %c3_56] : memref<1x4x32x13xbf16, #tpu.memory_space<vmem>>, vector<1x1x32x9xbf16>
    %47 = vector.shape_cast %46 : vector<1x1x32x9xbf16> to vector<32x9xbf16>
    %cst_57 = arith.constant dense<0.000000e+00> : vector<32x9xf32>
    %48 = tpu.matmul %45, %47, %cst_57 {dimension_numbers = #tpu.dot_dimension_numbers<[1], [0], [0], [1], [0, 0, 1, 1], [], []>} : vector<32x32xbf16>, vector<32x9xbf16>, vector<32x9xf32> -> vector<32x9xf32>
    %49 = arith.addf %43, %48 : vector<32x9xf32>
    %c8 = arith.constant 8 : index
    %c0_58 = arith.constant 0 : index
    %c0_59 = arith.constant 0 : index
    %50 = vector.load %arg3[%c8, %c0_58, %c0_59] : memref<9x32x32xbf16, #tpu.memory_space<vmem>>, vector<1x32x32xbf16>
    %51 = vector.shape_cast %50 : vector<1x32x32xbf16> to vector<32x32xbf16>
    %c0_60 = arith.constant 0 : index
    %c0_61 = arith.constant 0 : index
    %c0_62 = arith.constant 0 : index
    %c4_63 = arith.constant 4 : index
    %52 = vector.load %arg1[%c0_60, %c0_61, %c0_62, %c4_63] : memref<1x4x32x13xbf16, #tpu.memory_space<vmem>>, vector<1x1x32x9xbf16>
    %53 = vector.shape_cast %52 : vector<1x1x32x9xbf16> to vector<32x9xbf16>
    %cst_64 = arith.constant dense<0.000000e+00> : vector<32x9xf32>
    %54 = tpu.matmul %51, %53, %cst_64 {dimension_numbers = #tpu.dot_dimension_numbers<[1], [0], [0], [1], [0, 0, 1, 1], [], []>} : vector<32x32xbf16>, vector<32x9xbf16>, vector<32x9xf32> -> vector<32x9xf32>
    %55 = arith.addf %49, %54 : vector<32x9xf32>
    %c0_65 = arith.constant 0 : index
    %c0_66 = arith.constant 0 : index
    %56 = vector.load %arg4[%c0_65, %c0_66] : memref<32x1xf32, #tpu.memory_space<vmem>>, vector<32x1xf32>
    %57 = vector.broadcast %56 : vector<32x1xf32> to vector<32x9xf32>
    %58 = arith.addf %55, %57 : vector<32x9xf32>
    %cst_67 = arith.constant 0.000000e+00 : f32
    %59 = vector.broadcast %cst_67 : f32 to vector<32x9xf32>
    %60 = arith.cmpf oge, %58, %59 : vector<32x9xf32>
    %cst_68 = arith.constant 0.00999999977 : f32
    %61 = vector.broadcast %cst_68 : f32 to vector<32x9xf32>
    %62 = arith.mulf %61, %58 : vector<32x9xf32>
    %63 = arith.select %60, %58, %62 : vector<32x9xi1>, vector<32x9xf32>
    %64 = arith.truncf %63 : vector<32x9xf32> to vector<32x9xbf16>
    %c0_69 = arith.constant 0 : index
    %c0_70 = arith.constant 0 : index
    %65 = vector.load %arg12[%c0_69, %c0_70] : memref<32x9xbf16, #tpu.memory_space<vmem>>, vector<32x9xbf16>
    tpu.vector_store %arg12[%c0_69, %c0_70], %64 {strides = array<i32>} : memref<32x9xbf16, #tpu.memory_space<vmem>>, vector<32x9xbf16>,
    %c0_71 = arith.constant 0 : index
    %c0_72 = arith.constant 0 : index
    %66 = vector.load %arg9[%c0_71, %c0_72] : memref<32x32xbf16, #tpu.memory_space<vmem>>, vector<32x32xbf16>
    %c0_73 = arith.constant 0 : index
    %c3_74 = arith.constant 3 : index
    %c0_75 = arith.constant 0 : index
    %c0_76 = arith.constant 0 : index
    %67 = vector.load %arg1[%c0_73, %c3_74, %c0_75, %c0_76] : memref<1x4x32x13xbf16, #tpu.memory_space<vmem>>, vector<1x1x32x9xbf16>
    %68 = vector.shape_cast %67 : vector<1x1x32x9xbf16> to vector<32x9xbf16>
    %cst_77 = arith.constant dense<0.000000e+00> : vector<32x9xf32>
    %69 = tpu.matmul %66, %68, %cst_77 {dimension_numbers = #tpu.dot_dimension_numbers<[1], [0], [0], [1], [0, 0, 1, 1], [], []>} : vector<32x32xbf16>, vector<32x9xbf16>, vector<32x9xf32> -> vector<32x9xf32>
    %c0_78 = arith.constant 0 : index
    %c0_79 = arith.constant 0 : index
    %70 = vector.load %arg10[%c0_78, %c0_79] : memref<32x1xf32, #tpu.memory_space<vmem>>, vector<32x1xf32>
    %71 = vector.broadcast %70 : vector<32x1xf32> to vector<32x9xf32>
    %72 = arith.addf %69, %71 : vector<32x9xf32>
    %c0_80 = arith.constant 0 : index
    %c0_81 = arith.constant 0 : index
    %73 = vector.load %arg13[%c0_80, %c0_81] : memref<32x9xf32, #tpu.memory_space<vmem>>, vector<32x9xf32>
    tpu.vector_store %arg13[%c0_80, %c0_81], %72 {strides = array<i32>} : memref<32x9xf32, #tpu.memory_space<vmem>>, vector<32x9xf32>,
    %cst_82 = arith.constant 0.000000e+00 : bf16
    %74 = vector.broadcast %cst_82 : bf16 to vector<32x26xbf16>
    %c0_83 = arith.constant 0 : index
    %c0_84 = arith.constant 0 : index
    %75 = vector.load %arg14[%c0_83, %c0_84] : memref<32x26xbf16, #tpu.memory_space<vmem>>, vector<32x26xbf16>
    tpu.vector_store %arg14[%c0_83, %c0_84], %74 {strides = array<i32>} : memref<32x26xbf16, #tpu.memory_space<vmem>>, vector<32x26xbf16>,
    %cst_85 = arith.constant 0.000000e+00 : f32
    %76 = vector.broadcast %cst_85 : f32 to vector<32x16xf32>
    %c0_86 = arith.constant 0 : index
    %c0_87 = arith.constant 0 : index
    %77 = vector.load %arg15[%c0_86, %c0_87] : memref<32x16xf32, #tpu.memory_space<vmem>>, vector<32x16xf32>
    tpu.vector_store %arg15[%c0_86, %c0_87], %76 {strides = array<i32>} : memref<32x16xf32, #tpu.memory_space<vmem>>, vector<32x16xf32>,
    %c0_88 = arith.constant 0 : index
    %c0_89 = arith.constant 0 : index
    %78 = vector.load %arg12[%c0_88, %c0_89] : memref<32x9xbf16, #tpu.memory_space<vmem>>, vector<32x2xbf16>
    %c0_90 = arith.constant 0 : index
    %c10 = arith.constant 10 : index
    %79 = vector.load %arg14[%c0_90, %c10] : memref<32x26xbf16, #tpu.memory_space<vmem>>, vector<32x2xbf16>
    tpu.vector_store %arg14[%c0_90, %c10], %78 {strides = array<i32>} : memref<32x26xbf16, #tpu.memory_space<vmem>>, vector<32x2xbf16>,
    %c0_91 = arith.constant 0 : index
    %c0_92 = arith.constant 0 : index
    %80 = vector.load %arg13[%c0_91, %c0_92] : memref<32x9xf32, #tpu.memory_space<vmem>>, vector<32x2xf32>
    %c0_93 = arith.constant 0 : index
    %c5_94 = arith.constant 5 : index
    %81 = vector.load %arg15[%c0_93, %c5_94] : memref<32x16xf32, #tpu.memory_space<vmem>>, vector<32x2xf32>
    tpu.vector_store %arg15[%c0_93, %c5_94], %80 {strides = array<i32>} : memref<32x16xf32, #tpu.memory_space<vmem>>, vector<32x2xf32>,
    %c0_95 = arith.constant 0 : index
    %c3_96 = arith.constant 3 : index
    %82 = vector.load %arg12[%c0_95, %c3_96] : memref<32x9xbf16, #tpu.memory_space<vmem>>, vector<32x2xbf16>
    %c0_97 = arith.constant 0 : index
    %c14 = arith.constant 14 : index
    %83 = vector.load %arg14[%c0_97, %c14] : memref<32x26xbf16, #tpu.memory_space<vmem>>, vector<32x2xbf16>
    tpu.vector_store %arg14[%c0_97, %c14], %82 {strides = array<i32>} : memref<32x26xbf16, #tpu.memory_space<vmem>>, vector<32x2xbf16>,
    %c0_98 = arith.constant 0 : index
    %c3_99 = arith.constant 3 : index
    %84 = vector.load %arg13[%c0_98, %c3_99] : memref<32x9xf32, #tpu.memory_space<vmem>>, vector<32x2xf32>
    %c0_100 = arith.constant 0 : index
    %c9 = arith.constant 9 : index
    %85 = vector.load %arg15[%c0_100, %c9] : memref<32x16xf32, #tpu.memory_space<vmem>>, vector<32x2xf32>
    tpu.vector_store %arg15[%c0_100, %c9], %84 {strides = array<i32>} : memref<32x16xf32, #tpu.memory_space<vmem>>, vector<32x2xf32>,
    %cst_101 = arith.constant 0.000000e+00 : f32
    %86 = vector.broadcast %cst_101 : f32 to vector<32x16xf32>
    %c0_102 = arith.constant 0 : index
    %c0_103 = arith.constant 0 : index
    %c0_104 = arith.constant 0 : index
    %87 = vector.load %arg5[%c0_102, %c0_103, %c0_104] : memref<9x32x32xbf16, #tpu.memory_space<vmem>>, vector<1x32x32xbf16>
    %88 = vector.shape_cast %87 : vector<1x32x32xbf16> to vector<32x32xbf16>
    %c0_105 = arith.constant 0 : index
    %c0_106 = arith.constant 0 : index
    %89 = vector.load %arg14[%c0_105, %c0_106] : memref<32x26xbf16, #tpu.memory_space<vmem>>, vector<32x16xbf16>
    %cst_107 = arith.constant dense<0.000000e+00> : vector<32x16xf32>
    %90 = tpu.matmul %88, %89, %cst_107 {dimension_numbers = #tpu.dot_dimension_numbers<[1], [0], [0], [1], [0, 0, 1, 1], [], []>} : vector<32x32xbf16>, vector<32x16xbf16>, vector<32x16xf32> -> vector<32x16xf32>
    %91 = arith.addf %86, %90 : vector<32x16xf32>
    %c1_108 = arith.constant 1 : index
    %c0_109 = arith.constant 0 : index
    %c0_110 = arith.constant 0 : index
    %92 = vector.load %arg5[%c1_108, %c0_109, %c0_110] : memref<9x32x32xbf16, #tpu.memory_space<vmem>>, vector<1x32x32xbf16>
    %93 = vector.shape_cast %92 : vector<1x32x32xbf16> to vector<32x32xbf16>
    %c0_111 = arith.constant 0 : index
    %c1_112 = arith.constant 1 : index
    %94 = vector.load %arg14[%c0_111, %c1_112] : memref<32x26xbf16, #tpu.memory_space<vmem>>, vector<32x16xbf16>
    %cst_113 = arith.constant dense<0.000000e+00> : vector<32x16xf32>
    %95 = tpu.matmul %93, %94, %cst_113 {dimension_numbers = #tpu.dot_dimension_numbers<[1], [0], [0], [1], [0, 0, 1, 1], [], []>} : vector<32x32xbf16>, vector<32x16xbf16>, vector<32x16xf32> -> vector<32x16xf32>
    %96 = arith.addf %91, %95 : vector<32x16xf32>
    %c2_114 = arith.constant 2 : index
    %c0_115 = arith.constant 0 : index
    %c0_116 = arith.constant 0 : index
    %97 = vector.load %arg5[%c2_114, %c0_115, %c0_116] : memref<9x32x32xbf16, #tpu.memory_space<vmem>>, vector<1x32x32xbf16>
    %98 = vector.shape_cast %97 : vector<1x32x32xbf16> to vector<32x32xbf16>
    %c0_117 = arith.constant 0 : index
    %c2_118 = arith.constant 2 : index
    %99 = vector.load %arg14[%c0_117, %c2_118] : memref<32x26xbf16, #tpu.memory_space<vmem>>, vector<32x16xbf16>
    %cst_119 = arith.constant dense<0.000000e+00> : vector<32x16xf32>
    %100 = tpu.matmul %98, %99, %cst_119 {dimension_numbers = #tpu.dot_dimension_numbers<[1], [0], [0], [1], [0, 0, 1, 1], [], []>} : vector<32x32xbf16>, vector<32x16xbf16>, vector<32x16xf32> -> vector<32x16xf32>
    %101 = arith.addf %96, %100 : vector<32x16xf32>
    %c3_120 = arith.constant 3 : index
    %c0_121 = arith.constant 0 : index
    %c0_122 = arith.constant 0 : index
    %102 = vector.load %arg5[%c3_120, %c0_121, %c0_122] : memref<9x32x32xbf16, #tpu.memory_space<vmem>>, vector<1x32x32xbf16>
    %103 = vector.shape_cast %102 : vector<1x32x32xbf16> to vector<32x32xbf16>
    %c0_123 = arith.constant 0 : index
    %c4_124 = arith.constant 4 : index
    %104 = vector.load %arg14[%c0_123, %c4_124] : memref<32x26xbf16, #tpu.memory_space<vmem>>, vector<32x16xbf16>
    %cst_125 = arith.constant dense<0.000000e+00> : vector<32x16xf32>
    %105 = tpu.matmul %103, %104, %cst_125 {dimension_numbers = #tpu.dot_dimension_numbers<[1], [0], [0], [1], [0, 0, 1, 1], [], []>} : vector<32x32xbf16>, vector<32x16xbf16>, vector<32x16xf32> -> vector<32x16xf32>
    %106 = arith.addf %101, %105 : vector<32x16xf32>
    %c4_126 = arith.constant 4 : index
    %c0_127 = arith.constant 0 : index
    %c0_128 = arith.constant 0 : index
    %107 = vector.load %arg5[%c4_126, %c0_127, %c0_128] : memref<9x32x32xbf16, #tpu.memory_space<vmem>>, vector<1x32x32xbf16>
    %108 = vector.shape_cast %107 : vector<1x32x32xbf16> to vector<32x32xbf16>
    %c0_129 = arith.constant 0 : index
    %c5_130 = arith.constant 5 : index
    %109 = vector.load %arg14[%c0_129, %c5_130] : memref<32x26xbf16, #tpu.memory_space<vmem>>, vector<32x16xbf16>
    %cst_131 = arith.constant dense<0.000000e+00> : vector<32x16xf32>
    %110 = tpu.matmul %108, %109, %cst_131 {dimension_numbers = #tpu.dot_dimension_numbers<[1], [0], [0], [1], [0, 0, 1, 1], [], []>} : vector<32x32xbf16>, vector<32x16xbf16>, vector<32x16xf32> -> vector<32x16xf32>
    %111 = arith.addf %106, %110 : vector<32x16xf32>
    %c5_132 = arith.constant 5 : index
    %c0_133 = arith.constant 0 : index
    %c0_134 = arith.constant 0 : index
    %112 = vector.load %arg5[%c5_132, %c0_133, %c0_134] : memref<9x32x32xbf16, #tpu.memory_space<vmem>>, vector<1x32x32xbf16>
    %113 = vector.shape_cast %112 : vector<1x32x32xbf16> to vector<32x32xbf16>
    %c0_135 = arith.constant 0 : index
    %c6_136 = arith.constant 6 : index
    %114 = vector.load %arg14[%c0_135, %c6_136] : memref<32x26xbf16, #tpu.memory_space<vmem>>, vector<32x16xbf16>
    %cst_137 = arith.constant dense<0.000000e+00> : vector<32x16xf32>
    %115 = tpu.matmul %113, %114, %cst_137 {dimension_numbers = #tpu.dot_dimension_numbers<[1], [0], [0], [1], [0, 0, 1, 1], [], []>} : vector<32x32xbf16>, vector<32x16xbf16>, vector<32x16xf32> -> vector<32x16xf32>
    %116 = arith.addf %111, %115 : vector<32x16xf32>
    %c6_138 = arith.constant 6 : index
    %c0_139 = arith.constant 0 : index
    %c0_140 = arith.constant 0 : index
    %117 = vector.load %arg5[%c6_138, %c0_139, %c0_140] : memref<9x32x32xbf16, #tpu.memory_space<vmem>>, vector<1x32x32xbf16>
    %118 = vector.shape_cast %117 : vector<1x32x32xbf16> to vector<32x32xbf16>
    %c0_141 = arith.constant 0 : index
    %c8_142 = arith.constant 8 : index
    %119 = vector.load %arg14[%c0_141, %c8_142] : memref<32x26xbf16, #tpu.memory_space<vmem>>, vector<32x16xbf16>
    %cst_143 = arith.constant dense<0.000000e+00> : vector<32x16xf32>
    %120 = tpu.matmul %118, %119, %cst_143 {dimension_numbers = #tpu.dot_dimension_numbers<[1], [0], [0], [1], [0, 0, 1, 1], [], []>} : vector<32x32xbf16>, vector<32x16xbf16>, vector<32x16xf32> -> vector<32x16xf32>
    %121 = arith.addf %116, %120 : vector<32x16xf32>
    %c7_144 = arith.constant 7 : index
    %c0_145 = arith.constant 0 : index
    %c0_146 = arith.constant 0 : index
    %122 = vector.load %arg5[%c7_144, %c0_145, %c0_146] : memref<9x32x32xbf16, #tpu.memory_space<vmem>>, vector<1x32x32xbf16>
    %123 = vector.shape_cast %122 : vector<1x32x32xbf16> to vector<32x32xbf16>
    %c0_147 = arith.constant 0 : index
    %c9_148 = arith.constant 9 : index
    %124 = vector.load %arg14[%c0_147, %c9_148] : memref<32x26xbf16, #tpu.memory_space<vmem>>, vector<32x16xbf16>
    %cst_149 = arith.constant dense<0.000000e+00> : vector<32x16xf32>
    %125 = tpu.matmul %123, %124, %cst_149 {dimension_numbers = #tpu.dot_dimension_numbers<[1], [0], [0], [1], [0, 0, 1, 1], [], []>} : vector<32x32xbf16>, vector<32x16xbf16>, vector<32x16xf32> -> vector<32x16xf32>
    %126 = arith.addf %121, %125 : vector<32x16xf32>
    %c8_150 = arith.constant 8 : index
    %c0_151 = arith.constant 0 : index
    %c0_152 = arith.constant 0 : index
    %127 = vector.load %arg5[%c8_150, %c0_151, %c0_152] : memref<9x32x32xbf16, #tpu.memory_space<vmem>>, vector<1x32x32xbf16>
    %128 = vector.shape_cast %127 : vector<1x32x32xbf16> to vector<32x32xbf16>
    %c0_153 = arith.constant 0 : index
    %c10_154 = arith.constant 10 : index
    %129 = vector.load %arg14[%c0_153, %c10_154] : memref<32x26xbf16, #tpu.memory_space<vmem>>, vector<32x16xbf16>
    %cst_155 = arith.constant dense<0.000000e+00> : vector<32x16xf32>
    %130 = tpu.matmul %128, %129, %cst_155 {dimension_numbers = #tpu.dot_dimension_numbers<[1], [0], [0], [1], [0, 0, 1, 1], [], []>} : vector<32x32xbf16>, vector<32x16xbf16>, vector<32x16xf32> -> vector<32x16xf32>
    %131 = arith.addf %126, %130 : vector<32x16xf32>
    %c0_156 = arith.constant 0 : index
    %c0_157 = arith.constant 0 : index
    %132 = vector.load %arg6[%c0_156, %c0_157] : memref<32x1xf32, #tpu.memory_space<vmem>>, vector<32x1xf32>
    %133 = vector.broadcast %132 : vector<32x1xf32> to vector<32x16xf32>
    %134 = arith.addf %131, %133 : vector<32x16xf32>
    %135 = vector.broadcast %0 : vector<1x16xf32> to vector<32x16xf32>
    %136 = arith.mulf %134, %135 : vector<32x16xf32>
    %c0_158 = arith.constant 0 : index
    %c0_159 = arith.constant 0 : index
    %137 = vector.load %arg7[%c0_158, %c0_159] : memref<32x32xf32, #tpu.memory_space<vmem>>, vector<32x32xf32>
    %138 = arith.mulf %136, %136 : vector<32x16xf32>
    %cst_160 = arith.constant dense<0.000000e+00> : vector<32x16xf32>
    %139 = tpu.matmul %137, %138, %cst_160 {dimension_numbers = #tpu.dot_dimension_numbers<[1], [0], [0], [1], [0, 0, 1, 1], [], []>} : vector<32x32xf32>, vector<32x16xf32>, vector<32x16xf32> -> vector<32x16xf32>
    %c0_161 = arith.constant 0 : index
    %c0_162 = arith.constant 0 : index
    %140 = vector.load %arg8[%c0_161, %c0_162] : memref<32x1xf32, #tpu.memory_space<vmem>>, vector<32x1xf32>
    %141 = vector.broadcast %140 : vector<32x1xf32> to vector<32x16xf32>
    %142 = arith.addf %139, %141 : vector<32x16xf32>
    %143 = math.rsqrt %142 : vector<32x16xf32>
    %144 = arith.mulf %136, %143 : vector<32x16xf32>
    %c0_163 = arith.constant 0 : index
    %c0_164 = arith.constant 0 : index
    %145 = vector.load %arg15[%c0_163, %c0_164] : memref<32x16xf32, #tpu.memory_space<vmem>>, vector<32x16xf32>
    %146 = arith.addf %144, %145 : vector<32x16xf32>
    %147 = arith.truncf %146 : vector<32x16xf32> to vector<32x16xbf16>
    %c0_165 = arith.constant 0 : index
    %c0_166 = arith.constant 0 : index
    %c0_167 = arith.constant 0 : index
    %148 = vector.load %arg11[%c0_165, %c0_166, %c0_167] : memref<1x32x16xbf16, #tpu.memory_space<vmem>>, vector<1x32x16xbf16>
    %149 = vector.shape_cast %148 : vector<1x32x16xbf16> to vector<32x16xbf16>
    %150 = vector.shape_cast %147 : vector<32x16xbf16> to vector<1x32x16xbf16>
    tpu.vector_store %arg11[%c0_165, %c0_166, %c0_167], %150 {strides = array<i32>} : memref<1x32x16xbf16, #tpu.memory_space<vmem>>, vector<1x32x16xbf16>,
    return
  }
  func.func @transform_0(%arg0: i32) -> (i32, i32, i32, i32) {
    %c0_i32 = arith.constant 0 : i32
    %c0_i32_0 = arith.constant 0 : i32
    %c0_i32_1 = arith.constant 0 : i32
    %c0_i32_2 = arith.constant 0 : i32
    return %arg0, %c0_i32, %c0_i32_0, %c0_i32_1 : i32, i32, i32, i32
  }
  func.func @transform_1(%arg0: i32) -> (i32, i32) {
    %c0_i32 = arith.constant 0 : i32
    %c0_i32_0 = arith.constant 0 : i32
    %c0_i32_1 = arith.constant 0 : i32
    return %c0_i32, %c0_i32_0 : i32, i32
  }
  func.func @transform_2(%arg0: i32) -> (i32, i32, i32) {
    %c0_i32 = arith.constant 0 : i32
    %c0_i32_0 = arith.constant 0 : i32
    %c0_i32_1 = arith.constant 0 : i32
    %c0_i32_2 = arith.constant 0 : i32
    return %c0_i32, %c0_i32_0, %c0_i32_1 : i32, i32, i32
  }
  func.func @transform_3(%arg0: i32) -> (i32, i32) {
    %c0_i32 = arith.constant 0 : i32
    %c0_i32_0 = arith.constant 0 : i32
    %c0_i32_1 = arith.constant 0 : i32
    return %c0_i32, %c0_i32_0 : i32, i32
  }
  func.func @transform_4(%arg0: i32) -> (i32, i32, i32) {
    %c0_i32 = arith.constant 0 : i32
    %c0_i32_0 = arith.constant 0 : i32
    %c0_i32_1 = arith.constant 0 : i32
    %c0_i32_2 = arith.constant 0 : i32
    return %c0_i32, %c0_i32_0, %c0_i32_1 : i32, i32, i32
  }
  func.func @transform_5(%arg0: i32) -> (i32, i32) {
    %c0_i32 = arith.constant 0 : i32
    %c0_i32_0 = arith.constant 0 : i32
    %c0_i32_1 = arith.constant 0 : i32
    return %c0_i32, %c0_i32_0 : i32, i32
  }
  func.func @transform_6(%arg0: i32) -> (i32, i32) {
    %c0_i32 = arith.constant 0 : i32
    %c0_i32_0 = arith.constant 0 : i32
    %c0_i32_1 = arith.constant 0 : i32
    return %c0_i32, %c0_i32_0 : i32, i32
  }
  func.func @transform_7(%arg0: i32) -> (i32, i32) {
    %c0_i32 = arith.constant 0 : i32
    %c0_i32_0 = arith.constant 0 : i32
    %c0_i32_1 = arith.constant 0 : i32
    return %c0_i32, %c0_i32_0 : i32, i32
  }
  func.func @transform_8(%arg0: i32) -> (i32, i32) {
    %c0_i32 = arith.constant 0 : i32
    %c0_i32_0 = arith.constant 0 : i32
    %c0_i32_1 = arith.constant 0 : i32
    return %c0_i32, %c0_i32_0 : i32, i32
  }
  func.func @transform_9(%arg0: i32) -> (i32, i32) {
    %c0_i32 = arith.constant 0 : i32
    %c0_i32_0 = arith.constant 0 : i32
    %c0_i32_1 = arith.constant 0 : i32
    return %c0_i32, %c0_i32_0 : i32, i32
  }
  func.func @transform_10(%arg0: i32) -> (i32, i32, i32) {
    %c0_i32 = arith.constant 0 : i32
    %c0_i32_0 = arith.constant 0 : i32
    %c0_i32_1 = arith.constant 0 : i32
    return %arg0, %c0_i32, %c0_i32_0 : i32, i32, i32
  }
}

module attributes {stable_mosaic.version = 11 : i64} {
  func.func @kernel(%arg0: i32, %arg1: memref<1x4x32x7xbf16, #tpu.memory_space<vmem>>, %arg2: memref<9x48x32xbf16, #tpu.memory_space<vmem>>, %arg3: memref<48x1xf32, #tpu.memory_space<vmem>>, %arg4: memref<1x48x4xf32, #tpu.memory_space<vmem>>) attributes {dimension_semantics = [#tpu.dimension_semantics<parallel>], iteration_bounds = array<i64: 2>, scalar_prefetch = 0 : i64, scratch_operands = 0 : i64, tpu.core_type = #tpu.core_type<tc>, window_params = [{transform_indices = @transform_0, window_bounds = array<i64: 1, 4, 32, 7>}, {pipeline_mode = #tpu.pipeline_mode<synchronous>, transform_indices = @transform_1, window_bounds = array<i64: 9, 48, 32>}, {pipeline_mode = #tpu.pipeline_mode<synchronous>, transform_indices = @transform_2, window_bounds = array<i64: 48, 1>}, {transform_indices = @transform_3, window_bounds = array<i64: 1, 48, 4>}]} {
    %cst = arith.constant 0.000000e+00 : f32
    %0 = vector.broadcast %cst : f32 to vector<48x4xf32>
    %c0 = arith.constant 0 : index
    %c0_0 = arith.constant 0 : index
    %c0_1 = arith.constant 0 : index
    %1 = vector.load %arg2[%c0, %c0_0, %c0_1] : memref<9x48x32xbf16, #tpu.memory_space<vmem>>, vector<1x48x32xbf16>
    %2 = vector.shape_cast %1 : vector<1x48x32xbf16> to vector<48x32xbf16>
    %c0_2 = arith.constant 0 : index
    %c0_3 = arith.constant 0 : index
    %c0_4 = arith.constant 0 : index
    %c0_5 = arith.constant 0 : index
    %3 = vector.load %arg1[%c0_2, %c0_3, %c0_4, %c0_5] : memref<1x4x32x7xbf16, #tpu.memory_space<vmem>>, vector<1x1x32x4xbf16>
    %4 = vector.shape_cast %3 : vector<1x1x32x4xbf16> to vector<32x4xbf16>
    %cst_6 = arith.constant dense<0.000000e+00> : vector<48x4xf32>
    %5 = tpu.matmul %2, %4, %cst_6 {dimension_numbers = #tpu.dot_dimension_numbers<[1], [0], [0], [1], [0, 0, 1, 1], [], []>} : vector<48x32xbf16>, vector<32x4xbf16>, vector<48x4xf32> -> vector<48x4xf32>
    %6 = arith.addf %0, %5 : vector<48x4xf32>
    %c1 = arith.constant 1 : index
    %c0_7 = arith.constant 0 : index
    %c0_8 = arith.constant 0 : index
    %7 = vector.load %arg2[%c1, %c0_7, %c0_8] : memref<9x48x32xbf16, #tpu.memory_space<vmem>>, vector<1x48x32xbf16>
    %8 = vector.shape_cast %7 : vector<1x48x32xbf16> to vector<48x32xbf16>
    %c0_9 = arith.constant 0 : index
    %c1_10 = arith.constant 1 : index
    %c0_11 = arith.constant 0 : index
    %c0_12 = arith.constant 0 : index
    %9 = vector.load %arg1[%c0_9, %c1_10, %c0_11, %c0_12] : memref<1x4x32x7xbf16, #tpu.memory_space<vmem>>, vector<1x1x32x4xbf16>
    %10 = vector.shape_cast %9 : vector<1x1x32x4xbf16> to vector<32x4xbf16>
    %cst_13 = arith.constant dense<0.000000e+00> : vector<48x4xf32>
    %11 = tpu.matmul %8, %10, %cst_13 {dimension_numbers = #tpu.dot_dimension_numbers<[1], [0], [0], [1], [0, 0, 1, 1], [], []>} : vector<48x32xbf16>, vector<32x4xbf16>, vector<48x4xf32> -> vector<48x4xf32>
    %12 = arith.addf %6, %11 : vector<48x4xf32>
    %c2 = arith.constant 2 : index
    %c0_14 = arith.constant 0 : index
    %c0_15 = arith.constant 0 : index
    %13 = vector.load %arg2[%c2, %c0_14, %c0_15] : memref<9x48x32xbf16, #tpu.memory_space<vmem>>, vector<1x48x32xbf16>
    %14 = vector.shape_cast %13 : vector<1x48x32xbf16> to vector<48x32xbf16>
    %c0_16 = arith.constant 0 : index
    %c0_17 = arith.constant 0 : index
    %c0_18 = arith.constant 0 : index
    %c1_19 = arith.constant 1 : index
    %15 = vector.load %arg1[%c0_16, %c0_17, %c0_18, %c1_19] : memref<1x4x32x7xbf16, #tpu.memory_space<vmem>>, vector<1x1x32x4xbf16>
    %16 = vector.shape_cast %15 : vector<1x1x32x4xbf16> to vector<32x4xbf16>
    %cst_20 = arith.constant dense<0.000000e+00> : vector<48x4xf32>
    %17 = tpu.matmul %14, %16, %cst_20 {dimension_numbers = #tpu.dot_dimension_numbers<[1], [0], [0], [1], [0, 0, 1, 1], [], []>} : vector<48x32xbf16>, vector<32x4xbf16>, vector<48x4xf32> -> vector<48x4xf32>
    %18 = arith.addf %12, %17 : vector<48x4xf32>
    %c3 = arith.constant 3 : index
    %c0_21 = arith.constant 0 : index
    %c0_22 = arith.constant 0 : index
    %19 = vector.load %arg2[%c3, %c0_21, %c0_22] : memref<9x48x32xbf16, #tpu.memory_space<vmem>>, vector<1x48x32xbf16>
    %20 = vector.shape_cast %19 : vector<1x48x32xbf16> to vector<48x32xbf16>
    %c0_23 = arith.constant 0 : index
    %c2_24 = arith.constant 2 : index
    %c0_25 = arith.constant 0 : index
    %c0_26 = arith.constant 0 : index
    %21 = vector.load %arg1[%c0_23, %c2_24, %c0_25, %c0_26] : memref<1x4x32x7xbf16, #tpu.memory_space<vmem>>, vector<1x1x32x4xbf16>
    %22 = vector.shape_cast %21 : vector<1x1x32x4xbf16> to vector<32x4xbf16>
    %cst_27 = arith.constant dense<0.000000e+00> : vector<48x4xf32>
    %23 = tpu.matmul %20, %22, %cst_27 {dimension_numbers = #tpu.dot_dimension_numbers<[1], [0], [0], [1], [0, 0, 1, 1], [], []>} : vector<48x32xbf16>, vector<32x4xbf16>, vector<48x4xf32> -> vector<48x4xf32>
    %24 = arith.addf %18, %23 : vector<48x4xf32>
    %c4 = arith.constant 4 : index
    %c0_28 = arith.constant 0 : index
    %c0_29 = arith.constant 0 : index
    %25 = vector.load %arg2[%c4, %c0_28, %c0_29] : memref<9x48x32xbf16, #tpu.memory_space<vmem>>, vector<1x48x32xbf16>
    %26 = vector.shape_cast %25 : vector<1x48x32xbf16> to vector<48x32xbf16>
    %c0_30 = arith.constant 0 : index
    %c3_31 = arith.constant 3 : index
    %c0_32 = arith.constant 0 : index
    %c0_33 = arith.constant 0 : index
    %27 = vector.load %arg1[%c0_30, %c3_31, %c0_32, %c0_33] : memref<1x4x32x7xbf16, #tpu.memory_space<vmem>>, vector<1x1x32x4xbf16>
    %28 = vector.shape_cast %27 : vector<1x1x32x4xbf16> to vector<32x4xbf16>
    %cst_34 = arith.constant dense<0.000000e+00> : vector<48x4xf32>
    %29 = tpu.matmul %26, %28, %cst_34 {dimension_numbers = #tpu.dot_dimension_numbers<[1], [0], [0], [1], [0, 0, 1, 1], [], []>} : vector<48x32xbf16>, vector<32x4xbf16>, vector<48x4xf32> -> vector<48x4xf32>
    %30 = arith.addf %24, %29 : vector<48x4xf32>
    %c5 = arith.constant 5 : index
    %c0_35 = arith.constant 0 : index
    %c0_36 = arith.constant 0 : index
    %31 = vector.load %arg2[%c5, %c0_35, %c0_36] : memref<9x48x32xbf16, #tpu.memory_space<vmem>>, vector<1x48x32xbf16>
    %32 = vector.shape_cast %31 : vector<1x48x32xbf16> to vector<48x32xbf16>
    %c0_37 = arith.constant 0 : index
    %c2_38 = arith.constant 2 : index
    %c0_39 = arith.constant 0 : index
    %c1_40 = arith.constant 1 : index
    %33 = vector.load %arg1[%c0_37, %c2_38, %c0_39, %c1_40] : memref<1x4x32x7xbf16, #tpu.memory_space<vmem>>, vector<1x1x32x4xbf16>
    %34 = vector.shape_cast %33 : vector<1x1x32x4xbf16> to vector<32x4xbf16>
    %cst_41 = arith.constant dense<0.000000e+00> : vector<48x4xf32>
    %35 = tpu.matmul %32, %34, %cst_41 {dimension_numbers = #tpu.dot_dimension_numbers<[1], [0], [0], [1], [0, 0, 1, 1], [], []>} : vector<48x32xbf16>, vector<32x4xbf16>, vector<48x4xf32> -> vector<48x4xf32>
    %36 = arith.addf %30, %35 : vector<48x4xf32>
    %c6 = arith.constant 6 : index
    %c0_42 = arith.constant 0 : index
    %c0_43 = arith.constant 0 : index
    %37 = vector.load %arg2[%c6, %c0_42, %c0_43] : memref<9x48x32xbf16, #tpu.memory_space<vmem>>, vector<1x48x32xbf16>
    %38 = vector.shape_cast %37 : vector<1x48x32xbf16> to vector<48x32xbf16>
    %c0_44 = arith.constant 0 : index
    %c0_45 = arith.constant 0 : index
    %c0_46 = arith.constant 0 : index
    %c2_47 = arith.constant 2 : index
    %39 = vector.load %arg1[%c0_44, %c0_45, %c0_46, %c2_47] : memref<1x4x32x7xbf16, #tpu.memory_space<vmem>>, vector<1x1x32x4xbf16>
    %40 = vector.shape_cast %39 : vector<1x1x32x4xbf16> to vector<32x4xbf16>
    %cst_48 = arith.constant dense<0.000000e+00> : vector<48x4xf32>
    %41 = tpu.matmul %38, %40, %cst_48 {dimension_numbers = #tpu.dot_dimension_numbers<[1], [0], [0], [1], [0, 0, 1, 1], [], []>} : vector<48x32xbf16>, vector<32x4xbf16>, vector<48x4xf32> -> vector<48x4xf32>
    %42 = arith.addf %36, %41 : vector<48x4xf32>
    %c7 = arith.constant 7 : index
    %c0_49 = arith.constant 0 : index
    %c0_50 = arith.constant 0 : index
    %43 = vector.load %arg2[%c7, %c0_49, %c0_50] : memref<9x48x32xbf16, #tpu.memory_space<vmem>>, vector<1x48x32xbf16>
    %44 = vector.shape_cast %43 : vector<1x48x32xbf16> to vector<48x32xbf16>
    %c0_51 = arith.constant 0 : index
    %c1_52 = arith.constant 1 : index
    %c0_53 = arith.constant 0 : index
    %c2_54 = arith.constant 2 : index
    %45 = vector.load %arg1[%c0_51, %c1_52, %c0_53, %c2_54] : memref<1x4x32x7xbf16, #tpu.memory_space<vmem>>, vector<1x1x32x4xbf16>
    %46 = vector.shape_cast %45 : vector<1x1x32x4xbf16> to vector<32x4xbf16>
    %cst_55 = arith.constant dense<0.000000e+00> : vector<48x4xf32>
    %47 = tpu.matmul %44, %46, %cst_55 {dimension_numbers = #tpu.dot_dimension_numbers<[1], [0], [0], [1], [0, 0, 1, 1], [], []>} : vector<48x32xbf16>, vector<32x4xbf16>, vector<48x4xf32> -> vector<48x4xf32>
    %48 = arith.addf %42, %47 : vector<48x4xf32>
    %c8 = arith.constant 8 : index
    %c0_56 = arith.constant 0 : index
    %c0_57 = arith.constant 0 : index
    %49 = vector.load %arg2[%c8, %c0_56, %c0_57] : memref<9x48x32xbf16, #tpu.memory_space<vmem>>, vector<1x48x32xbf16>
    %50 = vector.shape_cast %49 : vector<1x48x32xbf16> to vector<48x32xbf16>
    %c0_58 = arith.constant 0 : index
    %c0_59 = arith.constant 0 : index
    %c0_60 = arith.constant 0 : index
    %c3_61 = arith.constant 3 : index
    %51 = vector.load %arg1[%c0_58, %c0_59, %c0_60, %c3_61] : memref<1x4x32x7xbf16, #tpu.memory_space<vmem>>, vector<1x1x32x4xbf16>
    %52 = vector.shape_cast %51 : vector<1x1x32x4xbf16> to vector<32x4xbf16>
    %cst_62 = arith.constant dense<0.000000e+00> : vector<48x4xf32>
    %53 = tpu.matmul %50, %52, %cst_62 {dimension_numbers = #tpu.dot_dimension_numbers<[1], [0], [0], [1], [0, 0, 1, 1], [], []>} : vector<48x32xbf16>, vector<32x4xbf16>, vector<48x4xf32> -> vector<48x4xf32>
    %54 = arith.addf %48, %53 : vector<48x4xf32>
    %c0_63 = arith.constant 0 : index
    %c0_64 = arith.constant 0 : index
    %55 = vector.load %arg3[%c0_63, %c0_64] : memref<48x1xf32, #tpu.memory_space<vmem>>, vector<48x1xf32>
    %56 = vector.broadcast %55 : vector<48x1xf32> to vector<48x4xf32>
    %57 = arith.addf %54, %56 : vector<48x4xf32>
    %c0_65 = arith.constant 0 : index
    %c0_66 = arith.constant 0 : index
    %c0_67 = arith.constant 0 : index
    %58 = vector.load %arg4[%c0_65, %c0_66, %c0_67] : memref<1x48x4xf32, #tpu.memory_space<vmem>>, vector<1x48x4xf32>
    %59 = vector.shape_cast %58 : vector<1x48x4xf32> to vector<48x4xf32>
    %60 = vector.shape_cast %57 : vector<48x4xf32> to vector<1x48x4xf32>
    tpu.vector_store %arg4[%c0_65, %c0_66, %c0_67], %60 {strides = array<i32>} : memref<1x48x4xf32, #tpu.memory_space<vmem>>, vector<1x48x4xf32>,
    return
  }
  func.func @transform_0(%arg0: i32) -> (i32, i32, i32, i32) {
    %c0_i32 = arith.constant 0 : i32
    %c0_i32_0 = arith.constant 0 : i32
    %c0_i32_1 = arith.constant 0 : i32
    %c0_i32_2 = arith.constant 0 : i32
    return %arg0, %c0_i32, %c0_i32_0, %c0_i32_1 : i32, i32, i32, i32
  }
  func.func @transform_1(%arg0: i32) -> (i32, i32, i32) {
    %c0_i32 = arith.constant 0 : i32
    %c0_i32_0 = arith.constant 0 : i32
    %c0_i32_1 = arith.constant 0 : i32
    %c0_i32_2 = arith.constant 0 : i32
    return %c0_i32, %c0_i32_0, %c0_i32_1 : i32, i32, i32
  }
  func.func @transform_2(%arg0: i32) -> (i32, i32) {
    %c0_i32 = arith.constant 0 : i32
    %c0_i32_0 = arith.constant 0 : i32
    %c0_i32_1 = arith.constant 0 : i32
    return %c0_i32, %c0_i32_0 : i32, i32
  }
  func.func @transform_3(%arg0: i32) -> (i32, i32, i32) {
    %c0_i32 = arith.constant 0 : i32
    %c0_i32_0 = arith.constant 0 : i32
    %c0_i32_1 = arith.constant 0 : i32
    return %arg0, %c0_i32, %c0_i32_0 : i32, i32, i32
  }
}

</mosaic_0001>

<bundles_post_ra>
// kernel: analysis_transform.8
= control target key start
LH: loop header
LB: loop body
LE: loop exit
PB: predicated region body
PF: predicated region fallthrough
CT: control target
= control target key end

     0   :  { %s2434_s21 = smov 0   ;;  %s2707_s0 = inlined_call_operand.vmem [shape: bf16[2,32,100], index: 0, kind: input, shape index: {}]   ;;  %s2708_s1 = inlined_call_operand.vmem [shape: f32[1,100], index: 1, kind: input, shape index: {}]   ;;  %s2709_s2 = inlined_call_operand.vmem [shape: bf16[9,32,32], index: 2, kind: input, shape index: {}]   ;;  %s2710_s3 = inlined_call_operand.vmem [shape: f32[32,1], index: 3, kind: input, shape index: {}]   ;;  %s2711_s4 = inlined_call_operand.vmem [shape: bf16[9,32,32], index: 4, kind: input, shape index: {}]   ;;  %s2712_s5 = inlined_call_operand.vmem [shape: f32[32,1], index: 5, kind: input, shape index: {}]   ;;  %s2713_s6 = inlined_call_operand.vmem [shape: bf16[2,32,100], index: 6, kind: output, shape index: {}]  }
   0x1 LB: > { %s1937_s22 = sadd.s32 4294967295, %s2387_s21   ;;  %p1941_p0 = scmp.ge.s32.totalorder %s2387_s21, 1  ;;  %s2387_s21 = sphi %s2434_s21, %s16_s21  }
   0x2   : > { %p212_p1 = scmp.lt.s32.totalorder %s2387_s21, 3 }
   0x4   : > { %p213_p2 = pnand %p1941_p0, %p212_p1 }
   0x5   : > { %p242_p3 = scmp.lt.s32.totalorder (!%p213_p2), %s1937_s22, 1  ;;  %s2390_s27 = smov (!%p213_p2), 11  }
   0x6   : > { %216 = sbr.rel (%p213_p2) target bundleno = 1002 (0x3ea), region = 44  ;;  %s2391_s8 = smov (!%p213_p2), 127  }
   0x7   : > { %s2392_s9 = smov (!%p213_p2), 126   ;;  %s2393_s14 = smov (!%p213_p2), 118  }
   0x8   : > { %s2394_s15 = smov (!%p213_p2), 117   ;;  %s2395_s16 = smov (!%p213_p2), 116  }
   0x9   : > { %s2396_s17 = smov (!%p213_p2), 108   ;;  %s2397_s18 = smov (!%p213_p2), 107  }
   0xa   : > { %s2398_s19 = smov (!%p213_p2), 106  }
   0xb   : > { %vm258_vm0 = vcmask 994304   ;;  %v2389_v0 = vmov 0   ;;  %s2715_s22 = smov (!%p242_p3, %s1937_s22), 1  ;;  %vm279_vm1 = vcmask 904280   ;;  %v2343_v9 = vld [vmem:[%s2709_s2 + $0x10] sm:$0xff]   ;;  %vm323_vm2 = vcmask 261120  }
   0xc   : > { %261 = vst.msk [vmem:[#allocation2 + $0x8] sm:$0xf] %vm258_vm0, %v2389_v0  ;;  %259 = vst.msk [vmem:[#allocation2] sm:$0xf] %vm258_vm0, %v2389_v0  ;;  %2342 = vset.pattern.permute.xlu1 %v2389_v0  ;;  %2341 = vset.pattern.permute.xlu0 %v2389_v0  ;;  %s2097_s23 = sshll.u32 %s2715_s22, 4  ;;  %v2344_v10 = vld [vmem:[%s2709_s2] sm:$0xff]  }
   0xd   : > { %260 = vst.msk [vmem:[#allocation2 + $0x4] sm:$0xf] %vm258_vm0, %v2389_v0  ;;  %262 = vst.msk [vmem:[#allocation2 + $0xc] sm:$0xf] %vm258_vm0, %v2389_v0  ;;  %s2450_s26 = scalar_lea.vmem %s2707_s0, %s2097_s23  ;;  %2183 = vmatprep.mubr.msk.bf16.mxu0 %vm323_vm2, %v2343_v9  ;;  %2191 = vmatprep.mubr.msk.bf16.mxu1 %vm323_vm2, %v2344_v10  ;;  %v2346_v17 = vld [vmem:[%s2709_s2 + $0x8] sm:$0xff]   ;;  %v2348_v18 = vld [vmem:[%s2709_s2 + $0x30] sm:$0xff]   ;;  %s251_s13 = scalar_lea.vmem %s2713_s6, %s2097_s23 }
   0xe   : > { %1056 = vst.msk [vmem:[#allocation3] sm:$0xf] %vm258_vm0, %v2389_v0  ;;  %1057 = vst.msk [vmem:[#allocation3 + $0x4] sm:$0xf] %vm258_vm0, %v2389_v0  ;;  %v2453_v1 = vld [vmem:[%s2450_s26 + $0x8] sm:$0xf] }
   0xf   : > { %1058 = vst.msk [vmem:[#allocation3 + $0x8] sm:$0xf] %vm258_vm0, %v2389_v0  ;;  %1059 = vst.msk [vmem:[#allocation3 + $0xc] sm:$0xf] %vm258_vm0, %v2389_v0  ;;  %v2456_v2 = vld [vmem:[%s2450_s26] sm:$0xf]  ;;  %271 = vrot.lane.b32.xlu0 %v2453_v1, %s2390_s27 }
  0x10   : > { %v256_v3 = vld [vmem:[%s2450_s26 + $0xc] sm:$0xf]  ;;  %267 = vrot.lane.b32.xlu1 %v2456_v2, %s2390_s27  ;;  %v254_v4 = vld [vmem:[%s2450_s26 + $0x4] sm:$0xf]  ;;  %v1008_v19 = vld [vmem:[%s2710_s3 + $0x10] sm:$0xff]  ;;  %vm1877_vm10 = vcmask 814080  }
  0x11   : > { %v1009_v20 = vld [vmem:[%s2710_s3 + $0x18] sm:$0xff]  ;;  %v1007_v21 = vld [vmem:[%s2710_s3 + $0x8] sm:$0xff]  ;;  %v1006_v22 = vld [vmem:[%s2710_s3] sm:$0xff] }
  0x12   : > { %v2345_v27 = vld [vmem:[%s2709_s2 + $0x18] sm:$0xff]   ;;  %v2347_v28 = vld [vmem:[%s2709_s2 + $0x20] sm:$0xff]   ;;  %v2349_v33 = vld [vmem:[%s2709_s2 + $0x28] sm:$0xff]  }
  0x13   : > { %273 = vrot.lane.b32.xlu0 %v256_v3, %s2390_s27  ;;  %v2350_v34 = vld [vmem:[%s2709_s2 + $0x38] sm:$0xff]   ;;  %v2351_v36 = vld [vmem:[%s2709_s2 + $0x40] sm:$0xff]   ;;  %v2352_v37 = vld [vmem:[%s2709_s2 + $0x50] sm:$0xff]  }
  0x14   : > { %269 = vrot.lane.b32.xlu1 %v254_v4, %s2390_s27  ;;  %v2353_v40 = vld [vmem:[%s2709_s2 + $0x48] sm:$0xff]   ;;  %v2354_v42 = vld [vmem:[%s2709_s2 + $0x58] sm:$0xff]   ;;  %v2355_v44 = vld [vmem:[%s2709_s2 + $0x60] sm:$0xff]  }
  0x15   : > { %v2356_v45 = vld [vmem:[%s2709_s2 + $0x70] sm:$0xff]   ;;  %v2357_v48 = vld [vmem:[%s2709_s2 + $0x68] sm:$0xff]   ;;  %v2358_v49 = vld [vmem:[%s2709_s2 + $0x78] sm:$0xff]  }
  0x16   : > { %v2359_v50 = vld [vmem:[%s2709_s2 + $0x80] sm:$0xff]   ;;  %v2360_v52 = vld [vmem:[%s2709_s2 + $0x88] sm:$0xff]  }
  0x81   : > { %v272_v5 = vpop.permute.xlu0 %271 }
  0x82   : > { %v268_v6 = vpop.permute.xlu1 %267  ;;  %282 = vst.msk [vmem:[#allocation2 + $0x8] sm:$0xf] %vm279_vm1, %v272_v5 }
  0x83   : > { %280 = vst.msk [vmem:[#allocation2] sm:$0xf] %vm279_vm1, %v268_v6 }
  0x85   : > { %v274_v7 = vpop.permute.xlu0 %273 }
  0x86   : > { %v270_v8 = vpop.permute.xlu1 %269  ;;  %283 = vst.msk [vmem:[#allocation2 + $0xc] sm:$0xf] %vm279_vm1, %v274_v7 }
  0x87   : > { %281 = vst.msk [vmem:[#allocation2 + $0x4] sm:$0xf] %vm279_vm1, %v270_v8 }
  0x89   : > { %v290_v12 = vld [vmem:[#allocation2 + $0x8] sm:$0xf] }
  0x8a   : > { %v288_v11 = vld [vmem:[#allocation2] sm:$0xf] }
  0x8d   : > { %v291_v13 = vld [vmem:[#allocation2 + $0xc] sm:$0xf] }
  0x8e   : > { %v289_v14 = vld [vmem:[#allocation2 + $0x4] sm:$0xf]  ;;  %v1953_v15 = vcombine.low %v290_v12, %v291_v13 }
  0x8f   : > { %v1952_v16 = vcombine.low %v288_v11, %v289_v14 }
  0x90   : > { %319 = vrot.lane.b32.xlu0 %v1953_v15, %s2391_s8  ;;  %2187 = vmatprep.subr.bf16.mxu1 %v1953_v15 }
  0x91   : > { %317 = vrot.lane.b32.xlu1 %v1952_v16, %s2391_s8  ;;  %2188 = vmatpush3.bf16.msra.mxu1 %v1953_v15 }
  0x92   : > { %2189 = vmatprep.subr.bf16.mxu1 %v1952_v16 }
  0x94   : > { %463 = vrot.lane.b32.xlu0 %v1953_v15, %s2392_s9 }
  0x95   : > { %461 = vrot.lane.b32.xlu1 %v1952_v16, %s2392_s9  ;;  %2190 = vmatpush3.bf16.msra.mxu1 %v1952_v16 }
  0x98   : > { %543 = vrot.lane.b32.xlu0 %v1953_v15, %s2393_s14  ;;  %2192 = vmatmul.mubr.msk.bf16.vlgmr.msra.gmra.mxu1 %vm323_vm2, %v2346_v17 }
  0x99   : > { %623 = vrot.lane.b32.xlu1 %v1953_v15, %s2394_s15  ;;  %2207 = vmatprep.mubr.msk.bf16.mxu1 %vm323_vm2, %v2348_v18 }
  0x9c   : > { %541 = vrot.lane.b32.xlu0 %v1952_v16, %s2393_s14 }
  0x9d   : > { %621 = vrot.lane.b32.xlu1 %v1952_v16, %s2394_s15 }
  0xa0   : > { %703 = vrot.lane.b32.xlu0 %v1953_v15, %s2395_s16 }
  0xa1   : > { %783 = vrot.lane.b32.xlu1 %v1953_v15, %s2396_s17 }
  0xa4   : > { %701 = vrot.lane.b32.xlu0 %v1952_v16, %s2395_s16 }
  0xa5   : > { %781 = vrot.lane.b32.xlu1 %v1952_v16, %s2396_s17 }
  0xa8   : > { %863 = vrot.lane.b32.xlu0 %v1953_v15, %s2397_s18 }
  0xa9   : > { %943 = vrot.lane.b32.xlu1 %v1953_v15, %s2398_s19 }
  0xac   : > { %861 = vrot.lane.b32.xlu0 %v1952_v16, %s2397_s18 }
  0xad   : > { %941 = vrot.lane.b32.xlu1 %v1952_v16, %s2398_s19 }
  0xb0   : > { %1022 = vperm.xlu0 %2341, %v1008_v19  }
  0xb1   : > { %1027 = vperm.xlu1 %2342, %v1009_v20  }
  0xb4   : > { %1017 = vperm.xlu0 %2341, %v1007_v21  }
  0xb5   : > { %1012 = vperm.xlu1 %2342, %v1006_v22  }
 0x102   : > { %v320_v23 = vpop.permute.xlu0 %319 }
 0x103   : > { %v318_v24 = vpop.permute.xlu1 %317  ;;  %2179 = vmatprep.subr.bf16.mxu0 %v320_v23 }
 0x104   : > { %2180 = vmatpush3.bf16.msra.mxu0 %v320_v23 }
 0x105   : > { %2181 = vmatprep.subr.bf16.mxu0 %v318_v24 }
 0x106   : > { %v464_v25 = vpop.permute.xlu0 %463 }
 0x107   : > { %v462_v26 = vpop.permute.xlu1 %461 }
 0x108   : > { %2182 = vmatpush3.bf16.msra.mxu0 %v318_v24 }
 0x109   : > { %2195 = vmatprep.subr.bf16.mxu0 %v464_v25 }
 0x10a   : > { %v544_v29 = vpop.permute.xlu0 %543 }
 0x10b   : > { %v624_v30 = vpop.permute.xlu1 %623  ;;  %2184 = vmatmul.mubr.msk.bf16.vlgmr.msra.gmra.mxu0 %vm323_vm2, %v2345_v27  ;;  %2203 = vmatprep.subr.bf16.mxu1 %v544_v29 }
 0x10c   : > { %2196 = vmatpush3.bf16.msra.mxu0 %v464_v25  ;;  %2204 = vmatpush3.bf16.msra.mxu1 %v544_v29 }
 0x10d   : > { %2197 = vmatprep.subr.bf16.mxu0 %v462_v26  ;;  %2199 = vmatprep.mubr.msk.bf16.mxu0 %vm323_vm2, %v2347_v28 }
 0x10e   : > { %v542_v31 = vpop.permute.xlu0 %541 }
 0x10f   : > { %v622_v32 = vpop.permute.xlu1 %621  ;;  %2205 = vmatprep.subr.bf16.mxu1 %v542_v31 }
 0x110   : > { %2198 = vmatpush3.bf16.msra.mxu0 %v462_v26  ;;  %2206 = vmatpush3.bf16.msra.mxu1 %v542_v31 }
 0x111   : > { %2211 = vmatprep.subr.bf16.mxu0 %v624_v30 }
 0x112   : > { %v704_v35 = vpop.permute.xlu0 %703 }
 0x113   : > { %v784_v38 = vpop.permute.xlu1 %783  ;;  %2200 = vmatmul.mubr.msk.bf16.vlgmr.msra.gmra.mxu0 %vm323_vm2, %v2349_v33  ;;  %2208 = vmatmul.mubr.msk.bf16.vlgmr.msra.gmra.mxu1 %vm323_vm2, %v2350_v34 }
 0x114   : > { %2219 = vmatprep.subr.bf16.mxu1 %v704_v35  ;;  %2212 = vmatpush3.bf16.msra.mxu0 %v624_v30 }
 0x115   : > { %2220 = vmatpush3.bf16.msra.mxu1 %v704_v35  ;;  %2213 = vmatprep.subr.bf16.mxu0 %v622_v32 }
 0x116   : > { %v702_v39 = vpop.permute.xlu0 %701  ;;  %2215 = vmatprep.mubr.msk.bf16.mxu0 %vm323_vm2, %v2351_v36  ;;  %2223 = vmatprep.mubr.msk.bf16.mxu1 %vm323_vm2, %v2352_v37 }
 0x117   : > { %2221 = vmatprep.subr.bf16.mxu1 %v702_v39  ;;  %v782_v41 = vpop.permute.xlu1 %781 }
 0x118   : > { %2214 = vmatpush3.bf16.msra.mxu0 %v622_v32 }
 0x119   : > { %2222 = vmatpush3.bf16.msra.mxu1 %v702_v39  ;;  %2227 = vmatprep.subr.bf16.mxu0 %v784_v38 }
 0x11a   : > { %v864_v43 = vpop.permute.xlu0 %863 }
 0x11b   : > { %2216 = vmatmul.mubr.msk.bf16.vlgmr.msra.gmra.mxu0 %vm323_vm2, %v2353_v40  ;;  %2235 = vmatprep.subr.bf16.mxu1 %v864_v43  ;;  %v944_v46 = vpop.permute.xlu1 %943 }
 0x11c   : > { %2224 = vmatmul.mubr.msk.bf16.vlgmr.msra.gmra.mxu1 %vm323_vm2, %v2354_v42  ;;  %2228 = vmatpush3.bf16.msra.mxu0 %v784_v38 }
 0x11d   : > { %2236 = vmatpush3.bf16.msra.mxu1 %v864_v43  ;;  %2229 = vmatprep.subr.bf16.mxu0 %v782_v41 }
 0x11e   : > { %v862_v47 = vpop.permute.xlu0 %861  ;;  %2231 = vmatprep.mubr.msk.bf16.mxu0 %vm323_vm2, %v2355_v44  ;;  %2239 = vmatprep.mubr.msk.bf16.mxu1 %vm323_vm2, %v2356_v45 }
 0x11f   : > { %2237 = vmatprep.subr.bf16.mxu1 %v862_v47  ;;  %v942_v51 = vpop.permute.xlu1 %941 }
 0x120   : > { %2230 = vmatpush3.bf16.msra.mxu0 %v782_v41 }
 0x121   : > { %2238 = vmatpush3.bf16.msra.mxu1 %v862_v47  ;;  %2243 = vmatprep.subr.bf16.mxu0 %v944_v46 }
 0x123   : > { %2232 = vmatmul.mubr.msk.bf16.vlgmr.msra.gmra.mxu0 %vm323_vm2, %v2357_v48 }
 0x124   : > { %2240 = vmatmul.mubr.msk.bf16.vlgmr.msra.gmra.mxu1 %vm323_vm2, %v2358_v49  ;;  %2244 = vmatpush3.bf16.msra.mxu0 %v944_v46 }
 0x125   : > { %2245 = vmatprep.subr.bf16.mxu0 %v942_v51  ;;  %2247 = vmatprep.mubr.msk.bf16.mxu0 %vm323_vm2, %v2359_v50 }
 0x128   : > { %2246 = vmatpush3.bf16.msra.mxu0 %v942_v51 }
 0x12b   : > { %2248 = vmatmul.mubr.msk.bf16.vlgmr.msra.gmra.mxu0 %vm323_vm2, %v2360_v52  ;;  %v1023_v47 = vpop.permute.xlu0 %1022 }
 0x12c   : > { %v1028_v38 = vpop.permute.xlu1 %1027 }
 0x158   : > { %v2193_v53 = vpop.f32.mrf.mxu1 }
 0x15a   : > { %v431_v54 = vpop.f32.mrf.mxu1 }
 0x15c   : > { %v2194_v56 = vpop.f32.mrf.mxu1 }
 0x15e   : > { %v434_v59 = vpop.f32.mrf.mxu1 }
 0x1cb   : > { %v2185_v55 = vpop.f32.mrf.mxu0 }
 0x1cc   : > { %v440_v5 = vadd.f32 %v2193_v53, %v2185_v55  ;;  %v1013_v53 = vpop.permute.xlu1 %1012 }
 0x1cd   : > { %v364_v57 = vpop.f32.mrf.mxu0 }
 0x1ce   : > { %v432_v8 = vadd.f32 %v431_v54, %v364_v57 }
 0x1cf   : > { %v2186_v58 = vpop.f32.mrf.mxu0 }
 0x1d0   : > { %v443_v11 = vadd.f32 %v2194_v56, %v2186_v58 }
 0x1d1   : > { %v367_v60 = vpop.f32.mrf.mxu0 }
 0x1d2   : > { %v435_v18 = vadd.f32 %v434_v59, %v367_v60 }
 0x1d3   : > { %v2201_v61 = vpop.f32.mrf.mxu0  ;;  %v2209_v62 = vpop.f32.mrf.mxu1 }
 0x1d4   : > { %v524_v9 = vadd.f32 %v2201_v61, %v440_v5 }
 0x1d5   : > { %v507_v63 = vpop.f32.mrf.mxu0  ;;  %v587_v0 = vpop.f32.mrf.mxu1 }
 0x1d6   : > { %v522_v12 = vadd.f32 %v507_v63, %v432_v8  ;;  %v604_v15 = vadd.f32 %v2209_v62, %v524_v9  ;;  %v2573_v62 = vld [vmem:[%s2708_s1] ss:$0 sm:$0xff] }
 0x1d7   : > { %v2202_v3 = vpop.f32.mrf.mxu0  ;;  %v2210_v4 = vpop.f32.mrf.mxu1 }
 0x1d8   : > { %v525_v16 = vadd.f32 %v2202_v3, %v443_v11  ;;  %v602_v20 = vadd.f32 %v587_v0, %v522_v12 }
 0x1d9   : > { %v510_v6 = vpop.f32.mrf.mxu0  ;;  %v590_v7 = vpop.f32.mrf.mxu1 }
 0x1da   : > { %v523_v23 = vadd.f32 %v510_v6, %v435_v18  ;;  %v605_v25 = vadd.f32 %v2210_v4, %v525_v16 }
 0x1db   : > { %v2217_v10 = vpop.f32.mrf.mxu0 }
 0x1dc   : > { %v2225_v13 = vpop.f32.mrf.mxu1  ;;  %v684_v21 = vadd.f32 %v2217_v10, %v604_v15  ;;  %v603_v32 = vadd.f32 %v590_v7, %v523_v23  ;;  %v1018_v10 = vpop.permute.xlu0 %1017 }
 0x1dd   : > { %v667_v14 = vpop.f32.mrf.mxu0 }
 0x1de   : > { %v747_v17 = vpop.f32.mrf.mxu1  ;;  %v682_v26 = vadd.f32 %v667_v14, %v602_v20  ;;  %v764_v29 = vadd.f32 %v2225_v13, %v684_v21 }
 0x1df   : > { %v2218_v19 = vpop.f32.mrf.mxu0 }
 0x1e0   : > { %v2226_v22 = vpop.f32.mrf.mxu1  ;;  %v685_v30 = vadd.f32 %v2218_v19, %v605_v25  ;;  %v762_v34 = vadd.f32 %v747_v17, %v682_v26  ;;  %v2361_v26 = vld [vmem:[%s2711_s4 + $0x10] sm:$0xff]  }
 0x1e1   : > { %v670_v24 = vpop.f32.mrf.mxu0  ;;  %2255 = vmatprep.mubr.msk.bf16.mxu1 %vm323_vm2, %v2361_v26 }
 0x1e2   : > { %v750_v27 = vpop.f32.mrf.mxu1  ;;  %v683_v36 = vadd.f32 %v670_v24, %v603_v32  ;;  %v765_v39 = vadd.f32 %v2226_v22, %v685_v30 }
 0x1e3   : > { %v2233_v28 = vpop.f32.mrf.mxu0 }
 0x1e4   : > { %v2241_v31 = vpop.f32.mrf.mxu1  ;;  %v844_v35 = vadd.f32 %v2233_v28, %v764_v29  ;;  %v763_v45 = vadd.f32 %v750_v27, %v683_v36  ;;  %v2362_v27 = vld [vmem:[%s2711_s4] sm:$0xff]  }
 0x1e5   : > { %v827_v33 = vpop.f32.mrf.mxu0  ;;  %2263 = vmatprep.mubr.msk.bf16.mxu0 %vm323_vm2, %v2362_v27  ;;  %v1809_v36 = vld [vmem:[%s2712_s5] sm:$0xff] }
 0x1e6   : > { %v842_v40 = vadd.f32 %v827_v33, %v762_v34  ;;  %v907_v41 = vpop.f32.mrf.mxu1  ;;  %v924_v43 = vadd.f32 %v2241_v31, %v844_v35  ;;  %v2364_v34 = vld [vmem:[%s2711_s4 + $0x8] sm:$0xff]   ;;  %v2367_v35 = vld [vmem:[%s2711_s4 + $0x30] sm:$0xff]  }
 0x1e7   : > { %v2234_v37 = vpop.f32.mrf.mxu0 }
 0x1e8   : > { %v845_v44 = vadd.f32 %v2234_v37, %v765_v39  ;;  %v922_v48 = vadd.f32 %v907_v41, %v842_v40  ;;  %v2242_v49 = vpop.f32.mrf.mxu1  ;;  %v1811_v37 = vld [vmem:[%s2712_s5 + $0x10] sm:$0xff]  ;;  %v1812_v39 = vld [vmem:[%s2712_s5 + $0x18] sm:$0xff] }
 0x1e9   : > { %v830_v42 = vpop.f32.mrf.mxu0 }
 0x1ea   : > { %v843_v51 = vadd.f32 %v830_v42, %v763_v45  ;;  %v925_v54 = vadd.f32 %v2242_v49, %v845_v44  ;;  %v910_v58 = vpop.f32.mrf.mxu1  ;;  %v2365_v44 = vld [vmem:[%s2711_s4 + $0x20] sm:$0xff]   ;;  %v2366_v49 = vld [vmem:[%s2711_s4 + $0x28] sm:$0xff]  }
 0x1eb   : > { %v2249_v46 = vpop.f32.mrf.mxu0 }
 0x1ec   : > { %v1004_v50 = vadd.f32 %v2249_v46, %v924_v43  ;;  %v923_v63 = vadd.f32 %v910_v58, %v843_v51  ;;  %v2363_v43 = vld [vmem:[%s2711_s4 + $0x18] sm:$0xff]  }
 0x1ed   : > { %v987_v52 = vpop.f32.mrf.mxu0  ;;  %v2372_v58 = vld [vmem:[%s2711_s4 + $0x58] sm:$0xff]  }
 0x1ee   : > { %v1032_v55 = vadd.f32 %v1023_v47, %v1004_v50  ;;  %v1002_v56 = vadd.f32 %v987_v52, %v922_v48  ;;  %v2368_v50 = vld [vmem:[%s2711_s4 + $0x38] sm:$0xff]  }
 0x1ef   : > { %v2250_v57 = vpop.f32.mrf.mxu0 }
 0x1f0   : > { %vm1036_vm3 = vcmp.ge.f32.partialorder %v1032_v55, 0.0  ;;  %v1040_v59 = vmul.f32 0.01, %v1032_v55  ;;  %v1005_v60 = vadd.f32 %v2250_v57, %v925_v54  ;;  %v1030_v61 = vadd.f32 %v1013_v53, %v1002_v56  ;;  %v2369_v53 = vld [vmem:[%s2711_s4 + $0x40] sm:$0xff]   ;;  %v2371_v54 = vld [vmem:[%s2711_s4 + $0x50] sm:$0xff]   ;;  %v2370_v57 = vld [vmem:[%s2711_s4 + $0x48] sm:$0xff]  }
 0x1f1   : > { %v990_v0 = vpop.f32.mrf.mxu0 }
 0x1f2   : > { %v1044_v3 = vsel %vm1036_vm3, %v1032_v55, %v1040_v59  ;;  %v1033_v4 = vadd.f32 %v1028_v38, %v1005_v60  ;;  %vm1034_vm4 = vcmp.ge.f32.partialorder %v1030_v61, 0.0  ;;  %v1038_v5 = vmul.f32 0.01, %v1030_v61  ;;  %v1810_v38 = vld [vmem:[%s2712_s5 + $0x8] sm:$0xff] }
 0x1f3   : > { %v1003_v6 = vadd.f32 %v990_v0, %v923_v63  ;;  %v1054_v7 = vmul.f32 %v2573_v62, %v1044_v3  ;;  %v2375_v63 = vld [vmem:[%s2711_s4 + $0x70] sm:$0xff]  }
 0x1f4   : > { %vm1037_vm5 = vcmp.ge.f32.partialorder %v1033_v4, 0.0  ;;  %v1041_v8 = vmul.f32 0.01, %v1033_v4  ;;  %v1042_v9 = vsel %vm1034_vm4, %v1030_v61, %v1038_v5  ;;  %v2373_v61 = vld [vmem:[%s2711_s4 + $0x60] sm:$0xff]   ;;  %v2376_v5 = vld [vmem:[%s2711_s4 + $0x78] sm:$0xff]  }
 0x1f5   : > { %v1031_v11 = vadd.f32 %v1018_v10, %v1003_v6  ;;  %v2101_v12 = vpack.c.bf16 %v1054_v7, %v1054_v7  ;;  %v1052_v13 = vmul.f32 %v2573_v62, %v1042_v9  ;;  %v2377_v6 = vld [vmem:[%s2711_s4 + $0x80] sm:$0xff]  }
 0x1f6   : > { %v1045_v14 = vsel %vm1037_vm5, %v1033_v4, %v1041_v8  ;;  %v2374_v4 = vld [vmem:[%s2711_s4 + $0x68] sm:$0xff]  }
 0x1f7   : > { %vm1035_vm6 = vcmp.ge.f32.partialorder %v1031_v11, 0.0  ;;  %v1039_v15 = vmul.f32 0.01, %v1031_v11  ;;  %1076 = vrot.lane.b32.xlu1 %v2101_v12, %s2390_s27  ;;  %v1055_v16 = vmul.f32 %v2573_v62, %v1045_v14  ;;  %v2099_v18 = vpack.c.bf16 %v1052_v13, %v1052_v13  ;;  %v2378_v8 = vld [vmem:[%s2711_s4 + $0x88] sm:$0xff]  }
 0x1f9   : > { %v2102_v17 = vpack.c.bf16 %v1055_v16, %v1055_v16  ;;  %v1043_v19 = vsel %vm1035_vm6, %v1031_v11, %v1039_v15 }
 0x1fa   : > { %v1053_v20 = vmul.f32 %v2573_v62, %v1043_v19 }
 0x1fb   : > { %1078 = vrot.lane.b32.xlu0 %v2102_v17, %s2390_s27  ;;  %1072 = vrot.lane.b32.xlu1 %v2099_v18, %s2390_s27 }
 0x1fc   : > { %v2100_v21 = vpack.c.bf16 %v1053_v20, %v1053_v20 }
 0x1ff   : > { %1074 = vrot.lane.b32.xlu0 %v2100_v21, %s2390_s27 }
 0x269   : > { %v1077_v22 = vpop.permute.xlu1 %1076 }
 0x26a   : > { %1086 = vst.msk [vmem:[#allocation3 + $0x8] sm:$0xf] %vm279_vm1, %v1077_v22 }
 0x26d   : > { %v1079_v23 = vpop.permute.xlu0 %1078  ;;  %v1073_v24 = vpop.permute.xlu1 %1072 }
 0x26e   : > { %1087 = vst.msk [vmem:[#allocation3 + $0xc] sm:$0xf] %vm279_vm1, %v1079_v23  ;;  %1084 = vst.msk [vmem:[#allocation3] sm:$0xf] %vm279_vm1, %v1073_v24 }
 0x271   : > { %v1075_v25 = vpop.permute.xlu0 %1074  ;;  %v1094_v28 = vld [vmem:[#allocation3 + $0x8] sm:$0xf] }
 0x272   : > { %1085 = vst.msk [vmem:[#allocation3 + $0x4] sm:$0xf] %vm279_vm1, %v1075_v25 }
 0x275   : > { %v1095_v29 = vld [vmem:[#allocation3 + $0xc] sm:$0xf]  ;;  %v1092_v31 = vld [vmem:[#allocation3] sm:$0xf] }
 0x276   : > { %v2028_v30 = vcombine.low %v1094_v28, %v1095_v29 }
 0x278   : > { %2259 = vmatprep.subr.bf16.mxu0 %v2028_v30  ;;  %1123 = vrot.lane.b32.xlu1 %v2028_v30, %s2391_s8 }
 0x279   : > { %v1093_v32 = vld [vmem:[#allocation3 + $0x4] sm:$0xf]  ;;  %2260 = vmatpush3.bf16.msra.mxu0 %v2028_v30 }
 0x27a   : > { %v2027_v33 = vcombine.low %v1092_v31, %v1093_v32 }
 0x27c   : > { %1266 = vrot.lane.b32.xlu1 %v2028_v30, %s2392_s9  ;;  %1121 = vrot.lane.b32.xlu0 %v2027_v33, %s2391_s8 }
 0x27d   : > { %2261 = vmatprep.subr.bf16.mxu0 %v2027_v33 }
 0x27e   : > { %2262 = vmatpush3.bf16.msra.mxu0 %v2027_v33 }
 0x280   : > { %1346 = vrot.lane.b32.xlu1 %v2028_v30, %s2393_s14  ;;  %1264 = vrot.lane.b32.xlu0 %v2027_v33, %s2392_s9 }
 0x281   : > { %2264 = vmatmul.mubr.msk.bf16.vlgmr.msra.gmra.mxu0 %vm323_vm2, %v2364_v34 }
 0x282   : > { %2279 = vmatprep.mubr.msk.bf16.mxu0 %vm323_vm2, %v2367_v35 }
 0x284   : > { %1344 = vrot.lane.b32.xlu1 %v2027_v33, %s2393_s14  ;;  %1426 = vrot.lane.b32.xlu0 %v2028_v30, %s2394_s15 }
 0x288   : > { %1506 = vrot.lane.b32.xlu1 %v2028_v30, %s2395_s16  ;;  %1424 = vrot.lane.b32.xlu0 %v2027_v33, %s2394_s15 }
 0x28c   : > { %1504 = vrot.lane.b32.xlu1 %v2027_v33, %s2395_s16  ;;  %1586 = vrot.lane.b32.xlu0 %v2028_v30, %s2396_s17 }
 0x290   : > { %1666 = vrot.lane.b32.xlu1 %v2028_v30, %s2397_s18  ;;  %1584 = vrot.lane.b32.xlu0 %v2027_v33, %s2396_s17 }
 0x294   : > { %1664 = vrot.lane.b32.xlu1 %v2027_v33, %s2397_s18  ;;  %1746 = vrot.lane.b32.xlu0 %v2028_v30, %s2398_s19 }
 0x298   : > { %1815 = vperm.xlu1 %2342, %v1809_v36   ;;  %1744 = vrot.lane.b32.xlu0 %v2027_v33, %s2398_s19 }
 0x29c   : > { %1825 = vperm.xlu1 %2342, %v1811_v37   ;;  %1820 = vperm.xlu0 %2341, %v1810_v38  }
 0x2a0   : > { %1830 = vperm.xlu0 %2341, %v1812_v39  }
 0x2ea   : > { %v1124_v40 = vpop.permute.xlu1 %1123 }
 0x2eb   : > { %2251 = vmatprep.subr.bf16.mxu1 %v1124_v40 }
 0x2ec   : > { %2252 = vmatpush3.bf16.msra.mxu1 %v1124_v40 }
 0x2ee   : > { %v1122_v41 = vpop.permute.xlu0 %1121  ;;  %v1267_v42 = vpop.permute.xlu1 %1266 }
 0x2ef   : > { %2253 = vmatprep.subr.bf16.mxu1 %v1122_v41 }
 0x2f0   : > { %2254 = vmatpush3.bf16.msra.mxu1 %v1122_v41 }
 0x2f1   : > { %2267 = vmatprep.subr.bf16.mxu1 %v1267_v42 }
 0x2f2   : > { %v1265_v45 = vpop.permute.xlu0 %1264  ;;  %v1347_v46 = vpop.permute.xlu1 %1346 }
 0x2f3   : > { %2256 = vmatmul.mubr.msk.bf16.vlgmr.msra.gmra.mxu1 %vm323_vm2, %v2363_v43  ;;  %2275 = vmatprep.subr.bf16.mxu0 %v1347_v46 }
 0x2f4   : > { %2268 = vmatpush3.bf16.msra.mxu1 %v1267_v42  ;;  %2276 = vmatpush3.bf16.msra.mxu0 %v1347_v46 }
 0x2f5   : > { %2269 = vmatprep.subr.bf16.mxu1 %v1265_v45  ;;  %2271 = vmatprep.mubr.msk.bf16.mxu1 %vm323_vm2, %v2365_v44 }
 0x2f6   : > { %v1427_v47 = vpop.permute.xlu0 %1426  ;;  %v1345_v48 = vpop.permute.xlu1 %1344 }
 0x2f7   : > { %2277 = vmatprep.subr.bf16.mxu0 %v1345_v48 }
 0x2f8   : > { %2270 = vmatpush3.bf16.msra.mxu1 %v1265_v45  ;;  %2278 = vmatpush3.bf16.msra.mxu0 %v1345_v48 }
 0x2f9   : > { %2283 = vmatprep.subr.bf16.mxu1 %v1427_v47 }
 0x2fa   : > { %v1425_v51 = vpop.permute.xlu0 %1424  ;;  %v1507_v52 = vpop.permute.xlu1 %1506 }
 0x2fb   : > { %2272 = vmatmul.mubr.msk.bf16.vlgmr.msra.gmra.mxu1 %vm323_vm2, %v2366_v49  ;;  %2291 = vmatprep.subr.bf16.mxu0 %v1507_v52 }
 0x2fc   : > { %2280 = vmatmul.mubr.msk.bf16.vlgmr.msra.gmra.mxu0 %vm323_vm2, %v2368_v50  ;;  %2284 = vmatpush3.bf16.msra.mxu1 %v1427_v47 }
 0x2fd   : > { %2292 = vmatpush3.bf16.msra.mxu0 %v1507_v52  ;;  %2285 = vmatprep.subr.bf16.mxu1 %v1425_v51 }
 0x2fe   : > { %v1587_v55 = vpop.permute.xlu0 %1586  ;;  %v1505_v56 = vpop.permute.xlu1 %1504  ;;  %2287 = vmatprep.mubr.msk.bf16.mxu1 %vm323_vm2, %v2369_v53  ;;  %2295 = vmatprep.mubr.msk.bf16.mxu0 %vm323_vm2, %v2371_v54 }
 0x2ff   : > { %2293 = vmatprep.subr.bf16.mxu0 %v1505_v56 }
 0x300   : > { %2286 = vmatpush3.bf16.msra.mxu1 %v1425_v51 }
 0x301   : > { %2294 = vmatpush3.bf16.msra.mxu0 %v1505_v56  ;;  %2299 = vmatprep.subr.bf16.mxu1 %v1587_v55 }
 0x302   : > { %v1585_v59 = vpop.permute.xlu0 %1584  ;;  %v1667_v60 = vpop.permute.xlu1 %1666 }
 0x303   : > { %2288 = vmatmul.mubr.msk.bf16.vlgmr.msra.gmra.mxu1 %vm323_vm2, %v2370_v57  ;;  %2307 = vmatprep.subr.bf16.mxu0 %v1667_v60 }
 0x304   : > { %2296 = vmatmul.mubr.msk.bf16.vlgmr.msra.gmra.mxu0 %vm323_vm2, %v2372_v58  ;;  %2300 = vmatpush3.bf16.msra.mxu1 %v1587_v55 }
 0x305   : > { %2308 = vmatpush3.bf16.msra.mxu0 %v1667_v60  ;;  %2301 = vmatprep.subr.bf16.mxu1 %v1585_v59 }
 0x306   : > { %v1747_v0 = vpop.permute.xlu0 %1746  ;;  %v1665_v3 = vpop.permute.xlu1 %1664  ;;  %2303 = vmatprep.mubr.msk.bf16.mxu1 %vm323_vm2, %v2373_v61  ;;  %2311 = vmatprep.mubr.msk.bf16.mxu0 %vm323_vm2, %v2375_v63 }
 0x307   : > { %2309 = vmatprep.subr.bf16.mxu0 %v1665_v3 }
 0x308   : > { %2302 = vmatpush3.bf16.msra.mxu1 %v1585_v59 }
 0x309   : > { %2310 = vmatpush3.bf16.msra.mxu0 %v1665_v3  ;;  %2315 = vmatprep.subr.bf16.mxu1 %v1747_v0 }
 0x30a   : > { %v1745_v7 = vpop.permute.xlu0 %1744 }
 0x30b   : > { %2304 = vmatmul.mubr.msk.bf16.vlgmr.msra.gmra.mxu1 %vm323_vm2, %v2374_v4 }
 0x30c   : > { %2312 = vmatmul.mubr.msk.bf16.vlgmr.msra.gmra.mxu0 %vm323_vm2, %v2376_v5  ;;  %2316 = vmatpush3.bf16.msra.mxu1 %v1747_v0 }
 0x30d   : > { %2317 = vmatprep.subr.bf16.mxu1 %v1745_v7  ;;  %2319 = vmatprep.mubr.msk.bf16.mxu1 %vm323_vm2, %v2377_v6 }
 0x310   : > { %2318 = vmatpush3.bf16.msra.mxu1 %v1745_v7 }
 0x313   : > { %2320 = vmatmul.mubr.msk.bf16.vlgmr.msra.gmra.mxu1 %vm323_vm2, %v2378_v8  ;;  %v1816_v54 = vpop.permute.xlu1 %1815 }
 0x317   : > { %v1821_v0 = vpop.permute.xlu0 %1820  ;;  %v1826_v8 = vpop.permute.xlu1 %1825 }
 0x341   : > { %v2265_v9 = vpop.f32.mrf.mxu0 }
 0x343   : > { %v1234_v10 = vpop.f32.mrf.mxu0 }
 0x345   : > { %v2266_v12 = vpop.f32.mrf.mxu0 }
 0x347   : > { %v1237_v15 = vpop.f32.mrf.mxu0 }
 0x3b3   : > { %v2257_v11 = vpop.f32.mrf.mxu1 }
 0x3b4   : > { %v1243_v22 = vadd.f32 %v2265_v9, %v2257_v11 }
 0x3b5   : > { %v1167_v13 = vpop.f32.mrf.mxu1 }
 0x3b6   : > { %v1235_v25 = vadd.f32 %v1234_v10, %v1167_v13 }
 0x3b7   : > { %v2258_v14 = vpop.f32.mrf.mxu1 }
 0x3b8   : > { %v1246_v29 = vadd.f32 %v2266_v12, %v2258_v14 }
 0x3b9   : > { %v1170_v16 = vpop.f32.mrf.mxu1 }
 0x3ba   : > { %v1238_v36 = vadd.f32 %v1237_v15, %v1170_v16 }
 0x3bb   : > { %v2273_v17 = vpop.f32.mrf.mxu1 }
 0x3bc   : > { %v2281_v18 = vpop.f32.mrf.mxu0  ;;  %v1327_v26 = vadd.f32 %v2273_v17, %v1243_v22 }
 0x3bd   : > { %v1310_v19 = vpop.f32.mrf.mxu1 }
 0x3be   : > { %v1390_v20 = vpop.f32.mrf.mxu0  ;;  %v1325_v30 = vadd.f32 %v1310_v19, %v1235_v25  ;;  %v1407_v33 = vadd.f32 %v2281_v18, %v1327_v26  ;;  %v1855_v19 = vunpack.c.l.bf16 %v2453_v1  ;;  %v1853_v26 = vunpack.c.l.bf16 %v2456_v2 }
 0x3bf   : > { %v2274_v21 = vpop.f32.mrf.mxu1 }
 0x3c0   : > { %v2282_v23 = vpop.f32.mrf.mxu0  ;;  %v1328_v34 = vadd.f32 %v2274_v21, %v1246_v29  ;;  %v1405_v38 = vadd.f32 %v1390_v20, %v1325_v30  ;;  %v1831_v20 = vpop.permute.xlu0 %1830 }
 0x3c1   : > { %v1313_v24 = vpop.f32.mrf.mxu1 }
 0x3c2   : > { %v1393_v27 = vpop.f32.mrf.mxu0  ;;  %v1326_v41 = vadd.f32 %v1313_v24, %v1238_v36  ;;  %v1408_v43 = vadd.f32 %v2282_v23, %v1328_v34 }
 0x3c3   : > { %v2289_v28 = vpop.f32.mrf.mxu1 }
 0x3c4   : > { %v2297_v31 = vpop.f32.mrf.mxu0  ;;  %v1487_v39 = vadd.f32 %v2289_v28, %v1407_v33  ;;  %v1406_v50 = vadd.f32 %v1393_v27, %v1326_v41 }
 0x3c5   : > { %v1470_v32 = vpop.f32.mrf.mxu1 }
 0x3c6   : > { %v1550_v35 = vpop.f32.mrf.mxu0  ;;  %v1485_v44 = vadd.f32 %v1470_v32, %v1405_v38  ;;  %v1567_v47 = vadd.f32 %v2297_v31, %v1487_v39  ;;  %v2379_v31 = vld [vmem:[%s2450_s26 + $0xc] sm:$0xf]  ;;  %v2380_v39 = vld [vmem:[%s2450_s26 + $0x4] sm:$0xf] }
 0x3c7   : > { %v2290_v37 = vpop.f32.mrf.mxu1  ;;  %v1856_v32 = vunpack.c.l.bf16 %v2379_v31 }
 0x3c8   : > { %v2298_v40 = vpop.f32.mrf.mxu0  ;;  %v1488_v48 = vadd.f32 %v2290_v37, %v1408_v43  ;;  %v1565_v52 = vadd.f32 %v1550_v35, %v1485_v44 }
 0x3c9   : > { %v1473_v42 = vpop.f32.mrf.mxu1 }
 0x3ca   : > { %v1553_v45 = vpop.f32.mrf.mxu0  ;;  %v1486_v55 = vadd.f32 %v1473_v42, %v1406_v50  ;;  %v1568_v57 = vadd.f32 %v2298_v40, %v1488_v48  ;;  %v1854_v40 = vunpack.c.l.bf16 %v2380_v39 }
 0x3cb   : > { %v2305_v46 = vpop.f32.mrf.mxu1 }
 0x3cc   : > { %v2313_v49 = vpop.f32.mrf.mxu0  ;;  %v1647_v53 = vadd.f32 %v2305_v46, %v1567_v47  ;;  %v1566_v3 = vadd.f32 %v1553_v45, %v1486_v55 }
 0x3cd   : > { %v1630_v51 = vpop.f32.mrf.mxu1 }
 0x3ce   : > { %v1645_v58 = vadd.f32 %v1630_v51, %v1565_v52  ;;  %v1710_v59 = vpop.f32.mrf.mxu0  ;;  %v1727_v61 = vadd.f32 %v2313_v49, %v1647_v53 }
 0x3cf   : > { %v2306_v56 = vpop.f32.mrf.mxu1 }
 0x3d0   : > { %v1648_v63 = vadd.f32 %v2306_v56, %v1568_v57  ;;  %v1725_v5 = vadd.f32 %v1710_v59, %v1645_v58  ;;  %v2314_v6 = vpop.f32.mrf.mxu0 }
 0x3d1   : > { %v1633_v60 = vpop.f32.mrf.mxu1 }
 0x3d2   : > { %v1646_v9 = vadd.f32 %v1633_v60, %v1566_v3  ;;  %v1728_v11 = vadd.f32 %v2314_v6, %v1648_v63  ;;  %v1713_v15 = vpop.f32.mrf.mxu0 }
 0x3d3   : > { %v2321_v4 = vpop.f32.mrf.mxu1 }
 0x3d4   : > { %v1807_v7 = vadd.f32 %v2321_v4, %v1727_v61  ;;  %v1726_v21 = vadd.f32 %v1713_v15, %v1646_v9 }
 0x3d5   : > { %v1790_v10 = vpop.f32.mrf.mxu1 }
 0x3d6   : > { %v1835_v12 = vadd.f32 %v1826_v8, %v1807_v7  ;;  %v1805_v13 = vadd.f32 %v1790_v10, %v1725_v5 }
 0x3d7   : > { %v2322_v14 = vpop.f32.mrf.mxu1 }
 0x3d8   : > { %vm1839_vm7 = vcmp.ge.f32.partialorder %v1835_v12, 0.0  ;;  %v1843_v16 = vmul.f32 0.01, %v1835_v12  ;;  %v1833_v17 = vadd.f32 %v1816_v54, %v1805_v13  ;;  %v1808_v18 = vadd.f32 %v2322_v14, %v1728_v11 }
 0x3d9   : > { %v1793_v22 = vpop.f32.mrf.mxu1 }
 0x3da   : > { %v1847_v23 = vsel %vm1839_vm7, %v1835_v12, %v1843_v16  ;;  %vm1837_vm8 = vcmp.ge.f32.partialorder %v1833_v17, 0.0  ;;  %v1841_v24 = vmul.f32 0.01, %v1833_v17  ;;  %v1836_v25 = vadd.f32 %v1831_v20, %v1808_v18 }
 0x3db   : > { %v1851_v27 = vmul.f32 %v2573_v62, %v1847_v23  ;;  %v1806_v28 = vadd.f32 %v1793_v22, %v1726_v21 }
 0x3dc   : > { %v1845_v29 = vsel %vm1837_vm8, %v1833_v17, %v1841_v24  ;;  %vm1840_vm9 = vcmp.ge.f32.partialorder %v1836_v25, 0.0  ;;  %v1844_v30 = vmul.f32 0.01, %v1836_v25 }
 0x3dd   : > { %v1859_v1 = vadd.f32 %v1855_v19, %v1851_v27  ;;  %v1849_v33 = vmul.f32 %v2573_v62, %v1845_v29  ;;  %v1834_v34 = vadd.f32 %v1821_v0, %v1806_v28 }
 0x3de   : > { %v1848_v2 = vsel %vm1840_vm9, %v1836_v25, %v1844_v30 }
 0x3df   : > { %v2105_v35 = vpack.c.bf16 %v1859_v1, %v1859_v1  ;;  %v1857_v36 = vadd.f32 %v1853_v26, %v1849_v33  ;;  %v1852_v37 = vmul.f32 %v2573_v62, %v1848_v2  ;;  %vm1838_vm11 = vcmp.ge.f32.partialorder %v1834_v34, 0.0 }
 0x3e0   : > { %v1842_v38 = vmul.f32 0.01, %v1834_v34 }
 0x3e1   : > { %1880 = vst.msk [vmem:[%s251_s13 + $0x8] sm:$0xf] %vm1877_vm10, %v2105_v35  ;;  %v2103_v41 = vpack.c.bf16 %v1857_v36, %v1857_v36  ;;  %v1860_v42 = vadd.f32 %v1856_v32, %v1852_v37 }
 0x3e2   : > { %v1846_v43 = vsel %vm1838_vm11, %v1834_v34, %v1842_v38 }
 0x3e3   : > { %1878 = vst.msk [vmem:[%s251_s13] sm:$0xf] %vm1877_vm10, %v2103_v41  ;;  %v2106_v44 = vpack.c.bf16 %v1860_v42, %v1860_v42  ;;  %v1850_v45 = vmul.f32 %v2573_v62, %v1846_v43 }
 0x3e5   : > { %1881 = vst.msk [vmem:[%s251_s13 + $0xc] sm:$0xf] %vm1877_vm10, %v2106_v44  ;;  %v1858_v46 = vadd.f32 %v1854_v40, %v1850_v45 }
 0x3e7   : > { %v2104_v47 = vpack.c.bf16 %v1858_v46, %v1858_v46 }
 0x3e9   : > { %1879 = vst.msk [vmem:[%s251_s13 + $0x4] sm:$0xf] %vm1877_vm10, %v2104_v47 }
 0x3ea PF: > { %s16_s21 = sadd.s32 1, %s2387_s21  }
 0x3eb   : > { %p13_p4 = scmp.ge.s32.totalorder %s16_s21, 4  }
 0x3ed   :  { %15 = sbr.rel (!%p13_p4) target bundleno = 1 (0x1), region = 90 }

// kernel: analysis_transform.10
= control target key start
LH: loop header
LB: loop body
LE: loop exit
PB: predicated region body
PF: predicated region fallthrough
CT: control target
= control target key end

     0   :  { %s2434_s21 = smov 0   ;;  %s2707_s0 = inlined_call_operand.vmem [shape: bf16[2,32,36], index: 0, kind: input, shape index: {}]   ;;  %s2708_s1 = inlined_call_operand.vmem [shape: f32[1,36], index: 1, kind: input, shape index: {}]   ;;  %s2709_s2 = inlined_call_operand.vmem [shape: bf16[9,32,32], index: 2, kind: input, shape index: {}]   ;;  %s2710_s3 = inlined_call_operand.vmem [shape: f32[32,1], index: 3, kind: input, shape index: {}]   ;;  %s2711_s4 = inlined_call_operand.vmem [shape: bf16[9,32,32], index: 4, kind: input, shape index: {}]   ;;  %s2712_s5 = inlined_call_operand.vmem [shape: f32[32,1], index: 5, kind: input, shape index: {}]   ;;  %s2713_s6 = inlined_call_operand.vmem [shape: bf16[2,32,36], index: 6, kind: output, shape index: {}]  }
   0x1 LB: > { %s1937_s22 = sadd.s32 4294967295, %s2387_s21   ;;  %p1941_p0 = scmp.ge.s32.totalorder %s2387_s21, 1  ;;  %s2387_s21 = sphi %s2434_s21, %s16_s21  }
   0x2   : > { %p212_p1 = scmp.lt.s32.totalorder %s2387_s21, 3 }
   0x4   : > { %p213_p2 = pnand %p1941_p0, %p212_p1 }
   0x5   : > { %p242_p3 = scmp.lt.s32.totalorder (!%p213_p2), %s1937_s22, 1  ;;  %s2390_s27 = smov (!%p213_p2), 7  }
   0x6   : > { %216 = sbr.rel (%p213_p2) target bundleno = 1002 (0x3ea), region = 44  ;;  %s2391_s8 = smov (!%p213_p2), 127  }
   0x7   : > { %s2392_s9 = smov (!%p213_p2), 126   ;;  %s2393_s14 = smov (!%p213_p2), 122  }
   0x8   : > { %s2394_s15 = smov (!%p213_p2), 121   ;;  %s2395_s16 = smov (!%p213_p2), 120  }
   0x9   : > { %s2396_s17 = smov (!%p213_p2), 116   ;;  %s2397_s18 = smov (!%p213_p2), 115  }
   0xa   : > { %s2398_s19 = smov (!%p213_p2), 114  }
   0xb   : > { %vm258_vm0 = vcmask 404480   ;;  %v2389_v0 = vmov 0   ;;  %s2715_s22 = smov (!%p242_p3, %s1937_s22), 1  ;;  %vm279_vm1 = vcmask 347192   ;;  %v2343_v9 = vld [vmem:[%s2709_s2 + $0x10] sm:$0xff]   ;;  %vm323_vm2 = vcmask 261120  }
   0xc   : > { %261 = vst.msk [vmem:[#allocation2 + $0x8] sm:$0xf] %vm258_vm0, %v2389_v0  ;;  %259 = vst.msk [vmem:[#allocation2] sm:$0xf] %vm258_vm0, %v2389_v0  ;;  %2342 = vset.pattern.permute.xlu1 %v2389_v0  ;;  %2341 = vset.pattern.permute.xlu0 %v2389_v0  ;;  %s2097_s23 = sshll.u32 %s2715_s22, 4  ;;  %v2344_v10 = vld [vmem:[%s2709_s2] sm:$0xff]  }
   0xd   : > { %260 = vst.msk [vmem:[#allocation2 + $0x4] sm:$0xf] %vm258_vm0, %v2389_v0  ;;  %262 = vst.msk [vmem:[#allocation2 + $0xc] sm:$0xf] %vm258_vm0, %v2389_v0  ;;  %s2450_s26 = scalar_lea.vmem %s2707_s0, %s2097_s23  ;;  %2183 = vmatprep.mubr.msk.bf16.mxu0 %vm323_vm2, %v2343_v9  ;;  %2191 = vmatprep.mubr.msk.bf16.mxu1 %vm323_vm2, %v2344_v10  ;;  %v2346_v17 = vld [vmem:[%s2709_s2 + $0x8] sm:$0xff]   ;;  %v2348_v18 = vld [vmem:[%s2709_s2 + $0x30] sm:$0xff]   ;;  %s251_s13 = scalar_lea.vmem %s2713_s6, %s2097_s23 }
   0xe   : > { %1056 = vst.msk [vmem:[#allocation3] sm:$0xf] %vm258_vm0, %v2389_v0  ;;  %1057 = vst.msk [vmem:[#allocation3 + $0x4] sm:$0xf] %vm258_vm0, %v2389_v0  ;;  %v2453_v1 = vld [vmem:[%s2450_s26 + $0x8] sm:$0xf] }
   0xf   : > { %1058 = vst.msk [vmem:[#allocation3 + $0x8] sm:$0xf] %vm258_vm0, %v2389_v0  ;;  %1059 = vst.msk [vmem:[#allocation3 + $0xc] sm:$0xf] %vm258_vm0, %v2389_v0  ;;  %v2456_v2 = vld [vmem:[%s2450_s26] sm:$0xf]  ;;  %271 = vrot.lane.b32.xlu0 %v2453_v1, %s2390_s27 }
  0x10   : > { %v256_v3 = vld [vmem:[%s2450_s26 + $0xc] sm:$0xf]  ;;  %267 = vrot.lane.b32.xlu1 %v2456_v2, %s2390_s27  ;;  %v254_v4 = vld [vmem:[%s2450_s26 + $0x4] sm:$0xf]  ;;  %v1008_v19 = vld [vmem:[%s2710_s3 + $0x10] sm:$0xff]  ;;  %vm1877_vm10 = vcmask 289792  }
  0x11   : > { %v1009_v20 = vld [vmem:[%s2710_s3 + $0x18] sm:$0xff]  ;;  %v1007_v21 = vld [vmem:[%s2710_s3 + $0x8] sm:$0xff]  ;;  %v1006_v22 = vld [vmem:[%s2710_s3] sm:$0xff] }
  0x12   : > { %v2345_v27 = vld [vmem:[%s2709_s2 + $0x18] sm:$0xff]   ;;  %v2347_v28 = vld [vmem:[%s2709_s2 + $0x20] sm:$0xff]   ;;  %v2349_v33 = vld [vmem:[%s2709_s2 + $0x28] sm:$0xff]  }
  0x13   : > { %273 = vrot.lane.b32.xlu0 %v256_v3, %s2390_s27  ;;  %v2350_v34 = vld [vmem:[%s2709_s2 + $0x38] sm:$0xff]   ;;  %v2351_v36 = vld [vmem:[%s2709_s2 + $0x40] sm:$0xff]   ;;  %v2352_v37 = vld [vmem:[%s2709_s2 + $0x50] sm:$0xff]  }
  0x14   : > { %269 = vrot.lane.b32.xlu1 %v254_v4, %s2390_s27  ;;  %v2353_v40 = vld [vmem:[%s2709_s2 + $0x48] sm:$0xff]   ;;  %v2354_v42 = vld [vmem:[%s2709_s2 + $0x58] sm:$0xff]   ;;  %v2355_v44 = vld [vmem:[%s2709_s2 + $0x60] sm:$0xff]  }
  0x15   : > { %v2356_v45 = vld [vmem:[%s2709_s2 + $0x70] sm:$0xff]   ;;  %v2357_v48 = vld [vmem:[%s2709_s2 + $0x68] sm:$0xff]   ;;  %v2358_v49 = vld [vmem:[%s2709_s2 + $0x78] sm:$0xff]  }
  0x16   : > { %v2359_v50 = vld [vmem:[%s2709_s2 + $0x80] sm:$0xff]   ;;  %v2360_v52 = vld [vmem:[%s2709_s2 + $0x88] sm:$0xff]  }
  0x81   : > { %v272_v5 = vpop.permute.xlu0 %271 }
  0x82   : > { %v268_v6 = vpop.permute.xlu1 %267  ;;  %282 = vst.msk [vmem:[#allocation2 + $0x8] sm:$0xf] %vm279_vm1, %v272_v5 }
  0x83   : > { %280 = vst.msk [vmem:[#allocation2] sm:$0xf] %vm279_vm1, %v268_v6 }
  0x85   : > { %v274_v7 = vpop.permute.xlu0 %273 }
  0x86   : > { %v270_v8 = vpop.permute.xlu1 %269  ;;  %283 = vst.msk [vmem:[#allocation2 + $0xc] sm:$0xf] %vm279_vm1, %v274_v7 }
  0x87   : > { %281 = vst.msk [vmem:[#allocation2 + $0x4] sm:$0xf] %vm279_vm1, %v270_v8 }
  0x89   : > { %v290_v12 = vld [vmem:[#allocation2 + $0x8] sm:$0xf] }
  0x8a   : > { %v288_v11 = vld [vmem:[#allocation2] sm:$0xf] }
  0x8d   : > { %v291_v13 = vld [vmem:[#allocation2 + $0xc] sm:$0xf] }
  0x8e   : > { %v289_v14 = vld [vmem:[#allocation2 + $0x4] sm:$0xf]  ;;  %v1953_v15 = vcombine.low %v290_v12, %v291_v13 }
  0x8f   : > { %v1952_v16 = vcombine.low %v288_v11, %v289_v14 }
  0x90   : > { %319 = vrot.lane.b32.xlu0 %v1953_v15, %s2391_s8  ;;  %2187 = vmatprep.subr.bf16.mxu1 %v1953_v15 }
  0x91   : > { %317 = vrot.lane.b32.xlu1 %v1952_v16, %s2391_s8  ;;  %2188 = vmatpush3.bf16.msra.mxu1 %v1953_v15 }
  0x92   : > { %2189 = vmatprep.subr.bf16.mxu1 %v1952_v16 }
  0x94   : > { %463 = vrot.lane.b32.xlu0 %v1953_v15, %s2392_s9 }
  0x95   : > { %461 = vrot.lane.b32.xlu1 %v1952_v16, %s2392_s9  ;;  %2190 = vmatpush3.bf16.msra.mxu1 %v1952_v16 }
  0x98   : > { %543 = vrot.lane.b32.xlu0 %v1953_v15, %s2393_s14  ;;  %2192 = vmatmul.mubr.msk.bf16.vlgmr.msra.gmra.mxu1 %vm323_vm2, %v2346_v17 }
  0x99   : > { %623 = vrot.lane.b32.xlu1 %v1953_v15, %s2394_s15  ;;  %2207 = vmatprep.mubr.msk.bf16.mxu1 %vm323_vm2, %v2348_v18 }
  0x9c   : > { %541 = vrot.lane.b32.xlu0 %v1952_v16, %s2393_s14 }
  0x9d   : > { %621 = vrot.lane.b32.xlu1 %v1952_v16, %s2394_s15 }
  0xa0   : > { %703 = vrot.lane.b32.xlu0 %v1953_v15, %s2395_s16 }
  0xa1   : > { %783 = vrot.lane.b32.xlu1 %v1953_v15, %s2396_s17 }
  0xa4   : > { %701 = vrot.lane.b32.xlu0 %v1952_v16, %s2395_s16 }
  0xa5   : > { %781 = vrot.lane.b32.xlu1 %v1952_v16, %s2396_s17 }
  0xa8   : > { %863 = vrot.lane.b32.xlu0 %v1953_v15, %s2397_s18 }
  0xa9   : > { %943 = vrot.lane.b32.xlu1 %v1953_v15, %s2398_s19 }
  0xac   : > { %861 = vrot.lane.b32.xlu0 %v1952_v16, %s2397_s18 }
  0xad   : > { %941 = vrot.lane.b32.xlu1 %v1952_v16, %s2398_s19 }
  0xb0   : > { %1022 = vperm.xlu0 %2341, %v1008_v19  }
  0xb1   : > { %1027 = vperm.xlu1 %2342, %v1009_v20  }
  0xb4   : > { %1017 = vperm.xlu0 %2341, %v1007_v21  }
  0xb5   : > { %1012 = vperm.xlu1 %2342, %v1006_v22  }
 0x102   : > { %v320_v23 = vpop.permute.xlu0 %319 }
 0x103   : > { %v318_v24 = vpop.permute.xlu1 %317  ;;  %2179 = vmatprep.subr.bf16.mxu0 %v320_v23 }
 0x104   : > { %2180 = vmatpush3.bf16.msra.mxu0 %v320_v23 }
 0x105   : > { %2181 = vmatprep.subr.bf16.mxu0 %v318_v24 }
 0x106   : > { %v464_v25 = vpop.permute.xlu0 %463 }
 0x107   : > { %v462_v26 = vpop.permute.xlu1 %461 }
 0x108   : > { %2182 = vmatpush3.bf16.msra.mxu0 %v318_v24 }
 0x109   : > { %2195 = vmatprep.subr.bf16.mxu0 %v464_v25 }
 0x10a   : > { %v544_v29 = vpop.permute.xlu0 %543 }
 0x10b   : > { %v624_v30 = vpop.permute.xlu1 %623  ;;  %2184 = vmatmul.mubr.msk.bf16.vlgmr.msra.gmra.mxu0 %vm323_vm2, %v2345_v27  ;;  %2203 = vmatprep.subr.bf16.mxu1 %v544_v29 }
 0x10c   : > { %2196 = vmatpush3.bf16.msra.mxu0 %v464_v25  ;;  %2204 = vmatpush3.bf16.msra.mxu1 %v544_v29 }
 0x10d   : > { %2197 = vmatprep.subr.bf16.mxu0 %v462_v26  ;;  %2199 = vmatprep.mubr.msk.bf16.mxu0 %vm323_vm2, %v2347_v28 }
 0x10e   : > { %v542_v31 = vpop.permute.xlu0 %541 }
 0x10f   : > { %v622_v32 = vpop.permute.xlu1 %621  ;;  %2205 = vmatprep.subr.bf16.mxu1 %v542_v31 }
 0x110   : > { %2198 = vmatpush3.bf16.msra.mxu0 %v462_v26  ;;  %2206 = vmatpush3.bf16.msra.mxu1 %v542_v31 }
 0x111   : > { %2211 = vmatprep.subr.bf16.mxu0 %v624_v30 }
 0x112   : > { %v704_v35 = vpop.permute.xlu0 %703 }
 0x113   : > { %v784_v38 = vpop.permute.xlu1 %783  ;;  %2200 = vmatmul.mubr.msk.bf16.vlgmr.msra.gmra.mxu0 %vm323_vm2, %v2349_v33  ;;  %2208 = vmatmul.mubr.msk.bf16.vlgmr.msra.gmra.mxu1 %vm323_vm2, %v2350_v34 }
 0x114   : > { %2219 = vmatprep.subr.bf16.mxu1 %v704_v35  ;;  %2212 = vmatpush3.bf16.msra.mxu0 %v624_v30 }
 0x115   : > { %2220 = vmatpush3.bf16.msra.mxu1 %v704_v35  ;;  %2213 = vmatprep.subr.bf16.mxu0 %v622_v32 }
 0x116   : > { %v702_v39 = vpop.permute.xlu0 %701  ;;  %2215 = vmatprep.mubr.msk.bf16.mxu0 %vm323_vm2, %v2351_v36  ;;  %2223 = vmatprep.mubr.msk.bf16.mxu1 %vm323_vm2, %v2352_v37 }
 0x117   : > { %2221 = vmatprep.subr.bf16.mxu1 %v702_v39  ;;  %v782_v41 = vpop.permute.xlu1 %781 }
 0x118   : > { %2214 = vmatpush3.bf16.msra.mxu0 %v622_v32 }
 0x119   : > { %2222 = vmatpush3.bf16.msra.mxu1 %v702_v39  ;;  %2227 = vmatprep.subr.bf16.mxu0 %v784_v38 }
 0x11a   : > { %v864_v43 = vpop.permute.xlu0 %863 }
 0x11b   : > { %2216 = vmatmul.mubr.msk.bf16.vlgmr.msra.gmra.mxu0 %vm323_vm2, %v2353_v40  ;;  %2235 = vmatprep.subr.bf16.mxu1 %v864_v43  ;;  %v944_v46 = vpop.permute.xlu1 %943 }
 0x11c   : > { %2224 = vmatmul.mubr.msk.bf16.vlgmr.msra.gmra.mxu1 %vm323_vm2, %v2354_v42  ;;  %2228 = vmatpush3.bf16.msra.mxu0 %v784_v38 }
 0x11d   : > { %2236 = vmatpush3.bf16.msra.mxu1 %v864_v43  ;;  %2229 = vmatprep.subr.bf16.mxu0 %v782_v41 }
 0x11e   : > { %v862_v47 = vpop.permute.xlu0 %861  ;;  %2231 = vmatprep.mubr.msk.bf16.mxu0 %vm323_vm2, %v2355_v44  ;;  %2239 = vmatprep.mubr.msk.bf16.mxu1 %vm323_vm2, %v2356_v45 }
 0x11f   : > { %2237 = vmatprep.subr.bf16.mxu1 %v862_v47  ;;  %v942_v51 = vpop.permute.xlu1 %941 }
 0x120   : > { %2230 = vmatpush3.bf16.msra.mxu0 %v782_v41 }
 0x121   : > { %2238 = vmatpush3.bf16.msra.mxu1 %v862_v47  ;;  %2243 = vmatprep.subr.bf16.mxu0 %v944_v46 }
 0x123   : > { %2232 = vmatmul.mubr.msk.bf16.vlgmr.msra.gmra.mxu0 %vm323_vm2, %v2357_v48 }
 0x124   : > { %2240 = vmatmul.mubr.msk.bf16.vlgmr.msra.gmra.mxu1 %vm323_vm2, %v2358_v49  ;;  %2244 = vmatpush3.bf16.msra.mxu0 %v944_v46 }
 0x125   : > { %2245 = vmatprep.subr.bf16.mxu0 %v942_v51  ;;  %2247 = vmatprep.mubr.msk.bf16.mxu0 %vm323_vm2, %v2359_v50 }
 0x128   : > { %2246 = vmatpush3.bf16.msra.mxu0 %v942_v51 }
 0x12b   : > { %2248 = vmatmul.mubr.msk.bf16.vlgmr.msra.gmra.mxu0 %vm323_vm2, %v2360_v52  ;;  %v1023_v47 = vpop.permute.xlu0 %1022 }
 0x12c   : > { %v1028_v38 = vpop.permute.xlu1 %1027 }
 0x158   : > { %v2193_v53 = vpop.f32.mrf.mxu1 }
 0x15a   : > { %v431_v54 = vpop.f32.mrf.mxu1 }
 0x15c   : > { %v2194_v56 = vpop.f32.mrf.mxu1 }
 0x15e   : > { %v434_v59 = vpop.f32.mrf.mxu1 }
 0x1cb   : > { %v2185_v55 = vpop.f32.mrf.mxu0 }
 0x1cc   : > { %v440_v5 = vadd.f32 %v2193_v53, %v2185_v55  ;;  %v1013_v53 = vpop.permute.xlu1 %1012 }
 0x1cd   : > { %v364_v57 = vpop.f32.mrf.mxu0 }
 0x1ce   : > { %v432_v8 = vadd.f32 %v431_v54, %v364_v57 }
 0x1cf   : > { %v2186_v58 = vpop.f32.mrf.mxu0 }
 0x1d0   : > { %v443_v11 = vadd.f32 %v2194_v56, %v2186_v58 }
 0x1d1   : > { %v367_v60 = vpop.f32.mrf.mxu0 }
 0x1d2   : > { %v435_v18 = vadd.f32 %v434_v59, %v367_v60 }
 0x1d3   : > { %v2201_v61 = vpop.f32.mrf.mxu0  ;;  %v2209_v62 = vpop.f32.mrf.mxu1 }
 0x1d4   : > { %v524_v9 = vadd.f32 %v2201_v61, %v440_v5 }
 0x1d5   : > { %v507_v63 = vpop.f32.mrf.mxu0  ;;  %v587_v0 = vpop.f32.mrf.mxu1 }
 0x1d6   : > { %v522_v12 = vadd.f32 %v507_v63, %v432_v8  ;;  %v604_v15 = vadd.f32 %v2209_v62, %v524_v9  ;;  %v2573_v62 = vld [vmem:[%s2708_s1] ss:$0 sm:$0xff] }
 0x1d7   : > { %v2202_v3 = vpop.f32.mrf.mxu0  ;;  %v2210_v4 = vpop.f32.mrf.mxu1 }
 0x1d8   : > { %v525_v16 = vadd.f32 %v2202_v3, %v443_v11  ;;  %v602_v20 = vadd.f32 %v587_v0, %v522_v12 }
 0x1d9   : > { %v510_v6 = vpop.f32.mrf.mxu0  ;;  %v590_v7 = vpop.f32.mrf.mxu1 }
 0x1da   : > { %v523_v23 = vadd.f32 %v510_v6, %v435_v18  ;;  %v605_v25 = vadd.f32 %v2210_v4, %v525_v16 }
 0x1db   : > { %v2217_v10 = vpop.f32.mrf.mxu0 }
 0x1dc   : > { %v2225_v13 = vpop.f32.mrf.mxu1  ;;  %v684_v21 = vadd.f32 %v2217_v10, %v604_v15  ;;  %v603_v32 = vadd.f32 %v590_v7, %v523_v23  ;;  %v1018_v10 = vpop.permute.xlu0 %1017 }
 0x1dd   : > { %v667_v14 = vpop.f32.mrf.mxu0 }
 0x1de   : > { %v747_v17 = vpop.f32.mrf.mxu1  ;;  %v682_v26 = vadd.f32 %v667_v14, %v602_v20  ;;  %v764_v29 = vadd.f32 %v2225_v13, %v684_v21 }
 0x1df   : > { %v2218_v19 = vpop.f32.mrf.mxu0 }
 0x1e0   : > { %v2226_v22 = vpop.f32.mrf.mxu1  ;;  %v685_v30 = vadd.f32 %v2218_v19, %v605_v25  ;;  %v762_v34 = vadd.f32 %v747_v17, %v682_v26  ;;  %v2361_v26 = vld [vmem:[%s2711_s4 + $0x10] sm:$0xff]  }
 0x1e1   : > { %v670_v24 = vpop.f32.mrf.mxu0  ;;  %2255 = vmatprep.mubr.msk.bf16.mxu1 %vm323_vm2, %v2361_v26 }
 0x1e2   : > { %v750_v27 = vpop.f32.mrf.mxu1  ;;  %v683_v36 = vadd.f32 %v670_v24, %v603_v32  ;;  %v765_v39 = vadd.f32 %v2226_v22, %v685_v30 }
 0x1e3   : > { %v2233_v28 = vpop.f32.mrf.mxu0 }
 0x1e4   : > { %v2241_v31 = vpop.f32.mrf.mxu1  ;;  %v844_v35 = vadd.f32 %v2233_v28, %v764_v29  ;;  %v763_v45 = vadd.f32 %v750_v27, %v683_v36  ;;  %v2362_v27 = vld [vmem:[%s2711_s4] sm:$0xff]  }
 0x1e5   : > { %v827_v33 = vpop.f32.mrf.mxu0  ;;  %2263 = vmatprep.mubr.msk.bf16.mxu0 %vm323_vm2, %v2362_v27  ;;  %v1809_v36 = vld [vmem:[%s2712_s5] sm:$0xff] }
 0x1e6   : > { %v842_v40 = vadd.f32 %v827_v33, %v762_v34  ;;  %v907_v41 = vpop.f32.mrf.mxu1  ;;  %v924_v43 = vadd.f32 %v2241_v31, %v844_v35  ;;  %v2364_v34 = vld [vmem:[%s2711_s4 + $0x8] sm:$0xff]   ;;  %v2367_v35 = vld [vmem:[%s2711_s4 + $0x30] sm:$0xff]  }
 0x1e7   : > { %v2234_v37 = vpop.f32.mrf.mxu0 }
 0x1e8   : > { %v845_v44 = vadd.f32 %v2234_v37, %v765_v39  ;;  %v922_v48 = vadd.f32 %v907_v41, %v842_v40  ;;  %v2242_v49 = vpop.f32.mrf.mxu1  ;;  %v1811_v37 = vld [vmem:[%s2712_s5 + $0x10] sm:$0xff]  ;;  %v1812_v39 = vld [vmem:[%s2712_s5 + $0x18] sm:$0xff] }
 0x1e9   : > { %v830_v42 = vpop.f32.mrf.mxu0 }
 0x1ea   : > { %v843_v51 = vadd.f32 %v830_v42, %v763_v45  ;;  %v925_v54 = vadd.f32 %v2242_v49, %v845_v44  ;;  %v910_v58 = vpop.f32.mrf.mxu1  ;;  %v2365_v44 = vld [vmem:[%s2711_s4 + $0x20] sm:$0xff]   ;;  %v2366_v49 = vld [vmem:[%s2711_s4 + $0x28] sm:$0xff]  }
 0x1eb   : > { %v2249_v46 = vpop.f32.mrf.mxu0 }
 0x1ec   : > { %v1004_v50 = vadd.f32 %v2249_v46, %v924_v43  ;;  %v923_v63 = vadd.f32 %v910_v58, %v843_v51  ;;  %v2363_v43 = vld [vmem:[%s2711_s4 + $0x18] sm:$0xff]  }
 0x1ed   : > { %v987_v52 = vpop.f32.mrf.mxu0  ;;  %v2372_v58 = vld [vmem:[%s2711_s4 + $0x58] sm:$0xff]  }
 0x1ee   : > { %v1032_v55 = vadd.f32 %v1023_v47, %v1004_v50  ;;  %v1002_v56 = vadd.f32 %v987_v52, %v922_v48  ;;  %v2368_v50 = vld [vmem:[%s2711_s4 + $0x38] sm:$0xff]  }
 0x1ef   : > { %v2250_v57 = vpop.f32.mrf.mxu0 }
 0x1f0   : > { %vm1036_vm3 = vcmp.ge.f32.partialorder %v1032_v55, 0.0  ;;  %v1040_v59 = vmul.f32 0.01, %v1032_v55  ;;  %v1005_v60 = vadd.f32 %v2250_v57, %v925_v54  ;;  %v1030_v61 = vadd.f32 %v1013_v53, %v1002_v56  ;;  %v2369_v53 = vld [vmem:[%s2711_s4 + $0x40] sm:$0xff]   ;;  %v2371_v54 = vld [vmem:[%s2711_s4 + $0x50] sm:$0xff]   ;;  %v2370_v57 = vld [vmem:[%s2711_s4 + $0x48] sm:$0xff]  }
 0x1f1   : > { %v990_v0 = vpop.f32.mrf.mxu0 }
 0x1f2   : > { %v1044_v3 = vsel %vm1036_vm3, %v1032_v55, %v1040_v59  ;;  %v1033_v4 = vadd.f32 %v1028_v38, %v1005_v60  ;;  %vm1034_vm4 = vcmp.ge.f32.partialorder %v1030_v61, 0.0  ;;  %v1038_v5 = vmul.f32 0.01, %v1030_v61  ;;  %v1810_v38 = vld [vmem:[%s2712_s5 + $0x8] sm:$0xff] }
 0x1f3   : > { %v1003_v6 = vadd.f32 %v990_v0, %v923_v63  ;;  %v1054_v7 = vmul.f32 %v2573_v62, %v1044_v3  ;;  %v2375_v63 = vld [vmem:[%s2711_s4 + $0x70] sm:$0xff]  }
 0x1f4   : > { %vm1037_vm5 = vcmp.ge.f32.partialorder %v1033_v4, 0.0  ;;  %v1041_v8 = vmul.f32 0.01, %v1033_v4  ;;  %v1042_v9 = vsel %vm1034_vm4, %v1030_v61, %v1038_v5  ;;  %v2373_v61 = vld [vmem:[%s2711_s4 + $0x60] sm:$0xff]   ;;  %v2376_v5 = vld [vmem:[%s2711_s4 + $0x78] sm:$0xff]  }
 0x1f5   : > { %v1031_v11 = vadd.f32 %v1018_v10, %v1003_v6  ;;  %v2101_v12 = vpack.c.bf16 %v1054_v7, %v1054_v7  ;;  %v1052_v13 = vmul.f32 %v2573_v62, %v1042_v9  ;;  %v2377_v6 = vld [vmem:[%s2711_s4 + $0x80] sm:$0xff]  }
 0x1f6   : > { %v1045_v14 = vsel %vm1037_vm5, %v1033_v4, %v1041_v8  ;;  %v2374_v4 = vld [vmem:[%s2711_s4 + $0x68] sm:$0xff]  }
 0x1f7   : > { %vm1035_vm6 = vcmp.ge.f32.partialorder %v1031_v11, 0.0  ;;  %v1039_v15 = vmul.f32 0.01, %v1031_v11  ;;  %1076 = vrot.lane.b32.xlu1 %v2101_v12, %s2390_s27  ;;  %v1055_v16 = vmul.f32 %v2573_v62, %v1045_v14  ;;  %v2099_v18 = vpack.c.bf16 %v1052_v13, %v1052_v13  ;;  %v2378_v8 = vld [vmem:[%s2711_s4 + $0x88] sm:$0xff]  }
 0x1f9   : > { %v2102_v17 = vpack.c.bf16 %v1055_v16, %v1055_v16  ;;  %v1043_v19 = vsel %vm1035_vm6, %v1031_v11, %v1039_v15 }
 0x1fa   : > { %v1053_v20 = vmul.f32 %v2573_v62, %v1043_v19 }
 0x1fb   : > { %1078 = vrot.lane.b32.xlu0 %v2102_v17, %s2390_s27  ;;  %1072 = vrot.lane.b32.xlu1 %v2099_v18, %s2390_s27 }
 0x1fc   : > { %v2100_v21 = vpack.c.bf16 %v1053_v20, %v1053_v20 }
 0x1ff   : > { %1074 = vrot.lane.b32.xlu0 %v2100_v21, %s2390_s27 }
 0x269   : > { %v1077_v22 = vpop.permute.xlu1 %1076 }
 0x26a   : > { %1086 = vst.msk [vmem:[#allocation3 + $0x8] sm:$0xf] %vm279_vm1, %v1077_v22 }
 0x26d   : > { %v1079_v23 = vpop.permute.xlu0 %1078  ;;  %v1073_v24 = vpop.permute.xlu1 %1072 }
 0x26e   : > { %1087 = vst.msk [vmem:[#allocation3 + $0xc] sm:$0xf] %vm279_vm1, %v1079_v23  ;;  %1084 = vst.msk [vmem:[#allocation3] sm:$0xf] %vm279_vm1, %v1073_v24 }
 0x271   : > { %v1075_v25 = vpop.permute.xlu0 %1074  ;;  %v1094_v28 = vld [vmem:[#allocation3 + $0x8] sm:$0xf] }
 0x272   : > { %1085 = vst.msk [vmem:[#allocation3 + $0x4] sm:$0xf] %vm279_vm1, %v1075_v25 }
 0x275   : > { %v1095_v29 = vld [vmem:[#allocation3 + $0xc] sm:$0xf]  ;;  %v1092_v31 = vld [vmem:[#allocation3] sm:$0xf] }
 0x276   : > { %v2028_v30 = vcombine.low %v1094_v28, %v1095_v29 }
 0x278   : > { %2259 = vmatprep.subr.bf16.mxu0 %v2028_v30  ;;  %1123 = vrot.lane.b32.xlu1 %v2028_v30, %s2391_s8 }
 0x279   : > { %v1093_v32 = vld [vmem:[#allocation3 + $0x4] sm:$0xf]  ;;  %2260 = vmatpush3.bf16.msra.mxu0 %v2028_v30 }
 0x27a   : > { %v2027_v33 = vcombine.low %v1092_v31, %v1093_v32 }
 0x27c   : > { %1266 = vrot.lane.b32.xlu1 %v2028_v30, %s2392_s9  ;;  %1121 = vrot.lane.b32.xlu0 %v2027_v33, %s2391_s8 }
 0x27d   : > { %2261 = vmatprep.subr.bf16.mxu0 %v2027_v33 }
 0x27e   : > { %2262 = vmatpush3.bf16.msra.mxu0 %v2027_v33 }
 0x280   : > { %1346 = vrot.lane.b32.xlu1 %v2028_v30, %s2393_s14  ;;  %1264 = vrot.lane.b32.xlu0 %v2027_v33, %s2392_s9 }
 0x281   : > { %2264 = vmatmul.mubr.msk.bf16.vlgmr.msra.gmra.mxu0 %vm323_vm2, %v2364_v34 }
 0x282   : > { %2279 = vmatprep.mubr.msk.bf16.mxu0 %vm323_vm2, %v2367_v35 }
 0x284   : > { %1344 = vrot.lane.b32.xlu1 %v2027_v33, %s2393_s14  ;;  %1426 = vrot.lane.b32.xlu0 %v2028_v30, %s2394_s15 }
 0x288   : > { %1506 = vrot.lane.b32.xlu1 %v2028_v30, %s2395_s16  ;;  %1424 = vrot.lane.b32.xlu0 %v2027_v33, %s2394_s15 }
 0x28c   : > { %1504 = vrot.lane.b32.xlu1 %v2027_v33, %s2395_s16  ;;  %1586 = vrot.lane.b32.xlu0 %v2028_v30, %s2396_s17 }
 0x290   : > { %1666 = vrot.lane.b32.xlu1 %v2028_v30, %s2397_s18  ;;  %1584 = vrot.lane.b32.xlu0 %v2027_v33, %s2396_s17 }
 0x294   : > { %1664 = vrot.lane.b32.xlu1 %v2027_v33, %s2397_s18  ;;  %1746 = vrot.lane.b32.xlu0 %v2028_v30, %s2398_s19 }
 0x298   : > { %1815 = vperm.xlu1 %2342, %v1809_v36   ;;  %1744 = vrot.lane.b32.xlu0 %v2027_v33, %s2398_s19 }
 0x29c   : > { %1825 = vperm.xlu1 %2342, %v1811_v37   ;;  %1820 = vperm.xlu0 %2341, %v1810_v38  }
 0x2a0   : > { %1830 = vperm.xlu0 %2341, %v1812_v39  }
 0x2ea   : > { %v1124_v40 = vpop.permute.xlu1 %1123 }
 0x2eb   : > { %2251 = vmatprep.subr.bf16.mxu1 %v1124_v40 }
 0x2ec   : > { %2252 = vmatpush3.bf16.msra.mxu1 %v1124_v40 }
 0x2ee   : > { %v1122_v41 = vpop.permute.xlu0 %1121  ;;  %v1267_v42 = vpop.permute.xlu1 %1266 }
 0x2ef   : > { %2253 = vmatprep.subr.bf16.mxu1 %v1122_v41 }
 0x2f0   : > { %2254 = vmatpush3.bf16.msra.mxu1 %v1122_v41 }
 0x2f1   : > { %2267 = vmatprep.subr.bf16.mxu1 %v1267_v42 }
 0x2f2   : > { %v1265_v45 = vpop.permute.xlu0 %1264  ;;  %v1347_v46 = vpop.permute.xlu1 %1346 }
 0x2f3   : > { %2256 = vmatmul.mubr.msk.bf16.vlgmr.msra.gmra.mxu1 %vm323_vm2, %v2363_v43  ;;  %2275 = vmatprep.subr.bf16.mxu0 %v1347_v46 }
 0x2f4   : > { %2268 = vmatpush3.bf16.msra.mxu1 %v1267_v42  ;;  %2276 = vmatpush3.bf16.msra.mxu0 %v1347_v46 }
 0x2f5   : > { %2269 = vmatprep.subr.bf16.mxu1 %v1265_v45  ;;  %2271 = vmatprep.mubr.msk.bf16.mxu1 %vm323_vm2, %v2365_v44 }
 0x2f6   : > { %v1427_v47 = vpop.permute.xlu0 %1426  ;;  %v1345_v48 = vpop.permute.xlu1 %1344 }
 0x2f7   : > { %2277 = vmatprep.subr.bf16.mxu0 %v1345_v48 }
 0x2f8   : > { %2270 = vmatpush3.bf16.msra.mxu1 %v1265_v45  ;;  %2278 = vmatpush3.bf16.msra.mxu0 %v1345_v48 }
 0x2f9   : > { %2283 = vmatprep.subr.bf16.mxu1 %v1427_v47 }
 0x2fa   : > { %v1425_v51 = vpop.permute.xlu0 %1424  ;;  %v1507_v52 = vpop.permute.xlu1 %1506 }
 0x2fb   : > { %2272 = vmatmul.mubr.msk.bf16.vlgmr.msra.gmra.mxu1 %vm323_vm2, %v2366_v49  ;;  %2291 = vmatprep.subr.bf16.mxu0 %v1507_v52 }
 0x2fc   : > { %2280 = vmatmul.mubr.msk.bf16.vlgmr.msra.gmra.mxu0 %vm323_vm2, %v2368_v50  ;;  %2284 = vmatpush3.bf16.msra.mxu1 %v1427_v47 }
 0x2fd   : > { %2292 = vmatpush3.bf16.msra.mxu0 %v1507_v52  ;;  %2285 = vmatprep.subr.bf16.mxu1 %v1425_v51 }
 0x2fe   : > { %v1587_v55 = vpop.permute.xlu0 %1586  ;;  %v1505_v56 = vpop.permute.xlu1 %1504  ;;  %2287 = vmatprep.mubr.msk.bf16.mxu1 %vm323_vm2, %v2369_v53  ;;  %2295 = vmatprep.mubr.msk.bf16.mxu0 %vm323_vm2, %v2371_v54 }
 0x2ff   : > { %2293 = vmatprep.subr.bf16.mxu0 %v1505_v56 }
 0x300   : > { %2286 = vmatpush3.bf16.msra.mxu1 %v1425_v51 }
 0x301   : > { %2294 = vmatpush3.bf16.msra.mxu0 %v1505_v56  ;;  %2299 = vmatprep.subr.bf16.mxu1 %v1587_v55 }
 0x302   : > { %v1585_v59 = vpop.permute.xlu0 %1584  ;;  %v1667_v60 = vpop.permute.xlu1 %1666 }
 0x303   : > { %2288 = vmatmul.mubr.msk.bf16.vlgmr.msra.gmra.mxu1 %vm323_vm2, %v2370_v57  ;;  %2307 = vmatprep.subr.bf16.mxu0 %v1667_v60 }
 0x304   : > { %2296 = vmatmul.mubr.msk.bf16.vlgmr.msra.gmra.mxu0 %vm323_vm2, %v2372_v58  ;;  %2300 = vmatpush3.bf16.msra.mxu1 %v1587_v55 }
 0x305   : > { %2308 = vmatpush3.bf16.msra.mxu0 %v1667_v60  ;;  %2301 = vmatprep.subr.bf16.mxu1 %v1585_v59 }
 0x306   : > { %v1747_v0 = vpop.permute.xlu0 %1746  ;;  %v1665_v3 = vpop.permute.xlu1 %1664  ;;  %2303 = vmatprep.mubr.msk.bf16.mxu1 %vm323_vm2, %v2373_v61  ;;  %2311 = vmatprep.mubr.msk.bf16.mxu0 %vm323_vm2, %v2375_v63 }
 0x307   : > { %2309 = vmatprep.subr.bf16.mxu0 %v1665_v3 }
 0x308   : > { %2302 = vmatpush3.bf16.msra.mxu1 %v1585_v59 }
 0x309   : > { %2310 = vmatpush3.bf16.msra.mxu0 %v1665_v3  ;;  %2315 = vmatprep.subr.bf16.mxu1 %v1747_v0 }
 0x30a   : > { %v1745_v7 = vpop.permute.xlu0 %1744 }
 0x30b   : > { %2304 = vmatmul.mubr.msk.bf16.vlgmr.msra.gmra.mxu1 %vm323_vm2, %v2374_v4 }
 0x30c   : > { %2312 = vmatmul.mubr.msk.bf16.vlgmr.msra.gmra.mxu0 %vm323_vm2, %v2376_v5  ;;  %2316 = vmatpush3.bf16.msra.mxu1 %v1747_v0 }
 0x30d   : > { %2317 = vmatprep.subr.bf16.mxu1 %v1745_v7  ;;  %2319 = vmatprep.mubr.msk.bf16.mxu1 %vm323_vm2, %v2377_v6 }
 0x310   : > { %2318 = vmatpush3.bf16.msra.mxu1 %v1745_v7 }
 0x313   : > { %2320 = vmatmul.mubr.msk.bf16.vlgmr.msra.gmra.mxu1 %vm323_vm2, %v2378_v8  ;;  %v1816_v54 = vpop.permute.xlu1 %1815 }
 0x317   : > { %v1821_v0 = vpop.permute.xlu0 %1820  ;;  %v1826_v8 = vpop.permute.xlu1 %1825 }
 0x341   : > { %v2265_v9 = vpop.f32.mrf.mxu0 }
 0x343   : > { %v1234_v10 = vpop.f32.mrf.mxu0 }
 0x345   : > { %v2266_v12 = vpop.f32.mrf.mxu0 }
 0x347   : > { %v1237_v15 = vpop.f32.mrf.mxu0 }
 0x3b3   : > { %v2257_v11 = vpop.f32.mrf.mxu1 }
 0x3b4   : > { %v1243_v22 = vadd.f32 %v2265_v9, %v2257_v11 }
 0x3b5   : > { %v1167_v13 = vpop.f32.mrf.mxu1 }
 0x3b6   : > { %v1235_v25 = vadd.f32 %v1234_v10, %v1167_v13 }
 0x3b7   : > { %v2258_v14 = vpop.f32.mrf.mxu1 }
 0x3b8   : > { %v1246_v29 = vadd.f32 %v2266_v12, %v2258_v14 }
 0x3b9   : > { %v1170_v16 = vpop.f32.mrf.mxu1 }
 0x3ba   : > { %v1238_v36 = vadd.f32 %v1237_v15, %v1170_v16 }
 0x3bb   : > { %v2273_v17 = vpop.f32.mrf.mxu1 }
 0x3bc   : > { %v2281_v18 = vpop.f32.mrf.mxu0  ;;  %v1327_v26 = vadd.f32 %v2273_v17, %v1243_v22 }
 0x3bd   : > { %v1310_v19 = vpop.f32.mrf.mxu1 }
 0x3be   : > { %v1390_v20 = vpop.f32.mrf.mxu0  ;;  %v1325_v30 = vadd.f32 %v1310_v19, %v1235_v25  ;;  %v1407_v33 = vadd.f32 %v2281_v18, %v1327_v26  ;;  %v1855_v19 = vunpack.c.l.bf16 %v2453_v1  ;;  %v1853_v26 = vunpack.c.l.bf16 %v2456_v2 }
 0x3bf   : > { %v2274_v21 = vpop.f32.mrf.mxu1 }
 0x3c0   : > { %v2282_v23 = vpop.f32.mrf.mxu0  ;;  %v1328_v34 = vadd.f32 %v2274_v21, %v1246_v29  ;;  %v1405_v38 = vadd.f32 %v1390_v20, %v1325_v30  ;;  %v1831_v20 = vpop.permute.xlu0 %1830 }
 0x3c1   : > { %v1313_v24 = vpop.f32.mrf.mxu1 }
 0x3c2   : > { %v1393_v27 = vpop.f32.mrf.mxu0  ;;  %v1326_v41 = vadd.f32 %v1313_v24, %v1238_v36  ;;  %v1408_v43 = vadd.f32 %v2282_v23, %v1328_v34 }
 0x3c3   : > { %v2289_v28 = vpop.f32.mrf.mxu1 }
 0x3c4   : > { %v2297_v31 = vpop.f32.mrf.mxu0  ;;  %v1487_v39 = vadd.f32 %v2289_v28, %v1407_v33  ;;  %v1406_v50 = vadd.f32 %v1393_v27, %v1326_v41 }
 0x3c5   : > { %v1470_v32 = vpop.f32.mrf.mxu1 }
 0x3c6   : > { %v1550_v35 = vpop.f32.mrf.mxu0  ;;  %v1485_v44 = vadd.f32 %v1470_v32, %v1405_v38  ;;  %v1567_v47 = vadd.f32 %v2297_v31, %v1487_v39  ;;  %v2379_v31 = vld [vmem:[%s2450_s26 + $0xc] sm:$0xf]  ;;  %v2380_v39 = vld [vmem:[%s2450_s26 + $0x4] sm:$0xf] }
 0x3c7   : > { %v2290_v37 = vpop.f32.mrf.mxu1  ;;  %v1856_v32 = vunpack.c.l.bf16 %v2379_v31 }
 0x3c8   : > { %v2298_v40 = vpop.f32.mrf.mxu0  ;;  %v1488_v48 = vadd.f32 %v2290_v37, %v1408_v43  ;;  %v1565_v52 = vadd.f32 %v1550_v35, %v1485_v44 }
 0x3c9   : > { %v1473_v42 = vpop.f32.mrf.mxu1 }
 0x3ca   : > { %v1553_v45 = vpop.f32.mrf.mxu0  ;;  %v1486_v55 = vadd.f32 %v1473_v42, %v1406_v50  ;;  %v1568_v57 = vadd.f32 %v2298_v40, %v1488_v48  ;;  %v1854_v40 = vunpack.c.l.bf16 %v2380_v39 }
 0x3cb   : > { %v2305_v46 = vpop.f32.mrf.mxu1 }
 0x3cc   : > { %v2313_v49 = vpop.f32.mrf.mxu0  ;;  %v1647_v53 = vadd.f32 %v2305_v46, %v1567_v47  ;;  %v1566_v3 = vadd.f32 %v1553_v45, %v1486_v55 }
 0x3cd   : > { %v1630_v51 = vpop.f32.mrf.mxu1 }
 0x3ce   : > { %v1645_v58 = vadd.f32 %v1630_v51, %v1565_v52  ;;  %v1710_v59 = vpop.f32.mrf.mxu0  ;;  %v1727_v61 = vadd.f32 %v2313_v49, %v1647_v53 }
 0x3cf   : > { %v2306_v56 = vpop.f32.mrf.mxu1 }
 0x3d0   : > { %v1648_v63 = vadd.f32 %v2306_v56, %v1568_v57  ;;  %v1725_v5 = vadd.f32 %v1710_v59, %v1645_v58  ;;  %v2314_v6 = vpop.f32.mrf.mxu0 }
 0x3d1   : > { %v1633_v60 = vpop.f32.mrf.mxu1 }
 0x3d2   : > { %v1646_v9 = vadd.f32 %v1633_v60, %v1566_v3  ;;  %v1728_v11 = vadd.f32 %v2314_v6, %v1648_v63  ;;  %v1713_v15 = vpop.f32.mrf.mxu0 }
 0x3d3   : > { %v2321_v4 = vpop.f32.mrf.mxu1 }
 0x3d4   : > { %v1807_v7 = vadd.f32 %v2321_v4, %v1727_v61  ;;  %v1726_v21 = vadd.f32 %v1713_v15, %v1646_v9 }
 0x3d5   : > { %v1790_v10 = vpop.f32.mrf.mxu1 }
 0x3d6   : > { %v1835_v12 = vadd.f32 %v1826_v8, %v1807_v7  ;;  %v1805_v13 = vadd.f32 %v1790_v10, %v1725_v5 }
 0x3d7   : > { %v2322_v14 = vpop.f32.mrf.mxu1 }
 0x3d8   : > { %vm1839_vm7 = vcmp.ge.f32.partialorder %v1835_v12, 0.0  ;;  %v1843_v16 = vmul.f32 0.01, %v1835_v12  ;;  %v1833_v17 = vadd.f32 %v1816_v54, %v1805_v13  ;;  %v1808_v18 = vadd.f32 %v2322_v14, %v1728_v11 }
 0x3d9   : > { %v1793_v22 = vpop.f32.mrf.mxu1 }
 0x3da   : > { %v1847_v23 = vsel %vm1839_vm7, %v1835_v12, %v1843_v16  ;;  %vm1837_vm8 = vcmp.ge.f32.partialorder %v1833_v17, 0.0  ;;  %v1841_v24 = vmul.f32 0.01, %v1833_v17  ;;  %v1836_v25 = vadd.f32 %v1831_v20, %v1808_v18 }
 0x3db   : > { %v1851_v27 = vmul.f32 %v2573_v62, %v1847_v23  ;;  %v1806_v28 = vadd.f32 %v1793_v22, %v1726_v21 }
 0x3dc   : > { %v1845_v29 = vsel %vm1837_vm8, %v1833_v17, %v1841_v24  ;;  %vm1840_vm9 = vcmp.ge.f32.partialorder %v1836_v25, 0.0  ;;  %v1844_v30 = vmul.f32 0.01, %v1836_v25 }
 0x3dd   : > { %v1859_v1 = vadd.f32 %v1855_v19, %v1851_v27  ;;  %v1849_v33 = vmul.f32 %v2573_v62, %v1845_v29  ;;  %v1834_v34 = vadd.f32 %v1821_v0, %v1806_v28 }
 0x3de   : > { %v1848_v2 = vsel %vm1840_vm9, %v1836_v25, %v1844_v30 }
 0x3df   : > { %v2105_v35 = vpack.c.bf16 %v1859_v1, %v1859_v1  ;;  %v1857_v36 = vadd.f32 %v1853_v26, %v1849_v33  ;;  %v1852_v37 = vmul.f32 %v2573_v62, %v1848_v2  ;;  %vm1838_vm11 = vcmp.ge.f32.partialorder %v1834_v34, 0.0 }
 0x3e0   : > { %v1842_v38 = vmul.f32 0.01, %v1834_v34 }
 0x3e1   : > { %1880 = vst.msk [vmem:[%s251_s13 + $0x8] sm:$0xf] %vm1877_vm10, %v2105_v35  ;;  %v2103_v41 = vpack.c.bf16 %v1857_v36, %v1857_v36  ;;  %v1860_v42 = vadd.f32 %v1856_v32, %v1852_v37 }
 0x3e2   : > { %v1846_v43 = vsel %vm1838_vm11, %v1834_v34, %v1842_v38 }
 0x3e3   : > { %1878 = vst.msk [vmem:[%s251_s13] sm:$0xf] %vm1877_vm10, %v2103_v41  ;;  %v2106_v44 = vpack.c.bf16 %v1860_v42, %v1860_v42  ;;  %v1850_v45 = vmul.f32 %v2573_v62, %v1846_v43 }
 0x3e5   : > { %1881 = vst.msk [vmem:[%s251_s13 + $0xc] sm:$0xf] %vm1877_vm10, %v2106_v44  ;;  %v1858_v46 = vadd.f32 %v1854_v40, %v1850_v45 }
 0x3e7   : > { %v2104_v47 = vpack.c.bf16 %v1858_v46, %v1858_v46 }
 0x3e9   : > { %1879 = vst.msk [vmem:[%s251_s13 + $0x4] sm:$0xf] %vm1877_vm10, %v2104_v47 }
 0x3ea PF: > { %s16_s21 = sadd.s32 1, %s2387_s21  }
 0x3eb   : > { %p13_p4 = scmp.ge.s32.totalorder %s16_s21, 4  }
 0x3ed   :  { %15 = sbr.rel (!%p13_p4) target bundleno = 1 (0x1), region = 90 }

// kernel: analysis_transform.9
= control target key start
LH: loop header
LB: loop body
LE: loop exit
PB: predicated region body
PF: predicated region fallthrough
CT: control target
= control target key end

     0   :  { %s3101_s13 = smov 0   ;;  %s3437_s0 = inlined_call_operand.vmem [shape: bf16[2,4,32,31], index: 0, kind: input, shape index: {}]   ;;  %s3438_s1 = inlined_call_operand.vmem [shape: f32[1,36], index: 1, kind: input, shape index: {}]   ;;  %s3439_s2 = inlined_call_operand.vmem [shape: bf16[9,32,32], index: 2, kind: input, shape index: {}]   ;;  %s3440_s3 = inlined_call_operand.vmem [shape: f32[32,1], index: 3, kind: input, shape index: {}]   ;;  %s3441_s4 = inlined_call_operand.vmem [shape: bf16[9,32,32], index: 4, kind: input, shape index: {}]   ;;  %s3442_s5 = inlined_call_operand.vmem [shape: f32[32,1], index: 5, kind: input, shape index: {}]   ;;  %s3443_s6 = inlined_call_operand.vmem [shape: f32[32,32], index: 6, kind: input, shape index: {}]   ;;  %s3444_s7 = inlined_call_operand.vmem [shape: f32[32,1], index: 7, kind: input, shape index: {}]   ;;  %s3445_s8 = inlined_call_operand.vmem [shape: bf16[32,32], index: 8, kind: input, shape index: {}]   ;;  %s3446_s9 = inlined_call_operand.vmem [shape: f32[32,1], index: 9, kind: input, shape index: {}]   ;;  %s3447_s10 = inlined_call_operand.vmem [shape: bf16[2,32,36], index: 10, kind: output, shape index: {}]  }
   0x1 LB: > { %s2482_s14 = sadd.s32 4294967295, %s3025_s13   ;;  %p2486_p0 = scmp.ge.s32.totalorder %s3025_s13, 1  ;;  %s3025_s13 = sphi %s3101_s13, %s20_s13  }
   0x2   : > { %p312_p1 = scmp.lt.s32.totalorder %s3025_s13, 3 }
   0x4   : > { %p313_p2 = pnand %p2486_p0, %p312_p1 }
   0x5   : > { %p350_p3 = scmp.lt.s32.totalorder (!%p313_p2), %s2482_s14, 1  ;;  %s3027_s23 = smov (!%p313_p2), 127  }
   0x6   : > { %316 = sbr.rel (%p313_p2) target bundleno = 1115 (0x45b), region = 60  ;;  %s3028_s26 = smov (!%p313_p2), 123  }
   0x7   : > { %s3031_s21 = smov (!%p313_p2), 14   ;;  %s3032_s24 = smov (!%p313_p2), 15  }
   0x8   : > { %s3033_s25 = smov (!%p313_p2), 16   ;;  %s3035_s29 = smov (!%p313_p2), 126  }
   0x9   : > { %s3036_s18 = smov (!%p313_p2), 120   ;;  %s3039_s20 = smov (!%p313_p2), 116  }
   0xb   : > { %v2969_v0 = vld [vmem:[%s3439_s2 + $0x10] sm:$0xff]   ;;  %vm402_vm0 = vcmask 261120   ;;  %s3449_s14 = smov (!%p350_p3, %s2482_s14), 1  ;;  %v2970_v1 = vld [vmem:[%s3439_s2] sm:$0xff]   ;;  %v2972_v6 = vld [vmem:[%s3439_s2 + $0x8] sm:$0xff]   ;;  %v3030_v16 = vmov 0  }
   0xc   : > { %2772 = vmatprep.mubr.msk.bf16.mxu0 %vm402_vm0, %v2969_v0  ;;  %s2674_s19 = sshll.u32 %s3449_s14, 6  ;;  %2780 = vmatprep.mubr.msk.bf16.mxu1 %vm402_vm0, %v2970_v1  ;;  %v2974_v9 = vld [vmem:[%s3439_s2 + $0x30] sm:$0xff]   ;;  %v2971_v10 = vld [vmem:[%s3439_s2 + $0x18] sm:$0xff]   ;;  %v2973_v11 = vld [vmem:[%s3439_s2 + $0x20] sm:$0xff]   ;;  %vm1292_vm1 = vcmask 404480   ;;  %vm1173_vm3 = vcmask 199680  }
   0xd   : > { %s3123_s22 = scalar_lea.vmem %s3437_s0, %s2674_s19  ;;  %v2976_v12 = vld [vmem:[%s3439_s2 + $0x38] sm:$0xff]   ;;  %v2980_v13 = vld [vmem:[%s3439_s2 + $0x50] sm:$0xff]   ;;  %s3029_s19 = smov 122   ;;  %2962 = vset.pattern.permute.xlu1 %v3030_v16  ;;  %2961 = vset.pattern.permute.xlu0 %v3030_v16  ;;  %v1118_v17 = vld [vmem:[%s3440_s3 + $0x8] sm:$0xff]  ;;  %1295 = vst.msk [vmem:[#allocation4 + $0x8] sm:$0xf] %vm1292_vm1, %v3030_v16 }
   0xe   : > { %v2963_v2 = vld [vmem:[%s3123_s22 + $0x8] sm:$0xff]   ;;  %v2964_v3 = vld [vmem:[%s3123_s22] sm:$0xff]   ;;  %v2967_v5 = vld [vmem:[%s3123_s22 + $0x18] sm:$0xff]   ;;  %1293 = vst.msk [vmem:[#allocation4] sm:$0xf] %vm1292_vm1, %v3030_v16  ;;  %vm1322_vm7 = vcmask 142448  }
   0xf   : > { %552 = vrot.lane.b32.xlu0 %v2963_v2, %s3027_s23  ;;  %v2965_v4 = vld [vmem:[%s3123_s22 + $0x28] sm:$0xff]   ;;  %2776 = vmatprep.subr.bf16.mxu1 %v2963_v2  ;;  %v2966_v7 = vld [vmem:[%s3123_s22 + $0x20] sm:$0xff]   ;;  %v2968_v8 = vld [vmem:[%s3123_s22 + $0x10] sm:$0xff]   ;;  %1294 = vst.msk [vmem:[#allocation4 + $0x4] sm:$0xf] %vm1292_vm1, %v3030_v16  ;;  %vm1372_vm8 = vcmask 191648  }
  0x10   : > { %2777 = vmatpush3.bf16.msra.mxu1 %v2963_v2  ;;  %814 = vrot.lane.b32.xlu1 %v2965_v4, %s3027_s23  ;;  %v1120_v14 = vld [vmem:[%s3440_s3 + $0x18] sm:$0xff]  ;;  %v1119_v15 = vld [vmem:[%s3440_s3 + $0x10] sm:$0xff]  ;;  %v1117_v18 = vld [vmem:[%s3440_s3] sm:$0xff]  ;;  %1296 = vst.msk [vmem:[#allocation4 + $0xc] sm:$0xf] %vm1292_vm1, %v3030_v16  ;;  %vm1422_vm9 = vcmask 240848  }
  0x11   : > { %2778 = vmatprep.subr.bf16.mxu1 %v2964_v3  ;;  %2768 = vmatprep.subr.bf16.mxu0 %v2967_v5  ;;  %v2977_v21 = vld [vmem:[%s3123_s22 + $0x38] sm:$0xff]   ;;  %v2975_v23 = vld [vmem:[%s3439_s2 + $0x28] sm:$0xff]   ;;  %v2978_v25 = vld [vmem:[%s3123_s22 + $0x30] sm:$0xff]   ;;  %vm1472_vm10 = vcmask 290048   ;;  %vm1297_vm11 = vcmask 293888   ;;  %vm1287_vm12 = vcmask 203776  }
  0x12   : > { %2769 = vmatpush3.bf16.msra.mxu0 %v2967_v5  ;;  %v2979_v26 = vld [vmem:[%s3439_s2 + $0x40] sm:$0xff]   ;;  %v2982_v28 = vld [vmem:[%s3439_s2 + $0x58] sm:$0xff]   ;;  %v2984_v29 = vld [vmem:[%s3439_s2 + $0x70] sm:$0xff]   ;;  %vm1347_vm13 = vcmask 89144   ;;  %vm1397_vm14 = vcmask 138344   ;;  %vm1447_vm15 = vcmask 187544  }
  0x13   : > { %550 = vrot.lane.b32.xlu0 %v2964_v3, %s3027_s23  ;;  %2770 = vmatprep.subr.bf16.mxu0 %v2968_v8  ;;  %v2981_v32 = vld [vmem:[%s3439_s2 + $0x48] sm:$0xff]   ;;  %v2983_v33 = vld [vmem:[%s3439_s2 + $0x60] sm:$0xff]   ;;  %v2986_v35 = vld [vmem:[%s3439_s2 + $0x78] sm:$0xff]   ;;  %vm1497_vm1 = vcmask 236744   ;;  %s2675_s17 = sshll.u32 %s3449_s14, 4 }
  0x14   : > { %2779 = vmatpush3.bf16.msra.mxu1 %v2964_v3  ;;  %894 = vrot.lane.b32.xlu1 %v2963_v2, %s3028_s26  ;;  %v2985_v37 = vld [vmem:[%s3439_s2 + $0x68] sm:$0xff]   ;;  %v2987_v38 = vld [vmem:[%s3439_s2 + $0x80] sm:$0xff]   ;;  %v2989_v41 = vld [vmem:[%s3123_s22 + $0x38] sm:$0xff]  }
  0x15   : > { %2792 = vmatprep.subr.bf16.mxu1 %v2965_v4  ;;  %v2988_v40 = vld [vmem:[%s3439_s2 + $0x88] sm:$0xff]   ;;  %v2990_v42 = vld [vmem:[%s3123_s22 + $0x30] sm:$0xff]   ;;  %v2991_v43 = vld [vmem:[%s3445_s8] sm:$0xff]   ;;  %s3043_s22 = smov 8  }
  0x16   : > { %2771 = vmatpush3.bf16.msra.mxu0 %v2968_v8  ;;  %v2992_v44 = vld [vmem:[%s3445_s8 + $0x8] sm:$0xff]  }
  0x17   : > { %812 = vrot.lane.b32.xlu0 %v2966_v7, %s3027_s23  ;;  %2781 = vmatmul.mubr.msk.bf16.vlgmr.msra.gmra.mxu1 %vm402_vm0, %v2972_v6 }
  0x18   : > { %2793 = vmatpush3.bf16.msra.mxu1 %v2965_v4  ;;  %892 = vrot.lane.b32.xlu1 %v2964_v3, %s3028_s26 }
  0x19   : > { %2794 = vmatprep.subr.bf16.mxu1 %v2966_v7  ;;  %2796 = vmatprep.mubr.msk.bf16.mxu1 %vm402_vm0, %v2974_v9 }
  0x1a   : > { %2773 = vmatmul.mubr.msk.bf16.vlgmr.msra.gmra.mxu0 %vm402_vm0, %v2971_v10 }
  0x1b   : > { %974 = vrot.lane.b32.xlu0 %v2967_v5, %s3028_s26  ;;  %2788 = vmatprep.mubr.msk.bf16.mxu0 %vm402_vm0, %v2973_v11 }
  0x1c   : > { %2795 = vmatpush3.bf16.msra.mxu1 %v2966_v7  ;;  %1054 = vrot.lane.b32.xlu1 %v2963_v2, %s3029_s19 }
  0x1f   : > { %972 = vrot.lane.b32.xlu0 %v2968_v8, %s3028_s26  ;;  %2797 = vmatmul.mubr.msk.bf16.vlgmr.msra.gmra.mxu1 %vm402_vm0, %v2976_v12  ;;  %s3034_s26 = smov 17  }
  0x20   : > { %2812 = vmatprep.mubr.msk.bf16.mxu1 %vm402_vm0, %v2980_v13  ;;  %1052 = vrot.lane.b32.xlu1 %v2964_v3, %s3029_s19 }
  0x23   : > { %1133 = vperm.xlu0 %2961, %v1119_v15  }
  0x24   : > { %1138 = vperm.xlu1 %2962, %v1120_v14  }
  0x27   : > { %1128 = vperm.xlu0 %2961, %v1118_v17  }
  0x28   : > { %1123 = vperm.xlu1 %2962, %v1117_v18  }
  0x81   : > { %v553_v19 = vpop.permute.xlu0 %552 }
  0x82   : > { %2784 = vmatprep.subr.bf16.mxu0 %v553_v19  ;;  %v815_v20 = vpop.permute.xlu1 %814 }
  0x83   : > { %2785 = vmatpush3.bf16.msra.mxu0 %v553_v19  ;;  %2808 = vmatprep.subr.bf16.mxu1 %v815_v20 }
  0x84   : > { %2809 = vmatpush3.bf16.msra.mxu1 %v815_v20 }
  0x85   : > { %v551_v22 = vpop.permute.xlu0 %550 }
  0x86   : > { %2786 = vmatprep.subr.bf16.mxu0 %v551_v22  ;;  %v895_v24 = vpop.permute.xlu1 %894 }
  0x87   : > { %2787 = vmatpush3.bf16.msra.mxu0 %v551_v22 }
  0x88   : > { %2800 = vmatprep.subr.bf16.mxu0 %v2977_v21 }
  0x89   : > { %v813_v27 = vpop.permute.xlu0 %812 }
  0x8a   : > { %2789 = vmatmul.mubr.msk.bf16.vlgmr.msra.gmra.mxu0 %vm402_vm0, %v2975_v23  ;;  %2810 = vmatprep.subr.bf16.mxu1 %v813_v27  ;;  %v893_v31 = vpop.permute.xlu1 %892 }
  0x8b   : > { %2801 = vmatpush3.bf16.msra.mxu0 %v2977_v21  ;;  %2811 = vmatpush3.bf16.msra.mxu1 %v813_v27 }
  0x8c   : > { %2802 = vmatprep.subr.bf16.mxu0 %v2978_v25  ;;  %2804 = vmatprep.mubr.msk.bf16.mxu0 %vm402_vm0, %v2979_v26 }
  0x8d   : > { %v975_v30 = vpop.permute.xlu0 %974 }
  0x8e   : > { %2813 = vmatmul.mubr.msk.bf16.vlgmr.msra.gmra.mxu1 %vm402_vm0, %v2982_v28  ;;  %2824 = vmatprep.subr.bf16.mxu1 %v975_v30  ;;  %v1055_v36 = vpop.permute.xlu1 %1054 }
  0x8f   : > { %2803 = vmatpush3.bf16.msra.mxu0 %v2978_v25  ;;  %2825 = vmatpush3.bf16.msra.mxu1 %v975_v30 }
  0x90   : > { %2816 = vmatprep.subr.bf16.mxu0 %v895_v24  ;;  %2828 = vmatprep.mubr.msk.bf16.mxu1 %vm402_vm0, %v2984_v29 }
  0x91   : > { %v973_v34 = vpop.permute.xlu0 %972 }
  0x92   : > { %2805 = vmatmul.mubr.msk.bf16.vlgmr.msra.gmra.mxu0 %vm402_vm0, %v2981_v32  ;;  %2826 = vmatprep.subr.bf16.mxu1 %v973_v34  ;;  %v1053_v39 = vpop.permute.xlu1 %1052 }
  0x93   : > { %2817 = vmatpush3.bf16.msra.mxu0 %v895_v24  ;;  %2827 = vmatpush3.bf16.msra.mxu1 %v973_v34 }
  0x94   : > { %2818 = vmatprep.subr.bf16.mxu0 %v893_v31  ;;  %2820 = vmatprep.mubr.msk.bf16.mxu0 %vm402_vm0, %v2983_v33 }
  0x95   : > { %2840 = vmatprep.subr.bf16.mxu1 %v2989_v41 }
  0x96   : > { %2829 = vmatmul.mubr.msk.bf16.vlgmr.msra.gmra.mxu1 %vm402_vm0, %v2986_v35 }
  0x97   : > { %2819 = vmatpush3.bf16.msra.mxu0 %v893_v31  ;;  %2844 = vmatprep.mubr.msk.bf16.mxu1 %vm402_vm0, %v2991_v43 }
  0x98   : > { %2832 = vmatprep.subr.bf16.mxu0 %v1055_v36  ;;  %2841 = vmatpush3.bf16.msra.mxu1 %v2989_v41 }
  0x99   : > { %2842 = vmatprep.subr.bf16.mxu1 %v2990_v42 }
  0x9a   : > { %2821 = vmatmul.mubr.msk.bf16.vlgmr.msra.gmra.mxu0 %vm402_vm0, %v2985_v37 }
  0x9b   : > { %2833 = vmatpush3.bf16.msra.mxu0 %v1055_v36  ;;  %2836 = vmatprep.mubr.msk.bf16.mxu0 %vm402_vm0, %v2987_v38 }
  0x9c   : > { %2834 = vmatprep.subr.bf16.mxu0 %v1053_v39  ;;  %2843 = vmatpush3.bf16.msra.mxu1 %v2990_v42 }
  0x9e   : > { %v1134_v37 = vpop.permute.xlu0 %1133 }
  0x9f   : > { %2835 = vmatpush3.bf16.msra.mxu0 %v1053_v39  ;;  %2845 = vmatmul.mubr.msk.bf16.vlgmr.msra.gmra.mxu1 %vm402_vm0, %v2992_v44  ;;  %v1139_v28 = vpop.permute.xlu1 %1138 }
  0xa2   : > { %2837 = vmatmul.mubr.msk.bf16.vlgmr.msra.gmra.mxu0 %vm402_vm0, %v2988_v40 }
  0xa3   : > { %v1124_v43 = vpop.permute.xlu1 %1123 }
  0xd7   : > { %v2782_v45 = vpop.f32.mrf.mxu1 }
  0xd9   : > { %v520_v46 = vpop.f32.mrf.mxu1 }
  0xda   : > { %v2774_v48 = vpop.f32.mrf.mxu0 }
  0xdb   : > { %v2783_v47 = vpop.f32.mrf.mxu1  ;;  %v529_v61 = vadd.f32 %v2782_v45, %v2774_v48 }
  0xdc   : > { %v443_v51 = vpop.f32.mrf.mxu0 }
  0xdd   : > { %v523_v49 = vpop.f32.mrf.mxu1  ;;  %v521_v0 = vadd.f32 %v520_v46, %v443_v51 }
  0xde   : > { %v2775_v53 = vpop.f32.mrf.mxu0 }
  0xdf   : > { %v2798_v50 = vpop.f32.mrf.mxu1  ;;  %v532_v3 = vadd.f32 %v2783_v47, %v2775_v53 }
  0xe0   : > { %v446_v55 = vpop.f32.mrf.mxu0 }
  0xe1   : > { %v687_v52 = vpop.f32.mrf.mxu1  ;;  %v524_v9 = vadd.f32 %v523_v49, %v446_v55 }
  0xe3   : > { %v2799_v54 = vpop.f32.mrf.mxu1 }
  0xe5   : > { %v690_v57 = vpop.f32.mrf.mxu1 }
 0x14a   : > { %v2790_v56 = vpop.f32.mrf.mxu0 }
 0x14b   : > { %v613_v1 = vadd.f32 %v2790_v56, %v529_v61  ;;  %v1129_v61 = vpop.permute.xlu0 %1128 }
 0x14c   : > { %v596_v58 = vpop.f32.mrf.mxu0 }
 0x14d   : > { %v611_v4 = vadd.f32 %v596_v58, %v521_v0  ;;  %v704_v7 = vadd.f32 %v2798_v50, %v613_v1 }
 0x14e   : > { %v2791_v59 = vpop.f32.mrf.mxu0  ;;  %v2814_v60 = vpop.f32.mrf.mxu1 }
 0x14f   : > { %v614_v8 = vadd.f32 %v2791_v59, %v532_v3  ;;  %v702_v11 = vadd.f32 %v687_v52, %v611_v4 }
 0x150   : > { %v599_v62 = vpop.f32.mrf.mxu0  ;;  %v858_v63 = vpop.f32.mrf.mxu1 }
 0x151   : > { %v612_v14 = vadd.f32 %v599_v62, %v524_v9  ;;  %v705_v16 = vadd.f32 %v2799_v54, %v614_v8 }
 0x152   : > { %v2806_v2 = vpop.f32.mrf.mxu0  ;;  %v2815_v5 = vpop.f32.mrf.mxu1 }
 0x153   : > { %v795_v12 = vadd.f32 %v2806_v2, %v704_v7  ;;  %v703_v22 = vadd.f32 %v690_v57, %v612_v14 }
 0x154   : > { %v778_v6 = vpop.f32.mrf.mxu0  ;;  %v861_v13 = vpop.f32.mrf.mxu1 }
 0x155   : > { %v793_v17 = vadd.f32 %v778_v6, %v702_v11  ;;  %v875_v19 = vadd.f32 %v2814_v60, %v795_v12 }
 0x156   : > { %v2807_v10 = vpop.f32.mrf.mxu0  ;;  %v2830_v21 = vpop.f32.mrf.mxu1 }
 0x157   : > { %v796_v20 = vadd.f32 %v2807_v10, %v705_v16  ;;  %v873_v24 = vadd.f32 %v858_v63, %v793_v17 }
 0x158   : > { %v781_v15 = vpop.f32.mrf.mxu0  ;;  %v1018_v31 = vpop.f32.mrf.mxu1 }
 0x159   : > { %v794_v26 = vadd.f32 %v781_v15, %v703_v22  ;;  %v876_v29 = vadd.f32 %v2815_v5, %v796_v20 }
 0x15a   : > { %v2822_v18 = vpop.f32.mrf.mxu0  ;;  %v2831_v39 = vpop.f32.mrf.mxu1 }
 0x15b   : > { %v955_v25 = vadd.f32 %v2822_v18, %v875_v19  ;;  %v874_v35 = vadd.f32 %v861_v13, %v794_v26 }
 0x15c   : > { %v938_v23 = vpop.f32.mrf.mxu0  ;;  %v1021_v48 = vpop.f32.mrf.mxu1 }
 0x15d   : > { %v953_v30 = vadd.f32 %v938_v23, %v873_v24  ;;  %v1035_v33 = vadd.f32 %v2830_v21, %v955_v25 }
 0x15e   : > { %v2823_v27 = vpop.f32.mrf.mxu0 }
 0x15f   : > { %v956_v34 = vadd.f32 %v2823_v27, %v876_v29  ;;  %v1033_v38 = vadd.f32 %v1018_v31, %v953_v30 }
 0x160   : > { %v941_v32 = vpop.f32.mrf.mxu0 }
 0x161   : > { %v954_v41 = vadd.f32 %v941_v32, %v874_v35  ;;  %v1036_v44 = vadd.f32 %v2831_v39, %v956_v34  ;;  %v2993_v32 = vld [vmem:[%s3441_s4] sm:$0xff]  }
 0x162   : > { %v2838_v36 = vpop.f32.mrf.mxu0  ;;  %2860 = vmatprep.mubr.msk.bf16.mxu1 %vm402_vm0, %v2993_v32 }
 0x163   : > { %v1115_v40 = vadd.f32 %v2838_v36, %v1035_v33  ;;  %v1034_v52 = vadd.f32 %v1021_v48, %v954_v41  ;;  %v2995_v41 = vld [vmem:[%s3441_s4 + $0x10] sm:$0xff]   ;;  %v2224_v48 = vld [vmem:[%s3442_s5 + $0x8] sm:$0xff] }
 0x164   : > { %v1098_v42 = vpop.f32.mrf.mxu0  ;;  %2852 = vmatprep.mubr.msk.bf16.mxu0 %vm402_vm0, %v2995_v41 }
 0x165   : > { %v1113_v45 = vadd.f32 %v1098_v42, %v1033_v38  ;;  %v1143_v46 = vadd.f32 %v1134_v37, %v1115_v40 }
 0x166   : > { %v2839_v47 = vpop.f32.mrf.mxu0 }
 0x167   : > { %vm1147_vm2 = vcmp.ge.f32.partialorder %v1143_v46, 0.0  ;;  %v1151_v49 = vmul.f32 0.01, %v1143_v46  ;;  %v1141_v50 = vadd.f32 %v1124_v43, %v1113_v45  ;;  %v1116_v51 = vadd.f32 %v2839_v47, %v1036_v44  ;;  %v2994_v45 = vld [vmem:[%s3441_s4 + $0x8] sm:$0xff]   ;;  %v2226_v47 = vld [vmem:[%s3442_s5 + $0x18] sm:$0xff] }
 0x168   : > { %v1101_v53 = vpop.f32.mrf.mxu0 }
 0x169   : > { %v1155_v54 = vsel %vm1147_vm2, %v1143_v46, %v1151_v49  ;;  %vm1145_vm4 = vcmp.ge.f32.partialorder %v1141_v50, 0.0  ;;  %v1149_v55 = vmul.f32 0.01, %v1141_v50  ;;  %v1144_v56 = vadd.f32 %v1139_v28, %v1116_v51  ;;  %v2997_v46 = vld [vmem:[%s3441_s4 + $0x30] sm:$0xff]   ;;  %v1186_v49 = vld [vmem:[%s3446_s9] sm:$0xff] }
 0x16a   : > { %v2678_v57 = vpack.c.bf16 %v1155_v54, %v1155_v54  ;;  %v1114_v58 = vadd.f32 %v1101_v53, %v1034_v52  ;;  %v2225_v51 = vld [vmem:[%s3442_s5 + $0x10] sm:$0xff]  ;;  %v2269_v52 = vld [vmem:[%s3444_s7] sm:$0xff] }
 0x16b   : > { %v1153_v59 = vsel %vm1145_vm4, %v1141_v50, %v1149_v55  ;;  %vm1148_vm5 = vcmp.ge.f32.partialorder %v1144_v56, 0.0  ;;  %v1152_v60 = vmul.f32 0.01, %v1144_v56  ;;  %v1188_v50 = vld [vmem:[%s3446_s9 + $0x10] sm:$0xff]  ;;  %v2223_v53 = vld [vmem:[%s3442_s5] sm:$0xff]  ;;  %v1187_v55 = vld [vmem:[%s3446_s9 + $0x8] sm:$0xff] }
 0x16c   : > { %1176 = vst.msk [vmem:[#allocation2 + $0x8] sm:$0xf] %vm1173_vm3, %v2678_v57  ;;  %v2676_v62 = vpack.c.bf16 %v1153_v59, %v1153_v59  ;;  %v1142_v63 = vadd.f32 %v1129_v61, %v1114_v58  ;;  %v2271_v54 = vld [vmem:[%s3444_s7 + $0x10] sm:$0xff]  ;;  %v2270_v57 = vld [vmem:[%s3444_s7 + $0x8] sm:$0xff]  ;;  %v2272_v58 = vld [vmem:[%s3444_s7 + $0x18] sm:$0xff]  ;;  %v3041_v59 = vmov 0.0  }
 0x16d   : > { %v1156_v0 = vsel %vm1148_vm5, %v1144_v56, %v1152_v60  ;;  %v1189_v56 = vld [vmem:[%s3446_s9 + $0x18] sm:$0xff]  ;;  %1298 = vst.msk [vmem:[#allocation5] sm:$0xff] %vm1297_vm11, %v3041_v59  ;;  %1299 = vst.msk [vmem:[#allocation5 + $0x8] sm:$0xff] %vm1297_vm11, %v3041_v59 }
 0x16e   : > { %1174 = vst.msk [vmem:[#allocation2] sm:$0xf] %vm1173_vm3, %v2676_v62  ;;  %v2679_v1 = vpack.c.bf16 %v1156_v0, %v1156_v0  ;;  %vm1146_vm6 = vcmp.ge.f32.partialorder %v1142_v63, 0.0  ;;  %v1150_v2 = vmul.f32 0.01, %v1142_v63 }
 0x16f   : > { %1300 = vst.msk [vmem:[#allocation5 + $0x10] sm:$0xff] %vm1297_vm11, %v3041_v59  ;;  %1301 = vst.msk [vmem:[#allocation5 + $0x18] sm:$0xff] %vm1297_vm11, %v3041_v59 }
 0x170   : > { %1177 = vst.msk [vmem:[#allocation2 + $0xc] sm:$0xf] %vm1173_vm3, %v2679_v1  ;;  %v1154_v3 = vsel %vm1146_vm6, %v1142_v63, %v1150_v2  ;;  %v2996_v1 = vld [vmem:[%s3441_s4 + $0x18] sm:$0xff]  }
 0x171   : > { %v2677_v4 = vpack.c.bf16 %v1154_v3, %v1154_v3  ;;  %v2998_v2 = vld [vmem:[%s3441_s4 + $0x38] sm:$0xff]  }
 0x173   : > { %1175 = vst.msk [vmem:[#allocation2 + $0x4] sm:$0xf] %vm1173_vm3, %v2677_v4  ;;  %v1304_v5 = vld [vmem:[#allocation2 + $0x8] sm:$0xf] }
 0x174   : > { %1314 = vrot.lane.b32.xlu1 %v1304_v5, %s3031_s21  ;;  %v1354_v6 = vld [vmem:[#allocation2 + $0x8] sm:$0xf]  ;;  %v2999_v5 = vld [vmem:[%s3441_s4 + $0x20] sm:$0xff]  }
 0x175   : > { %v1404_v8 = vld [vmem:[#allocation2 + $0x8] sm:$0xf]  ;;  %v1302_v13 = vld [vmem:[#allocation2] sm:$0xf] }
 0x176   : > { %v1454_v10 = vld [vmem:[#allocation2 + $0x8] sm:$0xf]  ;;  %v1352_v15 = vld [vmem:[#allocation2] sm:$0xf] }
 0x177   : > { %v1305_v7 = vld [vmem:[#allocation2 + $0xc] sm:$0xf]  ;;  %v1402_v17 = vld [vmem:[#allocation2] sm:$0xf] }
 0x178   : > { %1364 = vrot.lane.b32.xlu1 %v1354_v6, %s3032_s24  ;;  %1316 = vrot.lane.b32.xlu0 %v1305_v7, %s3031_s21  ;;  %v1355_v9 = vld [vmem:[#allocation2 + $0xc] sm:$0xf]  ;;  %v1452_v19 = vld [vmem:[#allocation2] sm:$0xf]  ;;  %v3001_v6 = vld [vmem:[%s3441_s4 + $0x50] sm:$0xff]  }
 0x179   : > { %v1405_v11 = vld [vmem:[#allocation2 + $0xc] sm:$0xf] }
 0x17a   : > { %v1455_v12 = vld [vmem:[#allocation2 + $0xc] sm:$0xf]  ;;  %v1303_v14 = vld [vmem:[#allocation2 + $0x4] sm:$0xf] }
 0x17b   : > { %v1353_v16 = vld [vmem:[#allocation2 + $0x4] sm:$0xf] }
 0x17c   : > { %1414 = vrot.lane.b32.xlu1 %v1404_v8, %s3033_s25  ;;  %1366 = vrot.lane.b32.xlu0 %v1355_v9, %s3032_s24  ;;  %v1403_v18 = vld [vmem:[#allocation2 + $0x4] sm:$0xf]  ;;  %v3000_v9 = vld [vmem:[%s3441_s4 + $0x28] sm:$0xff]  }
 0x17d   : > { %v1453_v20 = vld [vmem:[#allocation2 + $0x4] sm:$0xf] }
 0x180   : > { %1464 = vrot.lane.b32.xlu1 %v1454_v10, %s3034_s26  ;;  %1416 = vrot.lane.b32.xlu0 %v1405_v11, %s3033_s25  ;;  %v3002_v10 = vld [vmem:[%s3441_s4 + $0x58] sm:$0xff]  }
 0x184   : > { %1466 = vrot.lane.b32.xlu0 %v1455_v12, %s3034_s26  ;;  %1310 = vrot.lane.b32.xlu1 %v1302_v13, %s3031_s21  ;;  %v3003_v13 = vld [vmem:[%s3441_s4 + $0x40] sm:$0xff]  }
 0x188   : > { %1312 = vrot.lane.b32.xlu0 %v1303_v14, %s3031_s21  ;;  %1360 = vrot.lane.b32.xlu1 %v1352_v15, %s3032_s24  ;;  %v3006_v14 = vld [vmem:[%s3441_s4 + $0x70] sm:$0xff]   ;;  %s3044_s21 = smov 9  }
 0x18c   : > { %1362 = vrot.lane.b32.xlu0 %v1353_v16, %s3032_s24  ;;  %1410 = vrot.lane.b32.xlu1 %v1402_v17, %s3033_s25  ;;  %v3004_v17 = vld [vmem:[%s3441_s4 + $0x48] sm:$0xff]   ;;  %s3045_s24 = smov 10  }
 0x190   : > { %1412 = vrot.lane.b32.xlu0 %v1403_v18, %s3033_s25  ;;  %1460 = vrot.lane.b32.xlu1 %v1452_v19, %s3034_s26  ;;  %v3005_v18 = vld [vmem:[%s3441_s4 + $0x60] sm:$0xff]   ;;  %v3008_v19 = vld [vmem:[%s3441_s4 + $0x78] sm:$0xff]  }
 0x194   : > { %1462 = vrot.lane.b32.xlu0 %v1453_v20, %s3034_s26  ;;  %s3040_s26 = smov 114  }
 0x1e6   : > { %v1315_v21 = vpop.permute.xlu1 %1314 }
 0x1e7   : > { %1325 = vst.msk [vmem:[#allocation4 + $0x8] sm:$0xf] %vm1322_vm7, %v1315_v21 }
 0x1ea   : > { %v1365_v22 = vpop.permute.xlu1 %1364  ;;  %v1317_v23 = vpop.permute.xlu0 %1316 }
 0x1eb   : > { %1375 = vst.msk [vmem:[#allocation4 + $0x8] sm:$0xf] %vm1372_vm8, %v1365_v22  ;;  %v3007_v22 = vld [vmem:[%s3441_s4 + $0x68] sm:$0xff]  }
 0x1ec   : > { %1326 = vst.msk [vmem:[#allocation4 + $0xc] sm:$0xf] %vm1322_vm7, %v1317_v23  ;;  %v3009_v23 = vld [vmem:[%s3441_s4 + $0x80] sm:$0xff]  }
 0x1ee   : > { %v1415_v24 = vpop.permute.xlu1 %1414  ;;  %v1367_v25 = vpop.permute.xlu0 %1366 }
 0x1ef   : > { %1425 = vst.msk [vmem:[#allocation4 + $0x8] sm:$0xf] %vm1422_vm9, %v1415_v24 }
 0x1f0   : > { %1376 = vst.msk [vmem:[#allocation4 + $0xc] sm:$0xf] %vm1372_vm8, %v1367_v25 }
 0x1f2   : > { %v1465_v26 = vpop.permute.xlu1 %1464  ;;  %v1417_v27 = vpop.permute.xlu0 %1416 }
 0x1f3   : > { %1475 = vst.msk [vmem:[#allocation4 + $0x8] sm:$0xf] %vm1472_vm10, %v1465_v26  ;;  %v2846_v26 = vpop.f32.mrf.mxu1 }
 0x1f4   : > { %1426 = vst.msk [vmem:[#allocation4 + $0xc] sm:$0xf] %vm1422_vm9, %v1417_v27 }
 0x1f6   : > { %v1467_v28 = vpop.permute.xlu0 %1466  ;;  %v1311_v29 = vpop.permute.xlu1 %1310 }
 0x1f7   : > { %1476 = vst.msk [vmem:[#allocation4 + $0xc] sm:$0xf] %vm1472_vm10, %v1467_v28  ;;  %v3010_v28 = vld [vmem:[%s3441_s4 + $0x88] sm:$0xff]  }
 0x1f8   : > { %1323 = vst.msk [vmem:[#allocation4] sm:$0xf] %vm1322_vm7, %v1311_v29  ;;  %v1272_v29 = vpop.f32.mrf.mxu1 }
 0x1fa   : > { %v1313_v30 = vpop.permute.xlu0 %1312  ;;  %v1361_v31 = vpop.permute.xlu1 %1360  ;;  %v1508_v33 = vld [vmem:[#allocation4 + $0x8] sm:$0xf] }
 0x1fb   : > { %1324 = vst.msk [vmem:[#allocation4 + $0x4] sm:$0xf] %vm1322_vm7, %v1313_v30 }
 0x1fc   : > { %1373 = vst.msk [vmem:[#allocation4] sm:$0xf] %vm1372_vm8, %v1361_v31 }
 0x1fe   : > { %v1509_v34 = vld [vmem:[#allocation4 + $0xc] sm:$0xf]  ;;  %v1363_v35 = vpop.permute.xlu0 %1362  ;;  %v1411_v36 = vpop.permute.xlu1 %1410 }
 0x1ff   : > { %v2600_v37 = vcombine.low %v1508_v33, %v1509_v34  ;;  %1374 = vst.msk [vmem:[#allocation4 + $0x4] sm:$0xf] %vm1372_vm8, %v1363_v35  ;;  %v2847_v35 = vpop.f32.mrf.mxu1 }
 0x200   : > { %1423 = vst.msk [vmem:[#allocation4] sm:$0xf] %vm1422_vm9, %v1411_v36 }
 0x201   : > { %2856 = vmatprep.subr.bf16.mxu1 %v2600_v37  ;;  %1537 = vrot.lane.b32.xlu1 %v2600_v37, %s3027_s23 }
 0x202   : > { %2857 = vmatpush3.bf16.msra.mxu1 %v2600_v37  ;;  %v1413_v38 = vpop.permute.xlu0 %1412  ;;  %v1461_v39 = vpop.permute.xlu1 %1460 }
 0x203   : > { %1424 = vst.msk [vmem:[#allocation4 + $0x4] sm:$0xf] %vm1422_vm9, %v1413_v38  ;;  %v1275_v38 = vpop.f32.mrf.mxu1 }
 0x204   : > { %1473 = vst.msk [vmem:[#allocation4] sm:$0xf] %vm1472_vm10, %v1461_v39 }
 0x205   : > { %1680 = vrot.lane.b32.xlu1 %v2600_v37, %s3035_s29 }
 0x206   : > { %v1463_v40 = vpop.permute.xlu0 %1462 }
 0x207   : > { %1474 = vst.msk [vmem:[#allocation4 + $0x4] sm:$0xf] %vm1472_vm10, %v1463_v40 }
 0x209   : > { %1760 = vrot.lane.b32.xlu1 %v2600_v37, %s3029_s19 }
 0x20b   : > { %v1506_v42 = vld [vmem:[#allocation4] sm:$0xf] }
 0x20e   : > { %v1507_v43 = vld [vmem:[#allocation4 + $0x4] sm:$0xf] }
 0x20f   : > { %v2599_v44 = vcombine.low %v1506_v42, %v1507_v43 }
 0x211   : > { %1758 = vrot.lane.b32.xlu1 %v2599_v44, %s3029_s19  ;;  %1535 = vrot.lane.b32.xlu0 %v2599_v44, %s3027_s23  ;;  %s3037_s19 = smov 121   ;;  %s3038_s23 = smov 115  }
 0x212   : > { %2858 = vmatprep.subr.bf16.mxu1 %v2599_v44 }
 0x213   : > { %2859 = vmatpush3.bf16.msra.mxu1 %v2599_v44 }
 0x215   : > { %1920 = vrot.lane.b32.xlu1 %v2600_v37, %s3036_s18  ;;  %1678 = vrot.lane.b32.xlu0 %v2599_v44, %s3035_s29 }
 0x216   : > { %2861 = vmatmul.mubr.msk.bf16.vlgmr.msra.gmra.mxu1 %vm402_vm0, %v2994_v45 }
 0x217   : > { %2876 = vmatprep.mubr.msk.bf16.mxu1 %vm402_vm0, %v2997_v46  ;;  %v2261_v46 = vld [vmem:[%s3443_s6] sm:$0xff] }
 0x219   : > { %1918 = vrot.lane.b32.xlu1 %v2599_v44, %s3036_s18  ;;  %1840 = vrot.lane.b32.xlu0 %v2600_v37, %s3037_s19 }
 0x21d   : > { %2080 = vrot.lane.b32.xlu1 %v2600_v37, %s3038_s23  ;;  %1838 = vrot.lane.b32.xlu0 %v2599_v44, %s3037_s19 }
 0x221   : > { %2078 = vrot.lane.b32.xlu1 %v2599_v44, %s3038_s23  ;;  %2000 = vrot.lane.b32.xlu0 %v2600_v37, %s3039_s20  ;;  %s359_s23 = scalar_lea.vmem %s3447_s10, %s2675_s17 }
 0x225   : > { %2244 = vperm.xlu1 %2962, %v2226_v47   ;;  %1998 = vrot.lane.b32.xlu0 %v2599_v44, %s3039_s20  ;;  %s3042_s20 = smov 7  }
 0x229   : > { %2234 = vperm.xlu1 %2962, %v2224_v48   ;;  %2160 = vrot.lane.b32.xlu0 %v2600_v37, %s3040_s26 }
 0x22d   : > { %1192 = vperm.xlu1 %2962, %v1186_v49   ;;  %2158 = vrot.lane.b32.xlu0 %v2599_v44, %s3040_s26 }
 0x231   : > { %1202 = vperm.xlu1 %2962, %v1188_v50   ;;  %2239 = vperm.xlu0 %2961, %v2225_v51  }
 0x235   : > { %2275 = vperm.xlu1 %2962, %v2269_v52   ;;  %2229 = vperm.xlu0 %2961, %v2223_v53  }
 0x239   : > { %2285 = vperm.xlu1 %2962, %v2271_v54   ;;  %1197 = vperm.xlu0 %2961, %v1187_v55  }
 0x23d   : > { %1207 = vperm.xlu0 %2961, %v1189_v56  }
 0x241   : > { %2280 = vperm.xlu0 %2961, %v2270_v57  }
 0x245   : > { %2290 = vperm.xlu0 %2961, %v2272_v58  }
 0x273   : > { %v1538_v60 = vpop.permute.xlu1 %1537 }
 0x274   : > { %2848 = vmatprep.subr.bf16.mxu0 %v1538_v60 }
 0x275   : > { %2849 = vmatpush3.bf16.msra.mxu0 %v1538_v60 }
 0x277   : > { %v1681_v61 = vpop.permute.xlu1 %1680 }
 0x27b   : > { %v1761_v62 = vpop.permute.xlu1 %1760 }
 0x27c   : > { %2872 = vmatprep.subr.bf16.mxu1 %v1761_v62 }
 0x27d   : > { %2873 = vmatpush3.bf16.msra.mxu1 %v1761_v62 }
 0x283   : > { %v1536_v63 = vpop.permute.xlu0 %1535  ;;  %v1759_v0 = vpop.permute.xlu1 %1758 }
 0x284   : > { %2850 = vmatprep.subr.bf16.mxu0 %v1536_v63  ;;  %2874 = vmatprep.subr.bf16.mxu1 %v1759_v0 }
 0x285   : > { %2851 = vmatpush3.bf16.msra.mxu0 %v1536_v63  ;;  %2875 = vmatpush3.bf16.msra.mxu1 %v1759_v0 }
 0x286   : > { %2864 = vmatprep.subr.bf16.mxu0 %v1681_v61 }
 0x287   : > { %v1679_v3 = vpop.permute.xlu0 %1678  ;;  %v1921_v4 = vpop.permute.xlu1 %1920 }
 0x288   : > { %2853 = vmatmul.mubr.msk.bf16.vlgmr.msra.gmra.mxu0 %vm402_vm0, %v2996_v1  ;;  %2888 = vmatprep.subr.bf16.mxu1 %v1921_v4 }
 0x289   : > { %2865 = vmatpush3.bf16.msra.mxu0 %v1681_v61  ;;  %2877 = vmatmul.mubr.msk.bf16.vlgmr.msra.gmra.mxu1 %vm402_vm0, %v2998_v2 }
 0x28a   : > { %2889 = vmatpush3.bf16.msra.mxu1 %v1921_v4  ;;  %2866 = vmatprep.subr.bf16.mxu0 %v1679_v3 }
 0x28b   : > { %v1841_v7 = vpop.permute.xlu0 %1840  ;;  %v1919_v8 = vpop.permute.xlu1 %1918  ;;  %2868 = vmatprep.mubr.msk.bf16.mxu0 %vm402_vm0, %v2999_v5  ;;  %2892 = vmatprep.mubr.msk.bf16.mxu1 %vm402_vm0, %v3001_v6 }
 0x28c   : > { %2890 = vmatprep.subr.bf16.mxu1 %v1919_v8 }
 0x28d   : > { %2867 = vmatpush3.bf16.msra.mxu0 %v1679_v3 }
 0x28e   : > { %2891 = vmatpush3.bf16.msra.mxu1 %v1919_v8  ;;  %2880 = vmatprep.subr.bf16.mxu0 %v1841_v7 }
 0x28f   : > { %v1839_v11 = vpop.permute.xlu0 %1838  ;;  %v2081_v12 = vpop.permute.xlu1 %2080 }
 0x290   : > { %2869 = vmatmul.mubr.msk.bf16.vlgmr.msra.gmra.mxu0 %vm402_vm0, %v3000_v9  ;;  %2904 = vmatprep.subr.bf16.mxu1 %v2081_v12 }
 0x291   : > { %2881 = vmatpush3.bf16.msra.mxu0 %v1841_v7  ;;  %2893 = vmatmul.mubr.msk.bf16.vlgmr.msra.gmra.mxu1 %vm402_vm0, %v3002_v10 }
 0x292   : > { %2905 = vmatpush3.bf16.msra.mxu1 %v2081_v12  ;;  %2882 = vmatprep.subr.bf16.mxu0 %v1839_v11 }
 0x293   : > { %v2001_v15 = vpop.permute.xlu0 %2000  ;;  %v2079_v16 = vpop.permute.xlu1 %2078  ;;  %2884 = vmatprep.mubr.msk.bf16.mxu0 %vm402_vm0, %v3003_v13  ;;  %2908 = vmatprep.mubr.msk.bf16.mxu1 %vm402_vm0, %v3006_v14 }
 0x294   : > { %2906 = vmatprep.subr.bf16.mxu1 %v2079_v16 }
 0x295   : > { %2883 = vmatpush3.bf16.msra.mxu0 %v1839_v11 }
 0x296   : > { %2907 = vmatpush3.bf16.msra.mxu1 %v2079_v16  ;;  %2896 = vmatprep.subr.bf16.mxu0 %v2001_v15 }
 0x297   : > { %v1999_v20 = vpop.permute.xlu0 %1998 }
 0x298   : > { %2885 = vmatmul.mubr.msk.bf16.vlgmr.msra.gmra.mxu0 %vm402_vm0, %v3004_v17 }
 0x299   : > { %2897 = vmatpush3.bf16.msra.mxu0 %v2001_v15  ;;  %2900 = vmatprep.mubr.msk.bf16.mxu0 %vm402_vm0, %v3005_v18 }
 0x29a   : > { %2898 = vmatprep.subr.bf16.mxu0 %v1999_v20  ;;  %2909 = vmatmul.mubr.msk.bf16.vlgmr.msra.gmra.mxu1 %vm402_vm0, %v3008_v19 }
 0x29b   : > { %v2161_v21 = vpop.permute.xlu0 %2160  ;;  %2928 = vmatprep.mubr.msk.f32.mxu1 %vm402_vm0, %v2261_v46 }
 0x29d   : > { %2899 = vmatpush3.bf16.msra.mxu0 %v1999_v20 }
 0x29e   : > { %2912 = vmatprep.subr.bf16.mxu0 %v2161_v21 }
 0x29f   : > { %v2159_v25 = vpop.permute.xlu0 %2158 }
 0x2a0   : > { %2901 = vmatmul.mubr.msk.bf16.vlgmr.msra.gmra.mxu0 %vm402_vm0, %v3007_v22  ;;  %v3358_v24 = vpop.permute.xlu1 %2244 }
 0x2a1   : > { %2913 = vmatpush3.bf16.msra.mxu0 %v2161_v21  ;;  %2916 = vmatprep.mubr.msk.bf16.mxu0 %vm402_vm0, %v3009_v23 }
 0x2a2   : > { %2914 = vmatprep.subr.bf16.mxu0 %v2159_v25 }
 0x2a4   : > { %v3361_v27 = vpop.permute.xlu1 %2234 }
 0x2a5   : > { %2915 = vmatpush3.bf16.msra.mxu0 %v2159_v25 }
 0x2a8   : > { %2917 = vmatmul.mubr.msk.bf16.vlgmr.msra.gmra.mxu0 %vm402_vm0, %v3010_v28  ;;  %v1193_v30 = vpop.permute.xlu1 %1192 }
 0x2a9   : > { %v1273_v31 = vadd.f32 %v1272_v29, %v1193_v30 }
 0x2ab   : > { %1288 = vst.msk [vmem:[#allocation3] sm:$0xff] %vm1287_vm12, %v1273_v31 }
 0x2ac   : > { %v3368_v32 = vpop.permute.xlu0 %2239  ;;  %v1203_v33 = vpop.permute.xlu1 %1202 }
 0x2ad   : > { %v1281_v34 = vadd.f32 %v2846_v26, %v1203_v33 }
 0x2af   : > { %1290 = vst.msk [vmem:[#allocation3 + $0x10] sm:$0xff] %vm1287_vm12, %v1281_v34 }
 0x2b0   : > { %v3371_v36 = vpop.permute.xlu0 %2229  ;;  %v3379_v47 = vpop.permute.xlu1 %2275 }
 0x2b2   : > { %v1327_v37 = vld [vmem:[#allocation3] sm:$0xff] }
 0x2b3   : > { %1335 = vrot.lane.b32.xlu1 %v1327_v37, %s3042_s20 }
 0x2b4   : > { %v1198_v39 = vpop.permute.xlu0 %1197  ;;  %v3381_v48 = vpop.permute.xlu1 %2285 }
 0x2b5   : > { %v1276_v40 = vadd.f32 %v1275_v38, %v1198_v39 }
 0x2b6   : > { %v1329_v41 = vld [vmem:[#allocation3 + $0x10] sm:$0xff] }
 0x2b7   : > { %1289 = vst.msk [vmem:[#allocation3 + $0x8] sm:$0xff] %vm1287_vm12, %v1276_v40  ;;  %1339 = vrot.lane.b32.xlu1 %v1329_v41, %s3042_s20 }
 0x2b8   : > { %v1208_v42 = vpop.permute.xlu0 %1207 }
 0x2b9   : > { %v1284_v43 = vadd.f32 %v2847_v35, %v1208_v42 }
 0x2bb   : > { %1291 = vst.msk [vmem:[#allocation3 + $0x18] sm:$0xff] %vm1287_vm12, %v1284_v43  ;;  %1385 = vrot.lane.b32.xlu1 %v1327_v37, %s3043_s22 }
 0x2bc   : > { %v3384_v50 = vpop.permute.xlu0 %2280 }
 0x2be   : > { %v1328_v44 = vld [vmem:[#allocation3 + $0x8] sm:$0xff] }
 0x2bf   : > { %1337 = vrot.lane.b32.xlu0 %v1328_v44, %s3042_s20  ;;  %1389 = vrot.lane.b32.xlu1 %v1329_v41, %s3043_s22 }
 0x2c0   : > { %v3387_v52 = vpop.permute.xlu0 %2290 }
 0x2c2   : > { %v1330_v45 = vld [vmem:[#allocation3 + $0x18] sm:$0xff] }
 0x2c3   : > { %1341 = vrot.lane.b32.xlu0 %v1330_v45, %s3042_s20  ;;  %1435 = vrot.lane.b32.xlu1 %v1327_v37, %s3044_s21 }
 0x2c7   : > { %1387 = vrot.lane.b32.xlu0 %v1328_v44, %s3043_s22  ;;  %1439 = vrot.lane.b32.xlu1 %v1329_v41, %s3044_s21 }
 0x2cb   : > { %1391 = vrot.lane.b32.xlu0 %v1330_v45, %s3043_s22  ;;  %1485 = vrot.lane.b32.xlu1 %v1327_v37, %s3045_s24 }
 0x2cf   : > { %1437 = vrot.lane.b32.xlu0 %v1328_v44, %s3044_s21  ;;  %1489 = vrot.lane.b32.xlu1 %v1329_v41, %s3045_s24 }
 0x2d3   : > { %1441 = vrot.lane.b32.xlu0 %v1330_v45, %s3044_s21 }
 0x2d6   : > { %v2862_v58 = vpop.f32.mrf.mxu1 }
 0x2d7   : > { %1487 = vrot.lane.b32.xlu0 %v1328_v44, %s3045_s24 }
 0x2d8   : > { %v1648_v61 = vpop.f32.mrf.mxu1 }
 0x2da   : > { %v2863_v0 = vpop.f32.mrf.mxu1 }
 0x2db   : > { %1491 = vrot.lane.b32.xlu0 %v1330_v45, %s3045_s24 }
 0x2dc   : > { %v1651_v4 = vpop.f32.mrf.mxu1 }
 0x325   : > { %v1336_v49 = vpop.permute.xlu1 %1335 }
 0x326   : > { %1348 = vst.msk [vmem:[#allocation5] sm:$0xff] %vm1347_vm13, %v1336_v49 }
 0x329   : > { %v1340_v51 = vpop.permute.xlu1 %1339 }
 0x32a   : > { %1350 = vst.msk [vmem:[#allocation5 + $0x10] sm:$0xff] %vm1347_vm13, %v1340_v51 }
 0x32d   : > { %v1386_v53 = vpop.permute.xlu1 %1385 }
 0x32e   : > { %1398 = vst.msk [vmem:[#allocation5] sm:$0xff] %vm1397_vm14, %v1386_v53 }
 0x331   : > { %v1338_v54 = vpop.permute.xlu0 %1337  ;;  %v1390_v55 = vpop.permute.xlu1 %1389 }
 0x332   : > { %1349 = vst.msk [vmem:[#allocation5 + $0x8] sm:$0xff] %vm1347_vm13, %v1338_v54 }
 0x333   : > { %1400 = vst.msk [vmem:[#allocation5 + $0x10] sm:$0xff] %vm1397_vm14, %v1390_v55 }
 0x335   : > { %v1342_v56 = vpop.permute.xlu0 %1341  ;;  %v1436_v57 = vpop.permute.xlu1 %1435 }
 0x336   : > { %1351 = vst.msk [vmem:[#allocation5 + $0x18] sm:$0xff] %vm1347_vm13, %v1342_v56 }
 0x337   : > { %1448 = vst.msk [vmem:[#allocation5] sm:$0xff] %vm1447_vm15, %v1436_v57 }
 0x339   : > { %v1388_v59 = vpop.permute.xlu0 %1387  ;;  %v1440_v60 = vpop.permute.xlu1 %1439 }
 0x33a   : > { %1399 = vst.msk [vmem:[#allocation5 + $0x8] sm:$0xff] %vm1397_vm14, %v1388_v59 }
 0x33b   : > { %1450 = vst.msk [vmem:[#allocation5 + $0x10] sm:$0xff] %vm1447_vm15, %v1440_v60 }
 0x33d   : > { %v1392_v62 = vpop.permute.xlu0 %1391  ;;  %v1486_v63 = vpop.permute.xlu1 %1485 }
 0x33e   : > { %1401 = vst.msk [vmem:[#allocation5 + $0x18] sm:$0xff] %vm1397_vm14, %v1392_v62 }
 0x33f   : > { %1498 = vst.msk [vmem:[#allocation5] sm:$0xff] %vm1497_vm1, %v1486_v63 }
 0x341   : > { %v1438_v1 = vpop.permute.xlu0 %1437  ;;  %v1490_v2 = vpop.permute.xlu1 %1489 }
 0x342   : > { %1449 = vst.msk [vmem:[#allocation5 + $0x8] sm:$0xff] %vm1447_vm15, %v1438_v1 }
 0x343   : > { %1500 = vst.msk [vmem:[#allocation5 + $0x10] sm:$0xff] %vm1497_vm1, %v1490_v2 }
 0x345   : > { %v1442_v3 = vpop.permute.xlu0 %1441 }
 0x346   : > { %1451 = vst.msk [vmem:[#allocation5 + $0x18] sm:$0xff] %vm1447_vm15, %v1442_v3 }
 0x348   : > { %v2854_v5 = vpop.f32.mrf.mxu0 }
 0x349   : > { %v1488_v6 = vpop.permute.xlu0 %1487  ;;  %v2878_v7 = vpop.f32.mrf.mxu1  ;;  %v1657_v20 = vadd.f32 %v2862_v58, %v2854_v5 }
 0x34a   : > { %1499 = vst.msk [vmem:[#allocation5 + $0x8] sm:$0xff] %vm1497_vm1, %v1488_v6  ;;  %v1581_v8 = vpop.f32.mrf.mxu0 }
 0x34b   : > { %v1804_v9 = vpop.f32.mrf.mxu1  ;;  %v1649_v26 = vadd.f32 %v1648_v61, %v1581_v8 }
 0x34c   : > { %v2855_v10 = vpop.f32.mrf.mxu0 }
 0x34d   : > { %v1492_v11 = vpop.permute.xlu0 %1491  ;;  %v2879_v12 = vpop.f32.mrf.mxu1  ;;  %v1660_v28 = vadd.f32 %v2863_v0, %v2855_v10 }
 0x34e   : > { %1501 = vst.msk [vmem:[#allocation5 + $0x18] sm:$0xff] %vm1497_vm1, %v1492_v11  ;;  %v1584_v13 = vpop.f32.mrf.mxu0 }
 0x34f   : > { %v1807_v14 = vpop.f32.mrf.mxu1  ;;  %v1652_v30 = vadd.f32 %v1651_v4, %v1584_v13 }
 0x350   : > { %v2870_v15 = vpop.f32.mrf.mxu0 }
 0x351   : > { %v2894_v16 = vpop.f32.mrf.mxu1  ;;  %v1741_v22 = vadd.f32 %v2870_v15, %v1657_v20 }
 0x352   : > { %v1724_v17 = vpop.f32.mrf.mxu0 }
 0x353   : > { %v1964_v19 = vpop.f32.mrf.mxu1  ;;  %v1821_v31 = vadd.f32 %v2878_v7, %v1741_v22  ;;  %v1739_v33 = vadd.f32 %v1724_v17, %v1649_v26 }
 0x354   : > { %v2871_v18 = vpop.f32.mrf.mxu0 }
 0x355   : > { %v2895_v25 = vpop.f32.mrf.mxu1  ;;  %v1742_v34 = vadd.f32 %v2871_v18, %v1660_v28  ;;  %v1819_v41 = vadd.f32 %v1804_v9, %v1739_v33 }
 0x356   : > { %v1727_v21 = vpop.f32.mrf.mxu0 }
 0x357   : > { %v1967_v37 = vpop.f32.mrf.mxu1  ;;  %v1740_v38 = vadd.f32 %v1727_v21, %v1652_v30  ;;  %v1822_v42 = vadd.f32 %v2879_v12, %v1742_v34 }
 0x358   : > { %v2886_v23 = vpop.f32.mrf.mxu0 }
 0x359   : > { %v1901_v39 = vadd.f32 %v2886_v23, %v1821_v31  ;;  %v1820_v45 = vadd.f32 %v1807_v14, %v1740_v38  ;;  %v2663_v14 = vld [vmem:[%s3438_s1] ss:$0 sm:$0xff] }
 0x35a   : > { %v1884_v29 = vpop.f32.mrf.mxu0  ;;  %v2910_v44 = vpop.f32.mrf.mxu1 }
 0x35b   : > { %v1981_v46 = vadd.f32 %v2894_v16, %v1901_v39  ;;  %v1899_v49 = vadd.f32 %v1884_v29, %v1819_v41 }
 0x35c   : > { %v2887_v35 = vpop.f32.mrf.mxu0  ;;  %v2124_v56 = vpop.f32.mrf.mxu1 }
 0x35d   : > { %v1902_v51 = vadd.f32 %v2887_v35, %v1822_v42  ;;  %v1979_v58 = vadd.f32 %v1964_v19, %v1899_v49  ;;  %v2399_v42 = vld [vmem:[#allocation5 + $0x8] sm:$0xff] }
 0x35e   : > { %v1887_v40 = vpop.f32.mrf.mxu0  ;;  %v2911_v1 = vpop.f32.mrf.mxu1 }
 0x35f   : > { %v1900_v54 = vadd.f32 %v1887_v40, %v1820_v45  ;;  %v1982_v59 = vadd.f32 %v2895_v25, %v1902_v51 }
 0x360   : > { %v2902_v43 = vpop.f32.mrf.mxu0  ;;  %v2127_v8 = vpop.f32.mrf.mxu1 }
 0x361   : > { %v2061_v55 = vadd.f32 %v2902_v43, %v1981_v46  ;;  %v1980_v61 = vadd.f32 %v1967_v37, %v1900_v54 }
 0x362   : > { %v2044_v53 = vpop.f32.mrf.mxu0 }
 0x363   : > { %v2141_v62 = vadd.f32 %v2910_v44, %v2061_v55  ;;  %v2059_v63 = vadd.f32 %v2044_v53, %v1979_v58  ;;  %v2400_v55 = vld [vmem:[#allocation5 + $0x10] sm:$0xff] }
 0x364   : > { %v2903_v57 = vpop.f32.mrf.mxu0 }
 0x365   : > { %v2062_v0 = vadd.f32 %v2903_v57, %v1982_v59  ;;  %v2139_v6 = vadd.f32 %v2124_v56, %v2059_v63 }
 0x366   : > { %v2047_v60 = vpop.f32.mrf.mxu0 }
 0x367   : > { %v2060_v3 = vadd.f32 %v2047_v60, %v1980_v61  ;;  %v2142_v7 = vadd.f32 %v2911_v1, %v2062_v0 }
 0x368   : > { %v2918_v2 = vpop.f32.mrf.mxu0 }
 0x369   : > { %v2221_v4 = vadd.f32 %v2918_v2, %v2141_v62  ;;  %v2140_v10 = vadd.f32 %v2127_v8, %v2060_v3 }
 0x36a   : > { %v2204_v5 = vpop.f32.mrf.mxu0 }
 0x36b   : > { %v2249_v11 = vadd.f32 %v3368_v32, %v2221_v4  ;;  %v2219_v12 = vadd.f32 %v2204_v5, %v2139_v6 }
 0x36c   : > { %v2919_v9 = vpop.f32.mrf.mxu0 }
 0x36d   : > { %v2222_v13 = vadd.f32 %v2919_v9, %v2142_v7  ;;  %v2259_v18 = vmul.f32 %v2663_v14, %v2249_v11  ;;  %v2247_v19 = vadd.f32 %v3371_v36, %v2219_v12  ;;  %v2264_v36 = vld [vmem:[%s3443_s6 + $0x18] sm:$0xff] }
 0x36e   : > { %v2207_v15 = vpop.f32.mrf.mxu0 }
 0x36f   : > { %v2250_v16 = vadd.f32 %v3358_v24, %v2222_v13  ;;  %v2220_v17 = vadd.f32 %v2207_v15, %v2140_v10  ;;  %v2257_v25 = vmul.f32 %v2663_v14, %v2247_v19  ;;  %v2267_v32 = vmul.f32 %v2259_v18, %v2259_v18  ;;  %v2262_v24 = vld [vmem:[%s3443_s6 + $0x8] sm:$0xff] }
 0x371   : > { %v2260_v20 = vmul.f32 %v2663_v14, %v2250_v16  ;;  %v2248_v21 = vadd.f32 %v3361_v27, %v2220_v17  ;;  %v2265_v28 = vmul.f32 %v2257_v25, %v2257_v25  ;;  %v2263_v27 = vld [vmem:[%s3443_s6 + $0x10] sm:$0xff] }
 0x373   : > { %v2258_v22 = vmul.f32 %v2663_v14, %v2248_v21  ;;  %v2268_v23 = vmul.f32 %v2260_v20, %v2260_v20 }
 0x375   : > { %2920 = vmatprep.subr.mxu1 %v2268_v23  ;;  %v2266_v26 = vmul.f32 %v2258_v22, %v2258_v22 }
 0x376   : > { %2921 = vmatpush3.msra.mxu1 %v2268_v23 }
 0x377   : > { %2922 = vmatprep.subr.mxu1 %v2267_v32 }
 0x378   : > { %2923 = vmatpush3.msra.mxu1 %v2267_v32 }
 0x379   : > { %2924 = vmatprep.subr.mxu1 %v2266_v26 }
 0x37a   : > { %2925 = vmatpush3.msra.mxu1 %v2266_v26 }
 0x37b   : > { %2926 = vmatprep.subr.mxu1 %v2265_v28 }
 0x37c   : > { %2927 = vmatpush3.msra.mxu1 %v2265_v28 }
 0x37d   : > { %2929 = vmatmul.mubr.msk.f32.vlgmr.msra.gmra.mxu1 %vm402_vm0, %v2262_v24 }
 0x37e   : > { %2931 = vmatprep.mubr.msk.f32.mxu1 %vm402_vm0, %v2263_v27 }
 0x381   : > { %2932 = vmatmul.mubr.msk.f32.gmra.mxu1 %vm402_vm0, %v2264_v36  ;;  %vm2422_vm0 = vcmask 289792  }
 0x43d   : > { %v2930_v29 = vpop.f32.mrf.mxu1 }
 0x43e   : > { %v2377_v30 = vadd.f32 %v2930_v29, %v3384_v50 }
 0x43f   : > { %v2371_v31 = vpop.f32.mrf.mxu1 }
 0x440   : > { %3011 = vrsqrt.f32 %v2377_v30  ;;  %v2372_v33 = vadd.f32 %v2371_v31, %v3379_v47  ;;  %v2398_v47 = vld [vmem:[#allocation5] sm:$0xff] }
 0x441   : > { %v2933_v34 = vpop.f32.mrf.mxu1 }
 0x442   : > { %3013 = vrsqrt.f32 %v2372_v33  ;;  %v2387_v35 = vadd.f32 %v2933_v34, %v3387_v52 }
 0x443   : > { %v2381_v37 = vpop.f32.mrf.mxu1 }
 0x444   : > { %3015 = vrsqrt.f32 %v2387_v35  ;;  %v2382_v38 = vadd.f32 %v2381_v37, %v3381_v48  ;;  %v2401_v48 = vld [vmem:[#allocation5 + $0x18] sm:$0xff] }
 0x446   : > { %3017 = vrsqrt.f32 %v2382_v38 }
 0x44d   : > { %v3012_v39 = vpop.eup %3011 }
 0x44e   : > { %v2395_v40 = vmul.f32 %v3012_v39, %v2258_v22 }
 0x44f   : > { %v3014_v41 = vpop.eup %3013 }
 0x450   : > { %v2403_v43 = vadd.f32 %v2399_v42, %v2395_v40  ;;  %v2394_v50 = vmul.f32 %v3014_v41, %v2257_v25 }
 0x451   : > { %v3016_v44 = vpop.eup %3015 }
 0x452   : > { %v2681_v52 = vpack.c.bf16 %v2403_v43, %v2403_v43  ;;  %v2402_v45 = vadd.f32 %v2398_v47, %v2394_v50  ;;  %v2397_v46 = vmul.f32 %v3016_v44, %v2260_v20 }
 0x453   : > { %v3018_v49 = vpop.eup %3017 }
 0x454   : > { %2424 = vst.msk [vmem:[%s359_s23 + $0x4] sm:$0xf] %vm2422_vm0, %v2681_v52  ;;  %v2680_v51 = vpack.c.bf16 %v2402_v45, %v2402_v45  ;;  %v2405_v53 = vadd.f32 %v2401_v48, %v2397_v46  ;;  %v2396_v54 = vmul.f32 %v3018_v49, %v2259_v18 }
 0x456   : > { %2423 = vst.msk [vmem:[%s359_s23] sm:$0xf] %vm2422_vm0, %v2680_v51  ;;  %v2683_v56 = vpack.c.bf16 %v2405_v53, %v2405_v53  ;;  %v2404_v57 = vadd.f32 %v2400_v55, %v2396_v54 }
 0x458   : > { %2426 = vst.msk [vmem:[%s359_s23 + $0xc] sm:$0xf] %vm2422_vm0, %v2683_v56  ;;  %v2682_v58 = vpack.c.bf16 %v2404_v57, %v2404_v57 }
 0x45a   : > { %2425 = vst.msk [vmem:[%s359_s23 + $0x8] sm:$0xf] %vm2422_vm0, %v2682_v58 }
 0x45b PF: > { %s20_s13 = sadd.s32 1, %s3025_s13  }
 0x45c   : > { %p17_p4 = scmp.ge.s32.totalorder %s20_s13, 4  }
 0x45e   :  { %19 = sbr.rel (!%p17_p4) target bundleno = 1 (0x1), region = 109 }

// kernel: analysis_transform.7
= control target key start
LH: loop header
LB: loop body
LE: loop exit
PB: predicated region body
PF: predicated region fallthrough
CT: control target
= control target key end

     0   :  { %s3215_s13 = smov 0   ;;  %s3603_s0 = inlined_call_operand.vmem [shape: bf16[2,4,16,91], index: 0, kind: input, shape index: {}]   ;;  %s3604_s1 = inlined_call_operand.vmem [shape: f32[1,100], index: 1, kind: input, shape index: {}]   ;;  %s3605_s2 = inlined_call_operand.vmem [shape: bf16[9,32,16], index: 2, kind: input, shape index: {}]   ;;  %s3606_s3 = inlined_call_operand.vmem [shape: f32[32,1], index: 3, kind: input, shape index: {}]   ;;  %s3607_s4 = inlined_call_operand.vmem [shape: bf16[9,32,32], index: 4, kind: input, shape index: {}]   ;;  %s3608_s5 = inlined_call_operand.vmem [shape: f32[32,1], index: 5, kind: input, shape index: {}]   ;;  %s3609_s6 = inlined_call_operand.vmem [shape: f32[32,32], index: 6, kind: input, shape index: {}]   ;;  %s3610_s7 = inlined_call_operand.vmem [shape: f32[32,1], index: 7, kind: input, shape index: {}]   ;;  %s3611_s8 = inlined_call_operand.vmem [shape: bf16[32,16], index: 8, kind: input, shape index: {}]   ;;  %s3612_s9 = inlined_call_operand.vmem [shape: f32[32,1], index: 9, kind: input, shape index: {}]   ;;  %s3613_s10 = inlined_call_operand.vmem [shape: bf16[2,32,100], index: 10, kind: output, shape index: {}]  }
   0x1 LB: > { %s2628_s14 = sadd.s32 4294967295, %s3131_s13   ;;  %p2632_p0 = scmp.ge.s32.totalorder %s3131_s13, 1  ;;  %s3131_s13 = sphi %s3215_s13, %s20_s13  }
   0x2   : > { %p312_p1 = scmp.lt.s32.totalorder %s3131_s13, 3 }
   0x4   : > { %p313_p2 = pnand %p2632_p0, %p312_p1 }
   0x5   : > { %p350_p3 = scmp.lt.s32.totalorder (!%p313_p2), %s2628_s14, 1  ;;  %s3133_s23 = smov (!%p313_p2), 127  }
   0x6   : > { %316 = sbr.rel (%p313_p2) target bundleno = 1144 (0x478), region = 60  ;;  %s3134_s24 = smov (!%p313_p2), 119  }
   0x7   : > { %s3135_s15 = smov (!%p313_p2), 118   ;;  %s3137_s18 = smov (!%p313_p2), 22  }
   0x8   : > { %s3139_s20 = smov (!%p313_p2), 24   ;;  %s3140_s21 = smov (!%p313_p2), 25  }
   0x9   : > { %s3142_s25 = smov (!%p313_p2), 27   ;;  %s3143_s29 = smov (!%p313_p2), 28  }
   0xa   : > { %s3144_s30 = smov (!%p313_p2), 29   ;;  %s3145_s16 = smov (!%p313_p2), 126  }
   0xb   : > { %v3077_v0 = vld [vmem:[%s3605_s2 + $0x10] sm:$0xff]   ;;  %vm392_vm0 = vcmask 130048   ;;  %s3615_s14 = smov (!%p350_p3, %s2628_s14), 1  ;;  %v3078_v1 = vld [vmem:[%s3605_s2] sm:$0xff]   ;;  %v3080_v5 = vld [vmem:[%s3605_s2 + $0x8] sm:$0xff]   ;;  %v3136_v12 = vmov 0  }
   0xc   : > { %2893 = vmatprep.mubr.msk.bf16.mxu0 %vm392_vm0, %v3077_v0  ;;  %s2807_s19 = sshll.u32 %s3615_s14, 5  ;;  %2899 = vmatprep.mubr.msk.bf16.mxu1 %vm392_vm0, %v3078_v1  ;;  %v3083_v6 = vld [vmem:[%s3605_s2 + $0x30] sm:$0xff]   ;;  %v3079_v7 = vld [vmem:[%s3605_s2 + $0x18] sm:$0xff]   ;;  %v3081_v8 = vld [vmem:[%s3605_s2 + $0x20] sm:$0xff]   ;;  %vm1237_vm1 = vcmask 994304   ;;  %vm1126_vm3 = vcmask 658432  }
   0xd   : > { %s3237_s22 = scalar_lea.vmem %s3603_s0, %s2807_s19  ;;  %v3084_v9 = vld [vmem:[%s3605_s2 + $0x38] sm:$0xff]   ;;  %v3088_v10 = vld [vmem:[%s3605_s2 + $0x50] sm:$0xff]   ;;  %3072 = vset.pattern.permute.xlu1 %v3136_v12  ;;  %v1070_v13 = vld [vmem:[%s3606_s3] sm:$0xff]  ;;  %3073 = vset.pattern.permute.xlu0 %v3136_v12  ;;  %1240 = vst.msk [vmem:[#allocation4 + $0x8] sm:$0xf] %vm1237_vm1, %v3136_v12  ;;  %s3138_s19 = smov 23  }
   0xe   : > { %v3074_v2 = vld [vmem:[%s3237_s22] sm:$0xff]   ;;  %v3075_v3 = vld [vmem:[%s3237_s22 + $0x10] sm:$0xff]   ;;  %v3076_v4 = vld [vmem:[%s3237_s22 + $0x8] sm:$0xff]   ;;  %1238 = vst.msk [vmem:[#allocation4] sm:$0xf] %vm1237_vm1, %v3136_v12  ;;  %vm1267_vm7 = vcmask 240816  }
   0xf   : > { %534 = vrot.lane.b32.xlu0 %v3074_v2, %s3133_s23  ;;  %854 = vrot.lane.b32.xlu1 %v3074_v2, %s3134_s24  ;;  %v1072_v11 = vld [vmem:[%s3606_s3 + $0x10] sm:$0xff]  ;;  %v1073_v14 = vld [vmem:[%s3606_s3 + $0x18] sm:$0xff]  ;;  %1239 = vst.msk [vmem:[#allocation4 + $0x4] sm:$0xf] %vm1237_vm1, %v3136_v12  ;;  %1241 = vst.msk [vmem:[#allocation4 + $0xc] sm:$0xf] %vm1237_vm1, %v3136_v12 }
  0x10   : > { %2897 = vmatprep.subr.bf16.mxu1 %v3074_v2  ;;  %2891 = vmatprep.subr.bf16.mxu0 %v3076_v4  ;;  %v1071_v15 = vld [vmem:[%s3606_s3 + $0x8] sm:$0xff]  ;;  %v3085_v16 = vld [vmem:[%s3237_s22 + $0x18] sm:$0xff]   ;;  %v3086_v20 = vld [vmem:[%s3605_s2 + $0x40] sm:$0xff]   ;;  %vm1317_vm8 = vcmask 322816   ;;  %vm1367_vm9 = vcmask 404816   ;;  %vm1417_vm10 = vcmask 486816  }
  0x11   : > { %2898 = vmatpush3.bf16.msra.mxu1 %v3074_v2  ;;  %2892 = vmatpush3.bf16.msra.mxu0 %v3076_v4  ;;  %v3082_v19 = vld [vmem:[%s3605_s2 + $0x28] sm:$0xff]   ;;  %v3089_v23 = vld [vmem:[%s3605_s2 + $0x58] sm:$0xff]   ;;  %v3092_v24 = vld [vmem:[%s3605_s2 + $0x70] sm:$0xff]   ;;  %vm1467_vm11 = vcmask 568816   ;;  %vm1517_vm12 = vcmask 650816   ;;  %vm1567_vm13 = vcmask 732816  }
  0x12   : > { %2909 = vmatprep.subr.bf16.mxu1 %v3075_v3  ;;  %v3087_v25 = vld [vmem:[%s3605_s2 + $0x48] sm:$0xff]   ;;  %v3090_v26 = vld [vmem:[%s3605_s2 + $0x60] sm:$0xff]   ;;  %v3093_v28 = vld [vmem:[%s3605_s2 + $0x78] sm:$0xff]   ;;  %vm1617_vm14 = vcmask 814816   ;;  %vm1686_vm15 = vcmask 261120   ;;  %s3149_s26 = smov 108  }
  0x13   : > { %777 = vrot.lane.b32.xlu0 %v3075_v3, %s3133_s23  ;;  %931 = vrot.lane.b32.xlu1 %v3076_v4, %s3134_s24  ;;  %v3091_v29 = vld [vmem:[%s3605_s2 + $0x68] sm:$0xff]   ;;  %v3094_v30 = vld [vmem:[%s3605_s2 + $0x80] sm:$0xff]   ;;  %s3141_s24 = smov 26   ;;  %vm1232_vm1 = vcmask 662528   ;;  %s3154_s27 = smov 13  }
  0x14   : > { %2900 = vmatmul.mubr.msk.bf16.vlgmr.msra.gmra.mxu1 %vm392_vm0, %v3080_v5  ;;  %2894 = vmatmul.mubr.msk.bf16.vlgmr.msra.gmra.mxu0 %vm392_vm0, %v3079_v7  ;;  %v3095_v31 = vld [vmem:[%s3605_s2 + $0x88] sm:$0xff]   ;;  %s3155_s28 = smov 14   ;;  %s3158_s11 = smov 17  }
  0x15   : > { %2910 = vmatpush3.bf16.msra.mxu1 %v3075_v3  ;;  %2911 = vmatprep.mubr.msk.bf16.mxu1 %vm392_vm0, %v3083_v6  ;;  %s3159_s12 = smov 18  }
  0x16   : > { %2905 = vmatprep.mubr.msk.bf16.mxu0 %vm392_vm0, %v3081_v8 }
  0x17   : > { %1008 = vrot.lane.b32.xlu0 %v3074_v2, %s3135_s15  ;;  %1086 = vperm.xlu1 %3072, %v1072_v11  }
  0x1b   : > { %1091 = vperm.xlu0 %3073, %v1073_v14   ;;  %1076 = vperm.xlu1 %3072, %v1070_v13  }
  0x1c   : > { %2912 = vmatmul.mubr.msk.bf16.vlgmr.msra.gmra.mxu1 %vm392_vm0, %v3084_v9 }
  0x1d   : > { %2923 = vmatprep.mubr.msk.bf16.mxu1 %vm392_vm0, %v3088_v10 }
  0x1f   : > { %1081 = vperm.xlu1 %3072, %v1071_v15  }
  0x81   : > { %v535_v17 = vpop.permute.xlu0 %534  ;;  %v855_v18 = vpop.permute.xlu1 %854 }
  0x82   : > { %2903 = vmatprep.subr.bf16.mxu0 %v535_v17 }
  0x83   : > { %2904 = vmatpush3.bf16.msra.mxu0 %v535_v17 }
  0x84   : > { %2915 = vmatprep.subr.bf16.mxu0 %v3085_v16 }
  0x85   : > { %v778_v21 = vpop.permute.xlu0 %777  ;;  %v932_v22 = vpop.permute.xlu1 %931 }
  0x86   : > { %2906 = vmatmul.mubr.msk.bf16.vlgmr.msra.gmra.mxu0 %vm392_vm0, %v3082_v19  ;;  %2921 = vmatprep.subr.bf16.mxu1 %v778_v21 }
  0x87   : > { %2916 = vmatpush3.bf16.msra.mxu0 %v3085_v16  ;;  %2917 = vmatprep.mubr.msk.bf16.mxu0 %vm392_vm0, %v3086_v20 }
  0x88   : > { %2922 = vmatpush3.bf16.msra.mxu1 %v778_v21  ;;  %2927 = vmatprep.subr.bf16.mxu0 %v855_v18 }
  0x89   : > { %2933 = vmatprep.subr.bf16.mxu1 %v932_v22  ;;  %v1009_v27 = vpop.permute.xlu0 %1008 }
  0x8b   : > { %2924 = vmatmul.mubr.msk.bf16.vlgmr.msra.gmra.mxu1 %vm392_vm0, %v3089_v23 }
  0x8c   : > { %2934 = vmatpush3.bf16.msra.mxu1 %v932_v22  ;;  %2935 = vmatprep.mubr.msk.bf16.mxu1 %vm392_vm0, %v3092_v24 }
  0x8e   : > { %2918 = vmatmul.mubr.msk.bf16.vlgmr.msra.gmra.mxu0 %vm392_vm0, %v3087_v25 }
  0x8f   : > { %2928 = vmatpush3.bf16.msra.mxu0 %v855_v18  ;;  %2929 = vmatprep.mubr.msk.bf16.mxu0 %vm392_vm0, %v3090_v26 }
  0x90   : > { %2939 = vmatprep.subr.bf16.mxu0 %v1009_v27 }
  0x92   : > { %v1087_v16 = vpop.permute.xlu1 %1086 }
  0x93   : > { %2936 = vmatmul.mubr.msk.bf16.vlgmr.msra.gmra.mxu1 %vm392_vm0, %v3093_v28 }
  0x96   : > { %2930 = vmatmul.mubr.msk.bf16.vlgmr.msra.gmra.mxu0 %vm392_vm0, %v3091_v29  ;;  %v1077_v29 = vpop.permute.xlu1 %1076 }
  0x97   : > { %2940 = vmatpush3.bf16.msra.mxu0 %v1009_v27  ;;  %2941 = vmatprep.mubr.msk.bf16.mxu0 %vm392_vm0, %v3094_v30 }
  0x9e   : > { %2942 = vmatmul.mubr.msk.bf16.vlgmr.msra.gmra.mxu0 %vm392_vm0, %v3095_v31 }
  0xd4   : > { %v2901_v32 = vpop.f32.mrf.mxu1  ;;  %v2895_v35 = vpop.f32.mrf.mxu0 }
  0xd5   : > { %v513_v47 = vadd.f32 %v2901_v32, %v2895_v35 }
  0xd6   : > { %v504_v33 = vpop.f32.mrf.mxu1  ;;  %v433_v38 = vpop.f32.mrf.mxu0 }
  0xd7   : > { %v505_v50 = vadd.f32 %v504_v33, %v433_v38 }
  0xd8   : > { %v2902_v34 = vpop.f32.mrf.mxu1  ;;  %v2896_v40 = vpop.f32.mrf.mxu0 }
  0xd9   : > { %v516_v54 = vadd.f32 %v2902_v34, %v2896_v40 }
  0xda   : > { %v507_v36 = vpop.f32.mrf.mxu1  ;;  %v436_v42 = vpop.f32.mrf.mxu0 }
  0xdb   : > { %v508_v57 = vadd.f32 %v507_v36, %v436_v42 }
  0xdc   : > { %v2913_v37 = vpop.f32.mrf.mxu1 }
  0xde   : > { %v660_v39 = vpop.f32.mrf.mxu1 }
  0xe0   : > { %v2914_v41 = vpop.f32.mrf.mxu1 }
  0xe2   : > { %v663_v44 = vpop.f32.mrf.mxu1 }
 0x146   : > { %v2907_v43 = vpop.f32.mrf.mxu0 }
 0x147   : > { %v594_v51 = vadd.f32 %v2907_v43, %v513_v47 }
 0x148   : > { %v577_v45 = vpop.f32.mrf.mxu0 }
 0x149   : > { %v592_v55 = vadd.f32 %v577_v45, %v505_v50  ;;  %v677_v59 = vadd.f32 %v2913_v37, %v594_v51 }
 0x14a   : > { %v2908_v46 = vpop.f32.mrf.mxu0 }
 0x14b   : > { %v2925_v48 = vpop.f32.mrf.mxu1  ;;  %v595_v60 = vadd.f32 %v2908_v46, %v516_v54  ;;  %v675_v0 = vadd.f32 %v660_v39, %v592_v55  ;;  %v1092_v39 = vpop.permute.xlu0 %1091 }
 0x14c   : > { %v580_v49 = vpop.f32.mrf.mxu0  ;;  %v1082_v46 = vpop.permute.xlu1 %1081 }
 0x14d   : > { %v820_v52 = vpop.f32.mrf.mxu1  ;;  %v593_v62 = vadd.f32 %v580_v49, %v508_v57  ;;  %v678_v3 = vadd.f32 %v2914_v41, %v595_v60 }
 0x14e   : > { %v2919_v53 = vpop.f32.mrf.mxu0 }
 0x14f   : > { %v2926_v56 = vpop.f32.mrf.mxu1  ;;  %v760_v1 = vadd.f32 %v2919_v53, %v677_v59  ;;  %v676_v6 = vadd.f32 %v663_v44, %v593_v62 }
 0x150   : > { %v743_v58 = vpop.f32.mrf.mxu0 }
 0x151   : > { %v823_v61 = vpop.f32.mrf.mxu1  ;;  %v758_v4 = vadd.f32 %v743_v58, %v675_v0  ;;  %v837_v8 = vadd.f32 %v2925_v48, %v760_v1 }
 0x152   : > { %v2920_v63 = vpop.f32.mrf.mxu0 }
 0x153   : > { %v2937_v5 = vpop.f32.mrf.mxu1  ;;  %v761_v9 = vadd.f32 %v2920_v63, %v678_v3  ;;  %v835_v12 = vadd.f32 %v820_v52, %v758_v4  ;;  %v3096_v63 = vld [vmem:[%s3237_s22 + $0x18] sm:$0xff]   ;;  %v3097_v4 = vld [vmem:[%s3611_s8] sm:$0xff]   ;;  %s3153_s22 = smov 12  }
 0x154   : > { %v746_v2 = vpop.f32.mrf.mxu0  ;;  %2945 = vmatprep.subr.bf16.mxu1 %v3096_v63  ;;  %2947 = vmatprep.mubr.msk.bf16.mxu1 %vm392_vm0, %v3097_v4  ;;  %v3103_v4 = vld [vmem:[%s3607_s4 + $0x30] sm:$0xff]  }
 0x155   : > { %v759_v10 = vadd.f32 %v746_v2, %v676_v6  ;;  %v974_v14 = vpop.f32.mrf.mxu1  ;;  %v838_v17 = vadd.f32 %v2926_v56, %v761_v9  ;;  %2946 = vmatpush3.bf16.msra.mxu1 %v3096_v63  ;;  %v3101_v63 = vld [vmem:[%s3607_s4 + $0x10] sm:$0xff]  }
 0x156   : > { %v2931_v7 = vpop.f32.mrf.mxu0  ;;  %2955 = vmatprep.mubr.msk.bf16.mxu0 %vm1686_vm15, %v3101_v63 }
 0x157   : > { %v914_v13 = vadd.f32 %v2931_v7, %v837_v8  ;;  %v836_v19 = vadd.f32 %v823_v61, %v759_v10  ;;  %v2938_v23 = vpop.f32.mrf.mxu1 }
 0x158   : > { %v897_v11 = vpop.f32.mrf.mxu0 }
 0x159   : > { %v912_v18 = vadd.f32 %v897_v11, %v835_v12  ;;  %v991_v21 = vadd.f32 %v2937_v5, %v914_v13  ;;  %v977_v31 = vpop.f32.mrf.mxu1  ;;  %v3098_v5 = vld [vmem:[%s3611_s8 + $0x8] sm:$0xff]  }
 0x15a   : > { %v2932_v15 = vpop.f32.mrf.mxu0  ;;  %2948 = vmatmul.mubr.msk.bf16.vlgmr.msra.gmra.mxu1 %vm392_vm0, %v3098_v5  ;;  %v2372_v5 = vld [vmem:[%s3608_s5 + $0x18] sm:$0xff]  ;;  %vm1242_vm0 = vcmask 818176  }
 0x15b   : > { %v915_v22 = vadd.f32 %v2932_v15, %v838_v17  ;;  %v989_v26 = vadd.f32 %v974_v14, %v912_v18 }
 0x15c   : > { %v900_v20 = vpop.f32.mrf.mxu0 }
 0x15d   : > { %v913_v24 = vadd.f32 %v900_v20, %v836_v19  ;;  %v992_v30 = vadd.f32 %v2938_v23, %v915_v22 }
 0x15e   : > { %v2943_v25 = vpop.f32.mrf.mxu0 }
 0x15f   : > { %v1068_v27 = vadd.f32 %v2943_v25, %v991_v21  ;;  %v990_v34 = vadd.f32 %v977_v31, %v913_v24 }
 0x160   : > { %v1051_v28 = vpop.f32.mrf.mxu0 }
 0x161   : > { %v1096_v32 = vadd.f32 %v1087_v16, %v1068_v27  ;;  %v1066_v33 = vadd.f32 %v1051_v28, %v989_v26 }
 0x162   : > { %v2944_v35 = vpop.f32.mrf.mxu0 }
 0x163   : > { %vm1100_vm2 = vcmp.ge.f32.partialorder %v1096_v32, 0.0  ;;  %v1104_v36 = vmul.f32 0.01, %v1096_v32  ;;  %v1094_v37 = vadd.f32 %v1077_v29, %v1066_v33  ;;  %v1069_v38 = vadd.f32 %v2944_v35, %v992_v30 }
 0x164   : > { %v1054_v40 = vpop.f32.mrf.mxu0 }
 0x165   : > { %v1108_v41 = vsel %vm1100_vm2, %v1096_v32, %v1104_v36  ;;  %vm1098_vm4 = vcmp.ge.f32.partialorder %v1094_v37, 0.0  ;;  %v1102_v42 = vmul.f32 0.01, %v1094_v37  ;;  %v1067_v43 = vadd.f32 %v1054_v40, %v990_v34 }
 0x166   : > { %v2811_v44 = vpack.c.bf16 %v1108_v41, %v1108_v41  ;;  %v1097_v45 = vadd.f32 %v1092_v39, %v1069_v38  ;;  %vm1292_vm2 = vcmask 154712  }
 0x167   : > { %v1106_v47 = vsel %vm1098_vm4, %v1094_v37, %v1102_v42  ;;  %v1095_v48 = vadd.f32 %v1082_v46, %v1067_v43  ;;  %v3099_v46 = vld [vmem:[%s3607_s4] sm:$0xff]   ;;  %vm1392_vm4 = vcmask 318712  }
 0x168   : > { %1129 = vst.msk [vmem:[#allocation2 + $0x8] sm:$0xf] %vm1126_vm3, %v2811_v44  ;;  %v2809_v49 = vpack.c.bf16 %v1106_v47, %v1106_v47  ;;  %vm1101_vm5 = vcmp.ge.f32.partialorder %v1097_v45, 0.0  ;;  %v1105_v50 = vmul.f32 0.01, %v1097_v45  ;;  %2963 = vmatprep.mubr.msk.bf16.mxu1 %vm1686_vm15, %v3099_v46 }
 0x169   : > { %vm1099_vm6 = vcmp.ge.f32.partialorder %v1095_v48, 0.0  ;;  %v1103_v51 = vmul.f32 0.01, %v1095_v48 }
 0x16a   : > { %1127 = vst.msk [vmem:[#allocation2] sm:$0xf] %vm1126_vm3, %v2809_v49  ;;  %v1109_v52 = vsel %vm1101_vm5, %v1097_v45, %v1105_v50  ;;  %vm1442_vm5 = vcmask 400712  }
 0x16b   : > { %v2812_v53 = vpack.c.bf16 %v1109_v52, %v1109_v52  ;;  %v1107_v54 = vsel %vm1099_vm6, %v1095_v48, %v1103_v51  ;;  %vm1492_vm6 = vcmask 482712  }
 0x16c   : > { %v2810_v55 = vpack.c.bf16 %v1107_v54, %v1107_v54 }
 0x16d   : > { %1130 = vst.msk [vmem:[#allocation2 + $0xc] sm:$0xf] %vm1126_vm3, %v2812_v53 }
 0x16e   : > { %1128 = vst.msk [vmem:[#allocation2 + $0x4] sm:$0xf] %vm1126_vm3, %v2810_v55  ;;  %vm1342_vm3 = vcmask 236712  }
 0x16f   : > { %v1249_v56 = vld [vmem:[#allocation2 + $0x8] sm:$0xf] }
 0x170   : > { %1259 = vrot.lane.b32.xlu0 %v1249_v56, %s3137_s18  ;;  %v1299_v57 = vld [vmem:[#allocation2 + $0x8] sm:$0xf] }
 0x171   : > { %v1349_v59 = vld [vmem:[#allocation2 + $0x8] sm:$0xf]  ;;  %v1247_v10 = vld [vmem:[#allocation2] sm:$0xf] }
 0x172   : > { %v1399_v61 = vld [vmem:[#allocation2 + $0x8] sm:$0xf]  ;;  %v1297_v12 = vld [vmem:[#allocation2] sm:$0xf] }
 0x173   : > { %v1449_v0 = vld [vmem:[#allocation2 + $0x8] sm:$0xf]  ;;  %v1347_v14 = vld [vmem:[#allocation2] sm:$0xf] }
 0x174   : > { %1309 = vrot.lane.b32.xlu0 %v1299_v57, %s3138_s19  ;;  %v1250_v58 = vld [vmem:[#allocation2 + $0xc] sm:$0xf]  ;;  %v1499_v2 = vld [vmem:[#allocation2 + $0x8] sm:$0xf]  ;;  %v1397_v16 = vld [vmem:[#allocation2] sm:$0xf] }
 0x175   : > { %1261 = vrot.lane.b32.xlu1 %v1250_v58, %s3137_s18  ;;  %v1300_v60 = vld [vmem:[#allocation2 + $0xc] sm:$0xf]  ;;  %v1549_v6 = vld [vmem:[#allocation2 + $0x8] sm:$0xf]  ;;  %v1248_v13 = vld [vmem:[#allocation2 + $0x4] sm:$0xf] }
 0x176   : > { %v1350_v62 = vld [vmem:[#allocation2 + $0xc] sm:$0xf]  ;;  %v1599_v8 = vld [vmem:[#allocation2 + $0x8] sm:$0xf]  ;;  %v1298_v15 = vld [vmem:[#allocation2 + $0x4] sm:$0xf] }
 0x177   : > { %v1400_v1 = vld [vmem:[#allocation2 + $0xc] sm:$0xf]  ;;  %v1348_v17 = vld [vmem:[#allocation2 + $0x4] sm:$0xf]  ;;  %v1447_v18 = vld [vmem:[#allocation2] sm:$0xf] }
 0x178   : > { %1359 = vrot.lane.b32.xlu0 %v1349_v59, %s3139_s20  ;;  %v1450_v3 = vld [vmem:[#allocation2 + $0xc] sm:$0xf]  ;;  %v1398_v19 = vld [vmem:[#allocation2 + $0x4] sm:$0xf]  ;;  %v1497_v20 = vld [vmem:[#allocation2] sm:$0xf] }
 0x179   : > { %1311 = vrot.lane.b32.xlu1 %v1300_v60, %s3138_s19  ;;  %v1500_v7 = vld [vmem:[#allocation2 + $0xc] sm:$0xf]  ;;  %v1448_v21 = vld [vmem:[#allocation2 + $0x4] sm:$0xf]  ;;  %v1547_v22 = vld [vmem:[#allocation2] sm:$0xf] }
 0x17a   : > { %v1550_v9 = vld [vmem:[#allocation2 + $0xc] sm:$0xf]  ;;  %v1498_v23 = vld [vmem:[#allocation2 + $0x4] sm:$0xf]  ;;  %v1597_v24 = vld [vmem:[#allocation2] sm:$0xf] }
 0x17b   : > { %v1600_v11 = vld [vmem:[#allocation2 + $0xc] sm:$0xf]  ;;  %v1548_v25 = vld [vmem:[#allocation2 + $0x4] sm:$0xf] }
 0x17c   : > { %1409 = vrot.lane.b32.xlu0 %v1399_v61, %s3140_s21  ;;  %v1598_v26 = vld [vmem:[#allocation2 + $0x4] sm:$0xf] }
 0x17d   : > { %1361 = vrot.lane.b32.xlu1 %v1350_v62, %s3139_s20 }
 0x180   : > { %1459 = vrot.lane.b32.xlu0 %v1449_v0, %s3141_s24 }
 0x181   : > { %1411 = vrot.lane.b32.xlu1 %v1400_v1, %s3140_s21 }
 0x184   : > { %1509 = vrot.lane.b32.xlu0 %v1499_v2, %s3142_s25 }
 0x185   : > { %1461 = vrot.lane.b32.xlu1 %v1450_v3, %s3141_s24  ;;  %v3100_v3 = vld [vmem:[%s3607_s4 + $0x8] sm:$0xff]  }
 0x188   : > { %1559 = vrot.lane.b32.xlu0 %v1549_v6, %s3143_s29  ;;  %v2370_v6 = vld [vmem:[%s3608_s5 + $0x8] sm:$0xff] }
 0x189   : > { %1511 = vrot.lane.b32.xlu1 %v1500_v7, %s3142_s25  ;;  %v1137_v7 = vld [vmem:[%s3612_s9] sm:$0xff] }
 0x18c   : > { %1609 = vrot.lane.b32.xlu0 %v1599_v8, %s3144_s30  ;;  %v1139_v8 = vld [vmem:[%s3612_s9 + $0x10] sm:$0xff] }
 0x18d   : > { %1561 = vrot.lane.b32.xlu1 %v1550_v9, %s3143_s29  ;;  %v2371_v9 = vld [vmem:[%s3608_s5 + $0x10] sm:$0xff] }
 0x190   : > { %1255 = vrot.lane.b32.xlu0 %v1247_v10, %s3137_s18  ;;  %v2415_v10 = vld [vmem:[%s3610_s7] sm:$0xff] }
 0x191   : > { %1611 = vrot.lane.b32.xlu1 %v1600_v11, %s3144_s30  ;;  %v2369_v11 = vld [vmem:[%s3608_s5] sm:$0xff] }
 0x194   : > { %1305 = vrot.lane.b32.xlu0 %v1297_v12, %s3138_s19  ;;  %v2417_v12 = vld [vmem:[%s3610_s7 + $0x10] sm:$0xff] }
 0x195   : > { %1257 = vrot.lane.b32.xlu1 %v1248_v13, %s3137_s18  ;;  %v1138_v13 = vld [vmem:[%s3612_s9 + $0x8] sm:$0xff] }
 0x198   : > { %1355 = vrot.lane.b32.xlu0 %v1347_v14, %s3139_s20  ;;  %v1140_v14 = vld [vmem:[%s3612_s9 + $0x18] sm:$0xff] }
 0x199   : > { %1307 = vrot.lane.b32.xlu1 %v1298_v15, %s3138_s19  ;;  %v2416_v15 = vld [vmem:[%s3610_s7 + $0x8] sm:$0xff] }
 0x19c   : > { %1405 = vrot.lane.b32.xlu0 %v1397_v16, %s3140_s21  ;;  %v2418_v16 = vld [vmem:[%s3610_s7 + $0x18] sm:$0xff] }
 0x19d   : > { %1357 = vrot.lane.b32.xlu1 %v1348_v17, %s3139_s20 }
 0x1a0   : > { %1455 = vrot.lane.b32.xlu0 %v1447_v18, %s3141_s24 }
 0x1a1   : > { %1407 = vrot.lane.b32.xlu1 %v1398_v19, %s3140_s21 }
 0x1a4   : > { %1505 = vrot.lane.b32.xlu0 %v1497_v20, %s3142_s25  ;;  %v3151_v20 = vmov 0.0  }
 0x1a5   : > { %1457 = vrot.lane.b32.xlu1 %v1448_v21, %s3141_s24  ;;  %1243 = vst.msk [vmem:[#allocation5] sm:$0xff] %vm1242_vm0, %v3151_v20  ;;  %1244 = vst.msk [vmem:[#allocation5 + $0x8] sm:$0xff] %vm1242_vm0, %v3151_v20 }
 0x1a6   : > { %1245 = vst.msk [vmem:[#allocation5 + $0x10] sm:$0xff] %vm1242_vm0, %v3151_v20  ;;  %1246 = vst.msk [vmem:[#allocation5 + $0x18] sm:$0xff] %vm1242_vm0, %v3151_v20 }
 0x1a8   : > { %1555 = vrot.lane.b32.xlu0 %v1547_v22, %s3143_s29 }
 0x1a9   : > { %1507 = vrot.lane.b32.xlu1 %v1498_v23, %s3142_s25  ;;  %s3146_s25 = smov 116   ;;  %v3102_v23 = vld [vmem:[%s3607_s4 + $0x18] sm:$0xff]  }
 0x1ac   : > { %1605 = vrot.lane.b32.xlu0 %v1597_v24, %s3144_s30  ;;  %v3104_v24 = vld [vmem:[%s3607_s4 + $0x38] sm:$0xff]  }
 0x1ad   : > { %1557 = vrot.lane.b32.xlu1 %v1548_v25, %s3143_s29  ;;  %s3156_s29 = smov 15  }
 0x1b1   : > { %1607 = vrot.lane.b32.xlu1 %v1598_v26, %s3144_s30  ;;  %s3150_s30 = smov 106  }
 0x1e2   : > { %v1260_v27 = vpop.permute.xlu0 %1259 }
 0x1e3   : > { %1270 = vst.msk [vmem:[#allocation4 + $0x8] sm:$0xf] %vm1267_vm7, %v1260_v27  ;;  %v3105_v27 = vld [vmem:[%s3607_s4 + $0x20] sm:$0xff]  }
 0x1e6   : > { %v1310_v28 = vpop.permute.xlu0 %1309 }
 0x1e7   : > { %1320 = vst.msk [vmem:[#allocation4 + $0x8] sm:$0xf] %vm1317_vm8, %v1310_v28  ;;  %v1262_v29 = vpop.permute.xlu1 %1261  ;;  %v3107_v28 = vld [vmem:[%s3607_s4 + $0x50] sm:$0xff]  }
 0x1e8   : > { %1271 = vst.msk [vmem:[#allocation4 + $0xc] sm:$0xf] %vm1267_vm7, %v1262_v29 }
 0x1ea   : > { %v1360_v30 = vpop.permute.xlu0 %1359 }
 0x1eb   : > { %1370 = vst.msk [vmem:[#allocation4 + $0x8] sm:$0xf] %vm1367_vm9, %v1360_v30  ;;  %v1312_v31 = vpop.permute.xlu1 %1311 }
 0x1ec   : > { %1321 = vst.msk [vmem:[#allocation4 + $0xc] sm:$0xf] %vm1317_vm8, %v1312_v31  ;;  %v3106_v31 = vld [vmem:[%s3607_s4 + $0x28] sm:$0xff]  }
 0x1ee   : > { %v1410_v32 = vpop.permute.xlu0 %1409 }
 0x1ef   : > { %1420 = vst.msk [vmem:[#allocation4 + $0x8] sm:$0xf] %vm1417_vm10, %v1410_v32  ;;  %v1362_v33 = vpop.permute.xlu1 %1361  ;;  %v3108_v32 = vld [vmem:[%s3607_s4 + $0x58] sm:$0xff]  }
 0x1f0   : > { %1371 = vst.msk [vmem:[#allocation4 + $0xc] sm:$0xf] %vm1367_vm9, %v1362_v33 }
 0x1f2   : > { %v1460_v34 = vpop.permute.xlu0 %1459 }
 0x1f3   : > { %1470 = vst.msk [vmem:[#allocation4 + $0x8] sm:$0xf] %vm1467_vm11, %v1460_v34  ;;  %v1412_v35 = vpop.permute.xlu1 %1411 }
 0x1f4   : > { %1421 = vst.msk [vmem:[#allocation4 + $0xc] sm:$0xf] %vm1417_vm10, %v1412_v35  ;;  %v3109_v35 = vld [vmem:[%s3607_s4 + $0x40] sm:$0xff]  }
 0x1f6   : > { %v1510_v36 = vpop.permute.xlu0 %1509 }
 0x1f7   : > { %1520 = vst.msk [vmem:[#allocation4 + $0x8] sm:$0xf] %vm1517_vm12, %v1510_v36  ;;  %v1462_v37 = vpop.permute.xlu1 %1461  ;;  %v3113_v36 = vld [vmem:[%s3607_s4 + $0x70] sm:$0xff]  }
 0x1f8   : > { %1471 = vst.msk [vmem:[#allocation4 + $0xc] sm:$0xf] %vm1467_vm11, %v1462_v37 }
 0x1fa   : > { %v1560_v38 = vpop.permute.xlu0 %1559 }
 0x1fb   : > { %1570 = vst.msk [vmem:[#allocation4 + $0x8] sm:$0xf] %vm1567_vm13, %v1560_v38  ;;  %v1512_v39 = vpop.permute.xlu1 %1511 }
 0x1fc   : > { %1521 = vst.msk [vmem:[#allocation4 + $0xc] sm:$0xf] %vm1517_vm12, %v1512_v39  ;;  %v3110_v39 = vld [vmem:[%s3607_s4 + $0x48] sm:$0xff]  }
 0x1fe   : > { %v1610_v40 = vpop.permute.xlu0 %1609 }
 0x1ff   : > { %1620 = vst.msk [vmem:[#allocation4 + $0x8] sm:$0xf] %vm1617_vm14, %v1610_v40  ;;  %v1562_v41 = vpop.permute.xlu1 %1561  ;;  %v3111_v40 = vld [vmem:[%s3607_s4 + $0x60] sm:$0xff]  }
 0x200   : > { %1571 = vst.msk [vmem:[#allocation4 + $0xc] sm:$0xf] %vm1567_vm13, %v1562_v41  ;;  %v3114_v41 = vld [vmem:[%s3607_s4 + $0x78] sm:$0xff]  }
 0x202   : > { %v1256_v42 = vpop.permute.xlu0 %1255 }
 0x203   : > { %v1612_v43 = vpop.permute.xlu1 %1611  ;;  %1268 = vst.msk [vmem:[#allocation4] sm:$0xf] %vm1267_vm7, %v1256_v42 }
 0x204   : > { %1621 = vst.msk [vmem:[#allocation4 + $0xc] sm:$0xf] %vm1617_vm14, %v1612_v43 }
 0x206   : > { %v1306_v44 = vpop.permute.xlu0 %1305  ;;  %v1653_v48 = vld [vmem:[#allocation4 + $0x8] sm:$0xf] }
 0x207   : > { %v1258_v45 = vpop.permute.xlu1 %1257  ;;  %1318 = vst.msk [vmem:[#allocation4] sm:$0xf] %vm1317_vm8, %v1306_v44  ;;  %v3112_v44 = vld [vmem:[%s3607_s4 + $0x68] sm:$0xff]  }
 0x208   : > { %1269 = vst.msk [vmem:[#allocation4 + $0x4] sm:$0xf] %vm1267_vm7, %v1258_v45  ;;  %v3115_v45 = vld [vmem:[%s3607_s4 + $0x80] sm:$0xff]   ;;  %vm1542_vm7 = vcmask 564712  }
 0x20a   : > { %v1356_v47 = vpop.permute.xlu0 %1355 }
 0x20b   : > { %v1654_v49 = vld [vmem:[#allocation4 + $0xc] sm:$0xf]  ;;  %v1308_v50 = vpop.permute.xlu1 %1307  ;;  %1368 = vst.msk [vmem:[#allocation4] sm:$0xf] %vm1367_vm9, %v1356_v47 }
 0x20c   : > { %v2733_v51 = vcombine.low %v1653_v48, %v1654_v49  ;;  %1319 = vst.msk [vmem:[#allocation4 + $0x4] sm:$0xf] %vm1317_vm8, %v1308_v50  ;;  %v3116_v50 = vld [vmem:[%s3607_s4 + $0x88] sm:$0xff]   ;;  %vm1592_vm8 = vcmask 646712  }
 0x20e   : > { %2959 = vmatprep.subr.bf16.mxu1 %v2733_v51  ;;  %1682 = vrot.lane.b32.xlu0 %v2733_v51, %s3133_s23  ;;  %v1406_v52 = vpop.permute.xlu0 %1405 }
 0x20f   : > { %2960 = vmatpush3.bf16.msra.mxu1 %v2733_v51  ;;  %v1358_v53 = vpop.permute.xlu1 %1357  ;;  %1418 = vst.msk [vmem:[#allocation4] sm:$0xf] %vm1417_vm10, %v1406_v52 }
 0x210   : > { %1369 = vst.msk [vmem:[#allocation4 + $0x4] sm:$0xf] %vm1367_vm9, %v1358_v53  ;;  %vm1642_vm9 = vcmask 728712  }
 0x212   : > { %1826 = vrot.lane.b32.xlu0 %v2733_v51, %s3145_s16  ;;  %v1456_v54 = vpop.permute.xlu0 %1455 }
 0x213   : > { %v1408_v55 = vpop.permute.xlu1 %1407  ;;  %1468 = vst.msk [vmem:[#allocation4] sm:$0xf] %vm1467_vm11, %v1456_v54 }
 0x214   : > { %1419 = vst.msk [vmem:[#allocation4 + $0x4] sm:$0xf] %vm1417_vm10, %v1408_v55  ;;  %vm2568_vm10 = vcmask 814080  }
 0x216   : > { %1906 = vrot.lane.b32.xlu0 %v2733_v51, %s3135_s15  ;;  %v1506_v56 = vpop.permute.xlu0 %1505 }
 0x217   : > { %v1458_v57 = vpop.permute.xlu1 %1457  ;;  %1518 = vst.msk [vmem:[#allocation4] sm:$0xf] %vm1517_vm12, %v1506_v56 }
 0x218   : > { %1469 = vst.msk [vmem:[#allocation4 + $0x4] sm:$0xf] %vm1467_vm11, %v1458_v57 }
 0x21a   : > { %v1556_v58 = vpop.permute.xlu0 %1555  ;;  %v2949_v48 = vpop.f32.mrf.mxu1 }
 0x21b   : > { %v1508_v59 = vpop.permute.xlu1 %1507  ;;  %1568 = vst.msk [vmem:[#allocation4] sm:$0xf] %vm1567_vm13, %v1556_v58 }
 0x21c   : > { %1519 = vst.msk [vmem:[#allocation4 + $0x4] sm:$0xf] %vm1517_vm12, %v1508_v59 }
 0x21e   : > { %v1606_v60 = vpop.permute.xlu0 %1605 }
 0x21f   : > { %v1558_v61 = vpop.permute.xlu1 %1557  ;;  %1618 = vst.msk [vmem:[#allocation4] sm:$0xf] %vm1617_vm14, %v1606_v60 }
 0x220   : > { %1569 = vst.msk [vmem:[#allocation4 + $0x4] sm:$0xf] %vm1567_vm13, %v1558_v61 }
 0x223   : > { %v1608_v62 = vpop.permute.xlu1 %1607 }
 0x224   : > { %1619 = vst.msk [vmem:[#allocation4 + $0x4] sm:$0xf] %vm1617_vm14, %v1608_v62 }
 0x226   : > { %v1651_v0 = vld [vmem:[#allocation4] sm:$0xf] }
 0x22b   : > { %v1652_v1 = vld [vmem:[#allocation4 + $0x4] sm:$0xf] }
 0x22c   : > { %v2732_v2 = vcombine.low %v1651_v0, %v1652_v1 }
 0x22e   : > { %1904 = vrot.lane.b32.xlu0 %v2732_v2, %s3135_s15  ;;  %1680 = vrot.lane.b32.xlu1 %v2732_v2, %s3133_s23  ;;  %s3147_s23 = smov 117   ;;  %s3148_s15 = smov 107  }
 0x22f   : > { %2961 = vmatprep.subr.bf16.mxu1 %v2732_v2 }
 0x230   : > { %2962 = vmatpush3.bf16.msra.mxu1 %v2732_v2 }
 0x232   : > { %2066 = vrot.lane.b32.xlu0 %v2733_v51, %s3146_s25  ;;  %1824 = vrot.lane.b32.xlu1 %v2732_v2, %s3145_s16 }
 0x233   : > { %2964 = vmatmul.mubr.msk.bf16.vlgmr.msra.gmra.mxu1 %vm1686_vm15, %v3100_v3 }
 0x234   : > { %2979 = vmatprep.mubr.msk.bf16.mxu1 %vm1686_vm15, %v3103_v4  ;;  %v2407_v4 = vld [vmem:[%s3609_s6] sm:$0xff] }
 0x236   : > { %2064 = vrot.lane.b32.xlu0 %v2732_v2, %s3146_s25  ;;  %1986 = vrot.lane.b32.xlu1 %v2733_v51, %s3147_s23 }
 0x23a   : > { %2226 = vrot.lane.b32.xlu0 %v2733_v51, %s3148_s15  ;;  %1984 = vrot.lane.b32.xlu1 %v2732_v2, %s3147_s23 }
 0x23e   : > { %2224 = vrot.lane.b32.xlu0 %v2732_v2, %s3148_s15  ;;  %2146 = vrot.lane.b32.xlu1 %v2733_v51, %s3149_s26 }
 0x242   : > { %2390 = vperm.xlu0 %3073, %v2372_v5   ;;  %2144 = vrot.lane.b32.xlu1 %v2732_v2, %s3149_s26  ;;  %s3152_s26 = smov 11  }
 0x246   : > { %2380 = vperm.xlu0 %3073, %v2370_v6   ;;  %2306 = vrot.lane.b32.xlu1 %v2733_v51, %s3150_s30  ;;  %v1217_v51 = vpop.f32.mrf.mxu1 }
 0x248   : > { %v2950_v57 = vpop.f32.mrf.mxu1 }
 0x24a   : > { %1143 = vperm.xlu0 %3073, %v1137_v7   ;;  %2304 = vrot.lane.b32.xlu1 %v2732_v2, %s3150_s30  ;;  %v1220_v60 = vpop.f32.mrf.mxu1  ;;  %s3157_s30 = smov 16  }
 0x24e   : > { %1153 = vperm.xlu0 %3073, %v1139_v8   ;;  %2385 = vperm.xlu1 %3072, %v2371_v9  }
 0x252   : > { %2421 = vperm.xlu0 %3073, %v2415_v10   ;;  %2375 = vperm.xlu1 %3072, %v2369_v11  }
 0x256   : > { %2431 = vperm.xlu0 %3073, %v2417_v12   ;;  %1148 = vperm.xlu1 %3072, %v1138_v13  }
 0x25a   : > { %1158 = vperm.xlu1 %3072, %v1140_v14  }
 0x25e   : > { %2426 = vperm.xlu1 %3072, %v2416_v15  }
 0x262   : > { %2436 = vperm.xlu1 %3072, %v2418_v16  }
 0x280   : > { %v1683_v17 = vpop.permute.xlu0 %1682 }
 0x281   : > { %2951 = vmatprep.subr.bf16.mxu0 %v1683_v17 }
 0x282   : > { %2952 = vmatpush3.bf16.msra.mxu0 %v1683_v17 }
 0x284   : > { %v1827_v18 = vpop.permute.xlu0 %1826 }
 0x288   : > { %v1907_v19 = vpop.permute.xlu0 %1906 }
 0x289   : > { %2975 = vmatprep.subr.bf16.mxu1 %v1907_v19 }
 0x28a   : > { %2976 = vmatpush3.bf16.msra.mxu1 %v1907_v19 }
 0x2a0   : > { %v1681_v21 = vpop.permute.xlu1 %1680  ;;  %v1905_v22 = vpop.permute.xlu0 %1904 }
 0x2a1   : > { %2953 = vmatprep.subr.bf16.mxu0 %v1681_v21  ;;  %2977 = vmatprep.subr.bf16.mxu1 %v1905_v22 }
 0x2a2   : > { %2954 = vmatpush3.bf16.msra.mxu0 %v1681_v21  ;;  %2978 = vmatpush3.bf16.msra.mxu1 %v1905_v22 }
 0x2a3   : > { %2967 = vmatprep.subr.bf16.mxu0 %v1827_v18 }
 0x2a4   : > { %v1825_v25 = vpop.permute.xlu1 %1824  ;;  %v2067_v26 = vpop.permute.xlu0 %2066 }
 0x2a5   : > { %2956 = vmatmul.mubr.msk.bf16.vlgmr.msra.gmra.mxu0 %vm1686_vm15, %v3102_v23  ;;  %2991 = vmatprep.subr.bf16.mxu1 %v2067_v26 }
 0x2a6   : > { %2968 = vmatpush3.bf16.msra.mxu0 %v1827_v18  ;;  %2980 = vmatmul.mubr.msk.bf16.vlgmr.msra.gmra.mxu1 %vm1686_vm15, %v3104_v24 }
 0x2a7   : > { %2992 = vmatpush3.bf16.msra.mxu1 %v2067_v26  ;;  %2969 = vmatprep.subr.bf16.mxu0 %v1825_v25 }
 0x2a8   : > { %v1987_v29 = vpop.permute.xlu1 %1986  ;;  %v2065_v30 = vpop.permute.xlu0 %2064  ;;  %2971 = vmatprep.mubr.msk.bf16.mxu0 %vm1686_vm15, %v3105_v27  ;;  %2995 = vmatprep.mubr.msk.bf16.mxu1 %vm1686_vm15, %v3107_v28 }
 0x2a9   : > { %2993 = vmatprep.subr.bf16.mxu1 %v2065_v30 }
 0x2aa   : > { %2970 = vmatpush3.bf16.msra.mxu0 %v1825_v25 }
 0x2ab   : > { %2994 = vmatpush3.bf16.msra.mxu1 %v2065_v30  ;;  %2983 = vmatprep.subr.bf16.mxu0 %v1987_v29 }
 0x2ac   : > { %v1985_v33 = vpop.permute.xlu1 %1984  ;;  %v2227_v34 = vpop.permute.xlu0 %2226 }
 0x2ad   : > { %2972 = vmatmul.mubr.msk.bf16.vlgmr.msra.gmra.mxu0 %vm1686_vm15, %v3106_v31  ;;  %3007 = vmatprep.subr.bf16.mxu1 %v2227_v34 }
 0x2ae   : > { %2984 = vmatpush3.bf16.msra.mxu0 %v1987_v29  ;;  %2996 = vmatmul.mubr.msk.bf16.vlgmr.msra.gmra.mxu1 %vm1686_vm15, %v3108_v32 }
 0x2af   : > { %3008 = vmatpush3.bf16.msra.mxu1 %v2227_v34  ;;  %2985 = vmatprep.subr.bf16.mxu0 %v1985_v33 }
 0x2b0   : > { %v2147_v37 = vpop.permute.xlu1 %2146  ;;  %v2225_v38 = vpop.permute.xlu0 %2224  ;;  %2987 = vmatprep.mubr.msk.bf16.mxu0 %vm1686_vm15, %v3109_v35  ;;  %3011 = vmatprep.mubr.msk.bf16.mxu1 %vm1686_vm15, %v3113_v36 }
 0x2b1   : > { %3009 = vmatprep.subr.bf16.mxu1 %v2225_v38 }
 0x2b2   : > { %2986 = vmatpush3.bf16.msra.mxu0 %v1985_v33 }
 0x2b3   : > { %3010 = vmatpush3.bf16.msra.mxu1 %v2225_v38  ;;  %2999 = vmatprep.subr.bf16.mxu0 %v2147_v37 }
 0x2b4   : > { %v2145_v42 = vpop.permute.xlu1 %2144 }
 0x2b5   : > { %2988 = vmatmul.mubr.msk.bf16.vlgmr.msra.gmra.mxu0 %vm1686_vm15, %v3110_v39 }
 0x2b6   : > { %3000 = vmatpush3.bf16.msra.mxu0 %v2147_v37  ;;  %3003 = vmatprep.mubr.msk.bf16.mxu0 %vm1686_vm15, %v3111_v40 }
 0x2b7   : > { %3001 = vmatprep.subr.bf16.mxu0 %v2145_v42  ;;  %3012 = vmatmul.mubr.msk.bf16.vlgmr.msra.gmra.mxu1 %vm1686_vm15, %v3114_v41 }
 0x2b8   : > { %v2307_v43 = vpop.permute.xlu1 %2306  ;;  %3031 = vmatprep.mubr.msk.f32.mxu1 %vm1686_vm15, %v2407_v4 }
 0x2ba   : > { %3002 = vmatpush3.bf16.msra.mxu0 %v2145_v42 }
 0x2bb   : > { %3015 = vmatprep.subr.bf16.mxu0 %v2307_v43 }
 0x2bc   : > { %v2305_v47 = vpop.permute.xlu1 %2304 }
 0x2bd   : > { %3004 = vmatmul.mubr.msk.bf16.vlgmr.msra.gmra.mxu0 %vm1686_vm15, %v3112_v44  ;;  %v3508_v46 = vpop.permute.xlu0 %2390 }
 0x2be   : > { %3016 = vmatpush3.bf16.msra.mxu0 %v2307_v43  ;;  %3019 = vmatprep.mubr.msk.bf16.mxu0 %vm1686_vm15, %v3115_v45 }
 0x2bf   : > { %3017 = vmatprep.subr.bf16.mxu0 %v2305_v47 }
 0x2c1   : > { %v3511_v49 = vpop.permute.xlu0 %2380 }
 0x2c2   : > { %3018 = vmatpush3.bf16.msra.mxu0 %v2305_v47 }
 0x2c5   : > { %3020 = vmatmul.mubr.msk.bf16.vlgmr.msra.gmra.mxu0 %vm1686_vm15, %v3116_v50  ;;  %v1144_v52 = vpop.permute.xlu0 %1143 }
 0x2c6   : > { %v1218_v53 = vadd.f32 %v1217_v51, %v1144_v52 }
 0x2c8   : > { %1233 = vst.msk [vmem:[#allocation3] sm:$0xff] %vm1232_vm1, %v1218_v53 }
 0x2c9   : > { %v3518_v54 = vpop.permute.xlu1 %2385  ;;  %v1154_v55 = vpop.permute.xlu0 %1153 }
 0x2ca   : > { %v1226_v56 = vadd.f32 %v2949_v48, %v1154_v55 }
 0x2cc   : > { %1235 = vst.msk [vmem:[#allocation3 + $0x10] sm:$0xff] %vm1232_vm1, %v1226_v56 }
 0x2cd   : > { %v3521_v58 = vpop.permute.xlu1 %2375  ;;  %v3529_v5 = vpop.permute.xlu0 %2421 }
 0x2cf   : > { %v1272_v59 = vld [vmem:[#allocation3] sm:$0xff] }
 0x2d0   : > { %1280 = vrot.lane.b32.xlu0 %v1272_v59, %s3152_s26 }
 0x2d1   : > { %v1149_v61 = vpop.permute.xlu1 %1148  ;;  %v3531_v6 = vpop.permute.xlu0 %2431 }
 0x2d2   : > { %v1221_v62 = vadd.f32 %v1220_v60, %v1149_v61 }
 0x2d3   : > { %v1274_v63 = vld [vmem:[#allocation3 + $0x10] sm:$0xff] }
 0x2d4   : > { %1234 = vst.msk [vmem:[#allocation3 + $0x8] sm:$0xff] %vm1232_vm1, %v1221_v62  ;;  %1284 = vrot.lane.b32.xlu0 %v1274_v63, %s3152_s26 }
 0x2d5   : > { %v1159_v0 = vpop.permute.xlu1 %1158 }
 0x2d6   : > { %v1229_v1 = vadd.f32 %v2950_v57, %v1159_v0 }
 0x2d8   : > { %1236 = vst.msk [vmem:[#allocation3 + $0x18] sm:$0xff] %vm1232_vm1, %v1229_v1  ;;  %1330 = vrot.lane.b32.xlu0 %v1272_v59, %s3153_s22 }
 0x2d9   : > { %v3534_v8 = vpop.permute.xlu1 %2426 }
 0x2db   : > { %v1273_v2 = vld [vmem:[#allocation3 + $0x8] sm:$0xff] }
 0x2dc   : > { %1282 = vrot.lane.b32.xlu1 %v1273_v2, %s3152_s26  ;;  %1334 = vrot.lane.b32.xlu0 %v1274_v63, %s3153_s22 }
 0x2dd   : > { %v3537_v10 = vpop.permute.xlu1 %2436 }
 0x2df   : > { %v1275_v3 = vld [vmem:[#allocation3 + $0x18] sm:$0xff] }
 0x2e0   : > { %1286 = vrot.lane.b32.xlu1 %v1275_v3, %s3152_s26  ;;  %1380 = vrot.lane.b32.xlu0 %v1272_v59, %s3154_s27  ;;  %s2808_s26 = sshll.u32 %s3615_s14, 4 }
 0x2e4   : > { %1332 = vrot.lane.b32.xlu1 %v1273_v2, %s3153_s22  ;;  %1384 = vrot.lane.b32.xlu0 %v1274_v63, %s3154_s27 }
 0x2e8   : > { %1336 = vrot.lane.b32.xlu1 %v1275_v3, %s3153_s22  ;;  %1430 = vrot.lane.b32.xlu0 %v1272_v59, %s3155_s28 }
 0x2ec   : > { %1382 = vrot.lane.b32.xlu1 %v1273_v2, %s3154_s27  ;;  %1434 = vrot.lane.b32.xlu0 %v1274_v63, %s3155_s28 }
 0x2f0   : > { %1386 = vrot.lane.b32.xlu1 %v1275_v3, %s3154_s27  ;;  %1480 = vrot.lane.b32.xlu0 %v1272_v59, %s3156_s29 }
 0x2f3   : > { %v2965_v18 = vpop.f32.mrf.mxu1 }
 0x2f4   : > { %1432 = vrot.lane.b32.xlu1 %v1273_v2, %s3155_s28  ;;  %1484 = vrot.lane.b32.xlu0 %v1274_v63, %s3156_s29 }
 0x2f5   : > { %v1794_v21 = vpop.f32.mrf.mxu1 }
 0x2f7   : > { %v2966_v24 = vpop.f32.mrf.mxu1 }
 0x2f8   : > { %1436 = vrot.lane.b32.xlu1 %v1275_v3, %s3155_s28  ;;  %1530 = vrot.lane.b32.xlu0 %v1272_v59, %s3157_s30  ;;  %s359_s28 = scalar_lea.vmem %s3613_s10, %s2808_s26 }
 0x2f9   : > { %v1797_v27 = vpop.f32.mrf.mxu1 }
 0x2fc   : > { %1482 = vrot.lane.b32.xlu1 %v1273_v2, %s3156_s29  ;;  %1534 = vrot.lane.b32.xlu0 %v1274_v63, %s3157_s30 }
 0x300   : > { %1486 = vrot.lane.b32.xlu1 %v1275_v3, %s3156_s29  ;;  %1580 = vrot.lane.b32.xlu0 %v1272_v59, %s3158_s11 }
 0x304   : > { %1532 = vrot.lane.b32.xlu1 %v1273_v2, %s3157_s30  ;;  %1584 = vrot.lane.b32.xlu0 %v1274_v63, %s3158_s11 }
 0x308   : > { %1536 = vrot.lane.b32.xlu1 %v1275_v3, %s3157_s30  ;;  %1630 = vrot.lane.b32.xlu0 %v1272_v59, %s3159_s12 }
 0x30c   : > { %1582 = vrot.lane.b32.xlu1 %v1273_v2, %s3158_s11  ;;  %1634 = vrot.lane.b32.xlu0 %v1274_v63, %s3159_s12 }
 0x310   : > { %1586 = vrot.lane.b32.xlu1 %v1275_v3, %s3158_s11 }
 0x314   : > { %1632 = vrot.lane.b32.xlu1 %v1273_v2, %s3159_s12 }
 0x318   : > { %1636 = vrot.lane.b32.xlu1 %v1275_v3, %s3159_s12 }
 0x342   : > { %v1281_v7 = vpop.permute.xlu0 %1280 }
 0x343   : > { %1293 = vst.msk [vmem:[#allocation5] sm:$0xff] %vm1292_vm2, %v1281_v7 }
 0x346   : > { %v1285_v9 = vpop.permute.xlu0 %1284 }
 0x347   : > { %1295 = vst.msk [vmem:[#allocation5 + $0x10] sm:$0xff] %vm1292_vm2, %v1285_v9 }
 0x34a   : > { %v1331_v11 = vpop.permute.xlu0 %1330 }
 0x34b   : > { %1343 = vst.msk [vmem:[#allocation5] sm:$0xff] %vm1342_vm3, %v1331_v11 }
 0x34e   : > { %v1283_v12 = vpop.permute.xlu1 %1282  ;;  %v1335_v13 = vpop.permute.xlu0 %1334 }
 0x34f   : > { %1294 = vst.msk [vmem:[#allocation5 + $0x8] sm:$0xff] %vm1292_vm2, %v1283_v12 }
 0x350   : > { %1345 = vst.msk [vmem:[#allocation5 + $0x10] sm:$0xff] %vm1342_vm3, %v1335_v13 }
 0x352   : > { %v1287_v14 = vpop.permute.xlu1 %1286  ;;  %v1381_v15 = vpop.permute.xlu0 %1380 }
 0x353   : > { %1296 = vst.msk [vmem:[#allocation5 + $0x18] sm:$0xff] %vm1292_vm2, %v1287_v14 }
 0x354   : > { %1393 = vst.msk [vmem:[#allocation5] sm:$0xff] %vm1392_vm4, %v1381_v15 }
 0x356   : > { %v1333_v16 = vpop.permute.xlu1 %1332  ;;  %v1385_v17 = vpop.permute.xlu0 %1384 }
 0x357   : > { %1344 = vst.msk [vmem:[#allocation5 + $0x8] sm:$0xff] %vm1342_vm3, %v1333_v16 }
 0x358   : > { %1395 = vst.msk [vmem:[#allocation5 + $0x10] sm:$0xff] %vm1392_vm4, %v1385_v17 }
 0x35a   : > { %v1337_v19 = vpop.permute.xlu1 %1336  ;;  %v1431_v20 = vpop.permute.xlu0 %1430 }
 0x35b   : > { %1346 = vst.msk [vmem:[#allocation5 + $0x18] sm:$0xff] %vm1342_vm3, %v1337_v19 }
 0x35c   : > { %1443 = vst.msk [vmem:[#allocation5] sm:$0xff] %vm1442_vm5, %v1431_v20 }
 0x35e   : > { %v1383_v22 = vpop.permute.xlu1 %1382  ;;  %v1435_v23 = vpop.permute.xlu0 %1434 }
 0x35f   : > { %1394 = vst.msk [vmem:[#allocation5 + $0x8] sm:$0xff] %vm1392_vm4, %v1383_v22 }
 0x360   : > { %1445 = vst.msk [vmem:[#allocation5 + $0x10] sm:$0xff] %vm1442_vm5, %v1435_v23 }
 0x362   : > { %v1387_v25 = vpop.permute.xlu1 %1386  ;;  %v1481_v26 = vpop.permute.xlu0 %1480 }
 0x363   : > { %1396 = vst.msk [vmem:[#allocation5 + $0x18] sm:$0xff] %vm1392_vm4, %v1387_v25 }
 0x364   : > { %1493 = vst.msk [vmem:[#allocation5] sm:$0xff] %vm1492_vm6, %v1481_v26 }
 0x365   : > { %v2957_v28 = vpop.f32.mrf.mxu0 }
 0x366   : > { %v1433_v29 = vpop.permute.xlu1 %1432  ;;  %v1485_v30 = vpop.permute.xlu0 %1484  ;;  %v1803_v48 = vadd.f32 %v2965_v18, %v2957_v28 }
 0x367   : > { %1444 = vst.msk [vmem:[#allocation5 + $0x8] sm:$0xff] %vm1442_vm5, %v1433_v29  ;;  %v1727_v31 = vpop.f32.mrf.mxu0  ;;  %v2981_v32 = vpop.f32.mrf.mxu1 }
 0x368   : > { %1495 = vst.msk [vmem:[#allocation5 + $0x10] sm:$0xff] %vm1492_vm6, %v1485_v30  ;;  %v1795_v57 = vadd.f32 %v1794_v21, %v1727_v31 }
 0x369   : > { %v2958_v33 = vpop.f32.mrf.mxu0  ;;  %v1950_v34 = vpop.f32.mrf.mxu1 }
 0x36a   : > { %v1437_v35 = vpop.permute.xlu1 %1436  ;;  %v1531_v36 = vpop.permute.xlu0 %1530  ;;  %v1806_v59 = vadd.f32 %v2966_v24, %v2958_v33 }
 0x36b   : > { %1446 = vst.msk [vmem:[#allocation5 + $0x18] sm:$0xff] %vm1442_vm5, %v1437_v35  ;;  %v1730_v37 = vpop.f32.mrf.mxu0  ;;  %v2982_v38 = vpop.f32.mrf.mxu1 }
 0x36c   : > { %1543 = vst.msk [vmem:[#allocation5] sm:$0xff] %vm1542_vm7, %v1531_v36  ;;  %v1798_v63 = vadd.f32 %v1797_v27, %v1730_v37 }
 0x36d   : > { %v2973_v39 = vpop.f32.mrf.mxu0  ;;  %v1953_v40 = vpop.f32.mrf.mxu1 }
 0x36e   : > { %v1483_v41 = vpop.permute.xlu1 %1482  ;;  %v1535_v42 = vpop.permute.xlu0 %1534  ;;  %v1887_v53 = vadd.f32 %v2973_v39, %v1803_v48 }
 0x36f   : > { %1494 = vst.msk [vmem:[#allocation5 + $0x8] sm:$0xff] %vm1492_vm6, %v1483_v41  ;;  %v1870_v43 = vpop.f32.mrf.mxu0  ;;  %v2997_v44 = vpop.f32.mrf.mxu1 }
 0x370   : > { %1545 = vst.msk [vmem:[#allocation5 + $0x10] sm:$0xff] %vm1542_vm7, %v1535_v42  ;;  %v1885_v0 = vadd.f32 %v1870_v43, %v1795_v57  ;;  %v1967_v1 = vadd.f32 %v2981_v32, %v1887_v53 }
 0x371   : > { %v2974_v45 = vpop.f32.mrf.mxu0  ;;  %v2110_v47 = vpop.f32.mrf.mxu1 }
 0x372   : > { %v1487_v50 = vpop.permute.xlu1 %1486  ;;  %v1581_v51 = vpop.permute.xlu0 %1580  ;;  %v1888_v2 = vadd.f32 %v2974_v45, %v1806_v59  ;;  %v1965_v14 = vadd.f32 %v1950_v34, %v1885_v0 }
 0x373   : > { %1496 = vst.msk [vmem:[#allocation5 + $0x18] sm:$0xff] %vm1492_vm6, %v1487_v50  ;;  %v1873_v52 = vpop.f32.mrf.mxu0  ;;  %v2998_v56 = vpop.f32.mrf.mxu1 }
 0x374   : > { %1593 = vst.msk [vmem:[#allocation5] sm:$0xff] %vm1592_vm8, %v1581_v51  ;;  %v1886_v7 = vadd.f32 %v1873_v52, %v1798_v63  ;;  %v1968_v15 = vadd.f32 %v2982_v38, %v1888_v2 }
 0x375   : > { %v2989_v55 = vpop.f32.mrf.mxu0  ;;  %v2113_v4 = vpop.f32.mrf.mxu1 }
 0x376   : > { %v1533_v60 = vpop.permute.xlu1 %1532  ;;  %v1585_v61 = vpop.permute.xlu0 %1584  ;;  %v2047_v9 = vadd.f32 %v2989_v55, %v1967_v1  ;;  %v1966_v18 = vadd.f32 %v1953_v40, %v1886_v7  ;;  %v2796_v55 = vld [vmem:[%s3604_s1] ss:$0 sm:$0xff] }
 0x377   : > { %1544 = vst.msk [vmem:[#allocation5 + $0x8] sm:$0xff] %vm1542_vm7, %v1533_v60  ;;  %v2030_v62 = vpop.f32.mrf.mxu0  ;;  %v3013_v17 = vpop.f32.mrf.mxu1 }
 0x378   : > { %1595 = vst.msk [vmem:[#allocation5 + $0x10] sm:$0xff] %vm1592_vm8, %v1585_v61  ;;  %v2045_v19 = vadd.f32 %v2030_v62, %v1965_v14  ;;  %v2127_v20 = vadd.f32 %v2997_v44, %v2047_v9 }
 0x379   : > { %v2990_v3 = vpop.f32.mrf.mxu0  ;;  %v2270_v28 = vpop.f32.mrf.mxu1 }
 0x37a   : > { %v1537_v11 = vpop.permute.xlu1 %1536  ;;  %v1631_v12 = vpop.permute.xlu0 %1630  ;;  %v2048_v21 = vadd.f32 %v2990_v3, %v1968_v15  ;;  %v2125_v29 = vadd.f32 %v2110_v47, %v2045_v19 }
 0x37b   : > { %1546 = vst.msk [vmem:[#allocation5 + $0x18] sm:$0xff] %vm1542_vm7, %v1537_v11  ;;  %v2033_v13 = vpop.f32.mrf.mxu0  ;;  %v3014_v37 = vpop.f32.mrf.mxu1 }
 0x37c   : > { %1643 = vst.msk [vmem:[#allocation5] sm:$0xff] %vm1642_vm9, %v1631_v12  ;;  %v2046_v25 = vadd.f32 %v2033_v13, %v1966_v18  ;;  %v2128_v30 = vadd.f32 %v2998_v56, %v2048_v21 }
 0x37d   : > { %v3005_v16 = vpop.f32.mrf.mxu0  ;;  %v2273_v45 = vpop.f32.mrf.mxu1 }
 0x37e   : > { %v1583_v22 = vpop.permute.xlu1 %1582  ;;  %v1635_v23 = vpop.permute.xlu0 %1634  ;;  %v2207_v26 = vadd.f32 %v3005_v16, %v2127_v20  ;;  %v2126_v33 = vadd.f32 %v2113_v4, %v2046_v25 }
 0x37f   : > { %1594 = vst.msk [vmem:[#allocation5 + $0x8] sm:$0xff] %vm1592_vm8, %v1583_v22  ;;  %v2190_v24 = vpop.f32.mrf.mxu0 }
 0x380   : > { %1645 = vst.msk [vmem:[#allocation5 + $0x10] sm:$0xff] %vm1642_vm9, %v1635_v23  ;;  %v2205_v34 = vadd.f32 %v2190_v24, %v2125_v29  ;;  %v2287_v35 = vadd.f32 %v3013_v17, %v2207_v26 }
 0x381   : > { %v3006_v27 = vpop.f32.mrf.mxu0 }
 0x382   : > { %v1587_v31 = vpop.permute.xlu1 %1586  ;;  %v2208_v36 = vadd.f32 %v3006_v27, %v2128_v30  ;;  %v2285_v43 = vadd.f32 %v2270_v28, %v2205_v34 }
 0x383   : > { %1596 = vst.msk [vmem:[#allocation5 + $0x18] sm:$0xff] %vm1592_vm8, %v1587_v31  ;;  %v2193_v32 = vpop.f32.mrf.mxu0 }
 0x384   : > { %v2206_v39 = vadd.f32 %v2193_v32, %v2126_v33  ;;  %v2288_v44 = vadd.f32 %v3014_v37, %v2208_v36 }
 0x385   : > { %v3021_v38 = vpop.f32.mrf.mxu0 }
 0x386   : > { %v2367_v40 = vadd.f32 %v3021_v38, %v2287_v35  ;;  %v1633_v41 = vpop.permute.xlu1 %1632  ;;  %v2286_v48 = vadd.f32 %v2273_v45, %v2206_v39 }
 0x387   : > { %1644 = vst.msk [vmem:[#allocation5 + $0x8] sm:$0xff] %vm1642_vm9, %v1633_v41  ;;  %v2350_v42 = vpop.f32.mrf.mxu0  ;;  %v2546_v29 = vld [vmem:[#allocation5 + $0x10] sm:$0xff] }
 0x388   : > { %v2395_v50 = vadd.f32 %v3518_v54, %v2367_v40  ;;  %v2365_v51 = vadd.f32 %v2350_v42, %v2285_v43 }
 0x389   : > { %v3022_v47 = vpop.f32.mrf.mxu0 }
 0x38a   : > { %v2368_v52 = vadd.f32 %v3022_v47, %v2288_v44  ;;  %v1637_v53 = vpop.permute.xlu1 %1636  ;;  %v2405_v60 = vmul.f32 %v2796_v55, %v2395_v50  ;;  %v2393_v61 = vadd.f32 %v3521_v58, %v2365_v51  ;;  %v2410_v58 = vld [vmem:[%s3609_s6 + $0x18] sm:$0xff] }
 0x38b   : > { %1646 = vst.msk [vmem:[#allocation5 + $0x18] sm:$0xff] %vm1642_vm9, %v1637_v53  ;;  %v2353_v56 = vpop.f32.mrf.mxu0 }
 0x38c   : > { %v2396_v57 = vadd.f32 %v3508_v46, %v2368_v52  ;;  %v2366_v59 = vadd.f32 %v2353_v56, %v2286_v48  ;;  %v2403_v1 = vmul.f32 %v2796_v55, %v2393_v61  ;;  %v2413_v2 = vmul.f32 %v2405_v60, %v2405_v60  ;;  %v2408_v46 = vld [vmem:[%s3609_s6 + $0x8] sm:$0xff] }
 0x38e   : > { %v2406_v62 = vmul.f32 %v2796_v55, %v2396_v57  ;;  %v2394_v63 = vadd.f32 %v3511_v49, %v2366_v59  ;;  %v2411_v4 = vmul.f32 %v2403_v1, %v2403_v1  ;;  %v2409_v49 = vld [vmem:[%s3609_s6 + $0x10] sm:$0xff]  ;;  %v2545_v20 = vld [vmem:[#allocation5 + $0x8] sm:$0xff] }
 0x390   : > { %v2404_v54 = vmul.f32 %v2796_v55, %v2394_v63  ;;  %v2414_v0 = vmul.f32 %v2406_v62, %v2406_v62 }
 0x392   : > { %3023 = vmatprep.subr.mxu1 %v2414_v0  ;;  %v2412_v3 = vmul.f32 %v2404_v54, %v2404_v54 }
 0x393   : > { %3024 = vmatpush3.msra.mxu1 %v2414_v0 }
 0x394   : > { %3025 = vmatprep.subr.mxu1 %v2413_v2 }
 0x395   : > { %3026 = vmatpush3.msra.mxu1 %v2413_v2 }
 0x396   : > { %3027 = vmatprep.subr.mxu1 %v2412_v3 }
 0x397   : > { %3028 = vmatpush3.msra.mxu1 %v2412_v3 }
 0x398   : > { %3029 = vmatprep.subr.mxu1 %v2411_v4 }
 0x399   : > { %3030 = vmatpush3.msra.mxu1 %v2411_v4 }
 0x39a   : > { %3032 = vmatmul.mubr.msk.f32.vlgmr.msra.gmra.mxu1 %vm1686_vm15, %v2408_v46 }
 0x39b   : > { %3034 = vmatprep.mubr.msk.f32.mxu1 %vm1686_vm15, %v2409_v49 }
 0x39e   : > { %3035 = vmatmul.mubr.msk.f32.gmra.mxu1 %vm1686_vm15, %v2410_v58 }
 0x45a   : > { %v3033_v7 = vpop.f32.mrf.mxu1 }
 0x45b   : > { %v2523_v9 = vadd.f32 %v3033_v7, %v3534_v8 }
 0x45c   : > { %v2517_v11 = vpop.f32.mrf.mxu1 }
 0x45d   : > { %3117 = vrsqrt.f32 %v2523_v9  ;;  %v2518_v12 = vadd.f32 %v2517_v11, %v3529_v5  ;;  %v2544_v5 = vld [vmem:[#allocation5] sm:$0xff] }
 0x45e   : > { %v3036_v13 = vpop.f32.mrf.mxu1 }
 0x45f   : > { %3119 = vrsqrt.f32 %v2518_v12  ;;  %v2533_v14 = vadd.f32 %v3036_v13, %v3537_v10 }
 0x460   : > { %v2527_v15 = vpop.f32.mrf.mxu1 }
 0x461   : > { %3121 = vrsqrt.f32 %v2533_v14  ;;  %v2528_v16 = vadd.f32 %v2527_v15, %v3531_v6  ;;  %v2547_v6 = vld [vmem:[#allocation5 + $0x18] sm:$0xff] }
 0x463   : > { %3123 = vrsqrt.f32 %v2528_v16 }
 0x46a   : > { %v3118_v17 = vpop.eup %3117 }
 0x46b   : > { %v2541_v18 = vmul.f32 %v3118_v17, %v2404_v54 }
 0x46c   : > { %v3120_v19 = vpop.eup %3119 }
 0x46d   : > { %v2549_v21 = vadd.f32 %v2545_v20, %v2541_v18  ;;  %v2540_v8 = vmul.f32 %v3120_v19, %v2403_v1 }
 0x46e   : > { %v3122_v22 = vpop.eup %3121 }
 0x46f   : > { %v2814_v10 = vpack.c.bf16 %v2549_v21, %v2549_v21  ;;  %v2548_v23 = vadd.f32 %v2544_v5, %v2540_v8  ;;  %v2543_v24 = vmul.f32 %v3122_v22, %v2406_v62 }
 0x470   : > { %v3124_v25 = vpop.eup %3123 }
 0x471   : > { %2570 = vst.msk [vmem:[%s359_s28 + $0x4] sm:$0xf] %vm2568_vm10, %v2814_v10  ;;  %v2813_v26 = vpack.c.bf16 %v2548_v23, %v2548_v23  ;;  %v2551_v27 = vadd.f32 %v2547_v6, %v2543_v24  ;;  %v2542_v28 = vmul.f32 %v3124_v25, %v2405_v60 }
 0x473   : > { %2569 = vst.msk [vmem:[%s359_s28] sm:$0xf] %vm2568_vm10, %v2813_v26  ;;  %v2816_v30 = vpack.c.bf16 %v2551_v27, %v2551_v27  ;;  %v2550_v31 = vadd.f32 %v2546_v29, %v2542_v28 }
 0x475   : > { %2572 = vst.msk [vmem:[%s359_s28 + $0xc] sm:$0xf] %vm2568_vm10, %v2816_v30  ;;  %v2815_v32 = vpack.c.bf16 %v2550_v31, %v2550_v31 }
 0x477   : > { %2571 = vst.msk [vmem:[%s359_s28 + $0x8] sm:$0xf] %vm2568_vm10, %v2815_v32 }
 0x478 PF: > { %s20_s13 = sadd.s32 1, %s3131_s13  }
 0x479   : > { %p17_p4 = scmp.ge.s32.totalorder %s20_s13, 4  }
 0x47b   :  { %19 = sbr.rel (!%p17_p4) target bundleno = 1 (0x1), region = 109 }

// kernel: analysis_transform.12
= control target key start
LH: loop header
LB: loop body
LE: loop exit
PB: predicated region body
PF: predicated region fallthrough
CT: control target
= control target key end

     0   :  { %s2434_s21 = smov 0   ;;  %s2707_s0 = inlined_call_operand.vmem [shape: bf16[2,32,16], index: 0, kind: input, shape index: {}]   ;;  %s2708_s1 = inlined_call_operand.vmem [shape: f32[1,16], index: 1, kind: input, shape index: {}]   ;;  %s2709_s2 = inlined_call_operand.vmem [shape: bf16[9,32,32], index: 2, kind: input, shape index: {}]   ;;  %s2710_s3 = inlined_call_operand.vmem [shape: f32[32,1], index: 3, kind: input, shape index: {}]   ;;  %s2711_s4 = inlined_call_operand.vmem [shape: bf16[9,32,32], index: 4, kind: input, shape index: {}]   ;;  %s2712_s5 = inlined_call_operand.vmem [shape: f32[32,1], index: 5, kind: input, shape index: {}]   ;;  %s2713_s6 = inlined_call_operand.vmem [shape: bf16[2,32,16], index: 6, kind: output, shape index: {}]  }
   0x1 LB: > { %s1937_s22 = sadd.s32 4294967295, %s2387_s21   ;;  %p1941_p0 = scmp.ge.s32.totalorder %s2387_s21, 1  ;;  %s2387_s21 = sphi %s2434_s21, %s16_s21  }
   0x2   : > { %p212_p1 = scmp.lt.s32.totalorder %s2387_s21, 3 }
   0x4   : > { %p213_p2 = pnand %p1941_p0, %p212_p1 }
   0x5   : > { %p242_p3 = scmp.lt.s32.totalorder (!%p213_p2), %s1937_s22, 1  ;;  %s2390_s27 = smov (!%p213_p2), 5  }
   0x6   : > { %216 = sbr.rel (%p213_p2) target bundleno = 1002 (0x3ea), region = 44  ;;  %s2391_s8 = smov (!%p213_p2), 127  }
   0x7   : > { %s2392_s9 = smov (!%p213_p2), 126   ;;  %s2393_s14 = smov (!%p213_p2), 124  }
   0x8   : > { %s2394_s15 = smov (!%p213_p2), 123   ;;  %s2395_s16 = smov (!%p213_p2), 122  }
   0x9   : > { %s2396_s17 = smov (!%p213_p2), 120   ;;  %s2397_s18 = smov (!%p213_p2), 119  }
   0xa   : > { %s2398_s19 = smov (!%p213_p2), 118  }
   0xb   : > { %vm258_vm0 = vcmask 207872   ;;  %v2389_v0 = vmov 0   ;;  %s2715_s22 = smov (!%p242_p3, %s1937_s22), 1  ;;  %vm279_vm1 = vcmask 166952   ;;  %v2343_v9 = vld [vmem:[%s2709_s2 + $0x10] sm:$0xff]   ;;  %vm323_vm2 = vcmask 261120  }
   0xc   : > { %261 = vst.msk [vmem:[#allocation2 + $0x8] sm:$0xf] %vm258_vm0, %v2389_v0  ;;  %259 = vst.msk [vmem:[#allocation2] sm:$0xf] %vm258_vm0, %v2389_v0  ;;  %2342 = vset.pattern.permute.xlu1 %v2389_v0  ;;  %2341 = vset.pattern.permute.xlu0 %v2389_v0  ;;  %s2097_s23 = sshll.u32 %s2715_s22, 4  ;;  %v2344_v10 = vld [vmem:[%s2709_s2] sm:$0xff]  }
   0xd   : > { %260 = vst.msk [vmem:[#allocation2 + $0x4] sm:$0xf] %vm258_vm0, %v2389_v0  ;;  %262 = vst.msk [vmem:[#allocation2 + $0xc] sm:$0xf] %vm258_vm0, %v2389_v0  ;;  %s2450_s26 = scalar_lea.vmem %s2707_s0, %s2097_s23  ;;  %2183 = vmatprep.mubr.msk.bf16.mxu0 %vm323_vm2, %v2343_v9  ;;  %2191 = vmatprep.mubr.msk.bf16.mxu1 %vm323_vm2, %v2344_v10  ;;  %v2346_v17 = vld [vmem:[%s2709_s2 + $0x8] sm:$0xff]   ;;  %v2348_v18 = vld [vmem:[%s2709_s2 + $0x30] sm:$0xff]   ;;  %s251_s13 = scalar_lea.vmem %s2713_s6, %s2097_s23 }
   0xe   : > { %1056 = vst.msk [vmem:[#allocation3] sm:$0xf] %vm258_vm0, %v2389_v0  ;;  %1057 = vst.msk [vmem:[#allocation3 + $0x4] sm:$0xf] %vm258_vm0, %v2389_v0  ;;  %v2453_v1 = vld [vmem:[%s2450_s26 + $0x8] sm:$0xf] }
   0xf   : > { %1058 = vst.msk [vmem:[#allocation3 + $0x8] sm:$0xf] %vm258_vm0, %v2389_v0  ;;  %1059 = vst.msk [vmem:[#allocation3 + $0xc] sm:$0xf] %vm258_vm0, %v2389_v0  ;;  %v2456_v2 = vld [vmem:[%s2450_s26] sm:$0xf]  ;;  %271 = vrot.lane.b32.xlu0 %v2453_v1, %s2390_s27 }
  0x10   : > { %v256_v3 = vld [vmem:[%s2450_s26 + $0xc] sm:$0xf]  ;;  %267 = vrot.lane.b32.xlu1 %v2456_v2, %s2390_s27  ;;  %v254_v4 = vld [vmem:[%s2450_s26 + $0x4] sm:$0xf]  ;;  %v1008_v19 = vld [vmem:[%s2710_s3 + $0x10] sm:$0xff]  ;;  %vm1877_vm10 = vcmask 125952  }
  0x11   : > { %v1009_v20 = vld [vmem:[%s2710_s3 + $0x18] sm:$0xff]  ;;  %v1007_v21 = vld [vmem:[%s2710_s3 + $0x8] sm:$0xff]  ;;  %v1006_v22 = vld [vmem:[%s2710_s3] sm:$0xff] }
  0x12   : > { %v2345_v27 = vld [vmem:[%s2709_s2 + $0x18] sm:$0xff]   ;;  %v2347_v28 = vld [vmem:[%s2709_s2 + $0x20] sm:$0xff]   ;;  %v2349_v33 = vld [vmem:[%s2709_s2 + $0x28] sm:$0xff]  }
  0x13   : > { %273 = vrot.lane.b32.xlu0 %v256_v3, %s2390_s27  ;;  %v2350_v34 = vld [vmem:[%s2709_s2 + $0x38] sm:$0xff]   ;;  %v2351_v36 = vld [vmem:[%s2709_s2 + $0x40] sm:$0xff]   ;;  %v2352_v37 = vld [vmem:[%s2709_s2 + $0x50] sm:$0xff]  }
  0x14   : > { %269 = vrot.lane.b32.xlu1 %v254_v4, %s2390_s27  ;;  %v2353_v40 = vld [vmem:[%s2709_s2 + $0x48] sm:$0xff]   ;;  %v2354_v42 = vld [vmem:[%s2709_s2 + $0x58] sm:$0xff]   ;;  %v2355_v44 = vld [vmem:[%s2709_s2 + $0x60] sm:$0xff]  }
  0x15   : > { %v2356_v45 = vld [vmem:[%s2709_s2 + $0x70] sm:$0xff]   ;;  %v2357_v48 = vld [vmem:[%s2709_s2 + $0x68] sm:$0xff]   ;;  %v2358_v49 = vld [vmem:[%s2709_s2 + $0x78] sm:$0xff]  }
  0x16   : > { %v2359_v50 = vld [vmem:[%s2709_s2 + $0x80] sm:$0xff]   ;;  %v2360_v52 = vld [vmem:[%s2709_s2 + $0x88] sm:$0xff]  }
  0x81   : > { %v272_v5 = vpop.permute.xlu0 %271 }
  0x82   : > { %v268_v6 = vpop.permute.xlu1 %267  ;;  %282 = vst.msk [vmem:[#allocation2 + $0x8] sm:$0xf] %vm279_vm1, %v272_v5 }
  0x83   : > { %280 = vst.msk [vmem:[#allocation2] sm:$0xf] %vm279_vm1, %v268_v6 }
  0x85   : > { %v274_v7 = vpop.permute.xlu0 %273 }
  0x86   : > { %v270_v8 = vpop.permute.xlu1 %269  ;;  %283 = vst.msk [vmem:[#allocation2 + $0xc] sm:$0xf] %vm279_vm1, %v274_v7 }
  0x87   : > { %281 = vst.msk [vmem:[#allocation2 + $0x4] sm:$0xf] %vm279_vm1, %v270_v8 }
  0x89   : > { %v290_v12 = vld [vmem:[#allocation2 + $0x8] sm:$0xf] }
  0x8a   : > { %v288_v11 = vld [vmem:[#allocation2] sm:$0xf] }
  0x8d   : > { %v291_v13 = vld [vmem:[#allocation2 + $0xc] sm:$0xf] }
  0x8e   : > { %v289_v14 = vld [vmem:[#allocation2 + $0x4] sm:$0xf]  ;;  %v1953_v15 = vcombine.low %v290_v12, %v291_v13 }
  0x8f   : > { %v1952_v16 = vcombine.low %v288_v11, %v289_v14 }
  0x90   : > { %319 = vrot.lane.b32.xlu0 %v1953_v15, %s2391_s8  ;;  %2187 = vmatprep.subr.bf16.mxu1 %v1953_v15 }
  0x91   : > { %317 = vrot.lane.b32.xlu1 %v1952_v16, %s2391_s8  ;;  %2188 = vmatpush3.bf16.msra.mxu1 %v1953_v15 }
  0x92   : > { %2189 = vmatprep.subr.bf16.mxu1 %v1952_v16 }
  0x94   : > { %463 = vrot.lane.b32.xlu0 %v1953_v15, %s2392_s9 }
  0x95   : > { %461 = vrot.lane.b32.xlu1 %v1952_v16, %s2392_s9  ;;  %2190 = vmatpush3.bf16.msra.mxu1 %v1952_v16 }
  0x98   : > { %543 = vrot.lane.b32.xlu0 %v1953_v15, %s2393_s14  ;;  %2192 = vmatmul.mubr.msk.bf16.vlgmr.msra.gmra.mxu1 %vm323_vm2, %v2346_v17 }
  0x99   : > { %623 = vrot.lane.b32.xlu1 %v1953_v15, %s2394_s15  ;;  %2207 = vmatprep.mubr.msk.bf16.mxu1 %vm323_vm2, %v2348_v18 }
  0x9c   : > { %541 = vrot.lane.b32.xlu0 %v1952_v16, %s2393_s14 }
  0x9d   : > { %621 = vrot.lane.b32.xlu1 %v1952_v16, %s2394_s15 }
  0xa0   : > { %703 = vrot.lane.b32.xlu0 %v1953_v15, %s2395_s16 }
  0xa1   : > { %783 = vrot.lane.b32.xlu1 %v1953_v15, %s2396_s17 }
  0xa4   : > { %701 = vrot.lane.b32.xlu0 %v1952_v16, %s2395_s16 }
  0xa5   : > { %781 = vrot.lane.b32.xlu1 %v1952_v16, %s2396_s17 }
  0xa8   : > { %863 = vrot.lane.b32.xlu0 %v1953_v15, %s2397_s18 }
  0xa9   : > { %943 = vrot.lane.b32.xlu1 %v1953_v15, %s2398_s19 }
  0xac   : > { %861 = vrot.lane.b32.xlu0 %v1952_v16, %s2397_s18 }
  0xad   : > { %941 = vrot.lane.b32.xlu1 %v1952_v16, %s2398_s19 }
  0xb0   : > { %1022 = vperm.xlu0 %2341, %v1008_v19  }
  0xb1   : > { %1027 = vperm.xlu1 %2342, %v1009_v20  }
  0xb4   : > { %1017 = vperm.xlu0 %2341, %v1007_v21  }
  0xb5   : > { %1012 = vperm.xlu1 %2342, %v1006_v22  }
 0x102   : > { %v320_v23 = vpop.permute.xlu0 %319 }
 0x103   : > { %v318_v24 = vpop.permute.xlu1 %317  ;;  %2179 = vmatprep.subr.bf16.mxu0 %v320_v23 }
 0x104   : > { %2180 = vmatpush3.bf16.msra.mxu0 %v320_v23 }
 0x105   : > { %2181 = vmatprep.subr.bf16.mxu0 %v318_v24 }
 0x106   : > { %v464_v25 = vpop.permute.xlu0 %463 }
 0x107   : > { %v462_v26 = vpop.permute.xlu1 %461 }
 0x108   : > { %2182 = vmatpush3.bf16.msra.mxu0 %v318_v24 }
 0x109   : > { %2195 = vmatprep.subr.bf16.mxu0 %v464_v25 }
 0x10a   : > { %v544_v29 = vpop.permute.xlu0 %543 }
 0x10b   : > { %v624_v30 = vpop.permute.xlu1 %623  ;;  %2184 = vmatmul.mubr.msk.bf16.vlgmr.msra.gmra.mxu0 %vm323_vm2, %v2345_v27  ;;  %2203 = vmatprep.subr.bf16.mxu1 %v544_v29 }
 0x10c   : > { %2196 = vmatpush3.bf16.msra.mxu0 %v464_v25  ;;  %2204 = vmatpush3.bf16.msra.mxu1 %v544_v29 }
 0x10d   : > { %2197 = vmatprep.subr.bf16.mxu0 %v462_v26  ;;  %2199 = vmatprep.mubr.msk.bf16.mxu0 %vm323_vm2, %v2347_v28 }
 0x10e   : > { %v542_v31 = vpop.permute.xlu0 %541 }
 0x10f   : > { %v622_v32 = vpop.permute.xlu1 %621  ;;  %2205 = vmatprep.subr.bf16.mxu1 %v542_v31 }
 0x110   : > { %2198 = vmatpush3.bf16.msra.mxu0 %v462_v26  ;;  %2206 = vmatpush3.bf16.msra.mxu1 %v542_v31 }
 0x111   : > { %2211 = vmatprep.subr.bf16.mxu0 %v624_v30 }
 0x112   : > { %v704_v35 = vpop.permute.xlu0 %703 }
 0x113   : > { %v784_v38 = vpop.permute.xlu1 %783  ;;  %2200 = vmatmul.mubr.msk.bf16.vlgmr.msra.gmra.mxu0 %vm323_vm2, %v2349_v33  ;;  %2208 = vmatmul.mubr.msk.bf16.vlgmr.msra.gmra.mxu1 %vm323_vm2, %v2350_v34 }
 0x114   : > { %2219 = vmatprep.subr.bf16.mxu1 %v704_v35  ;;  %2212 = vmatpush3.bf16.msra.mxu0 %v624_v30 }
 0x115   : > { %2220 = vmatpush3.bf16.msra.mxu1 %v704_v35  ;;  %2213 = vmatprep.subr.bf16.mxu0 %v622_v32 }
 0x116   : > { %v702_v39 = vpop.permute.xlu0 %701  ;;  %2215 = vmatprep.mubr.msk.bf16.mxu0 %vm323_vm2, %v2351_v36  ;;  %2223 = vmatprep.mubr.msk.bf16.mxu1 %vm323_vm2, %v2352_v37 }
 0x117   : > { %2221 = vmatprep.subr.bf16.mxu1 %v702_v39  ;;  %v782_v41 = vpop.permute.xlu1 %781 }
 0x118   : > { %2214 = vmatpush3.bf16.msra.mxu0 %v622_v32 }
 0x119   : > { %2222 = vmatpush3.bf16.msra.mxu1 %v702_v39  ;;  %2227 = vmatprep.subr.bf16.mxu0 %v784_v38 }
 0x11a   : > { %v864_v43 = vpop.permute.xlu0 %863 }
 0x11b   : > { %2216 = vmatmul.mubr.msk.bf16.vlgmr.msra.gmra.mxu0 %vm323_vm2, %v2353_v40  ;;  %2235 = vmatprep.subr.bf16.mxu1 %v864_v43  ;;  %v944_v46 = vpop.permute.xlu1 %943 }
 0x11c   : > { %2224 = vmatmul.mubr.msk.bf16.vlgmr.msra.gmra.mxu1 %vm323_vm2, %v2354_v42  ;;  %2228 = vmatpush3.bf16.msra.mxu0 %v784_v38 }
 0x11d   : > { %2236 = vmatpush3.bf16.msra.mxu1 %v864_v43  ;;  %2229 = vmatprep.subr.bf16.mxu0 %v782_v41 }
 0x11e   : > { %v862_v47 = vpop.permute.xlu0 %861  ;;  %2231 = vmatprep.mubr.msk.bf16.mxu0 %vm323_vm2, %v2355_v44  ;;  %2239 = vmatprep.mubr.msk.bf16.mxu1 %vm323_vm2, %v2356_v45 }
 0x11f   : > { %2237 = vmatprep.subr.bf16.mxu1 %v862_v47  ;;  %v942_v51 = vpop.permute.xlu1 %941 }
 0x120   : > { %2230 = vmatpush3.bf16.msra.mxu0 %v782_v41 }
 0x121   : > { %2238 = vmatpush3.bf16.msra.mxu1 %v862_v47  ;;  %2243 = vmatprep.subr.bf16.mxu0 %v944_v46 }
 0x123   : > { %2232 = vmatmul.mubr.msk.bf16.vlgmr.msra.gmra.mxu0 %vm323_vm2, %v2357_v48 }
 0x124   : > { %2240 = vmatmul.mubr.msk.bf16.vlgmr.msra.gmra.mxu1 %vm323_vm2, %v2358_v49  ;;  %2244 = vmatpush3.bf16.msra.mxu0 %v944_v46 }
 0x125   : > { %2245 = vmatprep.subr.bf16.mxu0 %v942_v51  ;;  %2247 = vmatprep.mubr.msk.bf16.mxu0 %vm323_vm2, %v2359_v50 }
 0x128   : > { %2246 = vmatpush3.bf16.msra.mxu0 %v942_v51 }
 0x12b   : > { %2248 = vmatmul.mubr.msk.bf16.vlgmr.msra.gmra.mxu0 %vm323_vm2, %v2360_v52  ;;  %v1023_v47 = vpop.permute.xlu0 %1022 }
 0x12c   : > { %v1028_v38 = vpop.permute.xlu1 %1027 }
 0x158   : > { %v2193_v53 = vpop.f32.mrf.mxu1 }
 0x15a   : > { %v431_v54 = vpop.f32.mrf.mxu1 }
 0x15c   : > { %v2194_v56 = vpop.f32.mrf.mxu1 }
 0x15e   : > { %v434_v59 = vpop.f32.mrf.mxu1 }
 0x1cb   : > { %v2185_v55 = vpop.f32.mrf.mxu0 }
 0x1cc   : > { %v440_v5 = vadd.f32 %v2193_v53, %v2185_v55  ;;  %v1013_v53 = vpop.permute.xlu1 %1012 }
 0x1cd   : > { %v364_v57 = vpop.f32.mrf.mxu0 }
 0x1ce   : > { %v432_v8 = vadd.f32 %v431_v54, %v364_v57 }
 0x1cf   : > { %v2186_v58 = vpop.f32.mrf.mxu0 }
 0x1d0   : > { %v443_v11 = vadd.f32 %v2194_v56, %v2186_v58 }
 0x1d1   : > { %v367_v60 = vpop.f32.mrf.mxu0 }
 0x1d2   : > { %v435_v18 = vadd.f32 %v434_v59, %v367_v60 }
 0x1d3   : > { %v2201_v61 = vpop.f32.mrf.mxu0  ;;  %v2209_v62 = vpop.f32.mrf.mxu1 }
 0x1d4   : > { %v524_v9 = vadd.f32 %v2201_v61, %v440_v5 }
 0x1d5   : > { %v507_v63 = vpop.f32.mrf.mxu0  ;;  %v587_v0 = vpop.f32.mrf.mxu1 }
 0x1d6   : > { %v522_v12 = vadd.f32 %v507_v63, %v432_v8  ;;  %v604_v15 = vadd.f32 %v2209_v62, %v524_v9  ;;  %v2573_v62 = vld [vmem:[%s2708_s1] ss:$0 sm:$0xff] }
 0x1d7   : > { %v2202_v3 = vpop.f32.mrf.mxu0  ;;  %v2210_v4 = vpop.f32.mrf.mxu1 }
 0x1d8   : > { %v525_v16 = vadd.f32 %v2202_v3, %v443_v11  ;;  %v602_v20 = vadd.f32 %v587_v0, %v522_v12 }
 0x1d9   : > { %v510_v6 = vpop.f32.mrf.mxu0  ;;  %v590_v7 = vpop.f32.mrf.mxu1 }
 0x1da   : > { %v523_v23 = vadd.f32 %v510_v6, %v435_v18  ;;  %v605_v25 = vadd.f32 %v2210_v4, %v525_v16 }
 0x1db   : > { %v2217_v10 = vpop.f32.mrf.mxu0 }
 0x1dc   : > { %v2225_v13 = vpop.f32.mrf.mxu1  ;;  %v684_v21 = vadd.f32 %v2217_v10, %v604_v15  ;;  %v603_v32 = vadd.f32 %v590_v7, %v523_v23  ;;  %v1018_v10 = vpop.permute.xlu0 %1017 }
 0x1dd   : > { %v667_v14 = vpop.f32.mrf.mxu0 }
 0x1de   : > { %v747_v17 = vpop.f32.mrf.mxu1  ;;  %v682_v26 = vadd.f32 %v667_v14, %v602_v20  ;;  %v764_v29 = vadd.f32 %v2225_v13, %v684_v21 }
 0x1df   : > { %v2218_v19 = vpop.f32.mrf.mxu0 }
 0x1e0   : > { %v2226_v22 = vpop.f32.mrf.mxu1  ;;  %v685_v30 = vadd.f32 %v2218_v19, %v605_v25  ;;  %v762_v34 = vadd.f32 %v747_v17, %v682_v26  ;;  %v2361_v26 = vld [vmem:[%s2711_s4 + $0x10] sm:$0xff]  }
 0x1e1   : > { %v670_v24 = vpop.f32.mrf.mxu0  ;;  %2255 = vmatprep.mubr.msk.bf16.mxu1 %vm323_vm2, %v2361_v26 }
 0x1e2   : > { %v750_v27 = vpop.f32.mrf.mxu1  ;;  %v683_v36 = vadd.f32 %v670_v24, %v603_v32  ;;  %v765_v39 = vadd.f32 %v2226_v22, %v685_v30 }
 0x1e3   : > { %v2233_v28 = vpop.f32.mrf.mxu0 }
 0x1e4   : > { %v2241_v31 = vpop.f32.mrf.mxu1  ;;  %v844_v35 = vadd.f32 %v2233_v28, %v764_v29  ;;  %v763_v45 = vadd.f32 %v750_v27, %v683_v36  ;;  %v2362_v27 = vld [vmem:[%s2711_s4] sm:$0xff]  }
 0x1e5   : > { %v827_v33 = vpop.f32.mrf.mxu0  ;;  %2263 = vmatprep.mubr.msk.bf16.mxu0 %vm323_vm2, %v2362_v27  ;;  %v1809_v36 = vld [vmem:[%s2712_s5] sm:$0xff] }
 0x1e6   : > { %v842_v40 = vadd.f32 %v827_v33, %v762_v34  ;;  %v907_v41 = vpop.f32.mrf.mxu1  ;;  %v924_v43 = vadd.f32 %v2241_v31, %v844_v35  ;;  %v2364_v34 = vld [vmem:[%s2711_s4 + $0x8] sm:$0xff]   ;;  %v2367_v35 = vld [vmem:[%s2711_s4 + $0x30] sm:$0xff]  }
 0x1e7   : > { %v2234_v37 = vpop.f32.mrf.mxu0 }
 0x1e8   : > { %v845_v44 = vadd.f32 %v2234_v37, %v765_v39  ;;  %v922_v48 = vadd.f32 %v907_v41, %v842_v40  ;;  %v2242_v49 = vpop.f32.mrf.mxu1  ;;  %v1811_v37 = vld [vmem:[%s2712_s5 + $0x10] sm:$0xff]  ;;  %v1812_v39 = vld [vmem:[%s2712_s5 + $0x18] sm:$0xff] }
 0x1e9   : > { %v830_v42 = vpop.f32.mrf.mxu0 }
 0x1ea   : > { %v843_v51 = vadd.f32 %v830_v42, %v763_v45  ;;  %v925_v54 = vadd.f32 %v2242_v49, %v845_v44  ;;  %v910_v58 = vpop.f32.mrf.mxu1  ;;  %v2365_v44 = vld [vmem:[%s2711_s4 + $0x20] sm:$0xff]   ;;  %v2366_v49 = vld [vmem:[%s2711_s4 + $0x28] sm:$0xff]  }
 0x1eb   : > { %v2249_v46 = vpop.f32.mrf.mxu0 }
 0x1ec   : > { %v1004_v50 = vadd.f32 %v2249_v46, %v924_v43  ;;  %v923_v63 = vadd.f32 %v910_v58, %v843_v51  ;;  %v2363_v43 = vld [vmem:[%s2711_s4 + $0x18] sm:$0xff]  }
 0x1ed   : > { %v987_v52 = vpop.f32.mrf.mxu0  ;;  %v2372_v58 = vld [vmem:[%s2711_s4 + $0x58] sm:$0xff]  }
 0x1ee   : > { %v1032_v55 = vadd.f32 %v1023_v47, %v1004_v50  ;;  %v1002_v56 = vadd.f32 %v987_v52, %v922_v48  ;;  %v2368_v50 = vld [vmem:[%s2711_s4 + $0x38] sm:$0xff]  }
 0x1ef   : > { %v2250_v57 = vpop.f32.mrf.mxu0 }
 0x1f0   : > { %vm1036_vm3 = vcmp.ge.f32.partialorder %v1032_v55, 0.0  ;;  %v1040_v59 = vmul.f32 0.01, %v1032_v55  ;;  %v1005_v60 = vadd.f32 %v2250_v57, %v925_v54  ;;  %v1030_v61 = vadd.f32 %v1013_v53, %v1002_v56  ;;  %v2369_v53 = vld [vmem:[%s2711_s4 + $0x40] sm:$0xff]   ;;  %v2371_v54 = vld [vmem:[%s2711_s4 + $0x50] sm:$0xff]   ;;  %v2370_v57 = vld [vmem:[%s2711_s4 + $0x48] sm:$0xff]  }
 0x1f1   : > { %v990_v0 = vpop.f32.mrf.mxu0 }
 0x1f2   : > { %v1044_v3 = vsel %vm1036_vm3, %v1032_v55, %v1040_v59  ;;  %v1033_v4 = vadd.f32 %v1028_v38, %v1005_v60  ;;  %vm1034_vm4 = vcmp.ge.f32.partialorder %v1030_v61, 0.0  ;;  %v1038_v5 = vmul.f32 0.01, %v1030_v61  ;;  %v1810_v38 = vld [vmem:[%s2712_s5 + $0x8] sm:$0xff] }
 0x1f3   : > { %v1003_v6 = vadd.f32 %v990_v0, %v923_v63  ;;  %v1054_v7 = vmul.f32 %v2573_v62, %v1044_v3  ;;  %v2375_v63 = vld [vmem:[%s2711_s4 + $0x70] sm:$0xff]  }
 0x1f4   : > { %vm1037_vm5 = vcmp.ge.f32.partialorder %v1033_v4, 0.0  ;;  %v1041_v8 = vmul.f32 0.01, %v1033_v4  ;;  %v1042_v9 = vsel %vm1034_vm4, %v1030_v61, %v1038_v5  ;;  %v2373_v61 = vld [vmem:[%s2711_s4 + $0x60] sm:$0xff]   ;;  %v2376_v5 = vld [vmem:[%s2711_s4 + $0x78] sm:$0xff]  }
 0x1f5   : > { %v1031_v11 = vadd.f32 %v1018_v10, %v1003_v6  ;;  %v2101_v12 = vpack.c.bf16 %v1054_v7, %v1054_v7  ;;  %v1052_v13 = vmul.f32 %v2573_v62, %v1042_v9  ;;  %v2377_v6 = vld [vmem:[%s2711_s4 + $0x80] sm:$0xff]  }
 0x1f6   : > { %v1045_v14 = vsel %vm1037_vm5, %v1033_v4, %v1041_v8  ;;  %v2374_v4 = vld [vmem:[%s2711_s4 + $0x68] sm:$0xff]  }
 0x1f7   : > { %vm1035_vm6 = vcmp.ge.f32.partialorder %v1031_v11, 0.0  ;;  %v1039_v15 = vmul.f32 0.01, %v1031_v11  ;;  %1076 = vrot.lane.b32.xlu1 %v2101_v12, %s2390_s27  ;;  %v1055_v16 = vmul.f32 %v2573_v62, %v1045_v14  ;;  %v2099_v18 = vpack.c.bf16 %v1052_v13, %v1052_v13  ;;  %v2378_v8 = vld [vmem:[%s2711_s4 + $0x88] sm:$0xff]  }
 0x1f9   : > { %v2102_v17 = vpack.c.bf16 %v1055_v16, %v1055_v16  ;;  %v1043_v19 = vsel %vm1035_vm6, %v1031_v11, %v1039_v15 }
 0x1fa   : > { %v1053_v20 = vmul.f32 %v2573_v62, %v1043_v19 }
 0x1fb   : > { %1078 = vrot.lane.b32.xlu0 %v2102_v17, %s2390_s27  ;;  %1072 = vrot.lane.b32.xlu1 %v2099_v18, %s2390_s27 }
 0x1fc   : > { %v2100_v21 = vpack.c.bf16 %v1053_v20, %v1053_v20 }
 0x1ff   : > { %1074 = vrot.lane.b32.xlu0 %v2100_v21, %s2390_s27 }
 0x269   : > { %v1077_v22 = vpop.permute.xlu1 %1076 }
 0x26a   : > { %1086 = vst.msk [vmem:[#allocation3 + $0x8] sm:$0xf] %vm279_vm1, %v1077_v22 }
 0x26d   : > { %v1079_v23 = vpop.permute.xlu0 %1078  ;;  %v1073_v24 = vpop.permute.xlu1 %1072 }
 0x26e   : > { %1087 = vst.msk [vmem:[#allocation3 + $0xc] sm:$0xf] %vm279_vm1, %v1079_v23  ;;  %1084 = vst.msk [vmem:[#allocation3] sm:$0xf] %vm279_vm1, %v1073_v24 }
 0x271   : > { %v1075_v25 = vpop.permute.xlu0 %1074  ;;  %v1094_v28 = vld [vmem:[#allocation3 + $0x8] sm:$0xf] }
 0x272   : > { %1085 = vst.msk [vmem:[#allocation3 + $0x4] sm:$0xf] %vm279_vm1, %v1075_v25 }
 0x275   : > { %v1095_v29 = vld [vmem:[#allocation3 + $0xc] sm:$0xf]  ;;  %v1092_v31 = vld [vmem:[#allocation3] sm:$0xf] }
 0x276   : > { %v2028_v30 = vcombine.low %v1094_v28, %v1095_v29 }
 0x278   : > { %2259 = vmatprep.subr.bf16.mxu0 %v2028_v30  ;;  %1123 = vrot.lane.b32.xlu1 %v2028_v30, %s2391_s8 }
 0x279   : > { %v1093_v32 = vld [vmem:[#allocation3 + $0x4] sm:$0xf]  ;;  %2260 = vmatpush3.bf16.msra.mxu0 %v2028_v30 }
 0x27a   : > { %v2027_v33 = vcombine.low %v1092_v31, %v1093_v32 }
 0x27c   : > { %1266 = vrot.lane.b32.xlu1 %v2028_v30, %s2392_s9  ;;  %1121 = vrot.lane.b32.xlu0 %v2027_v33, %s2391_s8 }
 0x27d   : > { %2261 = vmatprep.subr.bf16.mxu0 %v2027_v33 }
 0x27e   : > { %2262 = vmatpush3.bf16.msra.mxu0 %v2027_v33 }
 0x280   : > { %1346 = vrot.lane.b32.xlu1 %v2028_v30, %s2393_s14  ;;  %1264 = vrot.lane.b32.xlu0 %v2027_v33, %s2392_s9 }
 0x281   : > { %2264 = vmatmul.mubr.msk.bf16.vlgmr.msra.gmra.mxu0 %vm323_vm2, %v2364_v34 }
 0x282   : > { %2279 = vmatprep.mubr.msk.bf16.mxu0 %vm323_vm2, %v2367_v35 }
 0x284   : > { %1344 = vrot.lane.b32.xlu1 %v2027_v33, %s2393_s14  ;;  %1426 = vrot.lane.b32.xlu0 %v2028_v30, %s2394_s15 }
 0x288   : > { %1506 = vrot.lane.b32.xlu1 %v2028_v30, %s2395_s16  ;;  %1424 = vrot.lane.b32.xlu0 %v2027_v33, %s2394_s15 }
 0x28c   : > { %1504 = vrot.lane.b32.xlu1 %v2027_v33, %s2395_s16  ;;  %1586 = vrot.lane.b32.xlu0 %v2028_v30, %s2396_s17 }
 0x290   : > { %1666 = vrot.lane.b32.xlu1 %v2028_v30, %s2397_s18  ;;  %1584 = vrot.lane.b32.xlu0 %v2027_v33, %s2396_s17 }
 0x294   : > { %1664 = vrot.lane.b32.xlu1 %v2027_v33, %s2397_s18  ;;  %1746 = vrot.lane.b32.xlu0 %v2028_v30, %s2398_s19 }
 0x298   : > { %1815 = vperm.xlu1 %2342, %v1809_v36   ;;  %1744 = vrot.lane.b32.xlu0 %v2027_v33, %s2398_s19 }
 0x29c   : > { %1825 = vperm.xlu1 %2342, %v1811_v37   ;;  %1820 = vperm.xlu0 %2341, %v1810_v38  }
 0x2a0   : > { %1830 = vperm.xlu0 %2341, %v1812_v39  }
 0x2ea   : > { %v1124_v40 = vpop.permute.xlu1 %1123 }
 0x2eb   : > { %2251 = vmatprep.subr.bf16.mxu1 %v1124_v40 }
 0x2ec   : > { %2252 = vmatpush3.bf16.msra.mxu1 %v1124_v40 }
 0x2ee   : > { %v1122_v41 = vpop.permute.xlu0 %1121  ;;  %v1267_v42 = vpop.permute.xlu1 %1266 }
 0x2ef   : > { %2253 = vmatprep.subr.bf16.mxu1 %v1122_v41 }
 0x2f0   : > { %2254 = vmatpush3.bf16.msra.mxu1 %v1122_v41 }
 0x2f1   : > { %2267 = vmatprep.subr.bf16.mxu1 %v1267_v42 }
 0x2f2   : > { %v1265_v45 = vpop.permute.xlu0 %1264  ;;  %v1347_v46 = vpop.permute.xlu1 %1346 }
 0x2f3   : > { %2256 = vmatmul.mubr.msk.bf16.vlgmr.msra.gmra.mxu1 %vm323_vm2, %v2363_v43  ;;  %2275 = vmatprep.subr.bf16.mxu0 %v1347_v46 }
 0x2f4   : > { %2268 = vmatpush3.bf16.msra.mxu1 %v1267_v42  ;;  %2276 = vmatpush3.bf16.msra.mxu0 %v1347_v46 }
 0x2f5   : > { %2269 = vmatprep.subr.bf16.mxu1 %v1265_v45  ;;  %2271 = vmatprep.mubr.msk.bf16.mxu1 %vm323_vm2, %v2365_v44 }
 0x2f6   : > { %v1427_v47 = vpop.permute.xlu0 %1426  ;;  %v1345_v48 = vpop.permute.xlu1 %1344 }
 0x2f7   : > { %2277 = vmatprep.subr.bf16.mxu0 %v1345_v48 }
 0x2f8   : > { %2270 = vmatpush3.bf16.msra.mxu1 %v1265_v45  ;;  %2278 = vmatpush3.bf16.msra.mxu0 %v1345_v48 }
 0x2f9   : > { %2283 = vmatprep.subr.bf16.mxu1 %v1427_v47 }
 0x2fa   : > { %v1425_v51 = vpop.permute.xlu0 %1424  ;;  %v1507_v52 = vpop.permute.xlu1 %1506 }
 0x2fb   : > { %2272 = vmatmul.mubr.msk.bf16.vlgmr.msra.gmra.mxu1 %vm323_vm2, %v2366_v49  ;;  %2291 = vmatprep.subr.bf16.mxu0 %v1507_v52 }
 0x2fc   : > { %2280 = vmatmul.mubr.msk.bf16.vlgmr.msra.gmra.mxu0 %vm323_vm2, %v2368_v50  ;;  %2284 = vmatpush3.bf16.msra.mxu1 %v1427_v47 }
 0x2fd   : > { %2292 = vmatpush3.bf16.msra.mxu0 %v1507_v52  ;;  %2285 = vmatprep.subr.bf16.mxu1 %v1425_v51 }
 0x2fe   : > { %v1587_v55 = vpop.permute.xlu0 %1586  ;;  %v1505_v56 = vpop.permute.xlu1 %1504  ;;  %2287 = vmatprep.mubr.msk.bf16.mxu1 %vm323_vm2, %v2369_v53  ;;  %2295 = vmatprep.mubr.msk.bf16.mxu0 %vm323_vm2, %v2371_v54 }
 0x2ff   : > { %2293 = vmatprep.subr.bf16.mxu0 %v1505_v56 }
 0x300   : > { %2286 = vmatpush3.bf16.msra.mxu1 %v1425_v51 }
 0x301   : > { %2294 = vmatpush3.bf16.msra.mxu0 %v1505_v56  ;;  %2299 = vmatprep.subr.bf16.mxu1 %v1587_v55 }
 0x302   : > { %v1585_v59 = vpop.permute.xlu0 %1584  ;;  %v1667_v60 = vpop.permute.xlu1 %1666 }
 0x303   : > { %2288 = vmatmul.mubr.msk.bf16.vlgmr.msra.gmra.mxu1 %vm323_vm2, %v2370_v57  ;;  %2307 = vmatprep.subr.bf16.mxu0 %v1667_v60 }
 0x304   : > { %2296 = vmatmul.mubr.msk.bf16.vlgmr.msra.gmra.mxu0 %vm323_vm2, %v2372_v58  ;;  %2300 = vmatpush3.bf16.msra.mxu1 %v1587_v55 }
 0x305   : > { %2308 = vmatpush3.bf16.msra.mxu0 %v1667_v60  ;;  %2301 = vmatprep.subr.bf16.mxu1 %v1585_v59 }
 0x306   : > { %v1747_v0 = vpop.permute.xlu0 %1746  ;;  %v1665_v3 = vpop.permute.xlu1 %1664  ;;  %2303 = vmatprep.mubr.msk.bf16.mxu1 %vm323_vm2, %v2373_v61  ;;  %2311 = vmatprep.mubr.msk.bf16.mxu0 %vm323_vm2, %v2375_v63 }
 0x307   : > { %2309 = vmatprep.subr.bf16.mxu0 %v1665_v3 }
 0x308   : > { %2302 = vmatpush3.bf16.msra.mxu1 %v1585_v59 }
 0x309   : > { %2310 = vmatpush3.bf16.msra.mxu0 %v1665_v3  ;;  %2315 = vmatprep.subr.bf16.mxu1 %v1747_v0 }
 0x30a   : > { %v1745_v7 = vpop.permute.xlu0 %1744 }
 0x30b   : > { %2304 = vmatmul.mubr.msk.bf16.vlgmr.msra.gmra.mxu1 %vm323_vm2, %v2374_v4 }
 0x30c   : > { %2312 = vmatmul.mubr.msk.bf16.vlgmr.msra.gmra.mxu0 %vm323_vm2, %v2376_v5  ;;  %2316 = vmatpush3.bf16.msra.mxu1 %v1747_v0 }
 0x30d   : > { %2317 = vmatprep.subr.bf16.mxu1 %v1745_v7  ;;  %2319 = vmatprep.mubr.msk.bf16.mxu1 %vm323_vm2, %v2377_v6 }
 0x310   : > { %2318 = vmatpush3.bf16.msra.mxu1 %v1745_v7 }
 0x313   : > { %2320 = vmatmul.mubr.msk.bf16.vlgmr.msra.gmra.mxu1 %vm323_vm2, %v2378_v8  ;;  %v1816_v54 = vpop.permute.xlu1 %1815 }
 0x317   : > { %v1821_v0 = vpop.permute.xlu0 %1820  ;;  %v1826_v8 = vpop.permute.xlu1 %1825 }
 0x341   : > { %v2265_v9 = vpop.f32.mrf.mxu0 }
 0x343   : > { %v1234_v10 = vpop.f32.mrf.mxu0 }
 0x345   : > { %v2266_v12 = vpop.f32.mrf.mxu0 }
 0x347   : > { %v1237_v15 = vpop.f32.mrf.mxu0 }
 0x3b3   : > { %v2257_v11 = vpop.f32.mrf.mxu1 }
 0x3b4   : > { %v1243_v22 = vadd.f32 %v2265_v9, %v2257_v11 }
 0x3b5   : > { %v1167_v13 = vpop.f32.mrf.mxu1 }
 0x3b6   : > { %v1235_v25 = vadd.f32 %v1234_v10, %v1167_v13 }
 0x3b7   : > { %v2258_v14 = vpop.f32.mrf.mxu1 }
 0x3b8   : > { %v1246_v29 = vadd.f32 %v2266_v12, %v2258_v14 }
 0x3b9   : > { %v1170_v16 = vpop.f32.mrf.mxu1 }
 0x3ba   : > { %v1238_v36 = vadd.f32 %v1237_v15, %v1170_v16 }
 0x3bb   : > { %v2273_v17 = vpop.f32.mrf.mxu1 }
 0x3bc   : > { %v2281_v18 = vpop.f32.mrf.mxu0  ;;  %v1327_v26 = vadd.f32 %v2273_v17, %v1243_v22 }
 0x3bd   : > { %v1310_v19 = vpop.f32.mrf.mxu1 }
 0x3be   : > { %v1390_v20 = vpop.f32.mrf.mxu0  ;;  %v1325_v30 = vadd.f32 %v1310_v19, %v1235_v25  ;;  %v1407_v33 = vadd.f32 %v2281_v18, %v1327_v26  ;;  %v1855_v19 = vunpack.c.l.bf16 %v2453_v1  ;;  %v1853_v26 = vunpack.c.l.bf16 %v2456_v2 }
 0x3bf   : > { %v2274_v21 = vpop.f32.mrf.mxu1 }
 0x3c0   : > { %v2282_v23 = vpop.f32.mrf.mxu0  ;;  %v1328_v34 = vadd.f32 %v2274_v21, %v1246_v29  ;;  %v1405_v38 = vadd.f32 %v1390_v20, %v1325_v30  ;;  %v1831_v20 = vpop.permute.xlu0 %1830 }
 0x3c1   : > { %v1313_v24 = vpop.f32.mrf.mxu1 }
 0x3c2   : > { %v1393_v27 = vpop.f32.mrf.mxu0  ;;  %v1326_v41 = vadd.f32 %v1313_v24, %v1238_v36  ;;  %v1408_v43 = vadd.f32 %v2282_v23, %v1328_v34 }
 0x3c3   : > { %v2289_v28 = vpop.f32.mrf.mxu1 }
 0x3c4   : > { %v2297_v31 = vpop.f32.mrf.mxu0  ;;  %v1487_v39 = vadd.f32 %v2289_v28, %v1407_v33  ;;  %v1406_v50 = vadd.f32 %v1393_v27, %v1326_v41 }
 0x3c5   : > { %v1470_v32 = vpop.f32.mrf.mxu1 }
 0x3c6   : > { %v1550_v35 = vpop.f32.mrf.mxu0  ;;  %v1485_v44 = vadd.f32 %v1470_v32, %v1405_v38  ;;  %v1567_v47 = vadd.f32 %v2297_v31, %v1487_v39  ;;  %v2379_v31 = vld [vmem:[%s2450_s26 + $0xc] sm:$0xf]  ;;  %v2380_v39 = vld [vmem:[%s2450_s26 + $0x4] sm:$0xf] }
 0x3c7   : > { %v2290_v37 = vpop.f32.mrf.mxu1  ;;  %v1856_v32 = vunpack.c.l.bf16 %v2379_v31 }
 0x3c8   : > { %v2298_v40 = vpop.f32.mrf.mxu0  ;;  %v1488_v48 = vadd.f32 %v2290_v37, %v1408_v43  ;;  %v1565_v52 = vadd.f32 %v1550_v35, %v1485_v44 }
 0x3c9   : > { %v1473_v42 = vpop.f32.mrf.mxu1 }
 0x3ca   : > { %v1553_v45 = vpop.f32.mrf.mxu0  ;;  %v1486_v55 = vadd.f32 %v1473_v42, %v1406_v50  ;;  %v1568_v57 = vadd.f32 %v2298_v40, %v1488_v48  ;;  %v1854_v40 = vunpack.c.l.bf16 %v2380_v39 }
 0x3cb   : > { %v2305_v46 = vpop.f32.mrf.mxu1 }
 0x3cc   : > { %v2313_v49 = vpop.f32.mrf.mxu0  ;;  %v1647_v53 = vadd.f32 %v2305_v46, %v1567_v47  ;;  %v1566_v3 = vadd.f32 %v1553_v45, %v1486_v55 }
 0x3cd   : > { %v1630_v51 = vpop.f32.mrf.mxu1 }
 0x3ce   : > { %v1645_v58 = vadd.f32 %v1630_v51, %v1565_v52  ;;  %v1710_v59 = vpop.f32.mrf.mxu0  ;;  %v1727_v61 = vadd.f32 %v2313_v49, %v1647_v53 }
 0x3cf   : > { %v2306_v56 = vpop.f32.mrf.mxu1 }
 0x3d0   : > { %v1648_v63 = vadd.f32 %v2306_v56, %v1568_v57  ;;  %v1725_v5 = vadd.f32 %v1710_v59, %v1645_v58  ;;  %v2314_v6 = vpop.f32.mrf.mxu0 }
 0x3d1   : > { %v1633_v60 = vpop.f32.mrf.mxu1 }
 0x3d2   : > { %v1646_v9 = vadd.f32 %v1633_v60, %v1566_v3  ;;  %v1728_v11 = vadd.f32 %v2314_v6, %v1648_v63  ;;  %v1713_v15 = vpop.f32.mrf.mxu0 }
 0x3d3   : > { %v2321_v4 = vpop.f32.mrf.mxu1 }
 0x3d4   : > { %v1807_v7 = vadd.f32 %v2321_v4, %v1727_v61  ;;  %v1726_v21 = vadd.f32 %v1713_v15, %v1646_v9 }
 0x3d5   : > { %v1790_v10 = vpop.f32.mrf.mxu1 }
 0x3d6   : > { %v1835_v12 = vadd.f32 %v1826_v8, %v1807_v7  ;;  %v1805_v13 = vadd.f32 %v1790_v10, %v1725_v5 }
 0x3d7   : > { %v2322_v14 = vpop.f32.mrf.mxu1 }
 0x3d8   : > { %vm1839_vm7 = vcmp.ge.f32.partialorder %v1835_v12, 0.0  ;;  %v1843_v16 = vmul.f32 0.01, %v1835_v12  ;;  %v1833_v17 = vadd.f32 %v1816_v54, %v1805_v13  ;;  %v1808_v18 = vadd.f32 %v2322_v14, %v1728_v11 }
 0x3d9   : > { %v1793_v22 = vpop.f32.mrf.mxu1 }
 0x3da   : > { %v1847_v23 = vsel %vm1839_vm7, %v1835_v12, %v1843_v16  ;;  %vm1837_vm8 = vcmp.ge.f32.partialorder %v1833_v17, 0.0  ;;  %v1841_v24 = vmul.f32 0.01, %v1833_v17  ;;  %v1836_v25 = vadd.f32 %v1831_v20, %v1808_v18 }
 0x3db   : > { %v1851_v27 = vmul.f32 %v2573_v62, %v1847_v23  ;;  %v1806_v28 = vadd.f32 %v1793_v22, %v1726_v21 }
 0x3dc   : > { %v1845_v29 = vsel %vm1837_vm8, %v1833_v17, %v1841_v24  ;;  %vm1840_vm9 = vcmp.ge.f32.partialorder %v1836_v25, 0.0  ;;  %v1844_v30 = vmul.f32 0.01, %v1836_v25 }
 0x3dd   : > { %v1859_v1 = vadd.f32 %v1855_v19, %v1851_v27  ;;  %v1849_v33 = vmul.f32 %v2573_v62, %v1845_v29  ;;  %v1834_v34 = vadd.f32 %v1821_v0, %v1806_v28 }
 0x3de   : > { %v1848_v2 = vsel %vm1840_vm9, %v1836_v25, %v1844_v30 }
 0x3df   : > { %v2105_v35 = vpack.c.bf16 %v1859_v1, %v1859_v1  ;;  %v1857_v36 = vadd.f32 %v1853_v26, %v1849_v33  ;;  %v1852_v37 = vmul.f32 %v2573_v62, %v1848_v2  ;;  %vm1838_vm11 = vcmp.ge.f32.partialorder %v1834_v34, 0.0 }
 0x3e0   : > { %v1842_v38 = vmul.f32 0.01, %v1834_v34 }
 0x3e1   : > { %1880 = vst.msk [vmem:[%s251_s13 + $0x8] sm:$0xf] %vm1877_vm10, %v2105_v35  ;;  %v2103_v41 = vpack.c.bf16 %v1857_v36, %v1857_v36  ;;  %v1860_v42 = vadd.f32 %v1856_v32, %v1852_v37 }
 0x3e2   : > { %v1846_v43 = vsel %vm1838_vm11, %v1834_v34, %v1842_v38 }
 0x3e3   : > { %1878 = vst.msk [vmem:[%s251_s13] sm:$0xf] %vm1877_vm10, %v2103_v41  ;;  %v2106_v44 = vpack.c.bf16 %v1860_v42, %v1860_v42  ;;  %v1850_v45 = vmul.f32 %v2573_v62, %v1846_v43 }
 0x3e5   : > { %1881 = vst.msk [vmem:[%s251_s13 + $0xc] sm:$0xf] %vm1877_vm10, %v2106_v44  ;;  %v1858_v46 = vadd.f32 %v1854_v40, %v1850_v45 }
 0x3e7   : > { %v2104_v47 = vpack.c.bf16 %v1858_v46, %v1858_v46 }
 0x3e9   : > { %1879 = vst.msk [vmem:[%s251_s13 + $0x4] sm:$0xf] %vm1877_vm10, %v2104_v47 }
 0x3ea PF: > { %s16_s21 = sadd.s32 1, %s2387_s21  }
 0x3eb   : > { %p13_p4 = scmp.ge.s32.totalorder %s16_s21, 4  }
 0x3ed   :  { %15 = sbr.rel (!%p13_p4) target bundleno = 1 (0x1), region = 90 }

// kernel: analysis_transform.11
= control target key start
LH: loop header
LB: loop body
LE: loop exit
PB: predicated region body
PF: predicated region fallthrough
CT: control target
= control target key end

     0   :  { %s2993_s13 = smov 0   ;;  %s3301_s0 = inlined_call_operand.vmem [shape: bf16[2,4,32,13], index: 0, kind: input, shape index: {}]   ;;  %s3302_s1 = inlined_call_operand.vmem [shape: f32[1,16], index: 1, kind: input, shape index: {}]   ;;  %s3303_s2 = inlined_call_operand.vmem [shape: bf16[9,32,32], index: 2, kind: input, shape index: {}]   ;;  %s3304_s3 = inlined_call_operand.vmem [shape: f32[32,1], index: 3, kind: input, shape index: {}]   ;;  %s3305_s4 = inlined_call_operand.vmem [shape: bf16[9,32,32], index: 4, kind: input, shape index: {}]   ;;  %s3306_s5 = inlined_call_operand.vmem [shape: f32[32,1], index: 5, kind: input, shape index: {}]   ;;  %s3307_s6 = inlined_call_operand.vmem [shape: f32[32,32], index: 6, kind: input, shape index: {}]   ;;  %s3308_s7 = inlined_call_operand.vmem [shape: f32[32,1], index: 7, kind: input, shape index: {}]   ;;  %s3309_s8 = inlined_call_operand.vmem [shape: bf16[32,32], index: 8, kind: input, shape index: {}]   ;;  %s3310_s9 = inlined_call_operand.vmem [shape: f32[32,1], index: 9, kind: input, shape index: {}]   ;;  %s3311_s10 = inlined_call_operand.vmem [shape: bf16[2,32,16], index: 10, kind: output, shape index: {}]  }
   0x1 LB: > { %s2382_s14 = sadd.s32 4294967295, %s2921_s13   ;;  %p2386_p0 = scmp.ge.s32.totalorder %s2921_s13, 1  ;;  %s2921_s13 = sphi %s2993_s13, %s20_s13  }
   0x2   : > { %p312_p1 = scmp.lt.s32.totalorder %s2921_s13, 3 }
   0x4   : > { %p313_p2 = pnand %p2386_p0, %p312_p1 }
   0x5   : > { %p350_p3 = scmp.lt.s32.totalorder (!%p313_p2), %s2382_s14, 1  ;;  %s2923_s23 = smov (!%p313_p2), 127  }
   0x6   : > { %316 = sbr.rel (%p313_p2) target bundleno = 1099 (0x44b), region = 60  ;;  %s2924_s26 = smov (!%p313_p2), 125  }
   0x7   : > { %s2927_s21 = smov (!%p313_p2), 10   ;;  %s2928_s24 = smov (!%p313_p2), 11  }
   0x8   : > { %s2929_s29 = smov (!%p313_p2), 126   ;;  %s2930_s16 = smov (!%p313_p2), 122  }
   0x9   : > { %s2932_s17 = smov (!%p313_p2), 119   ;;  %s2933_s18 = smov (!%p313_p2), 120  }
   0xa   : > { %s2937_s20 = smov (!%p313_p2), 6  }
   0xb   : > { %v2865_v0 = vld [vmem:[%s3303_s2 + $0x10] sm:$0xff]   ;;  %vm402_vm0 = vcmask 261120   ;;  %s3313_s14 = smov (!%p350_p3, %s2382_s14), 1  ;;  %v2866_v1 = vld [vmem:[%s3303_s2] sm:$0xff]   ;;  %v2868_v6 = vld [vmem:[%s3303_s2 + $0x8] sm:$0xff]   ;;  %v2926_v16 = vmov 0  }
   0xc   : > { %2672 = vmatprep.mubr.msk.bf16.mxu0 %vm402_vm0, %v2865_v0  ;;  %s2574_s19 = sshll.u32 %s3313_s14, 6  ;;  %2680 = vmatprep.mubr.msk.bf16.mxu1 %vm402_vm0, %v2866_v1  ;;  %v2870_v9 = vld [vmem:[%s3303_s2 + $0x30] sm:$0xff]   ;;  %v2867_v10 = vld [vmem:[%s3303_s2 + $0x18] sm:$0xff]   ;;  %v2869_v11 = vld [vmem:[%s3303_s2 + $0x20] sm:$0xff]   ;;  %vm1292_vm1 = vcmask 207872   ;;  %vm1173_vm3 = vcmask 68608  }
   0xd   : > { %s3015_s22 = scalar_lea.vmem %s3301_s0, %s2574_s19  ;;  %v2872_v12 = vld [vmem:[%s3303_s2 + $0x38] sm:$0xff]   ;;  %v2876_v13 = vld [vmem:[%s3303_s2 + $0x50] sm:$0xff]   ;;  %s2925_s19 = smov 124   ;;  %2858 = vset.pattern.permute.xlu1 %v2926_v16  ;;  %2857 = vset.pattern.permute.xlu0 %v2926_v16  ;;  %v1118_v17 = vld [vmem:[%s3304_s3 + $0x8] sm:$0xff]  ;;  %1295 = vst.msk [vmem:[#allocation4 + $0x8] sm:$0xf] %vm1292_vm1, %v2926_v16 }
   0xe   : > { %v2859_v2 = vld [vmem:[%s3015_s22 + $0x8] sm:$0xff]   ;;  %v2860_v3 = vld [vmem:[%s3015_s22] sm:$0xff]   ;;  %v2863_v5 = vld [vmem:[%s3015_s22 + $0x18] sm:$0xff]   ;;  %1293 = vst.msk [vmem:[#allocation4] sm:$0xf] %vm1292_vm1, %v2926_v16  ;;  %vm1322_vm7 = vcmask 93264  }
   0xf   : > { %552 = vrot.lane.b32.xlu0 %v2859_v2, %s2923_s23  ;;  %v2861_v4 = vld [vmem:[%s3015_s22 + $0x28] sm:$0xff]   ;;  %2676 = vmatprep.subr.bf16.mxu1 %v2859_v2  ;;  %v2862_v7 = vld [vmem:[%s3015_s22 + $0x20] sm:$0xff]   ;;  %v2864_v8 = vld [vmem:[%s3015_s22 + $0x10] sm:$0xff]   ;;  %1294 = vst.msk [vmem:[#allocation4 + $0x4] sm:$0xf] %vm1292_vm1, %v2926_v16  ;;  %vm1372_vm8 = vcmask 126064  }
  0x10   : > { %2677 = vmatpush3.bf16.msra.mxu1 %v2859_v2  ;;  %814 = vrot.lane.b32.xlu1 %v2861_v4, %s2923_s23  ;;  %v1120_v14 = vld [vmem:[%s3304_s3 + $0x18] sm:$0xff]  ;;  %v1119_v15 = vld [vmem:[%s3304_s3 + $0x10] sm:$0xff]  ;;  %v1117_v18 = vld [vmem:[%s3304_s3] sm:$0xff]  ;;  %1296 = vst.msk [vmem:[#allocation4 + $0xc] sm:$0xf] %vm1292_vm1, %v2926_v16  ;;  %vm1297_vm9 = vcmask 130048  }
  0x11   : > { %2678 = vmatprep.subr.bf16.mxu1 %v2860_v3  ;;  %2668 = vmatprep.subr.bf16.mxu0 %v2863_v5  ;;  %v2873_v21 = vld [vmem:[%s3015_s22 + $0x38] sm:$0xff]   ;;  %v2871_v23 = vld [vmem:[%s3303_s2 + $0x28] sm:$0xff]   ;;  %v2874_v25 = vld [vmem:[%s3015_s22 + $0x30] sm:$0xff]   ;;  %vm1287_vm10 = vcmask 72704   ;;  %vm1347_vm11 = vcmask 56360   ;;  %vm1397_vm12 = vcmask 89160  }
  0x12   : > { %2669 = vmatpush3.bf16.msra.mxu0 %v2863_v5  ;;  %v2875_v26 = vld [vmem:[%s3303_s2 + $0x40] sm:$0xff]   ;;  %v2878_v28 = vld [vmem:[%s3303_s2 + $0x58] sm:$0xff]   ;;  %v2880_v29 = vld [vmem:[%s3303_s2 + $0x70] sm:$0xff]   ;;  %s2575_s11 = sshll.u32 %s3313_s14, 4  ;;  %vm2322_vm13 = vcmask 125952  }
  0x13   : > { %550 = vrot.lane.b32.xlu0 %v2860_v3, %s2923_s23  ;;  %2670 = vmatprep.subr.bf16.mxu0 %v2864_v8  ;;  %v2877_v32 = vld [vmem:[%s3303_s2 + $0x48] sm:$0xff]   ;;  %v2879_v33 = vld [vmem:[%s3303_s2 + $0x60] sm:$0xff]   ;;  %v2882_v35 = vld [vmem:[%s3303_s2 + $0x78] sm:$0xff]  }
  0x14   : > { %2679 = vmatpush3.bf16.msra.mxu1 %v2860_v3  ;;  %894 = vrot.lane.b32.xlu1 %v2859_v2, %s2924_s26  ;;  %v2881_v37 = vld [vmem:[%s3303_s2 + $0x68] sm:$0xff]   ;;  %v2883_v38 = vld [vmem:[%s3303_s2 + $0x80] sm:$0xff]   ;;  %v2885_v41 = vld [vmem:[%s3015_s22 + $0x38] sm:$0xff]  }
  0x15   : > { %2692 = vmatprep.subr.bf16.mxu1 %v2861_v4  ;;  %v2884_v40 = vld [vmem:[%s3303_s2 + $0x88] sm:$0xff]   ;;  %v2886_v42 = vld [vmem:[%s3015_s22 + $0x30] sm:$0xff]   ;;  %v2887_v43 = vld [vmem:[%s3309_s8] sm:$0xff]  }
  0x16   : > { %2671 = vmatpush3.bf16.msra.mxu0 %v2864_v8  ;;  %v2888_v44 = vld [vmem:[%s3309_s8 + $0x8] sm:$0xff]  }
  0x17   : > { %812 = vrot.lane.b32.xlu0 %v2862_v7, %s2923_s23  ;;  %2681 = vmatmul.mubr.msk.bf16.vlgmr.msra.gmra.mxu1 %vm402_vm0, %v2868_v6 }
  0x18   : > { %2693 = vmatpush3.bf16.msra.mxu1 %v2861_v4  ;;  %892 = vrot.lane.b32.xlu1 %v2860_v3, %s2924_s26 }
  0x19   : > { %2694 = vmatprep.subr.bf16.mxu1 %v2862_v7  ;;  %2696 = vmatprep.mubr.msk.bf16.mxu1 %vm402_vm0, %v2870_v9 }
  0x1a   : > { %2673 = vmatmul.mubr.msk.bf16.vlgmr.msra.gmra.mxu0 %vm402_vm0, %v2867_v10 }
  0x1b   : > { %974 = vrot.lane.b32.xlu0 %v2863_v5, %s2924_s26  ;;  %2688 = vmatprep.mubr.msk.bf16.mxu0 %vm402_vm0, %v2869_v11 }
  0x1c   : > { %2695 = vmatpush3.bf16.msra.mxu1 %v2862_v7  ;;  %1054 = vrot.lane.b32.xlu1 %v2859_v2, %s2925_s19 }
  0x1f   : > { %972 = vrot.lane.b32.xlu0 %v2864_v8, %s2924_s26  ;;  %2697 = vmatmul.mubr.msk.bf16.vlgmr.msra.gmra.mxu1 %vm402_vm0, %v2872_v12 }
  0x20   : > { %2712 = vmatprep.mubr.msk.bf16.mxu1 %vm402_vm0, %v2876_v13  ;;  %1052 = vrot.lane.b32.xlu1 %v2860_v3, %s2925_s19 }
  0x23   : > { %1133 = vperm.xlu0 %2857, %v1119_v15  }
  0x24   : > { %1138 = vperm.xlu1 %2858, %v1120_v14  }
  0x27   : > { %1128 = vperm.xlu0 %2857, %v1118_v17  }
  0x28   : > { %1123 = vperm.xlu1 %2858, %v1117_v18  }
  0x81   : > { %v553_v19 = vpop.permute.xlu0 %552 }
  0x82   : > { %2684 = vmatprep.subr.bf16.mxu0 %v553_v19  ;;  %v815_v20 = vpop.permute.xlu1 %814 }
  0x83   : > { %2685 = vmatpush3.bf16.msra.mxu0 %v553_v19  ;;  %2708 = vmatprep.subr.bf16.mxu1 %v815_v20 }
  0x84   : > { %2709 = vmatpush3.bf16.msra.mxu1 %v815_v20 }
  0x85   : > { %v551_v22 = vpop.permute.xlu0 %550 }
  0x86   : > { %2686 = vmatprep.subr.bf16.mxu0 %v551_v22  ;;  %v895_v24 = vpop.permute.xlu1 %894 }
  0x87   : > { %2687 = vmatpush3.bf16.msra.mxu0 %v551_v22 }
  0x88   : > { %2700 = vmatprep.subr.bf16.mxu0 %v2873_v21 }
  0x89   : > { %v813_v27 = vpop.permute.xlu0 %812 }
  0x8a   : > { %2689 = vmatmul.mubr.msk.bf16.vlgmr.msra.gmra.mxu0 %vm402_vm0, %v2871_v23  ;;  %2710 = vmatprep.subr.bf16.mxu1 %v813_v27  ;;  %v893_v31 = vpop.permute.xlu1 %892 }
  0x8b   : > { %2701 = vmatpush3.bf16.msra.mxu0 %v2873_v21  ;;  %2711 = vmatpush3.bf16.msra.mxu1 %v813_v27 }
  0x8c   : > { %2702 = vmatprep.subr.bf16.mxu0 %v2874_v25  ;;  %2704 = vmatprep.mubr.msk.bf16.mxu0 %vm402_vm0, %v2875_v26 }
  0x8d   : > { %v975_v30 = vpop.permute.xlu0 %974 }
  0x8e   : > { %2713 = vmatmul.mubr.msk.bf16.vlgmr.msra.gmra.mxu1 %vm402_vm0, %v2878_v28  ;;  %2724 = vmatprep.subr.bf16.mxu1 %v975_v30  ;;  %v1055_v36 = vpop.permute.xlu1 %1054 }
  0x8f   : > { %2703 = vmatpush3.bf16.msra.mxu0 %v2874_v25  ;;  %2725 = vmatpush3.bf16.msra.mxu1 %v975_v30 }
  0x90   : > { %2716 = vmatprep.subr.bf16.mxu0 %v895_v24  ;;  %2728 = vmatprep.mubr.msk.bf16.mxu1 %vm402_vm0, %v2880_v29 }
  0x91   : > { %v973_v34 = vpop.permute.xlu0 %972 }
  0x92   : > { %2705 = vmatmul.mubr.msk.bf16.vlgmr.msra.gmra.mxu0 %vm402_vm0, %v2877_v32  ;;  %2726 = vmatprep.subr.bf16.mxu1 %v973_v34  ;;  %v1053_v39 = vpop.permute.xlu1 %1052 }
  0x93   : > { %2717 = vmatpush3.bf16.msra.mxu0 %v895_v24  ;;  %2727 = vmatpush3.bf16.msra.mxu1 %v973_v34 }
  0x94   : > { %2718 = vmatprep.subr.bf16.mxu0 %v893_v31  ;;  %2720 = vmatprep.mubr.msk.bf16.mxu0 %vm402_vm0, %v2879_v33 }
  0x95   : > { %2740 = vmatprep.subr.bf16.mxu1 %v2885_v41 }
  0x96   : > { %2729 = vmatmul.mubr.msk.bf16.vlgmr.msra.gmra.mxu1 %vm402_vm0, %v2882_v35 }
  0x97   : > { %2719 = vmatpush3.bf16.msra.mxu0 %v893_v31  ;;  %2744 = vmatprep.mubr.msk.bf16.mxu1 %vm402_vm0, %v2887_v43 }
  0x98   : > { %2732 = vmatprep.subr.bf16.mxu0 %v1055_v36  ;;  %2741 = vmatpush3.bf16.msra.mxu1 %v2885_v41 }
  0x99   : > { %2742 = vmatprep.subr.bf16.mxu1 %v2886_v42 }
  0x9a   : > { %2721 = vmatmul.mubr.msk.bf16.vlgmr.msra.gmra.mxu0 %vm402_vm0, %v2881_v37 }
  0x9b   : > { %2733 = vmatpush3.bf16.msra.mxu0 %v1055_v36  ;;  %2736 = vmatprep.mubr.msk.bf16.mxu0 %vm402_vm0, %v2883_v38 }
  0x9c   : > { %2734 = vmatprep.subr.bf16.mxu0 %v1053_v39  ;;  %2743 = vmatpush3.bf16.msra.mxu1 %v2886_v42 }
  0x9e   : > { %v1134_v37 = vpop.permute.xlu0 %1133 }
  0x9f   : > { %2735 = vmatpush3.bf16.msra.mxu0 %v1053_v39  ;;  %2745 = vmatmul.mubr.msk.bf16.vlgmr.msra.gmra.mxu1 %vm402_vm0, %v2888_v44  ;;  %v1139_v28 = vpop.permute.xlu1 %1138 }
  0xa2   : > { %2737 = vmatmul.mubr.msk.bf16.vlgmr.msra.gmra.mxu0 %vm402_vm0, %v2884_v40 }
  0xa3   : > { %v1124_v43 = vpop.permute.xlu1 %1123 }
  0xd7   : > { %v2682_v45 = vpop.f32.mrf.mxu1 }
  0xd9   : > { %v520_v46 = vpop.f32.mrf.mxu1 }
  0xda   : > { %v2674_v48 = vpop.f32.mrf.mxu0 }
  0xdb   : > { %v2683_v47 = vpop.f32.mrf.mxu1  ;;  %v529_v61 = vadd.f32 %v2682_v45, %v2674_v48 }
  0xdc   : > { %v443_v51 = vpop.f32.mrf.mxu0 }
  0xdd   : > { %v523_v49 = vpop.f32.mrf.mxu1  ;;  %v521_v0 = vadd.f32 %v520_v46, %v443_v51 }
  0xde   : > { %v2675_v53 = vpop.f32.mrf.mxu0 }
  0xdf   : > { %v2698_v50 = vpop.f32.mrf.mxu1  ;;  %v532_v3 = vadd.f32 %v2683_v47, %v2675_v53 }
  0xe0   : > { %v446_v55 = vpop.f32.mrf.mxu0 }
  0xe1   : > { %v687_v52 = vpop.f32.mrf.mxu1  ;;  %v524_v9 = vadd.f32 %v523_v49, %v446_v55 }
  0xe3   : > { %v2699_v54 = vpop.f32.mrf.mxu1 }
  0xe5   : > { %v690_v57 = vpop.f32.mrf.mxu1 }
 0x14a   : > { %v2690_v56 = vpop.f32.mrf.mxu0 }
 0x14b   : > { %v613_v1 = vadd.f32 %v2690_v56, %v529_v61  ;;  %v1129_v61 = vpop.permute.xlu0 %1128 }
 0x14c   : > { %v596_v58 = vpop.f32.mrf.mxu0 }
 0x14d   : > { %v611_v4 = vadd.f32 %v596_v58, %v521_v0  ;;  %v704_v7 = vadd.f32 %v2698_v50, %v613_v1 }
 0x14e   : > { %v2691_v59 = vpop.f32.mrf.mxu0  ;;  %v2714_v60 = vpop.f32.mrf.mxu1 }
 0x14f   : > { %v614_v8 = vadd.f32 %v2691_v59, %v532_v3  ;;  %v702_v11 = vadd.f32 %v687_v52, %v611_v4 }
 0x150   : > { %v599_v62 = vpop.f32.mrf.mxu0  ;;  %v858_v63 = vpop.f32.mrf.mxu1 }
 0x151   : > { %v612_v14 = vadd.f32 %v599_v62, %v524_v9  ;;  %v705_v16 = vadd.f32 %v2699_v54, %v614_v8 }
 0x152   : > { %v2706_v2 = vpop.f32.mrf.mxu0  ;;  %v2715_v5 = vpop.f32.mrf.mxu1 }
 0x153   : > { %v795_v12 = vadd.f32 %v2706_v2, %v704_v7  ;;  %v703_v22 = vadd.f32 %v690_v57, %v612_v14 }
 0x154   : > { %v778_v6 = vpop.f32.mrf.mxu0  ;;  %v861_v13 = vpop.f32.mrf.mxu1 }
 0x155   : > { %v793_v17 = vadd.f32 %v778_v6, %v702_v11  ;;  %v875_v19 = vadd.f32 %v2714_v60, %v795_v12 }
 0x156   : > { %v2707_v10 = vpop.f32.mrf.mxu0  ;;  %v2730_v21 = vpop.f32.mrf.mxu1 }
 0x157   : > { %v796_v20 = vadd.f32 %v2707_v10, %v705_v16  ;;  %v873_v24 = vadd.f32 %v858_v63, %v793_v17 }
 0x158   : > { %v781_v15 = vpop.f32.mrf.mxu0  ;;  %v1018_v31 = vpop.f32.mrf.mxu1 }
 0x159   : > { %v794_v26 = vadd.f32 %v781_v15, %v703_v22  ;;  %v876_v29 = vadd.f32 %v2715_v5, %v796_v20  ;;  %v2889_v20 = vld [vmem:[%s3305_s4] sm:$0xff]  }
 0x15a   : > { %v2722_v18 = vpop.f32.mrf.mxu0  ;;  %v2731_v39 = vpop.f32.mrf.mxu1  ;;  %2760 = vmatprep.mubr.msk.bf16.mxu1 %vm402_vm0, %v2889_v20 }
 0x15b   : > { %v955_v25 = vadd.f32 %v2722_v18, %v875_v19  ;;  %v874_v35 = vadd.f32 %v861_v13, %v794_v26 }
 0x15c   : > { %v938_v23 = vpop.f32.mrf.mxu0  ;;  %v1021_v48 = vpop.f32.mrf.mxu1 }
 0x15d   : > { %v953_v30 = vadd.f32 %v938_v23, %v873_v24  ;;  %v1035_v33 = vadd.f32 %v2730_v21, %v955_v25  ;;  %v2891_v24 = vld [vmem:[%s3305_s4 + $0x10] sm:$0xff]  }
 0x15e   : > { %v2723_v27 = vpop.f32.mrf.mxu0  ;;  %2752 = vmatprep.mubr.msk.bf16.mxu0 %vm402_vm0, %v2891_v24 }
 0x15f   : > { %v956_v34 = vadd.f32 %v2723_v27, %v876_v29  ;;  %v1033_v38 = vadd.f32 %v1018_v31, %v953_v30  ;;  %v2890_v29 = vld [vmem:[%s3305_s4 + $0x8] sm:$0xff]   ;;  %v2893_v30 = vld [vmem:[%s3305_s4 + $0x30] sm:$0xff]   ;;  %v2126_v31 = vld [vmem:[%s3306_s5 + $0x18] sm:$0xff] }
 0x160   : > { %v941_v32 = vpop.f32.mrf.mxu0 }
 0x161   : > { %v954_v41 = vadd.f32 %v941_v32, %v874_v35  ;;  %v1036_v44 = vadd.f32 %v2731_v39, %v956_v34  ;;  %v2124_v32 = vld [vmem:[%s3306_s5 + $0x8] sm:$0xff]  ;;  %v2125_v34 = vld [vmem:[%s3306_s5 + $0x10] sm:$0xff] }
 0x162   : > { %v2738_v36 = vpop.f32.mrf.mxu0  ;;  %v1188_v35 = vld [vmem:[%s3310_s9 + $0x10] sm:$0xff] }
 0x163   : > { %v1115_v40 = vadd.f32 %v2738_v36, %v1035_v33  ;;  %v1034_v52 = vadd.f32 %v1021_v48, %v954_v41  ;;  %v1186_v33 = vld [vmem:[%s3310_s9] sm:$0xff]  ;;  %v2171_v39 = vld [vmem:[%s3308_s7 + $0x10] sm:$0xff]  ;;  %v2170_v41 = vld [vmem:[%s3308_s7 + $0x8] sm:$0xff] }
 0x164   : > { %v1098_v42 = vpop.f32.mrf.mxu0  ;;  %v2123_v36 = vld [vmem:[%s3306_s5] sm:$0xff]  ;;  %v2892_v48 = vld [vmem:[%s3305_s4 + $0x18] sm:$0xff]  }
 0x165   : > { %v1113_v45 = vadd.f32 %v1098_v42, %v1033_v38  ;;  %v1143_v46 = vadd.f32 %v1134_v37, %v1115_v40  ;;  %v2169_v37 = vld [vmem:[%s3308_s7] sm:$0xff]  ;;  %v1187_v38 = vld [vmem:[%s3310_s9 + $0x8] sm:$0xff]  ;;  %v1189_v40 = vld [vmem:[%s3310_s9 + $0x18] sm:$0xff] }
 0x166   : > { %v2739_v47 = vpop.f32.mrf.mxu0  ;;  %v2172_v42 = vld [vmem:[%s3308_s7 + $0x18] sm:$0xff] }
 0x167   : > { %vm1147_vm2 = vcmp.ge.f32.partialorder %v1143_v46, 0.0  ;;  %v1151_v49 = vmul.f32 0.01, %v1143_v46  ;;  %v1141_v50 = vadd.f32 %v1124_v43, %v1113_v45  ;;  %v1116_v51 = vadd.f32 %v2739_v47, %v1036_v44 }
 0x168   : > { %v1101_v53 = vpop.f32.mrf.mxu0  ;;  %v2935_v43 = vmov 0.0  }
 0x169   : > { %v1155_v54 = vsel %vm1147_vm2, %v1143_v46, %v1151_v49  ;;  %vm1145_vm4 = vcmp.ge.f32.partialorder %v1141_v50, 0.0  ;;  %v1149_v55 = vmul.f32 0.01, %v1141_v50  ;;  %v1144_v56 = vadd.f32 %v1139_v28, %v1116_v51  ;;  %1298 = vst.msk [vmem:[#allocation5] sm:$0xff] %vm1297_vm9, %v2935_v43  ;;  %1299 = vst.msk [vmem:[#allocation5 + $0x8] sm:$0xff] %vm1297_vm9, %v2935_v43  ;;  %v2895_v49 = vld [vmem:[%s3305_s4 + $0x20] sm:$0xff]  }
 0x16a   : > { %v2578_v57 = vpack.c.bf16 %v1155_v54, %v1155_v54  ;;  %v1114_v58 = vadd.f32 %v1101_v53, %v1034_v52  ;;  %1300 = vst.msk [vmem:[#allocation5 + $0x10] sm:$0xff] %vm1297_vm9, %v2935_v43  ;;  %1301 = vst.msk [vmem:[#allocation5 + $0x18] sm:$0xff] %vm1297_vm9, %v2935_v43  ;;  %v2894_v52 = vld [vmem:[%s3305_s4 + $0x38] sm:$0xff]   ;;  %v2897_v53 = vld [vmem:[%s3305_s4 + $0x50] sm:$0xff]  }
 0x16b   : > { %v1153_v59 = vsel %vm1145_vm4, %v1141_v50, %v1149_v55  ;;  %vm1148_vm5 = vcmp.ge.f32.partialorder %v1144_v56, 0.0  ;;  %v1152_v60 = vmul.f32 0.01, %v1144_v56 }
 0x16c   : > { %1176 = vst.msk [vmem:[#allocation2 + $0x8] sm:$0xf] %vm1173_vm3, %v2578_v57  ;;  %v2576_v62 = vpack.c.bf16 %v1153_v59, %v1153_v59  ;;  %v1142_v63 = vadd.f32 %v1129_v61, %v1114_v58  ;;  %v2899_v57 = vld [vmem:[%s3305_s4 + $0x40] sm:$0xff]   ;;  %v2902_v61 = vld [vmem:[%s3305_s4 + $0x70] sm:$0xff]  }
 0x16d   : > { %v1156_v0 = vsel %vm1148_vm5, %v1144_v56, %v1152_v60  ;;  %v2896_v56 = vld [vmem:[%s3305_s4 + $0x28] sm:$0xff]   ;;  %v2898_v60 = vld [vmem:[%s3305_s4 + $0x58] sm:$0xff]  }
 0x16e   : > { %1174 = vst.msk [vmem:[#allocation2] sm:$0xf] %vm1173_vm3, %v2576_v62  ;;  %v2579_v1 = vpack.c.bf16 %v1156_v0, %v1156_v0  ;;  %vm1146_vm6 = vcmp.ge.f32.partialorder %v1142_v63, 0.0  ;;  %v1150_v2 = vmul.f32 0.01, %v1142_v63  ;;  %v2900_v0 = vld [vmem:[%s3305_s4 + $0x48] sm:$0xff]  }
 0x170   : > { %1177 = vst.msk [vmem:[#allocation2 + $0xc] sm:$0xf] %vm1173_vm3, %v2579_v1  ;;  %v1154_v3 = vsel %vm1146_vm6, %v1142_v63, %v1150_v2  ;;  %v2901_v1 = vld [vmem:[%s3305_s4 + $0x60] sm:$0xff]  }
 0x171   : > { %v2577_v4 = vpack.c.bf16 %v1154_v3, %v1154_v3 }
 0x173   : > { %1175 = vst.msk [vmem:[#allocation2 + $0x4] sm:$0xf] %vm1173_vm3, %v2577_v4  ;;  %v1304_v5 = vld [vmem:[#allocation2 + $0x8] sm:$0xf]  ;;  %v2904_v4 = vld [vmem:[%s3305_s4 + $0x78] sm:$0xff]  }
 0x174   : > { %1314 = vrot.lane.b32.xlu1 %v1304_v5, %s2927_s21  ;;  %v1354_v6 = vld [vmem:[#allocation2 + $0x8] sm:$0xf] }
 0x175   : > { %v1302_v9 = vld [vmem:[#allocation2] sm:$0xf] }
 0x176   : > { %v1352_v11 = vld [vmem:[#allocation2] sm:$0xf] }
 0x177   : > { %v1305_v7 = vld [vmem:[#allocation2 + $0xc] sm:$0xf] }
 0x178   : > { %1364 = vrot.lane.b32.xlu1 %v1354_v6, %s2928_s24  ;;  %1316 = vrot.lane.b32.xlu0 %v1305_v7, %s2927_s21  ;;  %v1355_v8 = vld [vmem:[#allocation2 + $0xc] sm:$0xf]  ;;  %v2905_v7 = vld [vmem:[%s3305_s4 + $0x80] sm:$0xff]  }
 0x179   : > { %v2903_v6 = vld [vmem:[%s3305_s4 + $0x68] sm:$0xff]  }
 0x17a   : > { %v1303_v10 = vld [vmem:[#allocation2 + $0x4] sm:$0xf] }
 0x17b   : > { %v1353_v12 = vld [vmem:[#allocation2 + $0x4] sm:$0xf] }
 0x17c   : > { %1366 = vrot.lane.b32.xlu0 %v1355_v8, %s2928_s24  ;;  %1310 = vrot.lane.b32.xlu1 %v1302_v9, %s2927_s21 }
 0x180   : > { %1312 = vrot.lane.b32.xlu0 %v1303_v10, %s2927_s21  ;;  %1360 = vrot.lane.b32.xlu1 %v1352_v11, %s2928_s24  ;;  %v2906_v10 = vld [vmem:[%s3305_s4 + $0x88] sm:$0xff]   ;;  %v2746_v11 = vpop.f32.mrf.mxu1 }
 0x184   : > { %1362 = vrot.lane.b32.xlu0 %v1353_v12, %s2928_s24 }
 0x1e6   : > { %v1315_v13 = vpop.permute.xlu1 %1314 }
 0x1e7   : > { %1325 = vst.msk [vmem:[#allocation4 + $0x8] sm:$0xf] %vm1322_vm7, %v1315_v13  ;;  %v1272_v13 = vpop.f32.mrf.mxu1 }
 0x1ea   : > { %v1365_v14 = vpop.permute.xlu1 %1364  ;;  %v1317_v15 = vpop.permute.xlu0 %1316 }
 0x1eb   : > { %1375 = vst.msk [vmem:[#allocation4 + $0x8] sm:$0xf] %vm1372_vm8, %v1365_v14 }
 0x1ec   : > { %1326 = vst.msk [vmem:[#allocation4 + $0xc] sm:$0xf] %vm1322_vm7, %v1317_v15 }
 0x1ee   : > { %v1367_v16 = vpop.permute.xlu0 %1366  ;;  %v1311_v17 = vpop.permute.xlu1 %1310 }
 0x1ef   : > { %1376 = vst.msk [vmem:[#allocation4 + $0xc] sm:$0xf] %vm1372_vm8, %v1367_v16 }
 0x1f0   : > { %1323 = vst.msk [vmem:[#allocation4] sm:$0xf] %vm1322_vm7, %v1311_v17  ;;  %v2747_v17 = vpop.f32.mrf.mxu1 }
 0x1f2   : > { %v1313_v18 = vpop.permute.xlu0 %1312  ;;  %v1361_v19 = vpop.permute.xlu1 %1360  ;;  %v1408_v21 = vld [vmem:[#allocation4 + $0x8] sm:$0xf] }
 0x1f3   : > { %1324 = vst.msk [vmem:[#allocation4 + $0x4] sm:$0xf] %vm1322_vm7, %v1313_v18 }
 0x1f4   : > { %1373 = vst.msk [vmem:[#allocation4] sm:$0xf] %vm1372_vm8, %v1361_v19 }
 0x1f6   : > { %v1409_v22 = vld [vmem:[#allocation4 + $0xc] sm:$0xf]  ;;  %v1363_v23 = vpop.permute.xlu0 %1362 }
 0x1f7   : > { %v2500_v25 = vcombine.low %v1408_v21, %v1409_v22  ;;  %1374 = vst.msk [vmem:[#allocation4 + $0x4] sm:$0xf] %vm1372_vm8, %v1363_v23  ;;  %v1275_v21 = vpop.f32.mrf.mxu1 }
 0x1f9   : > { %2756 = vmatprep.subr.bf16.mxu1 %v2500_v25  ;;  %1437 = vrot.lane.b32.xlu1 %v2500_v25, %s2923_s23 }
 0x1fa   : > { %2757 = vmatpush3.bf16.msra.mxu1 %v2500_v25 }
 0x1fb   : > { %v1406_v26 = vld [vmem:[#allocation4] sm:$0xf] }
 0x1fd   : > { %1580 = vrot.lane.b32.xlu1 %v2500_v25, %s2929_s29 }
 0x1fe   : > { %v1407_v27 = vld [vmem:[#allocation4 + $0x4] sm:$0xf] }
 0x1ff   : > { %v2499_v28 = vcombine.low %v1406_v26, %v1407_v27 }
 0x201   : > { %1660 = vrot.lane.b32.xlu1 %v2500_v25, %s2925_s19  ;;  %1435 = vrot.lane.b32.xlu0 %v2499_v28, %s2923_s23  ;;  %s2931_s23 = smov 123  }
 0x202   : > { %2758 = vmatprep.subr.bf16.mxu1 %v2499_v28 }
 0x203   : > { %2759 = vmatpush3.bf16.msra.mxu1 %v2499_v28 }
 0x205   : > { %1658 = vrot.lane.b32.xlu1 %v2499_v28, %s2925_s19  ;;  %1578 = vrot.lane.b32.xlu0 %v2499_v28, %s2929_s29  ;;  %s2934_s19 = smov 118  }
 0x206   : > { %2761 = vmatmul.mubr.msk.bf16.vlgmr.msra.gmra.mxu1 %vm402_vm0, %v2890_v29 }
 0x207   : > { %2776 = vmatprep.mubr.msk.bf16.mxu1 %vm402_vm0, %v2893_v30  ;;  %v2161_v30 = vld [vmem:[%s3307_s6] sm:$0xff] }
 0x209   : > { %1820 = vrot.lane.b32.xlu1 %v2500_v25, %s2930_s16  ;;  %1740 = vrot.lane.b32.xlu0 %v2500_v25, %s2931_s23 }
 0x20d   : > { %1818 = vrot.lane.b32.xlu1 %v2499_v28, %s2930_s16  ;;  %1738 = vrot.lane.b32.xlu0 %v2499_v28, %s2931_s23  ;;  %s359_s16 = scalar_lea.vmem %s3311_s10, %s2575_s11 }
 0x211   : > { %1980 = vrot.lane.b32.xlu1 %v2500_v25, %s2932_s17  ;;  %1900 = vrot.lane.b32.xlu0 %v2500_v25, %s2933_s18 }
 0x215   : > { %1978 = vrot.lane.b32.xlu1 %v2499_v28, %s2932_s17  ;;  %1898 = vrot.lane.b32.xlu0 %v2499_v28, %s2933_s18  ;;  %s2936_s18 = smov 5  }
 0x219   : > { %2144 = vperm.xlu1 %2858, %v2126_v31   ;;  %2060 = vrot.lane.b32.xlu0 %v2500_v25, %s2934_s19 }
 0x21d   : > { %2134 = vperm.xlu1 %2858, %v2124_v32   ;;  %2058 = vrot.lane.b32.xlu0 %v2499_v28, %s2934_s19 }
 0x221   : > { %1192 = vperm.xlu1 %2858, %v1186_v33   ;;  %2139 = vperm.xlu0 %2857, %v2125_v34  }
 0x225   : > { %1202 = vperm.xlu1 %2858, %v1188_v35   ;;  %2129 = vperm.xlu0 %2857, %v2123_v36  }
 0x229   : > { %2175 = vperm.xlu1 %2858, %v2169_v37   ;;  %1197 = vperm.xlu0 %2857, %v1187_v38  }
 0x22d   : > { %2185 = vperm.xlu1 %2858, %v2171_v39   ;;  %1207 = vperm.xlu0 %2857, %v1189_v40  }
 0x231   : > { %2180 = vperm.xlu0 %2857, %v2170_v41  }
 0x235   : > { %2190 = vperm.xlu0 %2857, %v2172_v42  }
 0x26b   : > { %v1438_v44 = vpop.permute.xlu1 %1437 }
 0x26c   : > { %2748 = vmatprep.subr.bf16.mxu0 %v1438_v44 }
 0x26d   : > { %2749 = vmatpush3.bf16.msra.mxu0 %v1438_v44 }
 0x26f   : > { %v1581_v45 = vpop.permute.xlu1 %1580 }
 0x273   : > { %v1436_v46 = vpop.permute.xlu0 %1435  ;;  %v1661_v47 = vpop.permute.xlu1 %1660 }
 0x274   : > { %2750 = vmatprep.subr.bf16.mxu0 %v1436_v46  ;;  %2772 = vmatprep.subr.bf16.mxu1 %v1661_v47 }
 0x275   : > { %2751 = vmatpush3.bf16.msra.mxu0 %v1436_v46  ;;  %2773 = vmatpush3.bf16.msra.mxu1 %v1661_v47 }
 0x276   : > { %2764 = vmatprep.subr.bf16.mxu0 %v1581_v45 }
 0x277   : > { %v1579_v50 = vpop.permute.xlu0 %1578  ;;  %v1659_v51 = vpop.permute.xlu1 %1658 }
 0x278   : > { %2753 = vmatmul.mubr.msk.bf16.vlgmr.msra.gmra.mxu0 %vm402_vm0, %v2892_v48  ;;  %2774 = vmatprep.subr.bf16.mxu1 %v1659_v51 }
 0x279   : > { %2765 = vmatpush3.bf16.msra.mxu0 %v1581_v45  ;;  %2775 = vmatpush3.bf16.msra.mxu1 %v1659_v51 }
 0x27a   : > { %2766 = vmatprep.subr.bf16.mxu0 %v1579_v50  ;;  %2768 = vmatprep.mubr.msk.bf16.mxu0 %vm402_vm0, %v2895_v49 }
 0x27b   : > { %v1741_v54 = vpop.permute.xlu0 %1740  ;;  %v1821_v55 = vpop.permute.xlu1 %1820 }
 0x27c   : > { %2788 = vmatprep.subr.bf16.mxu1 %v1821_v55  ;;  %2777 = vmatmul.mubr.msk.bf16.vlgmr.msra.gmra.mxu1 %vm402_vm0, %v2894_v52 }
 0x27d   : > { %2767 = vmatpush3.bf16.msra.mxu0 %v1579_v50  ;;  %2789 = vmatpush3.bf16.msra.mxu1 %v1821_v55 }
 0x27e   : > { %2780 = vmatprep.subr.bf16.mxu0 %v1741_v54  ;;  %2792 = vmatprep.mubr.msk.bf16.mxu1 %vm402_vm0, %v2897_v53 }
 0x27f   : > { %v1739_v58 = vpop.permute.xlu0 %1738  ;;  %v1819_v59 = vpop.permute.xlu1 %1818 }
 0x280   : > { %2769 = vmatmul.mubr.msk.bf16.vlgmr.msra.gmra.mxu0 %vm402_vm0, %v2896_v56  ;;  %2790 = vmatprep.subr.bf16.mxu1 %v1819_v59 }
 0x281   : > { %2781 = vmatpush3.bf16.msra.mxu0 %v1741_v54  ;;  %2791 = vmatpush3.bf16.msra.mxu1 %v1819_v59 }
 0x282   : > { %2782 = vmatprep.subr.bf16.mxu0 %v1739_v58  ;;  %2784 = vmatprep.mubr.msk.bf16.mxu0 %vm402_vm0, %v2899_v57 }
 0x283   : > { %v1901_v62 = vpop.permute.xlu0 %1900  ;;  %v1981_v63 = vpop.permute.xlu1 %1980 }
 0x284   : > { %2804 = vmatprep.subr.bf16.mxu1 %v1981_v63  ;;  %2793 = vmatmul.mubr.msk.bf16.vlgmr.msra.gmra.mxu1 %vm402_vm0, %v2898_v60 }
 0x285   : > { %2783 = vmatpush3.bf16.msra.mxu0 %v1739_v58  ;;  %2805 = vmatpush3.bf16.msra.mxu1 %v1981_v63 }
 0x286   : > { %2796 = vmatprep.subr.bf16.mxu0 %v1901_v62  ;;  %2808 = vmatprep.mubr.msk.bf16.mxu1 %vm402_vm0, %v2902_v61 }
 0x287   : > { %v1899_v2 = vpop.permute.xlu0 %1898  ;;  %v1979_v3 = vpop.permute.xlu1 %1978 }
 0x288   : > { %2785 = vmatmul.mubr.msk.bf16.vlgmr.msra.gmra.mxu0 %vm402_vm0, %v2900_v0  ;;  %2806 = vmatprep.subr.bf16.mxu1 %v1979_v3 }
 0x289   : > { %2797 = vmatpush3.bf16.msra.mxu0 %v1901_v62  ;;  %2807 = vmatpush3.bf16.msra.mxu1 %v1979_v3 }
 0x28a   : > { %2798 = vmatprep.subr.bf16.mxu0 %v1899_v2  ;;  %2800 = vmatprep.mubr.msk.bf16.mxu0 %vm402_vm0, %v2901_v1 }
 0x28b   : > { %v2061_v5 = vpop.permute.xlu0 %2060 }
 0x28c   : > { %2809 = vmatmul.mubr.msk.bf16.vlgmr.msra.gmra.mxu1 %vm402_vm0, %v2904_v4 }
 0x28d   : > { %2799 = vmatpush3.bf16.msra.mxu0 %v1899_v2  ;;  %2828 = vmatprep.mubr.msk.f32.mxu1 %vm402_vm0, %v2161_v30 }
 0x28e   : > { %2812 = vmatprep.subr.bf16.mxu0 %v2061_v5 }
 0x28f   : > { %v2059_v8 = vpop.permute.xlu0 %2058 }
 0x290   : > { %2801 = vmatmul.mubr.msk.bf16.vlgmr.msra.gmra.mxu0 %vm402_vm0, %v2903_v6 }
 0x291   : > { %2813 = vmatpush3.bf16.msra.mxu0 %v2061_v5  ;;  %2816 = vmatprep.mubr.msk.bf16.mxu0 %vm402_vm0, %v2905_v7 }
 0x292   : > { %2814 = vmatprep.subr.bf16.mxu0 %v2059_v8 }
 0x294   : > { %v3239_v9 = vpop.permute.xlu1 %2144 }
 0x295   : > { %2815 = vmatpush3.bf16.msra.mxu0 %v2059_v8 }
 0x298   : > { %2817 = vmatmul.mubr.msk.bf16.vlgmr.msra.gmra.mxu0 %vm402_vm0, %v2906_v10  ;;  %v3245_v12 = vpop.permute.xlu1 %2134 }
 0x29c   : > { %v3247_v14 = vpop.permute.xlu0 %2139  ;;  %v1193_v15 = vpop.permute.xlu1 %1192 }
 0x29d   : > { %v1273_v16 = vadd.f32 %v1272_v13, %v1193_v15 }
 0x29f   : > { %1288 = vst.msk [vmem:[#allocation3] sm:$0xff] %vm1287_vm10, %v1273_v16 }
 0x2a0   : > { %v3250_v18 = vpop.permute.xlu0 %2129  ;;  %v1203_v19 = vpop.permute.xlu1 %1202 }
 0x2a1   : > { %v1281_v20 = vadd.f32 %v2746_v11, %v1203_v19 }
 0x2a3   : > { %1290 = vst.msk [vmem:[#allocation3 + $0x10] sm:$0xff] %vm1287_vm10, %v1281_v20 }
 0x2a4   : > { %v1198_v22 = vpop.permute.xlu0 %1197  ;;  %v3259_v31 = vpop.permute.xlu1 %2175 }
 0x2a5   : > { %v1276_v23 = vadd.f32 %v1275_v21, %v1198_v22 }
 0x2a6   : > { %v1327_v24 = vld [vmem:[#allocation3] sm:$0xff] }
 0x2a7   : > { %1289 = vst.msk [vmem:[#allocation3 + $0x8] sm:$0xff] %vm1287_vm10, %v1276_v23  ;;  %1335 = vrot.lane.b32.xlu1 %v1327_v24, %s2936_s18 }
 0x2a8   : > { %v1208_v25 = vpop.permute.xlu0 %1207  ;;  %v3261_v32 = vpop.permute.xlu1 %2185 }
 0x2a9   : > { %v1284_v26 = vadd.f32 %v2747_v17, %v1208_v25 }
 0x2aa   : > { %v1329_v27 = vld [vmem:[#allocation3 + $0x10] sm:$0xff] }
 0x2ab   : > { %1291 = vst.msk [vmem:[#allocation3 + $0x18] sm:$0xff] %vm1287_vm10, %v1284_v26  ;;  %1339 = vrot.lane.b32.xlu1 %v1329_v27, %s2936_s18 }
 0x2ac   : > { %v3263_v33 = vpop.permute.xlu0 %2180 }
 0x2ae   : > { %v1328_v28 = vld [vmem:[#allocation3 + $0x8] sm:$0xff] }
 0x2af   : > { %1337 = vrot.lane.b32.xlu0 %v1328_v28, %s2936_s18  ;;  %1385 = vrot.lane.b32.xlu1 %v1327_v24, %s2937_s20 }
 0x2b0   : > { %v3265_v35 = vpop.permute.xlu0 %2190 }
 0x2b2   : > { %v1330_v29 = vld [vmem:[#allocation3 + $0x18] sm:$0xff] }
 0x2b3   : > { %1341 = vrot.lane.b32.xlu0 %v1330_v29, %s2936_s18  ;;  %1389 = vrot.lane.b32.xlu1 %v1329_v27, %s2937_s20 }
 0x2b7   : > { %1387 = vrot.lane.b32.xlu0 %v1328_v28, %s2937_s20 }
 0x2bb   : > { %1391 = vrot.lane.b32.xlu0 %v1330_v29, %s2937_s20 }
 0x2c6   : > { %v2762_v42 = vpop.f32.mrf.mxu1 }
 0x2c8   : > { %v1548_v44 = vpop.f32.mrf.mxu1 }
 0x2ca   : > { %v2763_v45 = vpop.f32.mrf.mxu1 }
 0x2cc   : > { %v1551_v47 = vpop.f32.mrf.mxu1 }
 0x319   : > { %v1336_v34 = vpop.permute.xlu1 %1335 }
 0x31a   : > { %1348 = vst.msk [vmem:[#allocation5] sm:$0xff] %vm1347_vm11, %v1336_v34 }
 0x31d   : > { %v1340_v36 = vpop.permute.xlu1 %1339 }
 0x31e   : > { %1350 = vst.msk [vmem:[#allocation5 + $0x10] sm:$0xff] %vm1347_vm11, %v1340_v36 }
 0x321   : > { %v1338_v37 = vpop.permute.xlu0 %1337  ;;  %v1386_v38 = vpop.permute.xlu1 %1385 }
 0x322   : > { %1349 = vst.msk [vmem:[#allocation5 + $0x8] sm:$0xff] %vm1347_vm11, %v1338_v37 }
 0x323   : > { %1398 = vst.msk [vmem:[#allocation5] sm:$0xff] %vm1397_vm12, %v1386_v38 }
 0x325   : > { %v1342_v39 = vpop.permute.xlu0 %1341  ;;  %v1390_v40 = vpop.permute.xlu1 %1389 }
 0x326   : > { %1351 = vst.msk [vmem:[#allocation5 + $0x18] sm:$0xff] %vm1347_vm11, %v1342_v39 }
 0x327   : > { %1400 = vst.msk [vmem:[#allocation5 + $0x10] sm:$0xff] %vm1397_vm12, %v1390_v40 }
 0x329   : > { %v1388_v41 = vpop.permute.xlu0 %1387 }
 0x32a   : > { %1399 = vst.msk [vmem:[#allocation5 + $0x8] sm:$0xff] %vm1397_vm12, %v1388_v41 }
 0x32d   : > { %v1392_v43 = vpop.permute.xlu0 %1391 }
 0x32e   : > { %1401 = vst.msk [vmem:[#allocation5 + $0x18] sm:$0xff] %vm1397_vm12, %v1392_v43 }
 0x338   : > { %v2754_v46 = vpop.f32.mrf.mxu0 }
 0x339   : > { %v1557_v59 = vadd.f32 %v2762_v42, %v2754_v46 }
 0x33a   : > { %v1481_v48 = vpop.f32.mrf.mxu0 }
 0x33b   : > { %v1549_v1 = vadd.f32 %v1548_v44, %v1481_v48 }
 0x33c   : > { %v2755_v49 = vpop.f32.mrf.mxu0  ;;  %v2778_v50 = vpop.f32.mrf.mxu1 }
 0x33d   : > { %v1560_v2 = vadd.f32 %v2763_v45, %v2755_v49 }
 0x33e   : > { %v1484_v51 = vpop.f32.mrf.mxu0  ;;  %v1704_v52 = vpop.f32.mrf.mxu1 }
 0x33f   : > { %v1552_v4 = vadd.f32 %v1551_v47, %v1484_v51 }
 0x340   : > { %v2770_v53 = vpop.f32.mrf.mxu0  ;;  %v2779_v54 = vpop.f32.mrf.mxu1 }
 0x341   : > { %v1641_v62 = vadd.f32 %v2770_v53, %v1557_v59 }
 0x342   : > { %v1624_v55 = vpop.f32.mrf.mxu0  ;;  %v1707_v56 = vpop.f32.mrf.mxu1 }
 0x343   : > { %v1721_v5 = vadd.f32 %v2778_v50, %v1641_v62  ;;  %v1639_v6 = vadd.f32 %v1624_v55, %v1549_v1 }
 0x344   : > { %v2771_v57 = vpop.f32.mrf.mxu0  ;;  %v2794_v58 = vpop.f32.mrf.mxu1 }
 0x345   : > { %v1642_v7 = vadd.f32 %v2771_v57, %v1560_v2  ;;  %v1719_v16 = vadd.f32 %v1704_v52, %v1639_v6 }
 0x346   : > { %v1627_v60 = vpop.f32.mrf.mxu0  ;;  %v1864_v61 = vpop.f32.mrf.mxu1 }
 0x347   : > { %v1640_v11 = vadd.f32 %v1627_v60, %v1552_v4  ;;  %v1722_v17 = vadd.f32 %v2779_v54, %v1642_v7  ;;  %v2563_v54 = vld [vmem:[%s3302_s1] ss:$0 sm:$0xff] }
 0x348   : > { %v2786_v63 = vpop.f32.mrf.mxu0  ;;  %v2795_v0 = vpop.f32.mrf.mxu1 }
 0x349   : > { %v1801_v13 = vadd.f32 %v2786_v63, %v1721_v5  ;;  %v1720_v21 = vadd.f32 %v1707_v56, %v1640_v11 }
 0x34a   : > { %v1784_v3 = vpop.f32.mrf.mxu0  ;;  %v1867_v10 = vpop.f32.mrf.mxu1 }
 0x34b   : > { %v1881_v22 = vadd.f32 %v2794_v58, %v1801_v13  ;;  %v1799_v23 = vadd.f32 %v1784_v3, %v1719_v16 }
 0x34c   : > { %v2787_v8 = vpop.f32.mrf.mxu0  ;;  %v2810_v20 = vpop.f32.mrf.mxu1 }
 0x34d   : > { %v1802_v24 = vadd.f32 %v2787_v8, %v1722_v17  ;;  %v1879_v30 = vadd.f32 %v1864_v61, %v1799_v23  ;;  %v2299_v17 = vld [vmem:[#allocation5 + $0x8] sm:$0xff] }
 0x34e   : > { %v1787_v15 = vpop.f32.mrf.mxu0  ;;  %v2024_v28 = vpop.f32.mrf.mxu1 }
 0x34f   : > { %v1800_v26 = vadd.f32 %v1787_v15, %v1720_v21  ;;  %v1882_v34 = vadd.f32 %v2795_v0, %v1802_v24 }
 0x350   : > { %v2802_v19 = vpop.f32.mrf.mxu0  ;;  %v2811_v41 = vpop.f32.mrf.mxu1 }
 0x351   : > { %v1961_v27 = vadd.f32 %v2802_v19, %v1881_v22  ;;  %v1880_v37 = vadd.f32 %v1867_v10, %v1800_v26 }
 0x352   : > { %v1944_v25 = vpop.f32.mrf.mxu0  ;;  %v2027_v48 = vpop.f32.mrf.mxu1 }
 0x353   : > { %v2041_v38 = vadd.f32 %v2810_v20, %v1961_v27  ;;  %v1959_v39 = vadd.f32 %v1944_v25, %v1879_v30  ;;  %v2300_v27 = vld [vmem:[#allocation5 + $0x10] sm:$0xff] }
 0x354   : > { %v2803_v29 = vpop.f32.mrf.mxu0 }
 0x355   : > { %v1962_v40 = vadd.f32 %v2803_v29, %v1882_v34  ;;  %v2039_v46 = vadd.f32 %v2024_v28, %v1959_v39 }
 0x356   : > { %v1947_v36 = vpop.f32.mrf.mxu0 }
 0x357   : > { %v1960_v43 = vadd.f32 %v1947_v36, %v1880_v37  ;;  %v2042_v47 = vadd.f32 %v2811_v41, %v1962_v40 }
 0x358   : > { %v2818_v42 = vpop.f32.mrf.mxu0 }
 0x359   : > { %v2121_v44 = vadd.f32 %v2818_v42, %v2041_v38  ;;  %v2040_v50 = vadd.f32 %v2027_v48, %v1960_v43 }
 0x35a   : > { %v2104_v45 = vpop.f32.mrf.mxu0 }
 0x35b   : > { %v2149_v51 = vadd.f32 %v3247_v14, %v2121_v44  ;;  %v2119_v52 = vadd.f32 %v2104_v45, %v2039_v46 }
 0x35c   : > { %v2819_v49 = vpop.f32.mrf.mxu0 }
 0x35d   : > { %v2122_v53 = vadd.f32 %v2819_v49, %v2042_v47  ;;  %v2159_v58 = vmul.f32 %v2563_v54, %v2149_v51  ;;  %v2147_v59 = vadd.f32 %v3250_v18, %v2119_v52  ;;  %v2164_v18 = vld [vmem:[%s3307_s6 + $0x18] sm:$0xff] }
 0x35e   : > { %v2107_v55 = vpop.f32.mrf.mxu0 }
 0x35f   : > { %v2150_v56 = vadd.f32 %v3239_v9, %v2122_v53  ;;  %v2120_v57 = vadd.f32 %v2107_v55, %v2040_v50  ;;  %v2157_v0 = vmul.f32 %v2563_v54, %v2147_v59  ;;  %v2167_v14 = vmul.f32 %v2159_v58, %v2159_v58  ;;  %v2162_v9 = vld [vmem:[%s3307_s6 + $0x8] sm:$0xff] }
 0x361   : > { %v2160_v60 = vmul.f32 %v2563_v54, %v2150_v56  ;;  %v2148_v61 = vadd.f32 %v3245_v12, %v2120_v57  ;;  %v2165_v2 = vmul.f32 %v2157_v0, %v2157_v0  ;;  %v2163_v12 = vld [vmem:[%s3307_s6 + $0x10] sm:$0xff] }
 0x363   : > { %v2158_v62 = vmul.f32 %v2563_v54, %v2148_v61  ;;  %v2168_v63 = vmul.f32 %v2160_v60, %v2160_v60 }
 0x365   : > { %2820 = vmatprep.subr.mxu1 %v2168_v63  ;;  %v2166_v1 = vmul.f32 %v2158_v62, %v2158_v62 }
 0x366   : > { %2821 = vmatpush3.msra.mxu1 %v2168_v63 }
 0x367   : > { %2822 = vmatprep.subr.mxu1 %v2167_v14 }
 0x368   : > { %2823 = vmatpush3.msra.mxu1 %v2167_v14 }
 0x369   : > { %2824 = vmatprep.subr.mxu1 %v2166_v1 }
 0x36a   : > { %2825 = vmatpush3.msra.mxu1 %v2166_v1 }
 0x36b   : > { %2826 = vmatprep.subr.mxu1 %v2165_v2 }
 0x36c   : > { %2827 = vmatpush3.msra.mxu1 %v2165_v2 }
 0x36d   : > { %2829 = vmatmul.mubr.msk.f32.vlgmr.msra.gmra.mxu1 %vm402_vm0, %v2162_v9 }
 0x36e   : > { %2831 = vmatprep.mubr.msk.f32.mxu1 %vm402_vm0, %v2163_v12 }
 0x371   : > { %2832 = vmatmul.mubr.msk.f32.gmra.mxu1 %vm402_vm0, %v2164_v18 }
 0x42d   : > { %v2830_v3 = vpop.f32.mrf.mxu1 }
 0x42e   : > { %v2277_v4 = vadd.f32 %v2830_v3, %v3263_v33 }
 0x42f   : > { %v2271_v5 = vpop.f32.mrf.mxu1 }
 0x430   : > { %2907 = vrsqrt.f32 %v2277_v4  ;;  %v2272_v6 = vadd.f32 %v2271_v5, %v3259_v31  ;;  %v2298_v31 = vld [vmem:[#allocation5] sm:$0xff] }
 0x431   : > { %v2833_v7 = vpop.f32.mrf.mxu1 }
 0x432   : > { %2909 = vrsqrt.f32 %v2272_v6  ;;  %v2287_v8 = vadd.f32 %v2833_v7, %v3265_v35 }
 0x433   : > { %v2281_v10 = vpop.f32.mrf.mxu1 }
 0x434   : > { %2911 = vrsqrt.f32 %v2287_v8  ;;  %v2282_v11 = vadd.f32 %v2281_v10, %v3261_v32  ;;  %v2301_v32 = vld [vmem:[#allocation5 + $0x18] sm:$0xff] }
 0x436   : > { %2913 = vrsqrt.f32 %v2282_v11 }
 0x43d   : > { %v2908_v13 = vpop.eup %2907 }
 0x43e   : > { %v2295_v15 = vmul.f32 %v2908_v13, %v2158_v62 }
 0x43f   : > { %v2910_v16 = vpop.eup %2909 }
 0x440   : > { %v2303_v19 = vadd.f32 %v2299_v17, %v2295_v15  ;;  %v2294_v33 = vmul.f32 %v2910_v16, %v2157_v0 }
 0x441   : > { %v2912_v20 = vpop.eup %2911 }
 0x442   : > { %v2581_v35 = vpack.c.bf16 %v2303_v19, %v2303_v19  ;;  %v2302_v21 = vadd.f32 %v2298_v31, %v2294_v33  ;;  %v2297_v22 = vmul.f32 %v2912_v20, %v2160_v60 }
 0x443   : > { %v2914_v23 = vpop.eup %2913 }
 0x444   : > { %2324 = vst.msk [vmem:[%s359_s16 + $0x4] sm:$0xf] %vm2322_vm13, %v2581_v35  ;;  %v2580_v24 = vpack.c.bf16 %v2302_v21, %v2302_v21  ;;  %v2305_v25 = vadd.f32 %v2301_v32, %v2297_v22  ;;  %v2296_v26 = vmul.f32 %v2914_v23, %v2159_v58 }
 0x446   : > { %2323 = vst.msk [vmem:[%s359_s16] sm:$0xf] %vm2322_vm13, %v2580_v24  ;;  %v2583_v28 = vpack.c.bf16 %v2305_v25, %v2305_v25  ;;  %v2304_v29 = vadd.f32 %v2300_v27, %v2296_v26 }
 0x448   : > { %2326 = vst.msk [vmem:[%s359_s16 + $0xc] sm:$0xf] %vm2322_vm13, %v2583_v28  ;;  %v2582_v30 = vpack.c.bf16 %v2304_v29, %v2304_v29 }
 0x44a   : > { %2325 = vst.msk [vmem:[%s359_s16 + $0x8] sm:$0xf] %vm2322_vm13, %v2582_v30 }
 0x44b PF: > { %s20_s13 = sadd.s32 1, %s2921_s13  }
 0x44c   : > { %p17_p4 = scmp.ge.s32.totalorder %s20_s13, 4  }
 0x44e   :  { %19 = sbr.rel (!%p17_p4) target bundleno = 1 (0x1), region = 109 }

// kernel: analysis_transform.13
= control target key start
LH: loop header
LB: loop body
LE: loop exit
PB: predicated region body
PF: predicated region fallthrough
CT: control target
= control target key end

     0   :  { %s1619_s12 = smov 0   ;;  %s1933_s0 = inlined_call_operand.vmem [shape: bf16[2,4,32,7], index: 0, kind: input, shape index: {}]   ;;  %s1934_s1 = inlined_call_operand.vmem [shape: bf16[9,48,32], index: 1, kind: input, shape index: {}]   ;;  %s1935_s2 = inlined_call_operand.vmem [shape: f32[48,1], index: 2, kind: input, shape index: {}]   ;;  %s1936_s3 = inlined_call_operand.vmem [shape: f32[2,48,4], index: 3, kind: output, shape index: {}]  }
   0x1 LB: > { %s1207_s13 = sadd.s32 4294967295, %s1591_s12   ;;  %p1211_p0 = scmp.ge.s32.totalorder %s1591_s12, 1  ;;  %s1591_s12 = sphi %s1619_s12, %s13_s12  }
   0x2   : > { %p137_p1 = scmp.lt.s32.totalorder %s1591_s12, 3 }
   0x4   : > { %p138_p2 = pnand %p1211_p0, %p137_p1 }
   0x5   : > { %p161_p3 = scmp.lt.s32.totalorder (!%p138_p2), %s1207_s13, 1  ;;  %s1595_s18 = smov (!%p138_p2), 127  }
   0x6   : > { %141 = sbr.rel (%p138_p2) target bundleno = 427 (0x1ab), region = 32  ;;  %s1596_s19 = smov (!%p138_p2), 126  }
   0x7   : > { %s1597_s26 = smov (!%p138_p2), 125  }
   0xb   : > { %v1593_v0 = vmov 0.0   ;;  %vm1594_vm0 = vmmov 0   ;;  %s1938_s13 = smov (!%p161_p3, %s1207_s13), 1  ;;  %v1556_v7 = vld [vmem:[%s1934_s1 + $0x20] sm:$0xff]   ;;  %vm221_vm1 = vcmask 261120   ;;  %v1560_v8 = vld [vmem:[%s1934_s1 + $0x18] sm:$0xff]  }
   0xc   : > { %1529 = vmatprep.subr.bf16.mxu1 %v1593_v0  ;;  %1393 = vmatprep.mubr.msk.bf16.mxu1 %vm1594_vm0, %v1593_v0  ;;  %s1339_s14 = sshll.u32 %s1938_s13, 6  ;;  %v1557_v9 = vld [vmem:[%s1934_s1 + $0x28] sm:$0xff]   ;;  %v1558_v10 = vld [vmem:[%s1934_s1] sm:$0xff]   ;;  %v1561_v12 = vld [vmem:[%s1934_s1 + $0x10] sm:$0xff]   ;;  %v1598_v18 = vmov 0   ;;  %s1533_s10 = smul.u32 48, %s1938_s13 }
   0xd   : > { %1385 = vmatprep.subr.bf16.mxu0 %v1593_v0  ;;  %1389 = vmatprep.mubr.msk.bf16.mxu0 %vm1594_vm0, %v1593_v0  ;;  %s1639_s17 = scalar_lea.vmem %s1933_s0, %s1339_s14  ;;  %v1559_v11 = vld [vmem:[%s1934_s1 + $0x8] sm:$0xff]   ;;  %v1566_v14 = vld [vmem:[%s1934_s1 + $0x50] sm:$0xff]   ;;  %v1569_v15 = vld [vmem:[%s1934_s1 + $0x58] sm:$0xff]   ;;  %vm1145_vm2 = vcmask 31744  }
   0xe   : > { %v1550_v1 = vld [vmem:[%s1639_s17 + $0x8] sm:$0xff]   ;;  %v1551_v2 = vld [vmem:[%s1639_s17] sm:$0xff]   ;;  %v1554_v4 = vld [vmem:[%s1639_s17 + $0x18] sm:$0xff]   ;;  %1548 = vset.pattern.permute.xlu0 %v1598_v18  ;;  %1549 = vset.pattern.permute.xlu1 %v1598_v18  ;;  %s1905_s15 = scalar_lea.vmem %s1936_s3, %s1533_s10 }
   0xf   : > { %405 = vrot.lane.b32.xlu0 %v1550_v1, %s1595_s18  ;;  %v1552_v3 = vld [vmem:[%s1639_s17 + $0x28] sm:$0xff]   ;;  %v1553_v5 = vld [vmem:[%s1639_s17 + $0x20] sm:$0xff]   ;;  %1531 = vmatpush3.bf16.msra.mxu1 %v1554_v4  ;;  %v1555_v6 = vld [vmem:[%s1639_s17 + $0x10] sm:$0xff]  }
  0x10   : > { %727 = vrot.lane.b32.xlu1 %v1552_v3, %s1595_s18  ;;  %1530 = vmatprep.subr.bf16.mxu1 %v1593_v0  ;;  %v1564_v13 = vld [vmem:[%s1934_s1 + $0x48] sm:$0xff]   ;;  %v1103_v16 = vld [vmem:[%s1935_s2] sm:$0xff]  ;;  %v1105_v19 = vld [vmem:[%s1935_s2 + $0x10] sm:$0xff] }
  0x11   : > { %1386 = vmatpush3.bf16.msra.mxu0 %v1554_v4  ;;  %v1104_v17 = vld [vmem:[%s1935_s2 + $0x8] sm:$0xff]  ;;  %v1106_v20 = vld [vmem:[%s1935_s2 + $0x18] sm:$0xff]  ;;  %v1107_v21 = vld [vmem:[%s1935_s2 + $0x20] sm:$0xff] }
  0x12   : > { %1387 = vmatprep.subr.bf16.mxu0 %v1593_v0  ;;  %v1108_v22 = vld [vmem:[%s1935_s2 + $0x28] sm:$0xff]  ;;  %v1562_v26 = vld [vmem:[%s1934_s1 + $0x30] sm:$0xff]   ;;  %v1563_v27 = vld [vmem:[%s1639_s17 + $0x38] sm:$0xff]  }
  0x13   : > { %403 = vrot.lane.b32.xlu0 %v1551_v2, %s1595_s18  ;;  %1532 = vmatpush3.bf16.msra.mxu1 %v1555_v6  ;;  %v1567_v29 = vld [vmem:[%s1639_s17 + $0x30] sm:$0xff]   ;;  %v1571_v30 = vld [vmem:[%s1934_s1 + $0x78] sm:$0xff]   ;;  %v1573_v34 = vld [vmem:[%s1934_s1 + $0x80] sm:$0xff]  }
  0x14   : > { %827 = vrot.lane.b32.xlu1 %v1550_v1, %s1596_s19  ;;  %1401 = vmatprep.subr.bf16.mxu1 %v1593_v0  ;;  %v1565_v31 = vld [vmem:[%s1934_s1 + $0x38] sm:$0xff]   ;;  %v1568_v35 = vld [vmem:[%s1934_s1 + $0x40] sm:$0xff]   ;;  %v1575_v36 = vld [vmem:[%s1934_s1 + $0x88] sm:$0xff]  }
  0x15   : > { %1388 = vmatpush3.bf16.msra.mxu0 %v1555_v6  ;;  %v1570_v38 = vld [vmem:[%s1934_s1 + $0x60] sm:$0xff]   ;;  %v1577_v39 = vld [vmem:[%s1934_s1 + $0xa8] sm:$0xff]   ;;  %v1579_v42 = vld [vmem:[%s1934_s1 + $0xb0] sm:$0xff]  }
  0x16   : > { %1417 = vmatprep.subr.bf16.mxu0 %v1593_v0  ;;  %1394 = vmatmul.mubr.msk.bf16.vlgmr.msra.gmra.mxu1 %vm221_vm1, %v1556_v7  ;;  %v1572_v41 = vld [vmem:[%s1934_s1 + $0x68] sm:$0xff]   ;;  %v1574_v43 = vld [vmem:[%s1934_s1 + $0x70] sm:$0xff]   ;;  %v1581_v44 = vld [vmem:[%s1934_s1 + $0xb8] sm:$0xff]  }
  0x17   : > { %725 = vrot.lane.b32.xlu0 %v1553_v5, %s1595_s18  ;;  %1397 = vmatprep.mubr.msk.bf16.mxu1 %vm1594_vm0, %v1593_v0  ;;  %v1576_v46 = vld [vmem:[%s1934_s1 + $0x90] sm:$0xff]   ;;  %v1578_v48 = vld [vmem:[%s1934_s1 + $0x98] sm:$0xff]   ;;  %v1580_v49 = vld [vmem:[%s1934_s1 + $0xa0] sm:$0xff]  }
  0x18   : > { %825 = vrot.lane.b32.xlu1 %v1551_v2, %s1596_s19  ;;  %1402 = vmatpush3.bf16.msra.mxu1 %v1550_v1  ;;  %v1582_v50 = vld [vmem:[%s1934_s1 + $0xc0] sm:$0xff]   ;;  %v1583_v51 = vld [vmem:[%s1934_s1 + $0xc8] sm:$0xff]   ;;  %v1584_v55 = vld [vmem:[%s1934_s1 + $0xd0] sm:$0xff]  }
  0x19   : > { %1390 = vmatmul.mubr.msk.bf16.vlgmr.msra.gmra.mxu0 %vm221_vm1, %v1560_v8  ;;  %1403 = vmatprep.subr.bf16.mxu1 %v1593_v0 }
  0x1a   : > { %1421 = vmatprep.mubr.msk.bf16.mxu0 %vm1594_vm0, %v1593_v0 }
  0x1b   : > { %927 = vrot.lane.b32.xlu0 %v1554_v4, %s1596_s19 }
  0x1c   : > { %1027 = vrot.lane.b32.xlu1 %v1550_v1, %s1597_s26  ;;  %1404 = vmatpush3.bf16.msra.mxu1 %v1551_v2 }
  0x1d   : > { %1433 = vmatprep.subr.bf16.mxu1 %v1593_v0 }
  0x1e   : > { %1398 = vmatmul.mubr.msk.bf16.gmra.mxu1 %vm221_vm1, %v1557_v9 }
  0x1f   : > { %925 = vrot.lane.b32.xlu0 %v1555_v6, %s1596_s19  ;;  %1405 = vmatprep.mubr.msk.bf16.mxu1 %vm1594_vm0, %v1593_v0 }
  0x20   : > { %1025 = vrot.lane.b32.xlu1 %v1551_v2, %s1597_s26 }
  0x23   : > { %1111 = vperm.xlu0 %1548, %v1103_v16  }
  0x24   : > { %1116 = vperm.xlu1 %1549, %v1104_v17  }
  0x26   : > { %1406 = vmatmul.mubr.msk.bf16.vlgmr.msra.gmra.mxu1 %vm221_vm1, %v1558_v10 }
  0x27   : > { %1409 = vmatprep.mubr.msk.bf16.mxu1 %vm1594_vm0, %v1593_v0  ;;  %1434 = vmatpush3.bf16.msra.mxu1 %v1552_v3 }
  0x28   : > { %1435 = vmatprep.subr.bf16.mxu1 %v1593_v0  ;;  %1121 = vperm.xlu1 %1549, %v1105_v19  }
  0x29   : > { %1126 = vperm.xlu0 %1548, %v1106_v20  }
  0x2b   : > { %1436 = vmatpush3.bf16.msra.mxu1 %v1553_v5 }
  0x2c   : > { %1465 = vmatprep.subr.bf16.mxu1 %v1593_v0  ;;  %1131 = vperm.xlu1 %1549, %v1107_v21  }
  0x2d   : > { %1136 = vperm.xlu0 %1548, %v1108_v22  }
  0x2e   : > { %1410 = vmatmul.mubr.msk.bf16.gmra.mxu1 %vm221_vm1, %v1559_v11 }
  0x2f   : > { %1413 = vmatprep.mubr.msk.bf16.mxu1 %vm1594_vm0, %v1593_v0 }
  0x36   : > { %1414 = vmatmul.mubr.msk.bf16.gmra.mxu1 %vm221_vm1, %v1561_v12 }
  0x37   : > { %1437 = vmatprep.mubr.msk.bf16.mxu1 %vm1594_vm0, %v1593_v0 }
  0x3e   : > { %1438 = vmatmul.mubr.msk.bf16.vlgmr.msra.gmra.mxu1 %vm221_vm1, %v1564_v13 }
  0x3f   : > { %1441 = vmatprep.mubr.msk.bf16.mxu1 %vm1594_vm0, %v1593_v0 }
  0x46   : > { %1442 = vmatmul.mubr.msk.bf16.gmra.mxu1 %vm221_vm1, %v1566_v14 }
  0x47   : > { %1445 = vmatprep.mubr.msk.bf16.mxu1 %vm1594_vm0, %v1593_v0 }
  0x4e   : > { %1446 = vmatmul.mubr.msk.bf16.gmra.mxu1 %vm221_vm1, %v1569_v15 }
  0x4f   : > { %1469 = vmatprep.mubr.msk.bf16.mxu1 %vm1594_vm0, %v1593_v0 }
  0x81   : > { %v406_v23 = vpop.permute.xlu0 %405 }
  0x82   : > { %1418 = vmatpush3.bf16.msra.mxu0 %v406_v23  ;;  %v728_v24 = vpop.permute.xlu1 %727 }
  0x83   : > { %1419 = vmatprep.subr.bf16.mxu0 %v1593_v0  ;;  %1466 = vmatpush3.bf16.msra.mxu1 %v728_v24 }
  0x84   : > { %1467 = vmatprep.subr.bf16.mxu1 %v1593_v0 }
  0x85   : > { %v404_v25 = vpop.permute.xlu0 %403 }
  0x86   : > { %1420 = vmatpush3.bf16.msra.mxu0 %v404_v25  ;;  %v828_v37 = vpop.permute.xlu1 %827 }
  0x87   : > { %1449 = vmatprep.subr.bf16.mxu0 %v1593_v0 }
  0x89   : > { %1422 = vmatmul.mubr.msk.bf16.vlgmr.msra.gmra.mxu0 %vm221_vm1, %v1562_v26  ;;  %v726_v28 = vpop.permute.xlu0 %725 }
  0x8a   : > { %1450 = vmatpush3.bf16.msra.mxu0 %v1563_v27  ;;  %1425 = vmatprep.mubr.msk.bf16.mxu0 %vm1594_vm0, %v1593_v0  ;;  %v826_v40 = vpop.permute.xlu1 %825 }
  0x8b   : > { %1451 = vmatprep.subr.bf16.mxu0 %v1593_v0  ;;  %1468 = vmatpush3.bf16.msra.mxu1 %v726_v28 }
  0x8c   : > { %1497 = vmatprep.subr.bf16.mxu1 %v1593_v0 }
  0x8d   : > { %v928_v32 = vpop.permute.xlu0 %927 }
  0x8e   : > { %1452 = vmatpush3.bf16.msra.mxu0 %v1567_v29  ;;  %1470 = vmatmul.mubr.msk.bf16.vlgmr.msra.gmra.mxu1 %vm221_vm1, %v1571_v30  ;;  %v1028_v45 = vpop.permute.xlu1 %1027 }
  0x8f   : > { %1481 = vmatprep.subr.bf16.mxu0 %v1593_v0  ;;  %1473 = vmatprep.mubr.msk.bf16.mxu1 %vm1594_vm0, %v1593_v0 }
  0x90   : > { %1498 = vmatpush3.bf16.msra.mxu1 %v928_v32 }
  0x91   : > { %1426 = vmatmul.mubr.msk.bf16.gmra.mxu0 %vm221_vm1, %v1565_v31  ;;  %v926_v33 = vpop.permute.xlu0 %925  ;;  %1499 = vmatprep.subr.bf16.mxu1 %v1593_v0 }
  0x92   : > { %1429 = vmatprep.mubr.msk.bf16.mxu0 %vm1594_vm0, %v1593_v0  ;;  %v1026_v47 = vpop.permute.xlu1 %1025 }
  0x94   : > { %1500 = vmatpush3.bf16.msra.mxu1 %v926_v33 }
  0x96   : > { %1474 = vmatmul.mubr.msk.bf16.gmra.mxu1 %vm221_vm1, %v1573_v34 }
  0x97   : > { %1477 = vmatprep.mubr.msk.bf16.mxu1 %vm1594_vm0, %v1593_v0 }
  0x99   : > { %1430 = vmatmul.mubr.msk.bf16.gmra.mxu0 %vm221_vm1, %v1568_v35 }
  0x9a   : > { %1453 = vmatprep.mubr.msk.bf16.mxu0 %vm1594_vm0, %v1593_v0 }
  0x9e   : > { %1478 = vmatmul.mubr.msk.bf16.gmra.mxu1 %vm221_vm1, %v1575_v36 }
  0x9f   : > { %1501 = vmatprep.mubr.msk.bf16.mxu1 %vm1594_vm0, %v1593_v0 }
  0xa1   : > { %1454 = vmatmul.mubr.msk.bf16.vlgmr.msra.gmra.mxu0 %vm221_vm1, %v1570_v38 }
  0xa2   : > { %1482 = vmatpush3.bf16.msra.mxu0 %v828_v37  ;;  %1457 = vmatprep.mubr.msk.bf16.mxu0 %vm1594_vm0, %v1593_v0 }
  0xa3   : > { %1483 = vmatprep.subr.bf16.mxu0 %v1593_v0 }
  0xa6   : > { %1484 = vmatpush3.bf16.msra.mxu0 %v826_v40  ;;  %1502 = vmatmul.mubr.msk.bf16.vlgmr.msra.gmra.mxu1 %vm221_vm1, %v1577_v39 }
  0xa7   : > { %1513 = vmatprep.subr.bf16.mxu0 %v1593_v0  ;;  %1505 = vmatprep.mubr.msk.bf16.mxu1 %vm1594_vm0, %v1593_v0 }
  0xa9   : > { %1458 = vmatmul.mubr.msk.bf16.gmra.mxu0 %vm221_vm1, %v1572_v41 }
  0xaa   : > { %1461 = vmatprep.mubr.msk.bf16.mxu0 %vm1594_vm0, %v1593_v0 }
  0xae   : > { %1506 = vmatmul.mubr.msk.bf16.gmra.mxu1 %vm221_vm1, %v1579_v42 }
  0xaf   : > { %1509 = vmatprep.mubr.msk.bf16.mxu1 %vm1594_vm0, %v1593_v0 }
  0xb1   : > { %1462 = vmatmul.mubr.msk.bf16.gmra.mxu0 %vm221_vm1, %v1574_v43 }
  0xb2   : > { %1485 = vmatprep.mubr.msk.bf16.mxu0 %vm1594_vm0, %v1593_v0 }
  0xb6   : > { %1510 = vmatmul.mubr.msk.bf16.gmra.mxu1 %vm221_vm1, %v1581_v44 }
  0xb9   : > { %1486 = vmatmul.mubr.msk.bf16.vlgmr.msra.gmra.mxu0 %vm221_vm1, %v1576_v46 }
  0xba   : > { %1514 = vmatpush3.bf16.msra.mxu0 %v1028_v45  ;;  %1489 = vmatprep.mubr.msk.bf16.mxu0 %vm1594_vm0, %v1593_v0 }
  0xbb   : > { %1515 = vmatprep.subr.bf16.mxu0 %v1593_v0 }
  0xbe   : > { %1516 = vmatpush3.bf16.msra.mxu0 %v1026_v47 }
  0xc1   : > { %1490 = vmatmul.mubr.msk.bf16.gmra.mxu0 %vm221_vm1, %v1578_v48 }
  0xc2   : > { %1493 = vmatprep.mubr.msk.bf16.mxu0 %vm1594_vm0, %v1593_v0 }
  0xc9   : > { %1494 = vmatmul.mubr.msk.bf16.gmra.mxu0 %vm221_vm1, %v1580_v49 }
  0xca   : > { %1517 = vmatprep.mubr.msk.bf16.mxu0 %vm1594_vm0, %v1593_v0 }
  0xd1   : > { %1518 = vmatmul.mubr.msk.bf16.vlgmr.msra.gmra.mxu0 %vm221_vm1, %v1582_v50 }
  0xd2   : > { %1521 = vmatprep.mubr.msk.bf16.mxu0 %vm1594_vm0, %v1593_v0 }
  0xd6   : > { %v273_v52 = vpop.f32.mrf.mxu1 }
  0xd8   : > { %v1395_v53 = vpop.f32.mrf.mxu1 }
  0xd9   : > { %1522 = vmatmul.mubr.msk.bf16.gmra.mxu0 %vm221_vm1, %v1583_v51  ;;  %v265_v54 = vpop.f32.mrf.mxu0 }
  0xda   : > { %1525 = vmatprep.mubr.msk.bf16.mxu0 %vm1594_vm0, %v1593_v0  ;;  %v276_v56 = vpop.f32.mrf.mxu1 }
  0xdb   : > { %v1391_v57 = vpop.f32.mrf.mxu0 }
  0xdc   : > { %v1396_v58 = vpop.f32.mrf.mxu1 }
  0xdd   : > { %v268_v59 = vpop.f32.mrf.mxu0 }
  0xde   : > { %v281_v60 = vpop.f32.mrf.mxu1 }
  0xdf   : > { %v1392_v61 = vpop.f32.mrf.mxu0 }
  0xe0   : > { %v1399_v62 = vpop.f32.mrf.mxu1 }
  0xe1   : > { %1526 = vmatmul.mubr.msk.bf16.gmra.mxu0 %vm221_vm1, %v1584_v55 }
  0xe2   : > { %v284_v63 = vpop.f32.mrf.mxu1 }
  0xe4   : > { %v1400_v1 = vpop.f32.mrf.mxu1 }
  0xe6   : > { %v358_v2 = vpop.f32.mrf.mxu1 }
  0xe7   : > { %v1843_v0 = vadd.f32 %v358_v2, %v265_v54 }
  0xe8   : > { %v1407_v3 = vpop.f32.mrf.mxu1 }
  0xea   : > { %v361_v4 = vpop.f32.mrf.mxu1 }
  0xeb   : > { %v1845_v5 = vadd.f32 %v361_v4, %v268_v59 }
  0xec   : > { %v1408_v6 = vpop.f32.mrf.mxu1 }
  0xee   : > { %v366_v7 = vpop.f32.mrf.mxu1 }
  0xef   : > { %v1847_v8 = vadd.f32 %v366_v7, %v273_v52 }
  0xf0   : > { %v1411_v9 = vpop.f32.mrf.mxu1 }
  0xf2   : > { %v369_v10 = vpop.f32.mrf.mxu1 }
  0xf3   : > { %v1849_v11 = vadd.f32 %v369_v10, %v276_v56 }
  0xf4   : > { %v1412_v12 = vpop.f32.mrf.mxu1 }
  0xf6   : > { %v374_v13 = vpop.f32.mrf.mxu1 }
  0xf7   : > { %v1851_v14 = vadd.f32 %v374_v13, %v281_v60 }
  0xf8   : > { %v1415_v15 = vpop.f32.mrf.mxu1 }
  0xfa   : > { %v377_v16 = vpop.f32.mrf.mxu1 }
  0xfb   : > { %v1853_v17 = vadd.f32 %v377_v16, %v284_v63 }
  0xfc   : > { %v1416_v18 = vpop.f32.mrf.mxu1 }
  0xfe   : > { %v1855_v19 = vpop.f32.mrf.mxu1 }
 0x100   : > { %v1439_v20 = vpop.f32.mrf.mxu1 }
 0x102   : > { %v1857_v21 = vpop.f32.mrf.mxu1 }
 0x104   : > { %v1440_v22 = vpop.f32.mrf.mxu1 }
 0x106   : > { %v1859_v23 = vpop.f32.mrf.mxu1 }
 0x108   : > { %v1443_v24 = vpop.f32.mrf.mxu1 }
 0x10a   : > { %v1861_v25 = vpop.f32.mrf.mxu1 }
 0x10c   : > { %v1444_v26 = vpop.f32.mrf.mxu1 }
 0x10e   : > { %v1863_v27 = vpop.f32.mrf.mxu1 }
 0x110   : > { %v1447_v28 = vpop.f32.mrf.mxu1 }
 0x112   : > { %v1865_v29 = vpop.f32.mrf.mxu1 }
 0x114   : > { %v1448_v30 = vpop.f32.mrf.mxu1 }
 0x149   : > { %v452_v31 = vpop.f32.mrf.mxu0 }
 0x14b   : > { %v1423_v32 = vpop.f32.mrf.mxu0 }
 0x14c   : > { %v475_v32 = vadd.f32 %v452_v31, %v1843_v0 }
 0x14d   : > { %v455_v33 = vpop.f32.mrf.mxu0 }
 0x14e   : > { %v774_v34 = vpop.f32.mrf.mxu1 }
 0x14f   : > { %v1424_v35 = vpop.f32.mrf.mxu0 }
 0x150   : > { %v1471_v36 = vpop.f32.mrf.mxu1 }
 0x151   : > { %v460_v37 = vpop.f32.mrf.mxu0 }
 0x152   : > { %v1867_v38 = vpop.f32.mrf.mxu1 }
 0x153   : > { %v1427_v39 = vpop.f32.mrf.mxu0 }
 0x154   : > { %v1472_v40 = vpop.f32.mrf.mxu1  ;;  %v586_v39 = vadd.f32 %v1855_v19, %v475_v32 }
 0x155   : > { %v463_v41 = vpop.f32.mrf.mxu0  ;;  %v476_v40 = vadd.f32 %v455_v33, %v1845_v5 }
 0x156   : > { %v1869_v42 = vpop.f32.mrf.mxu1  ;;  %v478_v31 = vadd.f32 %v463_v41, %v1849_v11 }
 0x157   : > { %v1428_v43 = vpop.f32.mrf.mxu0 }
 0x158   : > { %v1475_v44 = vpop.f32.mrf.mxu1 }
 0x159   : > { %v468_v45 = vpop.f32.mrf.mxu0 }
 0x15a   : > { %v1871_v46 = vpop.f32.mrf.mxu1 }
 0x15b   : > { %v1431_v47 = vpop.f32.mrf.mxu0 }
 0x15c   : > { %v1476_v48 = vpop.f32.mrf.mxu1 }
 0x15d   : > { %v1873_v49 = vpop.f32.mrf.mxu0  ;;  %v587_v48 = vadd.f32 %v1857_v21, %v476_v40  ;;  %v589_v21 = vadd.f32 %v1861_v25, %v478_v31 }
 0x15e   : > { %v1875_v50 = vpop.f32.mrf.mxu1  ;;  %v480_v25 = vadd.f32 %v1873_v49, %v1853_v17 }
 0x15f   : > { %v1432_v51 = vpop.f32.mrf.mxu0 }
 0x160   : > { %v1479_v52 = vpop.f32.mrf.mxu1  ;;  %v477_v51 = vadd.f32 %v460_v37, %v1847_v8 }
 0x161   : > { %v674_v53 = vpop.f32.mrf.mxu0 }
 0x162   : > { %v1877_v54 = vpop.f32.mrf.mxu1  ;;  %v697_v44 = vadd.f32 %v674_v53, %v586_v39  ;;  %v588_v0 = vadd.f32 %v1859_v23, %v477_v51  ;;  %v479_v53 = vadd.f32 %v468_v45, %v1851_v14  ;;  %v1117_v14 = vpop.permute.xlu1 %1116 }
 0x163   : > { %v1455_v55 = vpop.f32.mrf.mxu0 }
 0x164   : > { %v1480_v56 = vpop.f32.mrf.mxu1  ;;  %v797_v55 = vadd.f32 %v774_v34, %v697_v44  ;;  %v590_v11 = vadd.f32 %v1863_v27, %v479_v53 }
 0x165   : > { %v677_v57 = vpop.f32.mrf.mxu0 }
 0x166   : > { %v974_v58 = vpop.f32.mrf.mxu1  ;;  %v698_v56 = vadd.f32 %v677_v57, %v587_v48  ;;  %v1112_v57 = vpop.permute.xlu0 %1111 }
 0x167   : > { %v1456_v59 = vpop.f32.mrf.mxu0  ;;  %v1122_v49 = vpop.permute.xlu1 %1121 }
 0x168   : > { %v1503_v60 = vpop.f32.mrf.mxu1  ;;  %v798_v5 = vadd.f32 %v1867_v38, %v698_v56 }
 0x169   : > { %v682_v61 = vpop.f32.mrf.mxu0 }
 0x16a   : > { %v977_v62 = vpop.f32.mrf.mxu1  ;;  %v699_v33 = vadd.f32 %v682_v61, %v588_v0  ;;  %v1127_v32 = vpop.permute.xlu0 %1126 }
 0x16b   : > { %v1459_v63 = vpop.f32.mrf.mxu0  ;;  %v1132_v40 = vpop.permute.xlu1 %1131 }
 0x16c   : > { %v1504_v1 = vpop.f32.mrf.mxu1 }
 0x16d   : > { %v685_v2 = vpop.f32.mrf.mxu0  ;;  %v799_v1 = vadd.f32 %v1869_v42, %v699_v33 }
 0x16e   : > { %v1879_v3 = vpop.f32.mrf.mxu1  ;;  %v700_v23 = vadd.f32 %v685_v2, %v589_v21  ;;  %v1137_v51 = vpop.permute.xlu0 %1136 }
 0x16f   : > { %v1460_v4 = vpop.f32.mrf.mxu0 }
 0x170   : > { %v1507_v6 = vpop.f32.mrf.mxu1  ;;  %v800_v61 = vadd.f32 %v1871_v46, %v700_v23 }
 0x171   : > { %v690_v7 = vpop.f32.mrf.mxu0 }
 0x172   : > { %v1881_v9 = vpop.f32.mrf.mxu1  ;;  %v701_v27 = vadd.f32 %v690_v7, %v590_v11 }
 0x173   : > { %v1463_v10 = vpop.f32.mrf.mxu0 }
 0x174   : > { %v1508_v12 = vpop.f32.mrf.mxu1  ;;  %v591_v10 = vadd.f32 %v1865_v29, %v480_v25 }
 0x175   : > { %v1883_v13 = vpop.f32.mrf.mxu0 }
 0x176   : > { %v1885_v15 = vpop.f32.mrf.mxu1 }
 0x177   : > { %v1464_v16 = vpop.f32.mrf.mxu0 }
 0x178   : > { %v1511_v18 = vpop.f32.mrf.mxu1 }
 0x179   : > { %v874_v20 = vpop.f32.mrf.mxu0 }
 0x17a   : > { %v1887_v22 = vpop.f32.mrf.mxu1  ;;  %v897_v60 = vadd.f32 %v874_v20, %v797_v55  ;;  %v702_v20 = vadd.f32 %v1883_v13, %v591_v10 }
 0x17b   : > { %v1487_v24 = vpop.f32.mrf.mxu0 }
 0x17c   : > { %v1512_v26 = vpop.f32.mrf.mxu1  ;;  %v997_v8 = vadd.f32 %v974_v58, %v897_v60 }
 0x17d   : > { %v877_v28 = vpop.f32.mrf.mxu0 }
 0x17e   : > { %v898_v37 = vadd.f32 %v877_v28, %v798_v5 }
 0x17f   : > { %v1488_v30 = vpop.f32.mrf.mxu0 }
 0x180   : > { %v998_v38 = vadd.f32 %v977_v62, %v898_v37  ;;  %v801_v62 = vadd.f32 %v1875_v50, %v701_v27 }
 0x181   : > { %v882_v35 = vpop.f32.mrf.mxu0 }
 0x182   : > { %v899_v45 = vadd.f32 %v882_v35, %v799_v1 }
 0x183   : > { %v1491_v36 = vpop.f32.mrf.mxu0 }
 0x184   : > { %v999_v12 = vadd.f32 %v1879_v3, %v899_v45  ;;  %v802_v3 = vadd.f32 %v1877_v54, %v702_v20 }
 0x185   : > { %v885_v43 = vpop.f32.mrf.mxu0 }
 0x186   : > { %v900_v16 = vadd.f32 %v885_v43, %v800_v61 }
 0x187   : > { %v1492_v47 = vpop.f32.mrf.mxu0 }
 0x188   : > { %v1000_v24 = vadd.f32 %v1881_v9, %v900_v16 }
 0x189   : > { %v890_v52 = vpop.f32.mrf.mxu0 }
 0x18a   : > { %v901_v26 = vadd.f32 %v890_v52, %v801_v62 }
 0x18b   : > { %v1495_v59 = vpop.f32.mrf.mxu0 }
 0x18c   : > { %v1001_v13 = vadd.f32 %v1885_v15, %v901_v26 }
 0x18d   : > { %v893_v19 = vpop.f32.mrf.mxu0 }
 0x18e   : > { %v902_v35 = vadd.f32 %v893_v19, %v802_v3 }
 0x18f   : > { %v1496_v63 = vpop.f32.mrf.mxu0 }
 0x190   : > { %v1002_v44 = vadd.f32 %v1887_v22, %v902_v35 }
 0x191   : > { %v1074_v34 = vpop.f32.mrf.mxu0 }
 0x192   : > { %v1097_v4 = vadd.f32 %v1074_v34, %v997_v8 }
 0x193   : > { %v1519_v41 = vpop.f32.mrf.mxu0 }
 0x194   : > { %v1139_v42 = vadd.f32 %v1112_v57, %v1097_v4 }
 0x195   : > { %v1077_v58 = vpop.f32.mrf.mxu0 }
 0x196   : > { %1146 = vst.msk [vmem:[%s1905_s15] sm:$0xff] %vm1145_vm2, %v1139_v42  ;;  %v1098_v2 = vadd.f32 %v1077_v58, %v998_v38 }
 0x197   : > { %v1520_v6 = vpop.f32.mrf.mxu0 }
 0x198   : > { %v1140_v18 = vadd.f32 %v1117_v14, %v1098_v2 }
 0x199   : > { %v1082_v17 = vpop.f32.mrf.mxu0 }
 0x19a   : > { %1147 = vst.msk [vmem:[%s1905_s15 + $0x8] sm:$0xff] %vm1145_vm2, %v1140_v18  ;;  %v1099_v46 = vadd.f32 %v1082_v17, %v999_v12 }
 0x19b   : > { %v1523_v7 = vpop.f32.mrf.mxu0 }
 0x19c   : > { %v1141_v29 = vadd.f32 %v1122_v49, %v1099_v46 }
 0x19d   : > { %v1085_v28 = vpop.f32.mrf.mxu0 }
 0x19e   : > { %1148 = vst.msk [vmem:[%s1905_s15 + $0x10] sm:$0xff] %vm1145_vm2, %v1141_v29  ;;  %v1100_v30 = vadd.f32 %v1085_v28, %v1000_v24 }
 0x19f   : > { %v1524_v50 = vpop.f32.mrf.mxu0 }
 0x1a0   : > { %v1142_v36 = vadd.f32 %v1127_v32, %v1100_v30 }
 0x1a1   : > { %v1090_v39 = vpop.f32.mrf.mxu0 }
 0x1a2   : > { %1149 = vst.msk [vmem:[%s1905_s15 + $0x18] sm:$0xff] %vm1145_vm2, %v1142_v36  ;;  %v1101_v9 = vadd.f32 %v1090_v39, %v1001_v13 }
 0x1a3   : > { %v1527_v43 = vpop.f32.mrf.mxu0 }
 0x1a4   : > { %v1143_v54 = vadd.f32 %v1132_v40, %v1101_v9 }
 0x1a5   : > { %v1093_v47 = vpop.f32.mrf.mxu0 }
 0x1a6   : > { %1150 = vst.msk [vmem:[%s1905_s15 + $0x20] sm:$0xff] %vm1145_vm2, %v1143_v54  ;;  %v1102_v48 = vadd.f32 %v1093_v47, %v1002_v44 }
 0x1a7   : > { %v1528_v52 = vpop.f32.mrf.mxu0 }
 0x1a8   : > { %v1144_v55 = vadd.f32 %v1137_v51, %v1102_v48 }
 0x1aa   : > { %1151 = vst.msk [vmem:[%s1905_s15 + $0x28] sm:$0xff] %vm1145_vm2, %v1144_v55 }
 0x1ab PF: > { %s13_s12 = sadd.s32 1, %s1591_s12  }
 0x1ac   : > { %p10_p4 = scmp.ge.s32.totalorder %s13_s12, 4  }
 0x1ae   :  { %12 = sbr.rel (!%p10_p4) target bundleno = 1 (0x1), region = 73 }

</bundles_post_ra>
